<compile_context>
chip_gen: v7x
topology: tpu7x:2x2x1
jax: 0.10.0
libtpu: 0.0.40
codegen_flags: <defaults>
</compile_context>

<pallas_src>
import functools
import math

import jax
import jax.numpy as jnp
from jax import lax
from jax.experimental import pallas as pl
from jax.experimental.pallas import tpu as pltpu


_COMPILER_PARAMS = pltpu.CompilerParams(dimension_semantics=("parallel",))


# -----------------------------------------------------------------------------
# In-kernel helpers
# -----------------------------------------------------------------------------
def _apply_act(x, act):
    if act == "relu":
        return jnp.maximum(x, 0.0)
    if act == "selu":
        return 1.0507009873554805 * jnp.where(
            x > 0.0, x, 1.6732632423543772 * (jnp.exp(x) - 1.0))
    return x


def _conv3x3_acc(x_ref, w_ref, m_ref, M, Cout, Wo):
    """3x3 'same' conv == sum of 9 shifted matmuls on the flattened raster.

    x_ref : (M + 2*Wo + 2, Cin)  vertically zero-padded, flattened input
    w_ref : (9, Cin, Cout)       tap-major weights (t = ky*3 + kx)
    m_ref : (2, M, 1)            0/1 masks for the left (kx==0) / right (kx==2)
                                 column taps (horizontal zero padding).
    """
    ml = m_ref[0]
    mr = m_ref[1]
    acc = jnp.zeros((M, Cout), jnp.float32)
    for t in range(9):
        ky, kx = divmod(t, 3)
        a = x_ref[pl.ds(ky * Wo + kx, M), :]
        if kx == 0:
            a = a * ml
        elif kx == 2:
            a = a * mr
        acc = acc + jnp.dot(a, w_ref[t], preferred_element_type=jnp.float32)
    return acc


# -----------------------------------------------------------------------------
# Pallas kernels
# -----------------------------------------------------------------------------
def _conv3x3_kernel(x_ref, w_ref, b_ref, m_ref, o_ref, *, Wo, act):
    """Fused 3x3 conv (or transposed-conv equivalent) + bias + activation."""
    M, Cout = o_ref.shape
    acc = _conv3x3_acc(x_ref, w_ref, m_ref, M, Cout, Wo) + b_ref[...]
    o_ref[...] = _apply_act(acc, act)


def _convlstm_kernel(x_ref, wi_ref, wo_ref, wg_ref, b_ref, m_ref, h_ref, *, Wo):
    """ConvLSTM cell, zero initial (h, c): gate conv + gate math fused.

    Gate order in the reference cell is (i, f, o, g); with c0 = 0 the f gate
    is irrelevant, so only i/o/g weight slabs are used and c_next = i*g.
    """
    M, hd = h_ref.shape
    ml = m_ref[0]
    mr = m_ref[1]
    acc_i = jnp.zeros((M, hd), jnp.float32)
    acc_o = jnp.zeros((M, hd), jnp.float32)
    acc_g = jnp.zeros((M, hd), jnp.float32)
    for t in range(9):
        ky, kx = divmod(t, 3)
        a = x_ref[pl.ds(ky * Wo + kx, M), :]
        if kx == 0:
            a = a * ml
        elif kx == 2:
            a = a * mr
        acc_i = acc_i + jnp.dot(a, wi_ref[t], preferred_element_type=jnp.float32)
        acc_o = acc_o + jnp.dot(a, wo_ref[t], preferred_element_type=jnp.float32)
        acc_g = acc_g + jnp.dot(a, wg_ref[t], preferred_element_type=jnp.float32)
    gi = jax.nn.sigmoid(acc_i + b_ref[0:1, :])
    go = jax.nn.sigmoid(acc_o + b_ref[1:2, :])
    gg = jnp.tanh(acc_g + b_ref[2:3, :])
    c_next = gi * gg                       # f*c0 vanishes (c0 == 0)
    h_ref[...] = go * jnp.tanh(c_next)


def _deconv_cls_kernel(x_ref, w_ref, b_ref, wc_ref, bc_ref, m_ref, o_ref,
                       *, Wo, act):
    """deconv1 (transposed conv) + bias + activation + fused 1x1 classifier."""
    M = o_ref.shape[0]
    Cmid = w_ref.shape[2]
    acc = _conv3x3_acc(x_ref, w_ref, m_ref, M, Cmid, Wo) + b_ref[...]
    acc = _apply_act(acc, act)
    # 1x1 conv to a single channel: broadcast multiply + lane reduction.
    o_ref[...] = jnp.sum(acc * wc_ref[...], axis=1, keepdims=True) + bc_ref[...]


# -----------------------------------------------------------------------------
# Wrapper-side data preparation (pure data movement, XLA glue)
# -----------------------------------------------------------------------------
def _flat_pad_conv(x):
    """NHWC -> flattened, vertically padded input for a 3x3 'same' conv."""
    N, H, W, C = x.shape
    xp = jnp.pad(x, ((0, 0), (1, 1), (0, 0), (0, 0)))          # vertical pad
    flat = xp.reshape(N, (H + 2) * W, C)
    flat = jnp.pad(flat, ((0, 0), (1, 1), (0, 0)))              # slack rows
    return flat, H, W


def _flat_pad_deconv(x):
    """ConvTranspose2d(3, stride=2, pad=1, out_pad=1) expressed as a stride-1
    3x3 conv on the zero-dilated input; returns its flattened padded input."""
    N, H, W, C = x.shape
    Ho, Wo = 2 * H, 2 * W
    xd = jnp.zeros((N, 2 * H - 1, 2 * W - 1, C), x.dtype).at[:, ::2, ::2, :].set(x)
    xp = jnp.pad(xd, ((0, 0), (1, 2), (0, 1), (0, 0)))          # rows 1/2, col right 1
    flat = xp.reshape(N, (2 * H + 2) * Wo, C)
    flat = jnp.pad(flat, ((0, 0), (1, 1), (0, 0)))
    return flat, Ho, Wo


def _edge_masks(M, Wo):
    """(2, M, 1) 0/1 masks: [0] kills the w==0 column for left taps,
    [1] kills the w==Wo-1 column for right taps (horizontal zero padding)."""
    col = jnp.arange(M, dtype=jnp.int32) % Wo
    not_l = (col != 0).astype(jnp.float32)
    not_r = (col != Wo - 1).astype(jnp.float32)
    return jnp.stack([not_l, not_r], axis=0).reshape(2, M, 1)


def maxpool2x2(x):
    N, H, W, C = x.shape
    return x.reshape(N, H // 2, 2, W // 2, 2, C).max(axis=(2, 4))


# -----------------------------------------------------------------------------
# Pallas-call wrappers
# -----------------------------------------------------------------------------
def conv3x3_act(x, w_taps, bias, *, act, transposed=False):
    N, _, _, Cin = x.shape
    if transposed:
        flat, Ho, Wo = _flat_pad_deconv(x)
    else:
        flat, Ho, Wo = _flat_pad_conv(x)
    M = Ho * Wo
    P = flat.shape[1]
    Cout = w_taps.shape[-1]
    masks = _edge_masks(M, Wo)
    out = pl.pallas_call(
        functools.partial(_conv3x3_kernel, Wo=Wo, act=act),
        out_shape=jax.ShapeDtypeStruct((N, M, Cout), jnp.float32),
        grid=(N,),
        in_specs=[
            pl.BlockSpec((None, P, Cin), lambda n: (n, 0, 0)),
            pl.BlockSpec((9, Cin, Cout), lambda n: (0, 0, 0)),
            pl.BlockSpec((1, Cout), lambda n: (0, 0)),
            pl.BlockSpec((2, M, 1), lambda n: (0, 0, 0)),
        ],
        out_specs=pl.BlockSpec((None, M, Cout), lambda n: (n, 0, 0)),
        compiler_params=_COMPILER_PARAMS,
    )(flat, w_taps, bias.reshape(1, Cout), masks)
    return out.reshape(N, Ho, Wo, Cout)


def convlstm_zero_state(x, w_i, w_o, w_g, b_iog):
    """ConvLSTM cell with zero initial state; returns h_next (NHWC)."""
    N, _, _, Cin = x.shape
    hd = w_i.shape[-1]
    flat, Ho, Wo = _flat_pad_conv(x)
    M = Ho * Wo
    P = flat.shape[1]
    masks = _edge_masks(M, Wo)
    h = pl.pallas_call(
        functools.partial(_convlstm_kernel, Wo=Wo),
        out_shape=jax.ShapeDtypeStruct((N, M, hd), jnp.float32),
        grid=(N,),
        in_specs=[
            pl.BlockSpec((None, P, Cin), lambda n: (n, 0, 0)),
            pl.BlockSpec((9, Cin, hd), lambda n: (0, 0, 0)),
            pl.BlockSpec((9, Cin, hd), lambda n: (0, 0, 0)),
            pl.BlockSpec((9, Cin, hd), lambda n: (0, 0, 0)),
            pl.BlockSpec((3, hd), lambda n: (0, 0)),
            pl.BlockSpec((2, M, 1), lambda n: (0, 0, 0)),
        ],
        out_specs=pl.BlockSpec((None, M, hd), lambda n: (n, 0, 0)),
        compiler_params=_COMPILER_PARAMS,
    )(flat, w_i, w_o, w_g, b_iog, masks)
    return h.reshape(N, Ho, Wo, hd)


def deconv1_classifier(x, w_taps, bias, wc_row, bc, *, act):
    """deconv1 + activation + 1x1 classifier fused into one kernel."""
    N, _, _, Cin = x.shape
    flat, Ho, Wo = _flat_pad_deconv(x)
    M = Ho * Wo
    P = flat.shape[1]
    Cmid = w_taps.shape[-1]
    masks = _edge_masks(M, Wo)
    out = pl.pallas_call(
        functools.partial(_deconv_cls_kernel, Wo=Wo, act=act),
        out_shape=jax.ShapeDtypeStruct((N, M, 1), jnp.float32),
        grid=(N,),
        in_specs=[
            pl.BlockSpec((None, P, Cin), lambda n: (n, 0, 0)),
            pl.BlockSpec((9, Cin, Cmid), lambda n: (0, 0, 0)),
            pl.BlockSpec((1, Cmid), lambda n: (0, 0)),
            pl.BlockSpec((1, Cmid), lambda n: (0, 0)),
            pl.BlockSpec((1, 1), lambda n: (0, 0)),
            pl.BlockSpec((2, M, 1), lambda n: (0, 0, 0)),
        ],
        out_specs=pl.BlockSpec((None, M, 1), lambda n: (n, 0, 0)),
        compiler_params=_COMPILER_PARAMS,
    )(flat, w_taps, bias.reshape(1, Cmid), wc_row, bc, masks)
    return out.reshape(N, Ho, Wo, 1)


# -----------------------------------------------------------------------------
# Full forward (batchnorm=False, softmax=False, s=None)
# -----------------------------------------------------------------------------
def endeconvlstm_forward(x_nchw, P, *, activation="relu"):
    x = jnp.transpose(x_nchw, (0, 2, 3, 1)).astype(jnp.float32)   # NCHW -> NHWC

    p1 = maxpool2x2(conv3x3_act(x, P["conv1_w_taps"], P["conv1_b"], act=activation))
    p2 = maxpool2x2(conv3x3_act(p1, P["conv2_w_taps"], P["conv2_b"], act=activation))
    p3 = maxpool2x2(conv3x3_act(p2, P["conv3_w_taps"], P["conv3_b"], act=activation))

    h = convlstm_zero_state(p3, P["lstm_wi"], P["lstm_wo"], P["lstm_wg"],
                            P["lstm_b_iog"])

    d3 = conv3x3_act(h, P["deconv3_w_taps"], P["deconv3_b"], act=activation,
                     transposed=True)
    d2 = conv3x3_act(d3, P["deconv2_w_taps"], P["deconv2_b"], act=activation,
                     transposed=True)
    score = deconv1_classifier(d2, P["deconv1_w_taps"], P["deconv1_b"],
                               P["cls_w_row"], P["cls_b"], act=activation)
    return jnp.transpose(score, (0, 3, 1, 2))                      # NHWC -> NCHW


# -----------------------------------------------------------------------------
# Parameters (PyTorch layouts) + conversion to kernel layouts
# -----------------------------------------------------------------------------
def _torch_conv_init(key, cout, cin, k):
    # init_weights('default'): N(0, sqrt(2/(k*k*cout))); biases small (nonzero
    # to exercise the fused-bias path).
    std = math.sqrt(2.0 / (k * k * cout))
    kw, kb = jax.random.split(key)
    w = jax.random.normal(kw, (cout, cin, k, k), jnp.float32) * std
    b = jax.random.normal(kb, (cout,), jnp.float32) * 0.1
    return w, b


def _torch_deconv_init(key, cin, cout, k):
    # PyTorch ConvTranspose2d weight layout: (Cin, Cout, kh, kw)
    std = math.sqrt(2.0 / (k * k * cout))
    kw, kb = jax.random.split(key)
    w = jax.random.normal(kw, (cin, cout, k, k), jnp.float32) * std
    b = jax.random.normal(kb, (cout,), jnp.float32) * 0.1
    return w, b


def conv_w_to_taps(w):
    """(Cout, Cin, 3, 3) -> (9, Cin, Cout), tap t = ky*3 + kx."""
    cout, cin = w.shape[0], w.shape[1]
    return jnp.transpose(w, (2, 3, 1, 0)).reshape(9, cin, cout)


def deconv_w_to_taps(w):
    """PyTorch ConvTranspose2d (Cin, Cout, 3, 3) -> flipped equivalent-conv
    taps (9, Cin, Cout)."""
    cin, cout = w.shape[0], w.shape[1]
    wf = w[:, :, ::-1, ::-1]                       # spatial flip
    return jnp.transpose(wf, (2, 3, 0, 1)).reshape(9, cin, cout)


def lstm_w_to_gate_taps(w, cin, hd):
    """ConvLSTM conv weight (4*hd, cin+hd, 3, 3), gate order (i,f,o,g).
    Zero initial h -> only the x-half of the input channels matters; zero
    initial c -> the f gate is unused.  Returns (w_i, w_o, w_g)."""
    wx = w[:, :cin]
    def gate(g):
        return conv_w_to_taps(wx[g * hd:(g + 1) * hd])
    return gate(0), gate(2), gate(3)


def make_torch_params(key, num_channels, hd=64):
    ks = jax.random.split(key, 8)
    tw = {}
    tw["conv1"] = _torch_conv_init(ks[0], 16, num_channels, 3)
    tw["conv2"] = _torch_conv_init(ks[1], 32, 16, 3)
    tw["conv3"] = _torch_conv_init(ks[2], 64, 32, 3)
    tw["deconv3"] = _torch_deconv_init(ks[3], 64, 32, 3)
    tw["deconv2"] = _torch_deconv_init(ks[4], 32, 16, 3)
    tw["deconv1"] = _torch_deconv_init(ks[5], 16, 8, 3)
    tw["lstm"] = _torch_conv_init(ks[6], 4 * hd, 64 + hd, 3)
    tw["cls"] = _torch_conv_init(ks[7], 1, 8, 1)
    return tw


def to_kernel_params(tw, hd=64):
    P = {}
    for name in ("conv1", "conv2", "conv3"):
        w, b = tw[name]
        P[name + "_w_taps"] = conv_w_to_taps(w)
        P[name + "_b"] = b
    for name in ("deconv3", "deconv2", "deconv1"):
        w, b = tw[name]
        P[name + "_w_taps"] = deconv_w_to_taps(w)
        P[name + "_b"] = b
    wl, bl = tw["lstm"]
    wi, wo, wg = lstm_w_to_gate_taps(wl, 64, hd)
    P["lstm_wi"], P["lstm_wo"], P["lstm_wg"] = wi, wo, wg
    P["lstm_b_iog"] = jnp.stack(
        [bl[0:hd], bl[2 * hd:3 * hd], bl[3 * hd:4 * hd]], axis=0)
    wc, bc = tw["cls"]
    P["cls_w_row"] = wc[:, :, 0, 0]            # (1, 8)
    P["cls_b"] = bc.reshape(1, 1)
    return P


# -----------------------------------------------------------------------------
# Pure-JAX reference (for numerical validation of the Pallas path)
# -----------------------------------------------------------------------------
def reference_forward(x_nchw, tw, *, activation="relu", hd=64):
    act = jax.nn.relu if activation == "relu" else jax.nn.selu
    hp = lax.Precision.HIGHEST

    def conv(x, wb, pad):
        w, b = wb
        y = lax.conv_general_dilated(
            x, jnp.transpose(w, (2, 3, 1, 0)), (1, 1), ((pad, pad), (pad, pad)),
            dimension_numbers=("NHWC", "HWIO", "NHWC"), precision=hp)
        return y + b

    def deconv(x, wb):
        w, b = wb
        w_eq = jnp.transpose(w[:, :, ::-1, ::-1], (2, 3, 0, 1))
        y = lax.conv_general_dilated(
            x, w_eq, (1, 1), ((1, 2), (1, 2)), lhs_dilation=(2, 2),
            dimension_numbers=("NHWC", "HWIO", "NHWC"), precision=hp)
        return y + b

    x = jnp.transpose(x_nchw, (0, 2, 3, 1)).astype(jnp.float32)
    p1 = maxpool2x2(act(conv(x, tw["conv1"], 1)))
    p2 = maxpool2x2(act(conv(p1, tw["conv2"], 1)))
    p3 = maxpool2x2(act(conv(p2, tw["conv3"], 1)))

    h0 = jnp.zeros(p3.shape[:3] + (hd,), jnp.float32)
    gates = conv(jnp.concatenate([p3, h0], axis=-1), tw["lstm"], 1)
    gi, gf, go, gg = jnp.split(gates, 4, axis=-1)
    c = jax.nn.sigmoid(gf) * 0.0 + jax.nn.sigmoid(gi) * jnp.tanh(gg)
    h = jax.nn.sigmoid(go) * jnp.tanh(c)

    d3 = act(deconv(h, tw["deconv3"]))
    d2 = act(deconv(d3, tw["deconv2"]))
    d1 = act(deconv(d2, tw["deconv1"]))
    score = conv(d1, tw["cls"], 0)
    return jnp.transpose(score, (0, 3, 1, 2))


# -----------------------------------------------------------------------------
if __name__ == "__main__":
    key = jax.random.PRNGKey(0)
    k_x, k_p = jax.random.split(key)

    num_channels, image_h, image_w = 4, 16, 16     # module fixes batchsize = 1
    x = jax.random.normal(k_x, (1, num_channels, image_h, image_w), jnp.float32)

    tw = make_torch_params(k_p, num_channels)
    P = to_kernel_params(tw)

    fwd = jax.jit(lambda xx: endeconvlstm_forward(xx, P, activation="relu"))
    score = jax.block_until_ready(fwd(x))

    assert score.shape == (1, 1, image_h, image_w)
    assert bool(jnp.all(jnp.isfinite(score)))

    # validate against a pure-JAX reference of the same forward pass
    ref = jax.block_until_ready(reference_forward(x, tw, activation="relu"))
    err = float(jnp.max(jnp.abs(score - ref)))
    scale = float(jnp.max(jnp.abs(ref))) + 1e-6
    assert err <= 5e-2 * scale + 1e-3, f"mismatch: max|diff|={err}, scale={scale}"

    print("KERNEL_OK")
</pallas_src>

<mosaic_0001>
module attributes {stable_mosaic.version = 11 : i64} {
  func.func @_conv3x3_kernel(%arg0: i32, %arg1: memref<1x290x4xf32, #tpu.memory_space<vmem>>, %arg2: memref<9x4x16xf32, #tpu.memory_space<vmem>>, %arg3: memref<1x16xf32, #tpu.memory_space<vmem>>, %arg4: memref<2x256x1xf32, #tpu.memory_space<vmem>>, %arg5: memref<1x256x16xf32, #tpu.memory_space<vmem>>) attributes {dimension_semantics = [#tpu.dimension_semantics<parallel>], iteration_bounds = array<i64: 1>, scalar_prefetch = 0 : i64, scratch_operands = 0 : i64, tpu.core_type = #tpu.core_type<tc>, window_params = [{transform_indices = @transform_0, window_bounds = array<i64: 1, 290, 4>}, {pipeline_mode = #tpu.pipeline_mode<synchronous>, transform_indices = @transform_1, window_bounds = array<i64: 9, 4, 16>}, {pipeline_mode = #tpu.pipeline_mode<synchronous>, transform_indices = @transform_2, window_bounds = array<i64: 1, 16>}, {pipeline_mode = #tpu.pipeline_mode<synchronous>, transform_indices = @transform_3, window_bounds = array<i64: 2, 256, 1>}, {transform_indices = @transform_4, window_bounds = array<i64: 1, 256, 16>}]} {
    %c0 = arith.constant 0 : index
    %c0_0 = arith.constant 0 : index
    %c0_1 = arith.constant 0 : index
    %0 = vector.load %arg4[%c0, %c0_0, %c0_1] : memref<2x256x1xf32, #tpu.memory_space<vmem>>, vector<1x256x1xf32>
    %1 = vector.shape_cast %0 : vector<1x256x1xf32> to vector<256x1xf32>
    %c1 = arith.constant 1 : index
    %c0_2 = arith.constant 0 : index
    %c0_3 = arith.constant 0 : index
    %2 = vector.load %arg4[%c1, %c0_2, %c0_3] : memref<2x256x1xf32, #tpu.memory_space<vmem>>, vector<1x256x1xf32>
    %3 = vector.shape_cast %2 : vector<1x256x1xf32> to vector<256x1xf32>
    %cst = arith.constant 0.000000e+00 : f32
    %4 = vector.broadcast %cst : f32 to vector<256x16xf32>
    %c0_4 = arith.constant 0 : index
    %c0_5 = arith.constant 0 : index
    %c0_6 = arith.constant 0 : index
    %5 = vector.load %arg1[%c0_4, %c0_5, %c0_6] : memref<1x290x4xf32, #tpu.memory_space<vmem>>, vector<1x256x4xf32>
    %6 = vector.shape_cast %5 : vector<1x256x4xf32> to vector<256x4xf32>
    %7 = vector.broadcast %1 : vector<256x1xf32> to vector<256x4xf32>
    %8 = arith.mulf %6, %7 : vector<256x4xf32>
    %c0_7 = arith.constant 0 : index
    %c0_8 = arith.constant 0 : index
    %c0_9 = arith.constant 0 : index
    %9 = vector.load %arg2[%c0_7, %c0_8, %c0_9] : memref<9x4x16xf32, #tpu.memory_space<vmem>>, vector<1x4x16xf32>
    %10 = vector.shape_cast %9 : vector<1x4x16xf32> to vector<4x16xf32>
    %cst_10 = arith.constant dense<0.000000e+00> : vector<256x16xf32>
    %11 = tpu.matmul %8, %10, %cst_10 {dimension_numbers = #tpu.dot_dimension_numbers<[1], [0], [0], [1], [0, 0, 1, 1], [], []>} : vector<256x4xf32>, vector<4x16xf32>, vector<256x16xf32> -> vector<256x16xf32>
    %12 = arith.addf %4, %11 : vector<256x16xf32>
    %c0_11 = arith.constant 0 : index
    %c1_12 = arith.constant 1 : index
    %c0_13 = arith.constant 0 : index
    %13 = vector.load %arg1[%c0_11, %c1_12, %c0_13] : memref<1x290x4xf32, #tpu.memory_space<vmem>>, vector<1x256x4xf32>
    %14 = vector.shape_cast %13 : vector<1x256x4xf32> to vector<256x4xf32>
    %c1_14 = arith.constant 1 : index
    %c0_15 = arith.constant 0 : index
    %c0_16 = arith.constant 0 : index
    %15 = vector.load %arg2[%c1_14, %c0_15, %c0_16] : memref<9x4x16xf32, #tpu.memory_space<vmem>>, vector<1x4x16xf32>
    %16 = vector.shape_cast %15 : vector<1x4x16xf32> to vector<4x16xf32>
    %cst_17 = arith.constant dense<0.000000e+00> : vector<256x16xf32>
    %17 = tpu.matmul %14, %16, %cst_17 {dimension_numbers = #tpu.dot_dimension_numbers<[1], [0], [0], [1], [0, 0, 1, 1], [], []>} : vector<256x4xf32>, vector<4x16xf32>, vector<256x16xf32> -> vector<256x16xf32>
    %18 = arith.addf %12, %17 : vector<256x16xf32>
    %c0_18 = arith.constant 0 : index
    %c2 = arith.constant 2 : index
    %c0_19 = arith.constant 0 : index
    %19 = vector.load %arg1[%c0_18, %c2, %c0_19] : memref<1x290x4xf32, #tpu.memory_space<vmem>>, vector<1x256x4xf32>
    %20 = vector.shape_cast %19 : vector<1x256x4xf32> to vector<256x4xf32>
    %21 = vector.broadcast %3 : vector<256x1xf32> to vector<256x4xf32>
    %22 = arith.mulf %20, %21 : vector<256x4xf32>
    %c2_20 = arith.constant 2 : index
    %c0_21 = arith.constant 0 : index
    %c0_22 = arith.constant 0 : index
    %23 = vector.load %arg2[%c2_20, %c0_21, %c0_22] : memref<9x4x16xf32, #tpu.memory_space<vmem>>, vector<1x4x16xf32>
    %24 = vector.shape_cast %23 : vector<1x4x16xf32> to vector<4x16xf32>
    %cst_23 = arith.constant dense<0.000000e+00> : vector<256x16xf32>
    %25 = tpu.matmul %22, %24, %cst_23 {dimension_numbers = #tpu.dot_dimension_numbers<[1], [0], [0], [1], [0, 0, 1, 1], [], []>} : vector<256x4xf32>, vector<4x16xf32>, vector<256x16xf32> -> vector<256x16xf32>
    %26 = arith.addf %18, %25 : vector<256x16xf32>
    %c0_24 = arith.constant 0 : index
    %c16 = arith.constant 16 : index
    %c0_25 = arith.constant 0 : index
    %27 = vector.load %arg1[%c0_24, %c16, %c0_25] : memref<1x290x4xf32, #tpu.memory_space<vmem>>, vector<1x256x4xf32>
    %28 = vector.shape_cast %27 : vector<1x256x4xf32> to vector<256x4xf32>
    %29 = vector.broadcast %1 : vector<256x1xf32> to vector<256x4xf32>
    %30 = arith.mulf %28, %29 : vector<256x4xf32>
    %c3 = arith.constant 3 : index
    %c0_26 = arith.constant 0 : index
    %c0_27 = arith.constant 0 : index
    %31 = vector.load %arg2[%c3, %c0_26, %c0_27] : memref<9x4x16xf32, #tpu.memory_space<vmem>>, vector<1x4x16xf32>
    %32 = vector.shape_cast %31 : vector<1x4x16xf32> to vector<4x16xf32>
    %cst_28 = arith.constant dense<0.000000e+00> : vector<256x16xf32>
    %33 = tpu.matmul %30, %32, %cst_28 {dimension_numbers = #tpu.dot_dimension_numbers<[1], [0], [0], [1], [0, 0, 1, 1], [], []>} : vector<256x4xf32>, vector<4x16xf32>, vector<256x16xf32> -> vector<256x16xf32>
    %34 = arith.addf %26, %33 : vector<256x16xf32>
    %c0_29 = arith.constant 0 : index
    %c17 = arith.constant 17 : index
    %c0_30 = arith.constant 0 : index
    %35 = vector.load %arg1[%c0_29, %c17, %c0_30] : memref<1x290x4xf32, #tpu.memory_space<vmem>>, vector<1x256x4xf32>
    %36 = vector.shape_cast %35 : vector<1x256x4xf32> to vector<256x4xf32>
    %c4 = arith.constant 4 : index
    %c0_31 = arith.constant 0 : index
    %c0_32 = arith.constant 0 : index
    %37 = vector.load %arg2[%c4, %c0_31, %c0_32] : memref<9x4x16xf32, #tpu.memory_space<vmem>>, vector<1x4x16xf32>
    %38 = vector.shape_cast %37 : vector<1x4x16xf32> to vector<4x16xf32>
    %cst_33 = arith.constant dense<0.000000e+00> : vector<256x16xf32>
    %39 = tpu.matmul %36, %38, %cst_33 {dimension_numbers = #tpu.dot_dimension_numbers<[1], [0], [0], [1], [0, 0, 1, 1], [], []>} : vector<256x4xf32>, vector<4x16xf32>, vector<256x16xf32> -> vector<256x16xf32>
    %40 = arith.addf %34, %39 : vector<256x16xf32>
    %c0_34 = arith.constant 0 : index
    %c18 = arith.constant 18 : index
    %c0_35 = arith.constant 0 : index
    %41 = vector.load %arg1[%c0_34, %c18, %c0_35] : memref<1x290x4xf32, #tpu.memory_space<vmem>>, vector<1x256x4xf32>
    %42 = vector.shape_cast %41 : vector<1x256x4xf32> to vector<256x4xf32>
    %43 = vector.broadcast %3 : vector<256x1xf32> to vector<256x4xf32>
    %44 = arith.mulf %42, %43 : vector<256x4xf32>
    %c5 = arith.constant 5 : index
    %c0_36 = arith.constant 0 : index
    %c0_37 = arith.constant 0 : index
    %45 = vector.load %arg2[%c5, %c0_36, %c0_37] : memref<9x4x16xf32, #tpu.memory_space<vmem>>, vector<1x4x16xf32>
    %46 = vector.shape_cast %45 : vector<1x4x16xf32> to vector<4x16xf32>
    %cst_38 = arith.constant dense<0.000000e+00> : vector<256x16xf32>
    %47 = tpu.matmul %44, %46, %cst_38 {dimension_numbers = #tpu.dot_dimension_numbers<[1], [0], [0], [1], [0, 0, 1, 1], [], []>} : vector<256x4xf32>, vector<4x16xf32>, vector<256x16xf32> -> vector<256x16xf32>
    %48 = arith.addf %40, %47 : vector<256x16xf32>
    %c0_39 = arith.constant 0 : index
    %c32 = arith.constant 32 : index
    %c0_40 = arith.constant 0 : index
    %49 = vector.load %arg1[%c0_39, %c32, %c0_40] : memref<1x290x4xf32, #tpu.memory_space<vmem>>, vector<1x256x4xf32>
    %50 = vector.shape_cast %49 : vector<1x256x4xf32> to vector<256x4xf32>
    %51 = vector.broadcast %1 : vector<256x1xf32> to vector<256x4xf32>
    %52 = arith.mulf %50, %51 : vector<256x4xf32>
    %c6 = arith.constant 6 : index
    %c0_41 = arith.constant 0 : index
    %c0_42 = arith.constant 0 : index
    %53 = vector.load %arg2[%c6, %c0_41, %c0_42] : memref<9x4x16xf32, #tpu.memory_space<vmem>>, vector<1x4x16xf32>
    %54 = vector.shape_cast %53 : vector<1x4x16xf32> to vector<4x16xf32>
    %cst_43 = arith.constant dense<0.000000e+00> : vector<256x16xf32>
    %55 = tpu.matmul %52, %54, %cst_43 {dimension_numbers = #tpu.dot_dimension_numbers<[1], [0], [0], [1], [0, 0, 1, 1], [], []>} : vector<256x4xf32>, vector<4x16xf32>, vector<256x16xf32> -> vector<256x16xf32>
    %56 = arith.addf %48, %55 : vector<256x16xf32>
    %c0_44 = arith.constant 0 : index
    %c33 = arith.constant 33 : index
    %c0_45 = arith.constant 0 : index
    %57 = vector.load %arg1[%c0_44, %c33, %c0_45] : memref<1x290x4xf32, #tpu.memory_space<vmem>>, vector<1x256x4xf32>
    %58 = vector.shape_cast %57 : vector<1x256x4xf32> to vector<256x4xf32>
    %c7 = arith.constant 7 : index
    %c0_46 = arith.constant 0 : index
    %c0_47 = arith.constant 0 : index
    %59 = vector.load %arg2[%c7, %c0_46, %c0_47] : memref<9x4x16xf32, #tpu.memory_space<vmem>>, vector<1x4x16xf32>
    %60 = vector.shape_cast %59 : vector<1x4x16xf32> to vector<4x16xf32>
    %cst_48 = arith.constant dense<0.000000e+00> : vector<256x16xf32>
    %61 = tpu.matmul %58, %60, %cst_48 {dimension_numbers = #tpu.dot_dimension_numbers<[1], [0], [0], [1], [0, 0, 1, 1], [], []>} : vector<256x4xf32>, vector<4x16xf32>, vector<256x16xf32> -> vector<256x16xf32>
    %62 = arith.addf %56, %61 : vector<256x16xf32>
    %c0_49 = arith.constant 0 : index
    %c34 = arith.constant 34 : index
    %c0_50 = arith.constant 0 : index
    %63 = vector.load %arg1[%c0_49, %c34, %c0_50] : memref<1x290x4xf32, #tpu.memory_space<vmem>>, vector<1x256x4xf32>
    %64 = vector.shape_cast %63 : vector<1x256x4xf32> to vector<256x4xf32>
    %65 = vector.broadcast %3 : vector<256x1xf32> to vector<256x4xf32>
    %66 = arith.mulf %64, %65 : vector<256x4xf32>
    %c8 = arith.constant 8 : index
    %c0_51 = arith.constant 0 : index
    %c0_52 = arith.constant 0 : index
    %67 = vector.load %arg2[%c8, %c0_51, %c0_52] : memref<9x4x16xf32, #tpu.memory_space<vmem>>, vector<1x4x16xf32>
    %68 = vector.shape_cast %67 : vector<1x4x16xf32> to vector<4x16xf32>
    %cst_53 = arith.constant dense<0.000000e+00> : vector<256x16xf32>
    %69 = tpu.matmul %66, %68, %cst_53 {dimension_numbers = #tpu.dot_dimension_numbers<[1], [0], [0], [1], [0, 0, 1, 1], [], []>} : vector<256x4xf32>, vector<4x16xf32>, vector<256x16xf32> -> vector<256x16xf32>
    %70 = arith.addf %62, %69 : vector<256x16xf32>
    %c0_54 = arith.constant 0 : index
    %c0_55 = arith.constant 0 : index
    %71 = vector.load %arg3[%c0_54, %c0_55] : memref<1x16xf32, #tpu.memory_space<vmem>>, vector<1x16xf32>
    %72 = vector.broadcast %71 : vector<1x16xf32> to vector<256x16xf32>
    %73 = arith.addf %70, %72 : vector<256x16xf32>
    %cst_56 = arith.constant 0.000000e+00 : f32
    %74 = vector.broadcast %cst_56 : f32 to vector<256x16xf32>
    %75 = arith.maximumf %73, %74 : vector<256x16xf32>
    %c0_57 = arith.constant 0 : index
    %c0_58 = arith.constant 0 : index
    %c0_59 = arith.constant 0 : index
    %76 = vector.load %arg5[%c0_57, %c0_58, %c0_59] : memref<1x256x16xf32, #tpu.memory_space<vmem>>, vector<1x256x16xf32>
    %77 = vector.shape_cast %76 : vector<1x256x16xf32> to vector<256x16xf32>
    %78 = vector.shape_cast %75 : vector<256x16xf32> to vector<1x256x16xf32>
    tpu.vector_store %arg5[%c0_57, %c0_58, %c0_59], %78 {strides = array<i32>} : memref<1x256x16xf32, #tpu.memory_space<vmem>>, vector<1x256x16xf32>,
    return
  }
  func.func @transform_0(%arg0: i32) -> (i32, i32, i32) {
    %c0_i32 = arith.constant 0 : i32
    %c0_i32_0 = arith.constant 0 : i32
    %c0_i32_1 = arith.constant 0 : i32
    return %arg0, %c0_i32, %c0_i32_0 : i32, i32, i32
  }
  func.func @transform_1(%arg0: i32) -> (i32, i32, i32) {
    %c0_i32 = arith.constant 0 : i32
    %c0_i32_0 = arith.constant 0 : i32
    %c0_i32_1 = arith.constant 0 : i32
    %c0_i32_2 = arith.constant 0 : i32
    return %c0_i32, %c0_i32_0, %c0_i32_1 : i32, i32, i32
  }
  func.func @transform_2(%arg0: i32) -> (i32, i32) {
    %c0_i32 = arith.constant 0 : i32
    %c0_i32_0 = arith.constant 0 : i32
    %c0_i32_1 = arith.constant 0 : i32
    return %c0_i32, %c0_i32_0 : i32, i32
  }
  func.func @transform_3(%arg0: i32) -> (i32, i32, i32) {
    %c0_i32 = arith.constant 0 : i32
    %c0_i32_0 = arith.constant 0 : i32
    %c0_i32_1 = arith.constant 0 : i32
    %c0_i32_2 = arith.constant 0 : i32
    return %c0_i32, %c0_i32_0, %c0_i32_1 : i32, i32, i32
  }
  func.func @transform_4(%arg0: i32) -> (i32, i32, i32) {
    %c0_i32 = arith.constant 0 : i32
    %c0_i32_0 = arith.constant 0 : i32
    %c0_i32_1 = arith.constant 0 : i32
    return %arg0, %c0_i32, %c0_i32_0 : i32, i32, i32
  }
}

module attributes {stable_mosaic.version = 11 : i64} {
  func.func @_conv3x3_kernel(%arg0: i32, %arg1: memref<1x82x16xf32, #tpu.memory_space<vmem>>, %arg2: memref<9x16x32xf32, #tpu.memory_space<vmem>>, %arg3: memref<1x32xf32, #tpu.memory_space<vmem>>, %arg4: memref<2x64x1xf32, #tpu.memory_space<vmem>>, %arg5: memref<1x64x32xf32, #tpu.memory_space<vmem>>) attributes {dimension_semantics = [#tpu.dimension_semantics<parallel>], iteration_bounds = array<i64: 1>, scalar_prefetch = 0 : i64, scratch_operands = 0 : i64, tpu.core_type = #tpu.core_type<tc>, window_params = [{transform_indices = @transform_0, window_bounds = array<i64: 1, 82, 16>}, {pipeline_mode = #tpu.pipeline_mode<synchronous>, transform_indices = @transform_1, window_bounds = array<i64: 9, 16, 32>}, {pipeline_mode = #tpu.pipeline_mode<synchronous>, transform_indices = @transform_2, window_bounds = array<i64: 1, 32>}, {pipeline_mode = #tpu.pipeline_mode<synchronous>, transform_indices = @transform_3, window_bounds = array<i64: 2, 64, 1>}, {transform_indices = @transform_4, window_bounds = array<i64: 1, 64, 32>}]} {
    %c0 = arith.constant 0 : index
    %c0_0 = arith.constant 0 : index
    %c0_1 = arith.constant 0 : index
    %0 = vector.load %arg4[%c0, %c0_0, %c0_1] : memref<2x64x1xf32, #tpu.memory_space<vmem>>, vector<1x64x1xf32>
    %1 = vector.shape_cast %0 : vector<1x64x1xf32> to vector<64x1xf32>
    %c1 = arith.constant 1 : index
    %c0_2 = arith.constant 0 : index
    %c0_3 = arith.constant 0 : index
    %2 = vector.load %arg4[%c1, %c0_2, %c0_3] : memref<2x64x1xf32, #tpu.memory_space<vmem>>, vector<1x64x1xf32>
    %3 = vector.shape_cast %2 : vector<1x64x1xf32> to vector<64x1xf32>
    %cst = arith.constant 0.000000e+00 : f32
    %4 = vector.broadcast %cst : f32 to vector<64x32xf32>
    %c0_4 = arith.constant 0 : index
    %c0_5 = arith.constant 0 : index
    %c0_6 = arith.constant 0 : index
    %5 = vector.load %arg1[%c0_4, %c0_5, %c0_6] : memref<1x82x16xf32, #tpu.memory_space<vmem>>, vector<1x64x16xf32>
    %6 = vector.shape_cast %5 : vector<1x64x16xf32> to vector<64x16xf32>
    %7 = vector.broadcast %1 : vector<64x1xf32> to vector<64x16xf32>
    %8 = arith.mulf %6, %7 : vector<64x16xf32>
    %c0_7 = arith.constant 0 : index
    %c0_8 = arith.constant 0 : index
    %c0_9 = arith.constant 0 : index
    %9 = vector.load %arg2[%c0_7, %c0_8, %c0_9] : memref<9x16x32xf32, #tpu.memory_space<vmem>>, vector<1x16x32xf32>
    %10 = vector.shape_cast %9 : vector<1x16x32xf32> to vector<16x32xf32>
    %cst_10 = arith.constant dense<0.000000e+00> : vector<64x32xf32>
    %11 = tpu.matmul %8, %10, %cst_10 {dimension_numbers = #tpu.dot_dimension_numbers<[1], [0], [0], [1], [0, 0, 1, 1], [], []>} : vector<64x16xf32>, vector<16x32xf32>, vector<64x32xf32> -> vector<64x32xf32>
    %12 = arith.addf %4, %11 : vector<64x32xf32>
    %c0_11 = arith.constant 0 : index
    %c1_12 = arith.constant 1 : index
    %c0_13 = arith.constant 0 : index
    %13 = vector.load %arg1[%c0_11, %c1_12, %c0_13] : memref<1x82x16xf32, #tpu.memory_space<vmem>>, vector<1x64x16xf32>
    %14 = vector.shape_cast %13 : vector<1x64x16xf32> to vector<64x16xf32>
    %c1_14 = arith.constant 1 : index
    %c0_15 = arith.constant 0 : index
    %c0_16 = arith.constant 0 : index
    %15 = vector.load %arg2[%c1_14, %c0_15, %c0_16] : memref<9x16x32xf32, #tpu.memory_space<vmem>>, vector<1x16x32xf32>
    %16 = vector.shape_cast %15 : vector<1x16x32xf32> to vector<16x32xf32>
    %cst_17 = arith.constant dense<0.000000e+00> : vector<64x32xf32>
    %17 = tpu.matmul %14, %16, %cst_17 {dimension_numbers = #tpu.dot_dimension_numbers<[1], [0], [0], [1], [0, 0, 1, 1], [], []>} : vector<64x16xf32>, vector<16x32xf32>, vector<64x32xf32> -> vector<64x32xf32>
    %18 = arith.addf %12, %17 : vector<64x32xf32>
    %c0_18 = arith.constant 0 : index
    %c2 = arith.constant 2 : index
    %c0_19 = arith.constant 0 : index
    %19 = vector.load %arg1[%c0_18, %c2, %c0_19] : memref<1x82x16xf32, #tpu.memory_space<vmem>>, vector<1x64x16xf32>
    %20 = vector.shape_cast %19 : vector<1x64x16xf32> to vector<64x16xf32>
    %21 = vector.broadcast %3 : vector<64x1xf32> to vector<64x16xf32>
    %22 = arith.mulf %20, %21 : vector<64x16xf32>
    %c2_20 = arith.constant 2 : index
    %c0_21 = arith.constant 0 : index
    %c0_22 = arith.constant 0 : index
    %23 = vector.load %arg2[%c2_20, %c0_21, %c0_22] : memref<9x16x32xf32, #tpu.memory_space<vmem>>, vector<1x16x32xf32>
    %24 = vector.shape_cast %23 : vector<1x16x32xf32> to vector<16x32xf32>
    %cst_23 = arith.constant dense<0.000000e+00> : vector<64x32xf32>
    %25 = tpu.matmul %22, %24, %cst_23 {dimension_numbers = #tpu.dot_dimension_numbers<[1], [0], [0], [1], [0, 0, 1, 1], [], []>} : vector<64x16xf32>, vector<16x32xf32>, vector<64x32xf32> -> vector<64x32xf32>
    %26 = arith.addf %18, %25 : vector<64x32xf32>
    %c0_24 = arith.constant 0 : index
    %c8 = arith.constant 8 : index
    %c0_25 = arith.constant 0 : index
    %27 = vector.load %arg1[%c0_24, %c8, %c0_25] : memref<1x82x16xf32, #tpu.memory_space<vmem>>, vector<1x64x16xf32>
    %28 = vector.shape_cast %27 : vector<1x64x16xf32> to vector<64x16xf32>
    %29 = vector.broadcast %1 : vector<64x1xf32> to vector<64x16xf32>
    %30 = arith.mulf %28, %29 : vector<64x16xf32>
    %c3 = arith.constant 3 : index
    %c0_26 = arith.constant 0 : index
    %c0_27 = arith.constant 0 : index
    %31 = vector.load %arg2[%c3, %c0_26, %c0_27] : memref<9x16x32xf32, #tpu.memory_space<vmem>>, vector<1x16x32xf32>
    %32 = vector.shape_cast %31 : vector<1x16x32xf32> to vector<16x32xf32>
    %cst_28 = arith.constant dense<0.000000e+00> : vector<64x32xf32>
    %33 = tpu.matmul %30, %32, %cst_28 {dimension_numbers = #tpu.dot_dimension_numbers<[1], [0], [0], [1], [0, 0, 1, 1], [], []>} : vector<64x16xf32>, vector<16x32xf32>, vector<64x32xf32> -> vector<64x32xf32>
    %34 = arith.addf %26, %33 : vector<64x32xf32>
    %c0_29 = arith.constant 0 : index
    %c9 = arith.constant 9 : index
    %c0_30 = arith.constant 0 : index
    %35 = vector.load %arg1[%c0_29, %c9, %c0_30] : memref<1x82x16xf32, #tpu.memory_space<vmem>>, vector<1x64x16xf32>
    %36 = vector.shape_cast %35 : vector<1x64x16xf32> to vector<64x16xf32>
    %c4 = arith.constant 4 : index
    %c0_31 = arith.constant 0 : index
    %c0_32 = arith.constant 0 : index
    %37 = vector.load %arg2[%c4, %c0_31, %c0_32] : memref<9x16x32xf32, #tpu.memory_space<vmem>>, vector<1x16x32xf32>
    %38 = vector.shape_cast %37 : vector<1x16x32xf32> to vector<16x32xf32>
    %cst_33 = arith.constant dense<0.000000e+00> : vector<64x32xf32>
    %39 = tpu.matmul %36, %38, %cst_33 {dimension_numbers = #tpu.dot_dimension_numbers<[1], [0], [0], [1], [0, 0, 1, 1], [], []>} : vector<64x16xf32>, vector<16x32xf32>, vector<64x32xf32> -> vector<64x32xf32>
    %40 = arith.addf %34, %39 : vector<64x32xf32>
    %c0_34 = arith.constant 0 : index
    %c10 = arith.constant 10 : index
    %c0_35 = arith.constant 0 : index
    %41 = vector.load %arg1[%c0_34, %c10, %c0_35] : memref<1x82x16xf32, #tpu.memory_space<vmem>>, vector<1x64x16xf32>
    %42 = vector.shape_cast %41 : vector<1x64x16xf32> to vector<64x16xf32>
    %43 = vector.broadcast %3 : vector<64x1xf32> to vector<64x16xf32>
    %44 = arith.mulf %42, %43 : vector<64x16xf32>
    %c5 = arith.constant 5 : index
    %c0_36 = arith.constant 0 : index
    %c0_37 = arith.constant 0 : index
    %45 = vector.load %arg2[%c5, %c0_36, %c0_37] : memref<9x16x32xf32, #tpu.memory_space<vmem>>, vector<1x16x32xf32>
    %46 = vector.shape_cast %45 : vector<1x16x32xf32> to vector<16x32xf32>
    %cst_38 = arith.constant dense<0.000000e+00> : vector<64x32xf32>
    %47 = tpu.matmul %44, %46, %cst_38 {dimension_numbers = #tpu.dot_dimension_numbers<[1], [0], [0], [1], [0, 0, 1, 1], [], []>} : vector<64x16xf32>, vector<16x32xf32>, vector<64x32xf32> -> vector<64x32xf32>
    %48 = arith.addf %40, %47 : vector<64x32xf32>
    %c0_39 = arith.constant 0 : index
    %c16 = arith.constant 16 : index
    %c0_40 = arith.constant 0 : index
    %49 = vector.load %arg1[%c0_39, %c16, %c0_40] : memref<1x82x16xf32, #tpu.memory_space<vmem>>, vector<1x64x16xf32>
    %50 = vector.shape_cast %49 : vector<1x64x16xf32> to vector<64x16xf32>
    %51 = vector.broadcast %1 : vector<64x1xf32> to vector<64x16xf32>
    %52 = arith.mulf %50, %51 : vector<64x16xf32>
    %c6 = arith.constant 6 : index
    %c0_41 = arith.constant 0 : index
    %c0_42 = arith.constant 0 : index
    %53 = vector.load %arg2[%c6, %c0_41, %c0_42] : memref<9x16x32xf32, #tpu.memory_space<vmem>>, vector<1x16x32xf32>
    %54 = vector.shape_cast %53 : vector<1x16x32xf32> to vector<16x32xf32>
    %cst_43 = arith.constant dense<0.000000e+00> : vector<64x32xf32>
    %55 = tpu.matmul %52, %54, %cst_43 {dimension_numbers = #tpu.dot_dimension_numbers<[1], [0], [0], [1], [0, 0, 1, 1], [], []>} : vector<64x16xf32>, vector<16x32xf32>, vector<64x32xf32> -> vector<64x32xf32>
    %56 = arith.addf %48, %55 : vector<64x32xf32>
    %c0_44 = arith.constant 0 : index
    %c17 = arith.constant 17 : index
    %c0_45 = arith.constant 0 : index
    %57 = vector.load %arg1[%c0_44, %c17, %c0_45] : memref<1x82x16xf32, #tpu.memory_space<vmem>>, vector<1x64x16xf32>
    %58 = vector.shape_cast %57 : vector<1x64x16xf32> to vector<64x16xf32>
    %c7 = arith.constant 7 : index
    %c0_46 = arith.constant 0 : index
    %c0_47 = arith.constant 0 : index
    %59 = vector.load %arg2[%c7, %c0_46, %c0_47] : memref<9x16x32xf32, #tpu.memory_space<vmem>>, vector<1x16x32xf32>
    %60 = vector.shape_cast %59 : vector<1x16x32xf32> to vector<16x32xf32>
    %cst_48 = arith.constant dense<0.000000e+00> : vector<64x32xf32>
    %61 = tpu.matmul %58, %60, %cst_48 {dimension_numbers = #tpu.dot_dimension_numbers<[1], [0], [0], [1], [0, 0, 1, 1], [], []>} : vector<64x16xf32>, vector<16x32xf32>, vector<64x32xf32> -> vector<64x32xf32>
    %62 = arith.addf %56, %61 : vector<64x32xf32>
    %c0_49 = arith.constant 0 : index
    %c18 = arith.constant 18 : index
    %c0_50 = arith.constant 0 : index
    %63 = vector.load %arg1[%c0_49, %c18, %c0_50] : memref<1x82x16xf32, #tpu.memory_space<vmem>>, vector<1x64x16xf32>
    %64 = vector.shape_cast %63 : vector<1x64x16xf32> to vector<64x16xf32>
    %65 = vector.broadcast %3 : vector<64x1xf32> to vector<64x16xf32>
    %66 = arith.mulf %64, %65 : vector<64x16xf32>
    %c8_51 = arith.constant 8 : index
    %c0_52 = arith.constant 0 : index
    %c0_53 = arith.constant 0 : index
    %67 = vector.load %arg2[%c8_51, %c0_52, %c0_53] : memref<9x16x32xf32, #tpu.memory_space<vmem>>, vector<1x16x32xf32>
    %68 = vector.shape_cast %67 : vector<1x16x32xf32> to vector<16x32xf32>
    %cst_54 = arith.constant dense<0.000000e+00> : vector<64x32xf32>
    %69 = tpu.matmul %66, %68, %cst_54 {dimension_numbers = #tpu.dot_dimension_numbers<[1], [0], [0], [1], [0, 0, 1, 1], [], []>} : vector<64x16xf32>, vector<16x32xf32>, vector<64x32xf32> -> vector<64x32xf32>
    %70 = arith.addf %62, %69 : vector<64x32xf32>
    %c0_55 = arith.constant 0 : index
    %c0_56 = arith.constant 0 : index
    %71 = vector.load %arg3[%c0_55, %c0_56] : memref<1x32xf32, #tpu.memory_space<vmem>>, vector<1x32xf32>
    %72 = vector.broadcast %71 : vector<1x32xf32> to vector<64x32xf32>
    %73 = arith.addf %70, %72 : vector<64x32xf32>
    %cst_57 = arith.constant 0.000000e+00 : f32
    %74 = vector.broadcast %cst_57 : f32 to vector<64x32xf32>
    %75 = arith.maximumf %73, %74 : vector<64x32xf32>
    %c0_58 = arith.constant 0 : index
    %c0_59 = arith.constant 0 : index
    %c0_60 = arith.constant 0 : index
    %76 = vector.load %arg5[%c0_58, %c0_59, %c0_60] : memref<1x64x32xf32, #tpu.memory_space<vmem>>, vector<1x64x32xf32>
    %77 = vector.shape_cast %76 : vector<1x64x32xf32> to vector<64x32xf32>
    %78 = vector.shape_cast %75 : vector<64x32xf32> to vector<1x64x32xf32>
    tpu.vector_store %arg5[%c0_58, %c0_59, %c0_60], %78 {strides = array<i32>} : memref<1x64x32xf32, #tpu.memory_space<vmem>>, vector<1x64x32xf32>,
    return
  }
  func.func @transform_0(%arg0: i32) -> (i32, i32, i32) {
    %c0_i32 = arith.constant 0 : i32
    %c0_i32_0 = arith.constant 0 : i32
    %c0_i32_1 = arith.constant 0 : i32
    return %arg0, %c0_i32, %c0_i32_0 : i32, i32, i32
  }
  func.func @transform_1(%arg0: i32) -> (i32, i32, i32) {
    %c0_i32 = arith.constant 0 : i32
    %c0_i32_0 = arith.constant 0 : i32
    %c0_i32_1 = arith.constant 0 : i32
    %c0_i32_2 = arith.constant 0 : i32
    return %c0_i32, %c0_i32_0, %c0_i32_1 : i32, i32, i32
  }
  func.func @transform_2(%arg0: i32) -> (i32, i32) {
    %c0_i32 = arith.constant 0 : i32
    %c0_i32_0 = arith.constant 0 : i32
    %c0_i32_1 = arith.constant 0 : i32
    return %c0_i32, %c0_i32_0 : i32, i32
  }
  func.func @transform_3(%arg0: i32) -> (i32, i32, i32) {
    %c0_i32 = arith.constant 0 : i32
    %c0_i32_0 = arith.constant 0 : i32
    %c0_i32_1 = arith.constant 0 : i32
    %c0_i32_2 = arith.constant 0 : i32
    return %c0_i32, %c0_i32_0, %c0_i32_1 : i32, i32, i32
  }
  func.func @transform_4(%arg0: i32) -> (i32, i32, i32) {
    %c0_i32 = arith.constant 0 : i32
    %c0_i32_0 = arith.constant 0 : i32
    %c0_i32_1 = arith.constant 0 : i32
    return %arg0, %c0_i32, %c0_i32_0 : i32, i32, i32
  }
}

module attributes {stable_mosaic.version = 11 : i64} {
  func.func @_conv3x3_kernel(%arg0: i32, %arg1: memref<1x26x32xf32, #tpu.memory_space<vmem>>, %arg2: memref<9x32x64xf32, #tpu.memory_space<vmem>>, %arg3: memref<1x64xf32, #tpu.memory_space<vmem>>, %arg4: memref<2x16x1xf32, #tpu.memory_space<vmem>>, %arg5: memref<1x16x64xf32, #tpu.memory_space<vmem>>) attributes {dimension_semantics = [#tpu.dimension_semantics<parallel>], iteration_bounds = array<i64: 1>, scalar_prefetch = 0 : i64, scratch_operands = 0 : i64, tpu.core_type = #tpu.core_type<tc>, window_params = [{transform_indices = @transform_0, window_bounds = array<i64: 1, 26, 32>}, {pipeline_mode = #tpu.pipeline_mode<synchronous>, transform_indices = @transform_1, window_bounds = array<i64: 9, 32, 64>}, {pipeline_mode = #tpu.pipeline_mode<synchronous>, transform_indices = @transform_2, window_bounds = array<i64: 1, 64>}, {pipeline_mode = #tpu.pipeline_mode<synchronous>, transform_indices = @transform_3, window_bounds = array<i64: 2, 16, 1>}, {transform_indices = @transform_4, window_bounds = array<i64: 1, 16, 64>}]} {
    %c0 = arith.constant 0 : index
    %c0_0 = arith.constant 0 : index
    %c0_1 = arith.constant 0 : index
    %0 = vector.load %arg4[%c0, %c0_0, %c0_1] : memref<2x16x1xf32, #tpu.memory_space<vmem>>, vector<1x16x1xf32>
    %1 = vector.shape_cast %0 : vector<1x16x1xf32> to vector<16x1xf32>
    %c1 = arith.constant 1 : index
    %c0_2 = arith.constant 0 : index
    %c0_3 = arith.constant 0 : index
    %2 = vector.load %arg4[%c1, %c0_2, %c0_3] : memref<2x16x1xf32, #tpu.memory_space<vmem>>, vector<1x16x1xf32>
    %3 = vector.shape_cast %2 : vector<1x16x1xf32> to vector<16x1xf32>
    %cst = arith.constant 0.000000e+00 : f32
    %4 = vector.broadcast %cst : f32 to vector<16x64xf32>
    %c0_4 = arith.constant 0 : index
    %c0_5 = arith.constant 0 : index
    %c0_6 = arith.constant 0 : index
    %5 = vector.load %arg1[%c0_4, %c0_5, %c0_6] : memref<1x26x32xf32, #tpu.memory_space<vmem>>, vector<1x16x32xf32>
    %6 = vector.shape_cast %5 : vector<1x16x32xf32> to vector<16x32xf32>
    %7 = vector.broadcast %1 : vector<16x1xf32> to vector<16x32xf32>
    %8 = arith.mulf %6, %7 : vector<16x32xf32>
    %c0_7 = arith.constant 0 : index
    %c0_8 = arith.constant 0 : index
    %c0_9 = arith.constant 0 : index
    %9 = vector.load %arg2[%c0_7, %c0_8, %c0_9] : memref<9x32x64xf32, #tpu.memory_space<vmem>>, vector<1x32x64xf32>
    %10 = vector.shape_cast %9 : vector<1x32x64xf32> to vector<32x64xf32>
    %cst_10 = arith.constant dense<0.000000e+00> : vector<16x64xf32>
    %11 = tpu.matmul %8, %10, %cst_10 {dimension_numbers = #tpu.dot_dimension_numbers<[1], [0], [0], [1], [0, 0, 1, 1], [], []>} : vector<16x32xf32>, vector<32x64xf32>, vector<16x64xf32> -> vector<16x64xf32>
    %12 = arith.addf %4, %11 : vector<16x64xf32>
    %c0_11 = arith.constant 0 : index
    %c1_12 = arith.constant 1 : index
    %c0_13 = arith.constant 0 : index
    %13 = vector.load %arg1[%c0_11, %c1_12, %c0_13] : memref<1x26x32xf32, #tpu.memory_space<vmem>>, vector<1x16x32xf32>
    %14 = vector.shape_cast %13 : vector<1x16x32xf32> to vector<16x32xf32>
    %c1_14 = arith.constant 1 : index
    %c0_15 = arith.constant 0 : index
    %c0_16 = arith.constant 0 : index
    %15 = vector.load %arg2[%c1_14, %c0_15, %c0_16] : memref<9x32x64xf32, #tpu.memory_space<vmem>>, vector<1x32x64xf32>
    %16 = vector.shape_cast %15 : vector<1x32x64xf32> to vector<32x64xf32>
    %cst_17 = arith.constant dense<0.000000e+00> : vector<16x64xf32>
    %17 = tpu.matmul %14, %16, %cst_17 {dimension_numbers = #tpu.dot_dimension_numbers<[1], [0], [0], [1], [0, 0, 1, 1], [], []>} : vector<16x32xf32>, vector<32x64xf32>, vector<16x64xf32> -> vector<16x64xf32>
    %18 = arith.addf %12, %17 : vector<16x64xf32>
    %c0_18 = arith.constant 0 : index
    %c2 = arith.constant 2 : index
    %c0_19 = arith.constant 0 : index
    %19 = vector.load %arg1[%c0_18, %c2, %c0_19] : memref<1x26x32xf32, #tpu.memory_space<vmem>>, vector<1x16x32xf32>
    %20 = vector.shape_cast %19 : vector<1x16x32xf32> to vector<16x32xf32>
    %21 = vector.broadcast %3 : vector<16x1xf32> to vector<16x32xf32>
    %22 = arith.mulf %20, %21 : vector<16x32xf32>
    %c2_20 = arith.constant 2 : index
    %c0_21 = arith.constant 0 : index
    %c0_22 = arith.constant 0 : index
    %23 = vector.load %arg2[%c2_20, %c0_21, %c0_22] : memref<9x32x64xf32, #tpu.memory_space<vmem>>, vector<1x32x64xf32>
    %24 = vector.shape_cast %23 : vector<1x32x64xf32> to vector<32x64xf32>
    %cst_23 = arith.constant dense<0.000000e+00> : vector<16x64xf32>
    %25 = tpu.matmul %22, %24, %cst_23 {dimension_numbers = #tpu.dot_dimension_numbers<[1], [0], [0], [1], [0, 0, 1, 1], [], []>} : vector<16x32xf32>, vector<32x64xf32>, vector<16x64xf32> -> vector<16x64xf32>
    %26 = arith.addf %18, %25 : vector<16x64xf32>
    %c0_24 = arith.constant 0 : index
    %c4 = arith.constant 4 : index
    %c0_25 = arith.constant 0 : index
    %27 = vector.load %arg1[%c0_24, %c4, %c0_25] : memref<1x26x32xf32, #tpu.memory_space<vmem>>, vector<1x16x32xf32>
    %28 = vector.shape_cast %27 : vector<1x16x32xf32> to vector<16x32xf32>
    %29 = vector.broadcast %1 : vector<16x1xf32> to vector<16x32xf32>
    %30 = arith.mulf %28, %29 : vector<16x32xf32>
    %c3 = arith.constant 3 : index
    %c0_26 = arith.constant 0 : index
    %c0_27 = arith.constant 0 : index
    %31 = vector.load %arg2[%c3, %c0_26, %c0_27] : memref<9x32x64xf32, #tpu.memory_space<vmem>>, vector<1x32x64xf32>
    %32 = vector.shape_cast %31 : vector<1x32x64xf32> to vector<32x64xf32>
    %cst_28 = arith.constant dense<0.000000e+00> : vector<16x64xf32>
    %33 = tpu.matmul %30, %32, %cst_28 {dimension_numbers = #tpu.dot_dimension_numbers<[1], [0], [0], [1], [0, 0, 1, 1], [], []>} : vector<16x32xf32>, vector<32x64xf32>, vector<16x64xf32> -> vector<16x64xf32>
    %34 = arith.addf %26, %33 : vector<16x64xf32>
    %c0_29 = arith.constant 0 : index
    %c5 = arith.constant 5 : index
    %c0_30 = arith.constant 0 : index
    %35 = vector.load %arg1[%c0_29, %c5, %c0_30] : memref<1x26x32xf32, #tpu.memory_space<vmem>>, vector<1x16x32xf32>
    %36 = vector.shape_cast %35 : vector<1x16x32xf32> to vector<16x32xf32>
    %c4_31 = arith.constant 4 : index
    %c0_32 = arith.constant 0 : index
    %c0_33 = arith.constant 0 : index
    %37 = vector.load %arg2[%c4_31, %c0_32, %c0_33] : memref<9x32x64xf32, #tpu.memory_space<vmem>>, vector<1x32x64xf32>
    %38 = vector.shape_cast %37 : vector<1x32x64xf32> to vector<32x64xf32>
    %cst_34 = arith.constant dense<0.000000e+00> : vector<16x64xf32>
    %39 = tpu.matmul %36, %38, %cst_34 {dimension_numbers = #tpu.dot_dimension_numbers<[1], [0], [0], [1], [0, 0, 1, 1], [], []>} : vector<16x32xf32>, vector<32x64xf32>, vector<16x64xf32> -> vector<16x64xf32>
    %40 = arith.addf %34, %39 : vector<16x64xf32>
    %c0_35 = arith.constant 0 : index
    %c6 = arith.constant 6 : index
    %c0_36 = arith.constant 0 : index
    %41 = vector.load %arg1[%c0_35, %c6, %c0_36] : memref<1x26x32xf32, #tpu.memory_space<vmem>>, vector<1x16x32xf32>
    %42 = vector.shape_cast %41 : vector<1x16x32xf32> to vector<16x32xf32>
    %43 = vector.broadcast %3 : vector<16x1xf32> to vector<16x32xf32>
    %44 = arith.mulf %42, %43 : vector<16x32xf32>
    %c5_37 = arith.constant 5 : index
    %c0_38 = arith.constant 0 : index
    %c0_39 = arith.constant 0 : index
    %45 = vector.load %arg2[%c5_37, %c0_38, %c0_39] : memref<9x32x64xf32, #tpu.memory_space<vmem>>, vector<1x32x64xf32>
    %46 = vector.shape_cast %45 : vector<1x32x64xf32> to vector<32x64xf32>
    %cst_40 = arith.constant dense<0.000000e+00> : vector<16x64xf32>
    %47 = tpu.matmul %44, %46, %cst_40 {dimension_numbers = #tpu.dot_dimension_numbers<[1], [0], [0], [1], [0, 0, 1, 1], [], []>} : vector<16x32xf32>, vector<32x64xf32>, vector<16x64xf32> -> vector<16x64xf32>
    %48 = arith.addf %40, %47 : vector<16x64xf32>
    %c0_41 = arith.constant 0 : index
    %c8 = arith.constant 8 : index
    %c0_42 = arith.constant 0 : index
    %49 = vector.load %arg1[%c0_41, %c8, %c0_42] : memref<1x26x32xf32, #tpu.memory_space<vmem>>, vector<1x16x32xf32>
    %50 = vector.shape_cast %49 : vector<1x16x32xf32> to vector<16x32xf32>
    %51 = vector.broadcast %1 : vector<16x1xf32> to vector<16x32xf32>
    %52 = arith.mulf %50, %51 : vector<16x32xf32>
    %c6_43 = arith.constant 6 : index
    %c0_44 = arith.constant 0 : index
    %c0_45 = arith.constant 0 : index
    %53 = vector.load %arg2[%c6_43, %c0_44, %c0_45] : memref<9x32x64xf32, #tpu.memory_space<vmem>>, vector<1x32x64xf32>
    %54 = vector.shape_cast %53 : vector<1x32x64xf32> to vector<32x64xf32>
    %cst_46 = arith.constant dense<0.000000e+00> : vector<16x64xf32>
    %55 = tpu.matmul %52, %54, %cst_46 {dimension_numbers = #tpu.dot_dimension_numbers<[1], [0], [0], [1], [0, 0, 1, 1], [], []>} : vector<16x32xf32>, vector<32x64xf32>, vector<16x64xf32> -> vector<16x64xf32>
    %56 = arith.addf %48, %55 : vector<16x64xf32>
    %c0_47 = arith.constant 0 : index
    %c9 = arith.constant 9 : index
    %c0_48 = arith.constant 0 : index
    %57 = vector.load %arg1[%c0_47, %c9, %c0_48] : memref<1x26x32xf32, #tpu.memory_space<vmem>>, vector<1x16x32xf32>
    %58 = vector.shape_cast %57 : vector<1x16x32xf32> to vector<16x32xf32>
    %c7 = arith.constant 7 : index
    %c0_49 = arith.constant 0 : index
    %c0_50 = arith.constant 0 : index
    %59 = vector.load %arg2[%c7, %c0_49, %c0_50] : memref<9x32x64xf32, #tpu.memory_space<vmem>>, vector<1x32x64xf32>
    %60 = vector.shape_cast %59 : vector<1x32x64xf32> to vector<32x64xf32>
    %cst_51 = arith.constant dense<0.000000e+00> : vector<16x64xf32>
    %61 = tpu.matmul %58, %60, %cst_51 {dimension_numbers = #tpu.dot_dimension_numbers<[1], [0], [0], [1], [0, 0, 1, 1], [], []>} : vector<16x32xf32>, vector<32x64xf32>, vector<16x64xf32> -> vector<16x64xf32>
    %62 = arith.addf %56, %61 : vector<16x64xf32>
    %c0_52 = arith.constant 0 : index
    %c10 = arith.constant 10 : index
    %c0_53 = arith.constant 0 : index
    %63 = vector.load %arg1[%c0_52, %c10, %c0_53] : memref<1x26x32xf32, #tpu.memory_space<vmem>>, vector<1x16x32xf32>
    %64 = vector.shape_cast %63 : vector<1x16x32xf32> to vector<16x32xf32>
    %65 = vector.broadcast %3 : vector<16x1xf32> to vector<16x32xf32>
    %66 = arith.mulf %64, %65 : vector<16x32xf32>
    %c8_54 = arith.constant 8 : index
    %c0_55 = arith.constant 0 : index
    %c0_56 = arith.constant 0 : index
    %67 = vector.load %arg2[%c8_54, %c0_55, %c0_56] : memref<9x32x64xf32, #tpu.memory_space<vmem>>, vector<1x32x64xf32>
    %68 = vector.shape_cast %67 : vector<1x32x64xf32> to vector<32x64xf32>
    %cst_57 = arith.constant dense<0.000000e+00> : vector<16x64xf32>
    %69 = tpu.matmul %66, %68, %cst_57 {dimension_numbers = #tpu.dot_dimension_numbers<[1], [0], [0], [1], [0, 0, 1, 1], [], []>} : vector<16x32xf32>, vector<32x64xf32>, vector<16x64xf32> -> vector<16x64xf32>
    %70 = arith.addf %62, %69 : vector<16x64xf32>
    %c0_58 = arith.constant 0 : index
    %c0_59 = arith.constant 0 : index
    %71 = vector.load %arg3[%c0_58, %c0_59] : memref<1x64xf32, #tpu.memory_space<vmem>>, vector<1x64xf32>
    %72 = vector.broadcast %71 : vector<1x64xf32> to vector<16x64xf32>
    %73 = arith.addf %70, %72 : vector<16x64xf32>
    %cst_60 = arith.constant 0.000000e+00 : f32
    %74 = vector.broadcast %cst_60 : f32 to vector<16x64xf32>
    %75 = arith.maximumf %73, %74 : vector<16x64xf32>
    %c0_61 = arith.constant 0 : index
    %c0_62 = arith.constant 0 : index
    %c0_63 = arith.constant 0 : index
    %76 = vector.load %arg5[%c0_61, %c0_62, %c0_63] : memref<1x16x64xf32, #tpu.memory_space<vmem>>, vector<1x16x64xf32>
    %77 = vector.shape_cast %76 : vector<1x16x64xf32> to vector<16x64xf32>
    %78 = vector.shape_cast %75 : vector<16x64xf32> to vector<1x16x64xf32>
    tpu.vector_store %arg5[%c0_61, %c0_62, %c0_63], %78 {strides = array<i32>} : memref<1x16x64xf32, #tpu.memory_space<vmem>>, vector<1x16x64xf32>,
    return
  }
  func.func @transform_0(%arg0: i32) -> (i32, i32, i32) {
    %c0_i32 = arith.constant 0 : i32
    %c0_i32_0 = arith.constant 0 : i32
    %c0_i32_1 = arith.constant 0 : i32
    return %arg0, %c0_i32, %c0_i32_0 : i32, i32, i32
  }
  func.func @transform_1(%arg0: i32) -> (i32, i32, i32) {
    %c0_i32 = arith.constant 0 : i32
    %c0_i32_0 = arith.constant 0 : i32
    %c0_i32_1 = arith.constant 0 : i32
    %c0_i32_2 = arith.constant 0 : i32
    return %c0_i32, %c0_i32_0, %c0_i32_1 : i32, i32, i32
  }
  func.func @transform_2(%arg0: i32) -> (i32, i32) {
    %c0_i32 = arith.constant 0 : i32
    %c0_i32_0 = arith.constant 0 : i32
    %c0_i32_1 = arith.constant 0 : i32
    return %c0_i32, %c0_i32_0 : i32, i32
  }
  func.func @transform_3(%arg0: i32) -> (i32, i32, i32) {
    %c0_i32 = arith.constant 0 : i32
    %c0_i32_0 = arith.constant 0 : i32
    %c0_i32_1 = arith.constant 0 : i32
    %c0_i32_2 = arith.constant 0 : i32
    return %c0_i32, %c0_i32_0, %c0_i32_1 : i32, i32, i32
  }
  func.func @transform_4(%arg0: i32) -> (i32, i32, i32) {
    %c0_i32 = arith.constant 0 : i32
    %c0_i32_0 = arith.constant 0 : i32
    %c0_i32_1 = arith.constant 0 : i32
    return %arg0, %c0_i32, %c0_i32_0 : i32, i32, i32
  }
}

module attributes {stable_mosaic.version = 11 : i64} {
  func.func @_convlstm_kernel(%arg0: i32, %arg1: memref<1x10x64xf32, #tpu.memory_space<vmem>>, %arg2: memref<9x64x64xf32, #tpu.memory_space<vmem>>, %arg3: memref<9x64x64xf32, #tpu.memory_space<vmem>>, %arg4: memref<9x64x64xf32, #tpu.memory_space<vmem>>, %arg5: memref<3x64xf32, #tpu.memory_space<vmem>>, %arg6: memref<2x4x1xf32, #tpu.memory_space<vmem>>, %arg7: memref<1x4x64xf32, #tpu.memory_space<vmem>>) attributes {dimension_semantics = [#tpu.dimension_semantics<parallel>], iteration_bounds = array<i64: 1>, scalar_prefetch = 0 : i64, scratch_operands = 0 : i64, tpu.core_type = #tpu.core_type<tc>, window_params = [{transform_indices = @transform_0, window_bounds = array<i64: 1, 10, 64>}, {pipeline_mode = #tpu.pipeline_mode<synchronous>, transform_indices = @transform_1, window_bounds = array<i64: 9, 64, 64>}, {pipeline_mode = #tpu.pipeline_mode<synchronous>, transform_indices = @transform_2, window_bounds = array<i64: 9, 64, 64>}, {pipeline_mode = #tpu.pipeline_mode<synchronous>, transform_indices = @transform_3, window_bounds = array<i64: 9, 64, 64>}, {pipeline_mode = #tpu.pipeline_mode<synchronous>, transform_indices = @transform_4, window_bounds = array<i64: 3, 64>}, {pipeline_mode = #tpu.pipeline_mode<synchronous>, transform_indices = @transform_5, window_bounds = array<i64: 2, 4, 1>}, {transform_indices = @transform_6, window_bounds = array<i64: 1, 4, 64>}]} {
    %c0 = arith.constant 0 : index
    %c0_0 = arith.constant 0 : index
    %c0_1 = arith.constant 0 : index
    %0 = vector.load %arg6[%c0, %c0_0, %c0_1] : memref<2x4x1xf32, #tpu.memory_space<vmem>>, vector<1x4x1xf32>
    %1 = vector.shape_cast %0 : vector<1x4x1xf32> to vector<4x1xf32>
    %c1 = arith.constant 1 : index
    %c0_2 = arith.constant 0 : index
    %c0_3 = arith.constant 0 : index
    %2 = vector.load %arg6[%c1, %c0_2, %c0_3] : memref<2x4x1xf32, #tpu.memory_space<vmem>>, vector<1x4x1xf32>
    %3 = vector.shape_cast %2 : vector<1x4x1xf32> to vector<4x1xf32>
    %cst = arith.constant 0.000000e+00 : f32
    %4 = vector.broadcast %cst : f32 to vector<4x64xf32>
    %cst_4 = arith.constant 0.000000e+00 : f32
    %5 = vector.broadcast %cst_4 : f32 to vector<4x64xf32>
    %cst_5 = arith.constant 0.000000e+00 : f32
    %6 = vector.broadcast %cst_5 : f32 to vector<4x64xf32>
    %c0_6 = arith.constant 0 : index
    %c0_7 = arith.constant 0 : index
    %c0_8 = arith.constant 0 : index
    %7 = vector.load %arg1[%c0_6, %c0_7, %c0_8] : memref<1x10x64xf32, #tpu.memory_space<vmem>>, vector<1x4x64xf32>
    %8 = vector.shape_cast %7 : vector<1x4x64xf32> to vector<4x64xf32>
    %9 = vector.broadcast %1 : vector<4x1xf32> to vector<4x64xf32>
    %10 = arith.mulf %8, %9 : vector<4x64xf32>
    %c0_9 = arith.constant 0 : index
    %c0_10 = arith.constant 0 : index
    %c0_11 = arith.constant 0 : index
    %11 = vector.load %arg2[%c0_9, %c0_10, %c0_11] : memref<9x64x64xf32, #tpu.memory_space<vmem>>, vector<1x64x64xf32>
    %12 = vector.shape_cast %11 : vector<1x64x64xf32> to vector<64x64xf32>
    %cst_12 = arith.constant dense<0.000000e+00> : vector<4x64xf32>
    %13 = tpu.matmul %10, %12, %cst_12 {dimension_numbers = #tpu.dot_dimension_numbers<[1], [0], [0], [1], [0, 0, 1, 1], [], []>} : vector<4x64xf32>, vector<64x64xf32>, vector<4x64xf32> -> vector<4x64xf32>
    %14 = arith.addf %4, %13 : vector<4x64xf32>
    %c0_13 = arith.constant 0 : index
    %c0_14 = arith.constant 0 : index
    %c0_15 = arith.constant 0 : index
    %15 = vector.load %arg3[%c0_13, %c0_14, %c0_15] : memref<9x64x64xf32, #tpu.memory_space<vmem>>, vector<1x64x64xf32>
    %16 = vector.shape_cast %15 : vector<1x64x64xf32> to vector<64x64xf32>
    %cst_16 = arith.constant dense<0.000000e+00> : vector<4x64xf32>
    %17 = tpu.matmul %10, %16, %cst_16 {dimension_numbers = #tpu.dot_dimension_numbers<[1], [0], [0], [1], [0, 0, 1, 1], [], []>} : vector<4x64xf32>, vector<64x64xf32>, vector<4x64xf32> -> vector<4x64xf32>
    %18 = arith.addf %5, %17 : vector<4x64xf32>
    %c0_17 = arith.constant 0 : index
    %c0_18 = arith.constant 0 : index
    %c0_19 = arith.constant 0 : index
    %19 = vector.load %arg4[%c0_17, %c0_18, %c0_19] : memref<9x64x64xf32, #tpu.memory_space<vmem>>, vector<1x64x64xf32>
    %20 = vector.shape_cast %19 : vector<1x64x64xf32> to vector<64x64xf32>
    %cst_20 = arith.constant dense<0.000000e+00> : vector<4x64xf32>
    %21 = tpu.matmul %10, %20, %cst_20 {dimension_numbers = #tpu.dot_dimension_numbers<[1], [0], [0], [1], [0, 0, 1, 1], [], []>} : vector<4x64xf32>, vector<64x64xf32>, vector<4x64xf32> -> vector<4x64xf32>
    %22 = arith.addf %6, %21 : vector<4x64xf32>
    %c0_21 = arith.constant 0 : index
    %c1_22 = arith.constant 1 : index
    %c0_23 = arith.constant 0 : index
    %23 = vector.load %arg1[%c0_21, %c1_22, %c0_23] : memref<1x10x64xf32, #tpu.memory_space<vmem>>, vector<1x4x64xf32>
    %24 = vector.shape_cast %23 : vector<1x4x64xf32> to vector<4x64xf32>
    %c1_24 = arith.constant 1 : index
    %c0_25 = arith.constant 0 : index
    %c0_26 = arith.constant 0 : index
    %25 = vector.load %arg2[%c1_24, %c0_25, %c0_26] : memref<9x64x64xf32, #tpu.memory_space<vmem>>, vector<1x64x64xf32>
    %26 = vector.shape_cast %25 : vector<1x64x64xf32> to vector<64x64xf32>
    %cst_27 = arith.constant dense<0.000000e+00> : vector<4x64xf32>
    %27 = tpu.matmul %24, %26, %cst_27 {dimension_numbers = #tpu.dot_dimension_numbers<[1], [0], [0], [1], [0, 0, 1, 1], [], []>} : vector<4x64xf32>, vector<64x64xf32>, vector<4x64xf32> -> vector<4x64xf32>
    %28 = arith.addf %14, %27 : vector<4x64xf32>
    %c1_28 = arith.constant 1 : index
    %c0_29 = arith.constant 0 : index
    %c0_30 = arith.constant 0 : index
    %29 = vector.load %arg3[%c1_28, %c0_29, %c0_30] : memref<9x64x64xf32, #tpu.memory_space<vmem>>, vector<1x64x64xf32>
    %30 = vector.shape_cast %29 : vector<1x64x64xf32> to vector<64x64xf32>
    %cst_31 = arith.constant dense<0.000000e+00> : vector<4x64xf32>
    %31 = tpu.matmul %24, %30, %cst_31 {dimension_numbers = #tpu.dot_dimension_numbers<[1], [0], [0], [1], [0, 0, 1, 1], [], []>} : vector<4x64xf32>, vector<64x64xf32>, vector<4x64xf32> -> vector<4x64xf32>
    %32 = arith.addf %18, %31 : vector<4x64xf32>
    %c1_32 = arith.constant 1 : index
    %c0_33 = arith.constant 0 : index
    %c0_34 = arith.constant 0 : index
    %33 = vector.load %arg4[%c1_32, %c0_33, %c0_34] : memref<9x64x64xf32, #tpu.memory_space<vmem>>, vector<1x64x64xf32>
    %34 = vector.shape_cast %33 : vector<1x64x64xf32> to vector<64x64xf32>
    %cst_35 = arith.constant dense<0.000000e+00> : vector<4x64xf32>
    %35 = tpu.matmul %24, %34, %cst_35 {dimension_numbers = #tpu.dot_dimension_numbers<[1], [0], [0], [1], [0, 0, 1, 1], [], []>} : vector<4x64xf32>, vector<64x64xf32>, vector<4x64xf32> -> vector<4x64xf32>
    %36 = arith.addf %22, %35 : vector<4x64xf32>
    %c0_36 = arith.constant 0 : index
    %c2 = arith.constant 2 : index
    %c0_37 = arith.constant 0 : index
    %37 = vector.load %arg1[%c0_36, %c2, %c0_37] : memref<1x10x64xf32, #tpu.memory_space<vmem>>, vector<1x4x64xf32>
    %38 = vector.shape_cast %37 : vector<1x4x64xf32> to vector<4x64xf32>
    %39 = vector.broadcast %3 : vector<4x1xf32> to vector<4x64xf32>
    %40 = arith.mulf %38, %39 : vector<4x64xf32>
    %c2_38 = arith.constant 2 : index
    %c0_39 = arith.constant 0 : index
    %c0_40 = arith.constant 0 : index
    %41 = vector.load %arg2[%c2_38, %c0_39, %c0_40] : memref<9x64x64xf32, #tpu.memory_space<vmem>>, vector<1x64x64xf32>
    %42 = vector.shape_cast %41 : vector<1x64x64xf32> to vector<64x64xf32>
    %cst_41 = arith.constant dense<0.000000e+00> : vector<4x64xf32>
    %43 = tpu.matmul %40, %42, %cst_41 {dimension_numbers = #tpu.dot_dimension_numbers<[1], [0], [0], [1], [0, 0, 1, 1], [], []>} : vector<4x64xf32>, vector<64x64xf32>, vector<4x64xf32> -> vector<4x64xf32>
    %44 = arith.addf %28, %43 : vector<4x64xf32>
    %c2_42 = arith.constant 2 : index
    %c0_43 = arith.constant 0 : index
    %c0_44 = arith.constant 0 : index
    %45 = vector.load %arg3[%c2_42, %c0_43, %c0_44] : memref<9x64x64xf32, #tpu.memory_space<vmem>>, vector<1x64x64xf32>
    %46 = vector.shape_cast %45 : vector<1x64x64xf32> to vector<64x64xf32>
    %cst_45 = arith.constant dense<0.000000e+00> : vector<4x64xf32>
    %47 = tpu.matmul %40, %46, %cst_45 {dimension_numbers = #tpu.dot_dimension_numbers<[1], [0], [0], [1], [0, 0, 1, 1], [], []>} : vector<4x64xf32>, vector<64x64xf32>, vector<4x64xf32> -> vector<4x64xf32>
    %48 = arith.addf %32, %47 : vector<4x64xf32>
    %c2_46 = arith.constant 2 : index
    %c0_47 = arith.constant 0 : index
    %c0_48 = arith.constant 0 : index
    %49 = vector.load %arg4[%c2_46, %c0_47, %c0_48] : memref<9x64x64xf32, #tpu.memory_space<vmem>>, vector<1x64x64xf32>
    %50 = vector.shape_cast %49 : vector<1x64x64xf32> to vector<64x64xf32>
    %cst_49 = arith.constant dense<0.000000e+00> : vector<4x64xf32>
    %51 = tpu.matmul %40, %50, %cst_49 {dimension_numbers = #tpu.dot_dimension_numbers<[1], [0], [0], [1], [0, 0, 1, 1], [], []>} : vector<4x64xf32>, vector<64x64xf32>, vector<4x64xf32> -> vector<4x64xf32>
    %52 = arith.addf %36, %51 : vector<4x64xf32>
    %c0_50 = arith.constant 0 : index
    %c2_51 = arith.constant 2 : index
    %c0_52 = arith.constant 0 : index
    %53 = vector.load %arg1[%c0_50, %c2_51, %c0_52] : memref<1x10x64xf32, #tpu.memory_space<vmem>>, vector<1x4x64xf32>
    %54 = vector.shape_cast %53 : vector<1x4x64xf32> to vector<4x64xf32>
    %55 = vector.broadcast %1 : vector<4x1xf32> to vector<4x64xf32>
    %56 = arith.mulf %54, %55 : vector<4x64xf32>
    %c3 = arith.constant 3 : index
    %c0_53 = arith.constant 0 : index
    %c0_54 = arith.constant 0 : index
    %57 = vector.load %arg2[%c3, %c0_53, %c0_54] : memref<9x64x64xf32, #tpu.memory_space<vmem>>, vector<1x64x64xf32>
    %58 = vector.shape_cast %57 : vector<1x64x64xf32> to vector<64x64xf32>
    %cst_55 = arith.constant dense<0.000000e+00> : vector<4x64xf32>
    %59 = tpu.matmul %56, %58, %cst_55 {dimension_numbers = #tpu.dot_dimension_numbers<[1], [0], [0], [1], [0, 0, 1, 1], [], []>} : vector<4x64xf32>, vector<64x64xf32>, vector<4x64xf32> -> vector<4x64xf32>
    %60 = arith.addf %44, %59 : vector<4x64xf32>
    %c3_56 = arith.constant 3 : index
    %c0_57 = arith.constant 0 : index
    %c0_58 = arith.constant 0 : index
    %61 = vector.load %arg3[%c3_56, %c0_57, %c0_58] : memref<9x64x64xf32, #tpu.memory_space<vmem>>, vector<1x64x64xf32>
    %62 = vector.shape_cast %61 : vector<1x64x64xf32> to vector<64x64xf32>
    %cst_59 = arith.constant dense<0.000000e+00> : vector<4x64xf32>
    %63 = tpu.matmul %56, %62, %cst_59 {dimension_numbers = #tpu.dot_dimension_numbers<[1], [0], [0], [1], [0, 0, 1, 1], [], []>} : vector<4x64xf32>, vector<64x64xf32>, vector<4x64xf32> -> vector<4x64xf32>
    %64 = arith.addf %48, %63 : vector<4x64xf32>
    %c3_60 = arith.constant 3 : index
    %c0_61 = arith.constant 0 : index
    %c0_62 = arith.constant 0 : index
    %65 = vector.load %arg4[%c3_60, %c0_61, %c0_62] : memref<9x64x64xf32, #tpu.memory_space<vmem>>, vector<1x64x64xf32>
    %66 = vector.shape_cast %65 : vector<1x64x64xf32> to vector<64x64xf32>
    %cst_63 = arith.constant dense<0.000000e+00> : vector<4x64xf32>
    %67 = tpu.matmul %56, %66, %cst_63 {dimension_numbers = #tpu.dot_dimension_numbers<[1], [0], [0], [1], [0, 0, 1, 1], [], []>} : vector<4x64xf32>, vector<64x64xf32>, vector<4x64xf32> -> vector<4x64xf32>
    %68 = arith.addf %52, %67 : vector<4x64xf32>
    %c0_64 = arith.constant 0 : index
    %c3_65 = arith.constant 3 : index
    %c0_66 = arith.constant 0 : index
    %69 = vector.load %arg1[%c0_64, %c3_65, %c0_66] : memref<1x10x64xf32, #tpu.memory_space<vmem>>, vector<1x4x64xf32>
    %70 = vector.shape_cast %69 : vector<1x4x64xf32> to vector<4x64xf32>
    %c4 = arith.constant 4 : index
    %c0_67 = arith.constant 0 : index
    %c0_68 = arith.constant 0 : index
    %71 = vector.load %arg2[%c4, %c0_67, %c0_68] : memref<9x64x64xf32, #tpu.memory_space<vmem>>, vector<1x64x64xf32>
    %72 = vector.shape_cast %71 : vector<1x64x64xf32> to vector<64x64xf32>
    %cst_69 = arith.constant dense<0.000000e+00> : vector<4x64xf32>
    %73 = tpu.matmul %70, %72, %cst_69 {dimension_numbers = #tpu.dot_dimension_numbers<[1], [0], [0], [1], [0, 0, 1, 1], [], []>} : vector<4x64xf32>, vector<64x64xf32>, vector<4x64xf32> -> vector<4x64xf32>
    %74 = arith.addf %60, %73 : vector<4x64xf32>
    %c4_70 = arith.constant 4 : index
    %c0_71 = arith.constant 0 : index
    %c0_72 = arith.constant 0 : index
    %75 = vector.load %arg3[%c4_70, %c0_71, %c0_72] : memref<9x64x64xf32, #tpu.memory_space<vmem>>, vector<1x64x64xf32>
    %76 = vector.shape_cast %75 : vector<1x64x64xf32> to vector<64x64xf32>
    %cst_73 = arith.constant dense<0.000000e+00> : vector<4x64xf32>
    %77 = tpu.matmul %70, %76, %cst_73 {dimension_numbers = #tpu.dot_dimension_numbers<[1], [0], [0], [1], [0, 0, 1, 1], [], []>} : vector<4x64xf32>, vector<64x64xf32>, vector<4x64xf32> -> vector<4x64xf32>
    %78 = arith.addf %64, %77 : vector<4x64xf32>
    %c4_74 = arith.constant 4 : index
    %c0_75 = arith.constant 0 : index
    %c0_76 = arith.constant 0 : index
    %79 = vector.load %arg4[%c4_74, %c0_75, %c0_76] : memref<9x64x64xf32, #tpu.memory_space<vmem>>, vector<1x64x64xf32>
    %80 = vector.shape_cast %79 : vector<1x64x64xf32> to vector<64x64xf32>
    %cst_77 = arith.constant dense<0.000000e+00> : vector<4x64xf32>
    %81 = tpu.matmul %70, %80, %cst_77 {dimension_numbers = #tpu.dot_dimension_numbers<[1], [0], [0], [1], [0, 0, 1, 1], [], []>} : vector<4x64xf32>, vector<64x64xf32>, vector<4x64xf32> -> vector<4x64xf32>
    %82 = arith.addf %68, %81 : vector<4x64xf32>
    %c0_78 = arith.constant 0 : index
    %c4_79 = arith.constant 4 : index
    %c0_80 = arith.constant 0 : index
    %83 = vector.load %arg1[%c0_78, %c4_79, %c0_80] : memref<1x10x64xf32, #tpu.memory_space<vmem>>, vector<1x4x64xf32>
    %84 = vector.shape_cast %83 : vector<1x4x64xf32> to vector<4x64xf32>
    %85 = vector.broadcast %3 : vector<4x1xf32> to vector<4x64xf32>
    %86 = arith.mulf %84, %85 : vector<4x64xf32>
    %c5 = arith.constant 5 : index
    %c0_81 = arith.constant 0 : index
    %c0_82 = arith.constant 0 : index
    %87 = vector.load %arg2[%c5, %c0_81, %c0_82] : memref<9x64x64xf32, #tpu.memory_space<vmem>>, vector<1x64x64xf32>
    %88 = vector.shape_cast %87 : vector<1x64x64xf32> to vector<64x64xf32>
    %cst_83 = arith.constant dense<0.000000e+00> : vector<4x64xf32>
    %89 = tpu.matmul %86, %88, %cst_83 {dimension_numbers = #tpu.dot_dimension_numbers<[1], [0], [0], [1], [0, 0, 1, 1], [], []>} : vector<4x64xf32>, vector<64x64xf32>, vector<4x64xf32> -> vector<4x64xf32>
    %90 = arith.addf %74, %89 : vector<4x64xf32>
    %c5_84 = arith.constant 5 : index
    %c0_85 = arith.constant 0 : index
    %c0_86 = arith.constant 0 : index
    %91 = vector.load %arg3[%c5_84, %c0_85, %c0_86] : memref<9x64x64xf32, #tpu.memory_space<vmem>>, vector<1x64x64xf32>
    %92 = vector.shape_cast %91 : vector<1x64x64xf32> to vector<64x64xf32>
    %cst_87 = arith.constant dense<0.000000e+00> : vector<4x64xf32>
    %93 = tpu.matmul %86, %92, %cst_87 {dimension_numbers = #tpu.dot_dimension_numbers<[1], [0], [0], [1], [0, 0, 1, 1], [], []>} : vector<4x64xf32>, vector<64x64xf32>, vector<4x64xf32> -> vector<4x64xf32>
    %94 = arith.addf %78, %93 : vector<4x64xf32>
    %c5_88 = arith.constant 5 : index
    %c0_89 = arith.constant 0 : index
    %c0_90 = arith.constant 0 : index
    %95 = vector.load %arg4[%c5_88, %c0_89, %c0_90] : memref<9x64x64xf32, #tpu.memory_space<vmem>>, vector<1x64x64xf32>
    %96 = vector.shape_cast %95 : vector<1x64x64xf32> to vector<64x64xf32>
    %cst_91 = arith.constant dense<0.000000e+00> : vector<4x64xf32>
    %97 = tpu.matmul %86, %96, %cst_91 {dimension_numbers = #tpu.dot_dimension_numbers<[1], [0], [0], [1], [0, 0, 1, 1], [], []>} : vector<4x64xf32>, vector<64x64xf32>, vector<4x64xf32> -> vector<4x64xf32>
    %98 = arith.addf %82, %97 : vector<4x64xf32>
    %c0_92 = arith.constant 0 : index
    %c4_93 = arith.constant 4 : index
    %c0_94 = arith.constant 0 : index
    %99 = vector.load %arg1[%c0_92, %c4_93, %c0_94] : memref<1x10x64xf32, #tpu.memory_space<vmem>>, vector<1x4x64xf32>
    %100 = vector.shape_cast %99 : vector<1x4x64xf32> to vector<4x64xf32>
    %101 = vector.broadcast %1 : vector<4x1xf32> to vector<4x64xf32>
    %102 = arith.mulf %100, %101 : vector<4x64xf32>
    %c6 = arith.constant 6 : index
    %c0_95 = arith.constant 0 : index
    %c0_96 = arith.constant 0 : index
    %103 = vector.load %arg2[%c6, %c0_95, %c0_96] : memref<9x64x64xf32, #tpu.memory_space<vmem>>, vector<1x64x64xf32>
    %104 = vector.shape_cast %103 : vector<1x64x64xf32> to vector<64x64xf32>
    %cst_97 = arith.constant dense<0.000000e+00> : vector<4x64xf32>
    %105 = tpu.matmul %102, %104, %cst_97 {dimension_numbers = #tpu.dot_dimension_numbers<[1], [0], [0], [1], [0, 0, 1, 1], [], []>} : vector<4x64xf32>, vector<64x64xf32>, vector<4x64xf32> -> vector<4x64xf32>
    %106 = arith.addf %90, %105 : vector<4x64xf32>
    %c6_98 = arith.constant 6 : index
    %c0_99 = arith.constant 0 : index
    %c0_100 = arith.constant 0 : index
    %107 = vector.load %arg3[%c6_98, %c0_99, %c0_100] : memref<9x64x64xf32, #tpu.memory_space<vmem>>, vector<1x64x64xf32>
    %108 = vector.shape_cast %107 : vector<1x64x64xf32> to vector<64x64xf32>
    %cst_101 = arith.constant dense<0.000000e+00> : vector<4x64xf32>
    %109 = tpu.matmul %102, %108, %cst_101 {dimension_numbers = #tpu.dot_dimension_numbers<[1], [0], [0], [1], [0, 0, 1, 1], [], []>} : vector<4x64xf32>, vector<64x64xf32>, vector<4x64xf32> -> vector<4x64xf32>
    %110 = arith.addf %94, %109 : vector<4x64xf32>
    %c6_102 = arith.constant 6 : index
    %c0_103 = arith.constant 0 : index
    %c0_104 = arith.constant 0 : index
    %111 = vector.load %arg4[%c6_102, %c0_103, %c0_104] : memref<9x64x64xf32, #tpu.memory_space<vmem>>, vector<1x64x64xf32>
    %112 = vector.shape_cast %111 : vector<1x64x64xf32> to vector<64x64xf32>
    %cst_105 = arith.constant dense<0.000000e+00> : vector<4x64xf32>
    %113 = tpu.matmul %102, %112, %cst_105 {dimension_numbers = #tpu.dot_dimension_numbers<[1], [0], [0], [1], [0, 0, 1, 1], [], []>} : vector<4x64xf32>, vector<64x64xf32>, vector<4x64xf32> -> vector<4x64xf32>
    %114 = arith.addf %98, %113 : vector<4x64xf32>
    %c0_106 = arith.constant 0 : index
    %c5_107 = arith.constant 5 : index
    %c0_108 = arith.constant 0 : index
    %115 = vector.load %arg1[%c0_106, %c5_107, %c0_108] : memref<1x10x64xf32, #tpu.memory_space<vmem>>, vector<1x4x64xf32>
    %116 = vector.shape_cast %115 : vector<1x4x64xf32> to vector<4x64xf32>
    %c7 = arith.constant 7 : index
    %c0_109 = arith.constant 0 : index
    %c0_110 = arith.constant 0 : index
    %117 = vector.load %arg2[%c7, %c0_109, %c0_110] : memref<9x64x64xf32, #tpu.memory_space<vmem>>, vector<1x64x64xf32>
    %118 = vector.shape_cast %117 : vector<1x64x64xf32> to vector<64x64xf32>
    %cst_111 = arith.constant dense<0.000000e+00> : vector<4x64xf32>
    %119 = tpu.matmul %116, %118, %cst_111 {dimension_numbers = #tpu.dot_dimension_numbers<[1], [0], [0], [1], [0, 0, 1, 1], [], []>} : vector<4x64xf32>, vector<64x64xf32>, vector<4x64xf32> -> vector<4x64xf32>
    %120 = arith.addf %106, %119 : vector<4x64xf32>
    %c7_112 = arith.constant 7 : index
    %c0_113 = arith.constant 0 : index
    %c0_114 = arith.constant 0 : index
    %121 = vector.load %arg3[%c7_112, %c0_113, %c0_114] : memref<9x64x64xf32, #tpu.memory_space<vmem>>, vector<1x64x64xf32>
    %122 = vector.shape_cast %121 : vector<1x64x64xf32> to vector<64x64xf32>
    %cst_115 = arith.constant dense<0.000000e+00> : vector<4x64xf32>
    %123 = tpu.matmul %116, %122, %cst_115 {dimension_numbers = #tpu.dot_dimension_numbers<[1], [0], [0], [1], [0, 0, 1, 1], [], []>} : vector<4x64xf32>, vector<64x64xf32>, vector<4x64xf32> -> vector<4x64xf32>
    %124 = arith.addf %110, %123 : vector<4x64xf32>
    %c7_116 = arith.constant 7 : index
    %c0_117 = arith.constant 0 : index
    %c0_118 = arith.constant 0 : index
    %125 = vector.load %arg4[%c7_116, %c0_117, %c0_118] : memref<9x64x64xf32, #tpu.memory_space<vmem>>, vector<1x64x64xf32>
    %126 = vector.shape_cast %125 : vector<1x64x64xf32> to vector<64x64xf32>
    %cst_119 = arith.constant dense<0.000000e+00> : vector<4x64xf32>
    %127 = tpu.matmul %116, %126, %cst_119 {dimension_numbers = #tpu.dot_dimension_numbers<[1], [0], [0], [1], [0, 0, 1, 1], [], []>} : vector<4x64xf32>, vector<64x64xf32>, vector<4x64xf32> -> vector<4x64xf32>
    %128 = arith.addf %114, %127 : vector<4x64xf32>
    %c0_120 = arith.constant 0 : index
    %c6_121 = arith.constant 6 : index
    %c0_122 = arith.constant 0 : index
    %129 = vector.load %arg1[%c0_120, %c6_121, %c0_122] : memref<1x10x64xf32, #tpu.memory_space<vmem>>, vector<1x4x64xf32>
    %130 = vector.shape_cast %129 : vector<1x4x64xf32> to vector<4x64xf32>
    %131 = vector.broadcast %3 : vector<4x1xf32> to vector<4x64xf32>
    %132 = arith.mulf %130, %131 : vector<4x64xf32>
    %c8 = arith.constant 8 : index
    %c0_123 = arith.constant 0 : index
    %c0_124 = arith.constant 0 : index
    %133 = vector.load %arg2[%c8, %c0_123, %c0_124] : memref<9x64x64xf32, #tpu.memory_space<vmem>>, vector<1x64x64xf32>
    %134 = vector.shape_cast %133 : vector<1x64x64xf32> to vector<64x64xf32>
    %cst_125 = arith.constant dense<0.000000e+00> : vector<4x64xf32>
    %135 = tpu.matmul %132, %134, %cst_125 {dimension_numbers = #tpu.dot_dimension_numbers<[1], [0], [0], [1], [0, 0, 1, 1], [], []>} : vector<4x64xf32>, vector<64x64xf32>, vector<4x64xf32> -> vector<4x64xf32>
    %136 = arith.addf %120, %135 : vector<4x64xf32>
    %c8_126 = arith.constant 8 : index
    %c0_127 = arith.constant 0 : index
    %c0_128 = arith.constant 0 : index
    %137 = vector.load %arg3[%c8_126, %c0_127, %c0_128] : memref<9x64x64xf32, #tpu.memory_space<vmem>>, vector<1x64x64xf32>
    %138 = vector.shape_cast %137 : vector<1x64x64xf32> to vector<64x64xf32>
    %cst_129 = arith.constant dense<0.000000e+00> : vector<4x64xf32>
    %139 = tpu.matmul %132, %138, %cst_129 {dimension_numbers = #tpu.dot_dimension_numbers<[1], [0], [0], [1], [0, 0, 1, 1], [], []>} : vector<4x64xf32>, vector<64x64xf32>, vector<4x64xf32> -> vector<4x64xf32>
    %140 = arith.addf %124, %139 : vector<4x64xf32>
    %c8_130 = arith.constant 8 : index
    %c0_131 = arith.constant 0 : index
    %c0_132 = arith.constant 0 : index
    %141 = vector.load %arg4[%c8_130, %c0_131, %c0_132] : memref<9x64x64xf32, #tpu.memory_space<vmem>>, vector<1x64x64xf32>
    %142 = vector.shape_cast %141 : vector<1x64x64xf32> to vector<64x64xf32>
    %cst_133 = arith.constant dense<0.000000e+00> : vector<4x64xf32>
    %143 = tpu.matmul %132, %142, %cst_133 {dimension_numbers = #tpu.dot_dimension_numbers<[1], [0], [0], [1], [0, 0, 1, 1], [], []>} : vector<4x64xf32>, vector<64x64xf32>, vector<4x64xf32> -> vector<4x64xf32>
    %144 = arith.addf %128, %143 : vector<4x64xf32>
    %c0_134 = arith.constant 0 : index
    %c0_135 = arith.constant 0 : index
    %145 = vector.load %arg5[%c0_134, %c0_135] : memref<3x64xf32, #tpu.memory_space<vmem>>, vector<1x64xf32>
    %146 = vector.broadcast %145 : vector<1x64xf32> to vector<4x64xf32>
    %147 = arith.addf %136, %146 : vector<4x64xf32>
    %148 = arith.negf %147 : vector<4x64xf32>
    %149 = math.exp %148 : vector<4x64xf32>
    %cst_136 = arith.constant 1.000000e+00 : f32
    %150 = vector.broadcast %cst_136 : f32 to vector<4x64xf32>
    %151 = arith.addf %150, %149 : vector<4x64xf32>
    %152 = arith.divf %150, %151 : vector<4x64xf32>
    %c1_137 = arith.constant 1 : index
    %c0_138 = arith.constant 0 : index
    %153 = vector.load %arg5[%c1_137, %c0_138] : memref<3x64xf32, #tpu.memory_space<vmem>>, vector<1x64xf32>
    %154 = vector.broadcast %153 : vector<1x64xf32> to vector<4x64xf32>
    %155 = arith.addf %140, %154 : vector<4x64xf32>
    %156 = arith.negf %155 : vector<4x64xf32>
    %157 = math.exp %156 : vector<4x64xf32>
    %cst_139 = arith.constant 1.000000e+00 : f32
    %158 = vector.broadcast %cst_139 : f32 to vector<4x64xf32>
    %159 = arith.addf %158, %157 : vector<4x64xf32>
    %160 = arith.divf %158, %159 : vector<4x64xf32>
    %c2_140 = arith.constant 2 : index
    %c0_141 = arith.constant 0 : index
    %161 = vector.load %arg5[%c2_140, %c0_141] : memref<3x64xf32, #tpu.memory_space<vmem>>, vector<1x64xf32>
    %162 = vector.broadcast %161 : vector<1x64xf32> to vector<4x64xf32>
    %163 = arith.addf %144, %162 : vector<4x64xf32>
    %164 = math.tanh %163 : vector<4x64xf32>
    %165 = arith.mulf %152, %164 : vector<4x64xf32>
    %166 = math.tanh %165 : vector<4x64xf32>
    %167 = arith.mulf %160, %166 : vector<4x64xf32>
    %c0_142 = arith.constant 0 : index
    %c0_143 = arith.constant 0 : index
    %c0_144 = arith.constant 0 : index
    %168 = vector.load %arg7[%c0_142, %c0_143, %c0_144] : memref<1x4x64xf32, #tpu.memory_space<vmem>>, vector<1x4x64xf32>
    %169 = vector.shape_cast %168 : vector<1x4x64xf32> to vector<4x64xf32>
    %170 = vector.shape_cast %167 : vector<4x64xf32> to vector<1x4x64xf32>
    tpu.vector_store %arg7[%c0_142, %c0_143, %c0_144], %170 {strides = array<i32>} : memref<1x4x64xf32, #tpu.memory_space<vmem>>, vector<1x4x64xf32>,
    return
  }
  func.func @transform_0(%arg0: i32) -> (i32, i32, i32) {
    %c0_i32 = arith.constant 0 : i32
    %c0_i32_0 = arith.constant 0 : i32
    %c0_i32_1 = arith.constant 0 : i32
    return %arg0, %c0_i32, %c0_i32_0 : i32, i32, i32
  }
  func.func @transform_1(%arg0: i32) -> (i32, i32, i32) {
    %c0_i32 = arith.constant 0 : i32
    %c0_i32_0 = arith.constant 0 : i32
    %c0_i32_1 = arith.constant 0 : i32
    %c0_i32_2 = arith.constant 0 : i32
    return %c0_i32, %c0_i32_0, %c0_i32_1 : i32, i32, i32
  }
  func.func @transform_2(%arg0: i32) -> (i32, i32, i32) {
    %c0_i32 = arith.constant 0 : i32
    %c0_i32_0 = arith.constant 0 : i32
    %c0_i32_1 = arith.constant 0 : i32
    %c0_i32_2 = arith.constant 0 : i32
    return %c0_i32, %c0_i32_0, %c0_i32_1 : i32, i32, i32
  }
  func.func @transform_3(%arg0: i32) -> (i32, i32, i32) {
    %c0_i32 = arith.constant 0 : i32
    %c0_i32_0 = arith.constant 0 : i32
    %c0_i32_1 = arith.constant 0 : i32
    %c0_i32_2 = arith.constant 0 : i32
    return %c0_i32, %c0_i32_0, %c0_i32_1 : i32, i32, i32
  }
  func.func @transform_4(%arg0: i32) -> (i32, i32) {
    %c0_i32 = arith.constant 0 : i32
    %c0_i32_0 = arith.constant 0 : i32
    %c0_i32_1 = arith.constant 0 : i32
    return %c0_i32, %c0_i32_0 : i32, i32
  }
  func.func @transform_5(%arg0: i32) -> (i32, i32, i32) {
    %c0_i32 = arith.constant 0 : i32
    %c0_i32_0 = arith.constant 0 : i32
    %c0_i32_1 = arith.constant 0 : i32
    %c0_i32_2 = arith.constant 0 : i32
    return %c0_i32, %c0_i32_0, %c0_i32_1 : i32, i32, i32
  }
  func.func @transform_6(%arg0: i32) -> (i32, i32, i32) {
    %c0_i32 = arith.constant 0 : i32
    %c0_i32_0 = arith.constant 0 : i32
    %c0_i32_1 = arith.constant 0 : i32
    return %arg0, %c0_i32, %c0_i32_0 : i32, i32, i32
  }
}

module attributes {stable_mosaic.version = 11 : i64} {
  func.func @_conv3x3_kernel(%arg0: i32, %arg1: memref<1x26x64xf32, #tpu.memory_space<vmem>>, %arg2: memref<9x64x32xf32, #tpu.memory_space<vmem>>, %arg3: memref<1x32xf32, #tpu.memory_space<vmem>>, %arg4: memref<2x16x1xf32, #tpu.memory_space<vmem>>, %arg5: memref<1x16x32xf32, #tpu.memory_space<vmem>>) attributes {dimension_semantics = [#tpu.dimension_semantics<parallel>], iteration_bounds = array<i64: 1>, scalar_prefetch = 0 : i64, scratch_operands = 0 : i64, tpu.core_type = #tpu.core_type<tc>, window_params = [{transform_indices = @transform_0, window_bounds = array<i64: 1, 26, 64>}, {pipeline_mode = #tpu.pipeline_mode<synchronous>, transform_indices = @transform_1, window_bounds = array<i64: 9, 64, 32>}, {pipeline_mode = #tpu.pipeline_mode<synchronous>, transform_indices = @transform_2, window_bounds = array<i64: 1, 32>}, {pipeline_mode = #tpu.pipeline_mode<synchronous>, transform_indices = @transform_3, window_bounds = array<i64: 2, 16, 1>}, {transform_indices = @transform_4, window_bounds = array<i64: 1, 16, 32>}]} {
    %c0 = arith.constant 0 : index
    %c0_0 = arith.constant 0 : index
    %c0_1 = arith.constant 0 : index
    %0 = vector.load %arg4[%c0, %c0_0, %c0_1] : memref<2x16x1xf32, #tpu.memory_space<vmem>>, vector<1x16x1xf32>
    %1 = vector.shape_cast %0 : vector<1x16x1xf32> to vector<16x1xf32>
    %c1 = arith.constant 1 : index
    %c0_2 = arith.constant 0 : index
    %c0_3 = arith.constant 0 : index
    %2 = vector.load %arg4[%c1, %c0_2, %c0_3] : memref<2x16x1xf32, #tpu.memory_space<vmem>>, vector<1x16x1xf32>
    %3 = vector.shape_cast %2 : vector<1x16x1xf32> to vector<16x1xf32>
    %cst = arith.constant 0.000000e+00 : f32
    %4 = vector.broadcast %cst : f32 to vector<16x32xf32>
    %c0_4 = arith.constant 0 : index
    %c0_5 = arith.constant 0 : index
    %c0_6 = arith.constant 0 : index
    %5 = vector.load %arg1[%c0_4, %c0_5, %c0_6] : memref<1x26x64xf32, #tpu.memory_space<vmem>>, vector<1x16x64xf32>
    %6 = vector.shape_cast %5 : vector<1x16x64xf32> to vector<16x64xf32>
    %7 = vector.broadcast %1 : vector<16x1xf32> to vector<16x64xf32>
    %8 = arith.mulf %6, %7 : vector<16x64xf32>
    %c0_7 = arith.constant 0 : index
    %c0_8 = arith.constant 0 : index
    %c0_9 = arith.constant 0 : index
    %9 = vector.load %arg2[%c0_7, %c0_8, %c0_9] : memref<9x64x32xf32, #tpu.memory_space<vmem>>, vector<1x64x32xf32>
    %10 = vector.shape_cast %9 : vector<1x64x32xf32> to vector<64x32xf32>
    %cst_10 = arith.constant dense<0.000000e+00> : vector<16x32xf32>
    %11 = tpu.matmul %8, %10, %cst_10 {dimension_numbers = #tpu.dot_dimension_numbers<[1], [0], [0], [1], [0, 0, 1, 1], [], []>} : vector<16x64xf32>, vector<64x32xf32>, vector<16x32xf32> -> vector<16x32xf32>
    %12 = arith.addf %4, %11 : vector<16x32xf32>
    %c0_11 = arith.constant 0 : index
    %c1_12 = arith.constant 1 : index
    %c0_13 = arith.constant 0 : index
    %13 = vector.load %arg1[%c0_11, %c1_12, %c0_13] : memref<1x26x64xf32, #tpu.memory_space<vmem>>, vector<1x16x64xf32>
    %14 = vector.shape_cast %13 : vector<1x16x64xf32> to vector<16x64xf32>
    %c1_14 = arith.constant 1 : index
    %c0_15 = arith.constant 0 : index
    %c0_16 = arith.constant 0 : index
    %15 = vector.load %arg2[%c1_14, %c0_15, %c0_16] : memref<9x64x32xf32, #tpu.memory_space<vmem>>, vector<1x64x32xf32>
    %16 = vector.shape_cast %15 : vector<1x64x32xf32> to vector<64x32xf32>
    %cst_17 = arith.constant dense<0.000000e+00> : vector<16x32xf32>
    %17 = tpu.matmul %14, %16, %cst_17 {dimension_numbers = #tpu.dot_dimension_numbers<[1], [0], [0], [1], [0, 0, 1, 1], [], []>} : vector<16x64xf32>, vector<64x32xf32>, vector<16x32xf32> -> vector<16x32xf32>
    %18 = arith.addf %12, %17 : vector<16x32xf32>
    %c0_18 = arith.constant 0 : index
    %c2 = arith.constant 2 : index
    %c0_19 = arith.constant 0 : index
    %19 = vector.load %arg1[%c0_18, %c2, %c0_19] : memref<1x26x64xf32, #tpu.memory_space<vmem>>, vector<1x16x64xf32>
    %20 = vector.shape_cast %19 : vector<1x16x64xf32> to vector<16x64xf32>
    %21 = vector.broadcast %3 : vector<16x1xf32> to vector<16x64xf32>
    %22 = arith.mulf %20, %21 : vector<16x64xf32>
    %c2_20 = arith.constant 2 : index
    %c0_21 = arith.constant 0 : index
    %c0_22 = arith.constant 0 : index
    %23 = vector.load %arg2[%c2_20, %c0_21, %c0_22] : memref<9x64x32xf32, #tpu.memory_space<vmem>>, vector<1x64x32xf32>
    %24 = vector.shape_cast %23 : vector<1x64x32xf32> to vector<64x32xf32>
    %cst_23 = arith.constant dense<0.000000e+00> : vector<16x32xf32>
    %25 = tpu.matmul %22, %24, %cst_23 {dimension_numbers = #tpu.dot_dimension_numbers<[1], [0], [0], [1], [0, 0, 1, 1], [], []>} : vector<16x64xf32>, vector<64x32xf32>, vector<16x32xf32> -> vector<16x32xf32>
    %26 = arith.addf %18, %25 : vector<16x32xf32>
    %c0_24 = arith.constant 0 : index
    %c4 = arith.constant 4 : index
    %c0_25 = arith.constant 0 : index
    %27 = vector.load %arg1[%c0_24, %c4, %c0_25] : memref<1x26x64xf32, #tpu.memory_space<vmem>>, vector<1x16x64xf32>
    %28 = vector.shape_cast %27 : vector<1x16x64xf32> to vector<16x64xf32>
    %29 = vector.broadcast %1 : vector<16x1xf32> to vector<16x64xf32>
    %30 = arith.mulf %28, %29 : vector<16x64xf32>
    %c3 = arith.constant 3 : index
    %c0_26 = arith.constant 0 : index
    %c0_27 = arith.constant 0 : index
    %31 = vector.load %arg2[%c3, %c0_26, %c0_27] : memref<9x64x32xf32, #tpu.memory_space<vmem>>, vector<1x64x32xf32>
    %32 = vector.shape_cast %31 : vector<1x64x32xf32> to vector<64x32xf32>
    %cst_28 = arith.constant dense<0.000000e+00> : vector<16x32xf32>
    %33 = tpu.matmul %30, %32, %cst_28 {dimension_numbers = #tpu.dot_dimension_numbers<[1], [0], [0], [1], [0, 0, 1, 1], [], []>} : vector<16x64xf32>, vector<64x32xf32>, vector<16x32xf32> -> vector<16x32xf32>
    %34 = arith.addf %26, %33 : vector<16x32xf32>
    %c0_29 = arith.constant 0 : index
    %c5 = arith.constant 5 : index
    %c0_30 = arith.constant 0 : index
    %35 = vector.load %arg1[%c0_29, %c5, %c0_30] : memref<1x26x64xf32, #tpu.memory_space<vmem>>, vector<1x16x64xf32>
    %36 = vector.shape_cast %35 : vector<1x16x64xf32> to vector<16x64xf32>
    %c4_31 = arith.constant 4 : index
    %c0_32 = arith.constant 0 : index
    %c0_33 = arith.constant 0 : index
    %37 = vector.load %arg2[%c4_31, %c0_32, %c0_33] : memref<9x64x32xf32, #tpu.memory_space<vmem>>, vector<1x64x32xf32>
    %38 = vector.shape_cast %37 : vector<1x64x32xf32> to vector<64x32xf32>
    %cst_34 = arith.constant dense<0.000000e+00> : vector<16x32xf32>
    %39 = tpu.matmul %36, %38, %cst_34 {dimension_numbers = #tpu.dot_dimension_numbers<[1], [0], [0], [1], [0, 0, 1, 1], [], []>} : vector<16x64xf32>, vector<64x32xf32>, vector<16x32xf32> -> vector<16x32xf32>
    %40 = arith.addf %34, %39 : vector<16x32xf32>
    %c0_35 = arith.constant 0 : index
    %c6 = arith.constant 6 : index
    %c0_36 = arith.constant 0 : index
    %41 = vector.load %arg1[%c0_35, %c6, %c0_36] : memref<1x26x64xf32, #tpu.memory_space<vmem>>, vector<1x16x64xf32>
    %42 = vector.shape_cast %41 : vector<1x16x64xf32> to vector<16x64xf32>
    %43 = vector.broadcast %3 : vector<16x1xf32> to vector<16x64xf32>
    %44 = arith.mulf %42, %43 : vector<16x64xf32>
    %c5_37 = arith.constant 5 : index
    %c0_38 = arith.constant 0 : index
    %c0_39 = arith.constant 0 : index
    %45 = vector.load %arg2[%c5_37, %c0_38, %c0_39] : memref<9x64x32xf32, #tpu.memory_space<vmem>>, vector<1x64x32xf32>
    %46 = vector.shape_cast %45 : vector<1x64x32xf32> to vector<64x32xf32>
    %cst_40 = arith.constant dense<0.000000e+00> : vector<16x32xf32>
    %47 = tpu.matmul %44, %46, %cst_40 {dimension_numbers = #tpu.dot_dimension_numbers<[1], [0], [0], [1], [0, 0, 1, 1], [], []>} : vector<16x64xf32>, vector<64x32xf32>, vector<16x32xf32> -> vector<16x32xf32>
    %48 = arith.addf %40, %47 : vector<16x32xf32>
    %c0_41 = arith.constant 0 : index
    %c8 = arith.constant 8 : index
    %c0_42 = arith.constant 0 : index
    %49 = vector.load %arg1[%c0_41, %c8, %c0_42] : memref<1x26x64xf32, #tpu.memory_space<vmem>>, vector<1x16x64xf32>
    %50 = vector.shape_cast %49 : vector<1x16x64xf32> to vector<16x64xf32>
    %51 = vector.broadcast %1 : vector<16x1xf32> to vector<16x64xf32>
    %52 = arith.mulf %50, %51 : vector<16x64xf32>
    %c6_43 = arith.constant 6 : index
    %c0_44 = arith.constant 0 : index
    %c0_45 = arith.constant 0 : index
    %53 = vector.load %arg2[%c6_43, %c0_44, %c0_45] : memref<9x64x32xf32, #tpu.memory_space<vmem>>, vector<1x64x32xf32>
    %54 = vector.shape_cast %53 : vector<1x64x32xf32> to vector<64x32xf32>
    %cst_46 = arith.constant dense<0.000000e+00> : vector<16x32xf32>
    %55 = tpu.matmul %52, %54, %cst_46 {dimension_numbers = #tpu.dot_dimension_numbers<[1], [0], [0], [1], [0, 0, 1, 1], [], []>} : vector<16x64xf32>, vector<64x32xf32>, vector<16x32xf32> -> vector<16x32xf32>
    %56 = arith.addf %48, %55 : vector<16x32xf32>
    %c0_47 = arith.constant 0 : index
    %c9 = arith.constant 9 : index
    %c0_48 = arith.constant 0 : index
    %57 = vector.load %arg1[%c0_47, %c9, %c0_48] : memref<1x26x64xf32, #tpu.memory_space<vmem>>, vector<1x16x64xf32>
    %58 = vector.shape_cast %57 : vector<1x16x64xf32> to vector<16x64xf32>
    %c7 = arith.constant 7 : index
    %c0_49 = arith.constant 0 : index
    %c0_50 = arith.constant 0 : index
    %59 = vector.load %arg2[%c7, %c0_49, %c0_50] : memref<9x64x32xf32, #tpu.memory_space<vmem>>, vector<1x64x32xf32>
    %60 = vector.shape_cast %59 : vector<1x64x32xf32> to vector<64x32xf32>
    %cst_51 = arith.constant dense<0.000000e+00> : vector<16x32xf32>
    %61 = tpu.matmul %58, %60, %cst_51 {dimension_numbers = #tpu.dot_dimension_numbers<[1], [0], [0], [1], [0, 0, 1, 1], [], []>} : vector<16x64xf32>, vector<64x32xf32>, vector<16x32xf32> -> vector<16x32xf32>
    %62 = arith.addf %56, %61 : vector<16x32xf32>
    %c0_52 = arith.constant 0 : index
    %c10 = arith.constant 10 : index
    %c0_53 = arith.constant 0 : index
    %63 = vector.load %arg1[%c0_52, %c10, %c0_53] : memref<1x26x64xf32, #tpu.memory_space<vmem>>, vector<1x16x64xf32>
    %64 = vector.shape_cast %63 : vector<1x16x64xf32> to vector<16x64xf32>
    %65 = vector.broadcast %3 : vector<16x1xf32> to vector<16x64xf32>
    %66 = arith.mulf %64, %65 : vector<16x64xf32>
    %c8_54 = arith.constant 8 : index
    %c0_55 = arith.constant 0 : index
    %c0_56 = arith.constant 0 : index
    %67 = vector.load %arg2[%c8_54, %c0_55, %c0_56] : memref<9x64x32xf32, #tpu.memory_space<vmem>>, vector<1x64x32xf32>
    %68 = vector.shape_cast %67 : vector<1x64x32xf32> to vector<64x32xf32>
    %cst_57 = arith.constant dense<0.000000e+00> : vector<16x32xf32>
    %69 = tpu.matmul %66, %68, %cst_57 {dimension_numbers = #tpu.dot_dimension_numbers<[1], [0], [0], [1], [0, 0, 1, 1], [], []>} : vector<16x64xf32>, vector<64x32xf32>, vector<16x32xf32> -> vector<16x32xf32>
    %70 = arith.addf %62, %69 : vector<16x32xf32>
    %c0_58 = arith.constant 0 : index
    %c0_59 = arith.constant 0 : index
    %71 = vector.load %arg3[%c0_58, %c0_59] : memref<1x32xf32, #tpu.memory_space<vmem>>, vector<1x32xf32>
    %72 = vector.broadcast %71 : vector<1x32xf32> to vector<16x32xf32>
    %73 = arith.addf %70, %72 : vector<16x32xf32>
    %cst_60 = arith.constant 0.000000e+00 : f32
    %74 = vector.broadcast %cst_60 : f32 to vector<16x32xf32>
    %75 = arith.maximumf %73, %74 : vector<16x32xf32>
    %c0_61 = arith.constant 0 : index
    %c0_62 = arith.constant 0 : index
    %c0_63 = arith.constant 0 : index
    %76 = vector.load %arg5[%c0_61, %c0_62, %c0_63] : memref<1x16x32xf32, #tpu.memory_space<vmem>>, vector<1x16x32xf32>
    %77 = vector.shape_cast %76 : vector<1x16x32xf32> to vector<16x32xf32>
    %78 = vector.shape_cast %75 : vector<16x32xf32> to vector<1x16x32xf32>
    tpu.vector_store %arg5[%c0_61, %c0_62, %c0_63], %78 {strides = array<i32>} : memref<1x16x32xf32, #tpu.memory_space<vmem>>, vector<1x16x32xf32>,
    return
  }
  func.func @transform_0(%arg0: i32) -> (i32, i32, i32) {
    %c0_i32 = arith.constant 0 : i32
    %c0_i32_0 = arith.constant 0 : i32
    %c0_i32_1 = arith.constant 0 : i32
    return %arg0, %c0_i32, %c0_i32_0 : i32, i32, i32
  }
  func.func @transform_1(%arg0: i32) -> (i32, i32, i32) {
    %c0_i32 = arith.constant 0 : i32
    %c0_i32_0 = arith.constant 0 : i32
    %c0_i32_1 = arith.constant 0 : i32
    %c0_i32_2 = arith.constant 0 : i32
    return %c0_i32, %c0_i32_0, %c0_i32_1 : i32, i32, i32
  }
  func.func @transform_2(%arg0: i32) -> (i32, i32) {
    %c0_i32 = arith.constant 0 : i32
    %c0_i32_0 = arith.constant 0 : i32
    %c0_i32_1 = arith.constant 0 : i32
    return %c0_i32, %c0_i32_0 : i32, i32
  }
  func.func @transform_3(%arg0: i32) -> (i32, i32, i32) {
    %c0_i32 = arith.constant 0 : i32
    %c0_i32_0 = arith.constant 0 : i32
    %c0_i32_1 = arith.constant 0 : i32
    %c0_i32_2 = arith.constant 0 : i32
    return %c0_i32, %c0_i32_0, %c0_i32_1 : i32, i32, i32
  }
  func.func @transform_4(%arg0: i32) -> (i32, i32, i32) {
    %c0_i32 = arith.constant 0 : i32
    %c0_i32_0 = arith.constant 0 : i32
    %c0_i32_1 = arith.constant 0 : i32
    return %arg0, %c0_i32, %c0_i32_0 : i32, i32, i32
  }
}

module attributes {stable_mosaic.version = 11 : i64} {
  func.func @_conv3x3_kernel(%arg0: i32, %arg1: memref<1x82x32xf32, #tpu.memory_space<vmem>>, %arg2: memref<9x32x16xf32, #tpu.memory_space<vmem>>, %arg3: memref<1x16xf32, #tpu.memory_space<vmem>>, %arg4: memref<2x64x1xf32, #tpu.memory_space<vmem>>, %arg5: memref<1x64x16xf32, #tpu.memory_space<vmem>>) attributes {dimension_semantics = [#tpu.dimension_semantics<parallel>], iteration_bounds = array<i64: 1>, scalar_prefetch = 0 : i64, scratch_operands = 0 : i64, tpu.core_type = #tpu.core_type<tc>, window_params = [{transform_indices = @transform_0, window_bounds = array<i64: 1, 82, 32>}, {pipeline_mode = #tpu.pipeline_mode<synchronous>, transform_indices = @transform_1, window_bounds = array<i64: 9, 32, 16>}, {pipeline_mode = #tpu.pipeline_mode<synchronous>, transform_indices = @transform_2, window_bounds = array<i64: 1, 16>}, {pipeline_mode = #tpu.pipeline_mode<synchronous>, transform_indices = @transform_3, window_bounds = array<i64: 2, 64, 1>}, {transform_indices = @transform_4, window_bounds = array<i64: 1, 64, 16>}]} {
    %c0 = arith.constant 0 : index
    %c0_0 = arith.constant 0 : index
    %c0_1 = arith.constant 0 : index
    %0 = vector.load %arg4[%c0, %c0_0, %c0_1] : memref<2x64x1xf32, #tpu.memory_space<vmem>>, vector<1x64x1xf32>
    %1 = vector.shape_cast %0 : vector<1x64x1xf32> to vector<64x1xf32>
    %c1 = arith.constant 1 : index
    %c0_2 = arith.constant 0 : index
    %c0_3 = arith.constant 0 : index
    %2 = vector.load %arg4[%c1, %c0_2, %c0_3] : memref<2x64x1xf32, #tpu.memory_space<vmem>>, vector<1x64x1xf32>
    %3 = vector.shape_cast %2 : vector<1x64x1xf32> to vector<64x1xf32>
    %cst = arith.constant 0.000000e+00 : f32
    %4 = vector.broadcast %cst : f32 to vector<64x16xf32>
    %c0_4 = arith.constant 0 : index
    %c0_5 = arith.constant 0 : index
    %c0_6 = arith.constant 0 : index
    %5 = vector.load %arg1[%c0_4, %c0_5, %c0_6] : memref<1x82x32xf32, #tpu.memory_space<vmem>>, vector<1x64x32xf32>
    %6 = vector.shape_cast %5 : vector<1x64x32xf32> to vector<64x32xf32>
    %7 = vector.broadcast %1 : vector<64x1xf32> to vector<64x32xf32>
    %8 = arith.mulf %6, %7 : vector<64x32xf32>
    %c0_7 = arith.constant 0 : index
    %c0_8 = arith.constant 0 : index
    %c0_9 = arith.constant 0 : index
    %9 = vector.load %arg2[%c0_7, %c0_8, %c0_9] : memref<9x32x16xf32, #tpu.memory_space<vmem>>, vector<1x32x16xf32>
    %10 = vector.shape_cast %9 : vector<1x32x16xf32> to vector<32x16xf32>
    %cst_10 = arith.constant dense<0.000000e+00> : vector<64x16xf32>
    %11 = tpu.matmul %8, %10, %cst_10 {dimension_numbers = #tpu.dot_dimension_numbers<[1], [0], [0], [1], [0, 0, 1, 1], [], []>} : vector<64x32xf32>, vector<32x16xf32>, vector<64x16xf32> -> vector<64x16xf32>
    %12 = arith.addf %4, %11 : vector<64x16xf32>
    %c0_11 = arith.constant 0 : index
    %c1_12 = arith.constant 1 : index
    %c0_13 = arith.constant 0 : index
    %13 = vector.load %arg1[%c0_11, %c1_12, %c0_13] : memref<1x82x32xf32, #tpu.memory_space<vmem>>, vector<1x64x32xf32>
    %14 = vector.shape_cast %13 : vector<1x64x32xf32> to vector<64x32xf32>
    %c1_14 = arith.constant 1 : index
    %c0_15 = arith.constant 0 : index
    %c0_16 = arith.constant 0 : index
    %15 = vector.load %arg2[%c1_14, %c0_15, %c0_16] : memref<9x32x16xf32, #tpu.memory_space<vmem>>, vector<1x32x16xf32>
    %16 = vector.shape_cast %15 : vector<1x32x16xf32> to vector<32x16xf32>
    %cst_17 = arith.constant dense<0.000000e+00> : vector<64x16xf32>
    %17 = tpu.matmul %14, %16, %cst_17 {dimension_numbers = #tpu.dot_dimension_numbers<[1], [0], [0], [1], [0, 0, 1, 1], [], []>} : vector<64x32xf32>, vector<32x16xf32>, vector<64x16xf32> -> vector<64x16xf32>
    %18 = arith.addf %12, %17 : vector<64x16xf32>
    %c0_18 = arith.constant 0 : index
    %c2 = arith.constant 2 : index
    %c0_19 = arith.constant 0 : index
    %19 = vector.load %arg1[%c0_18, %c2, %c0_19] : memref<1x82x32xf32, #tpu.memory_space<vmem>>, vector<1x64x32xf32>
    %20 = vector.shape_cast %19 : vector<1x64x32xf32> to vector<64x32xf32>
    %21 = vector.broadcast %3 : vector<64x1xf32> to vector<64x32xf32>
    %22 = arith.mulf %20, %21 : vector<64x32xf32>
    %c2_20 = arith.constant 2 : index
    %c0_21 = arith.constant 0 : index
    %c0_22 = arith.constant 0 : index
    %23 = vector.load %arg2[%c2_20, %c0_21, %c0_22] : memref<9x32x16xf32, #tpu.memory_space<vmem>>, vector<1x32x16xf32>
    %24 = vector.shape_cast %23 : vector<1x32x16xf32> to vector<32x16xf32>
    %cst_23 = arith.constant dense<0.000000e+00> : vector<64x16xf32>
    %25 = tpu.matmul %22, %24, %cst_23 {dimension_numbers = #tpu.dot_dimension_numbers<[1], [0], [0], [1], [0, 0, 1, 1], [], []>} : vector<64x32xf32>, vector<32x16xf32>, vector<64x16xf32> -> vector<64x16xf32>
    %26 = arith.addf %18, %25 : vector<64x16xf32>
    %c0_24 = arith.constant 0 : index
    %c8 = arith.constant 8 : index
    %c0_25 = arith.constant 0 : index
    %27 = vector.load %arg1[%c0_24, %c8, %c0_25] : memref<1x82x32xf32, #tpu.memory_space<vmem>>, vector<1x64x32xf32>
    %28 = vector.shape_cast %27 : vector<1x64x32xf32> to vector<64x32xf32>
    %29 = vector.broadcast %1 : vector<64x1xf32> to vector<64x32xf32>
    %30 = arith.mulf %28, %29 : vector<64x32xf32>
    %c3 = arith.constant 3 : index
    %c0_26 = arith.constant 0 : index
    %c0_27 = arith.constant 0 : index
    %31 = vector.load %arg2[%c3, %c0_26, %c0_27] : memref<9x32x16xf32, #tpu.memory_space<vmem>>, vector<1x32x16xf32>
    %32 = vector.shape_cast %31 : vector<1x32x16xf32> to vector<32x16xf32>
    %cst_28 = arith.constant dense<0.000000e+00> : vector<64x16xf32>
    %33 = tpu.matmul %30, %32, %cst_28 {dimension_numbers = #tpu.dot_dimension_numbers<[1], [0], [0], [1], [0, 0, 1, 1], [], []>} : vector<64x32xf32>, vector<32x16xf32>, vector<64x16xf32> -> vector<64x16xf32>
    %34 = arith.addf %26, %33 : vector<64x16xf32>
    %c0_29 = arith.constant 0 : index
    %c9 = arith.constant 9 : index
    %c0_30 = arith.constant 0 : index
    %35 = vector.load %arg1[%c0_29, %c9, %c0_30] : memref<1x82x32xf32, #tpu.memory_space<vmem>>, vector<1x64x32xf32>
    %36 = vector.shape_cast %35 : vector<1x64x32xf32> to vector<64x32xf32>
    %c4 = arith.constant 4 : index
    %c0_31 = arith.constant 0 : index
    %c0_32 = arith.constant 0 : index
    %37 = vector.load %arg2[%c4, %c0_31, %c0_32] : memref<9x32x16xf32, #tpu.memory_space<vmem>>, vector<1x32x16xf32>
    %38 = vector.shape_cast %37 : vector<1x32x16xf32> to vector<32x16xf32>
    %cst_33 = arith.constant dense<0.000000e+00> : vector<64x16xf32>
    %39 = tpu.matmul %36, %38, %cst_33 {dimension_numbers = #tpu.dot_dimension_numbers<[1], [0], [0], [1], [0, 0, 1, 1], [], []>} : vector<64x32xf32>, vector<32x16xf32>, vector<64x16xf32> -> vector<64x16xf32>
    %40 = arith.addf %34, %39 : vector<64x16xf32>
    %c0_34 = arith.constant 0 : index
    %c10 = arith.constant 10 : index
    %c0_35 = arith.constant 0 : index
    %41 = vector.load %arg1[%c0_34, %c10, %c0_35] : memref<1x82x32xf32, #tpu.memory_space<vmem>>, vector<1x64x32xf32>
    %42 = vector.shape_cast %41 : vector<1x64x32xf32> to vector<64x32xf32>
    %43 = vector.broadcast %3 : vector<64x1xf32> to vector<64x32xf32>
    %44 = arith.mulf %42, %43 : vector<64x32xf32>
    %c5 = arith.constant 5 : index
    %c0_36 = arith.constant 0 : index
    %c0_37 = arith.constant 0 : index
    %45 = vector.load %arg2[%c5, %c0_36, %c0_37] : memref<9x32x16xf32, #tpu.memory_space<vmem>>, vector<1x32x16xf32>
    %46 = vector.shape_cast %45 : vector<1x32x16xf32> to vector<32x16xf32>
    %cst_38 = arith.constant dense<0.000000e+00> : vector<64x16xf32>
    %47 = tpu.matmul %44, %46, %cst_38 {dimension_numbers = #tpu.dot_dimension_numbers<[1], [0], [0], [1], [0, 0, 1, 1], [], []>} : vector<64x32xf32>, vector<32x16xf32>, vector<64x16xf32> -> vector<64x16xf32>
    %48 = arith.addf %40, %47 : vector<64x16xf32>
    %c0_39 = arith.constant 0 : index
    %c16 = arith.constant 16 : index
    %c0_40 = arith.constant 0 : index
    %49 = vector.load %arg1[%c0_39, %c16, %c0_40] : memref<1x82x32xf32, #tpu.memory_space<vmem>>, vector<1x64x32xf32>
    %50 = vector.shape_cast %49 : vector<1x64x32xf32> to vector<64x32xf32>
    %51 = vector.broadcast %1 : vector<64x1xf32> to vector<64x32xf32>
    %52 = arith.mulf %50, %51 : vector<64x32xf32>
    %c6 = arith.constant 6 : index
    %c0_41 = arith.constant 0 : index
    %c0_42 = arith.constant 0 : index
    %53 = vector.load %arg2[%c6, %c0_41, %c0_42] : memref<9x32x16xf32, #tpu.memory_space<vmem>>, vector<1x32x16xf32>
    %54 = vector.shape_cast %53 : vector<1x32x16xf32> to vector<32x16xf32>
    %cst_43 = arith.constant dense<0.000000e+00> : vector<64x16xf32>
    %55 = tpu.matmul %52, %54, %cst_43 {dimension_numbers = #tpu.dot_dimension_numbers<[1], [0], [0], [1], [0, 0, 1, 1], [], []>} : vector<64x32xf32>, vector<32x16xf32>, vector<64x16xf32> -> vector<64x16xf32>
    %56 = arith.addf %48, %55 : vector<64x16xf32>
    %c0_44 = arith.constant 0 : index
    %c17 = arith.constant 17 : index
    %c0_45 = arith.constant 0 : index
    %57 = vector.load %arg1[%c0_44, %c17, %c0_45] : memref<1x82x32xf32, #tpu.memory_space<vmem>>, vector<1x64x32xf32>
    %58 = vector.shape_cast %57 : vector<1x64x32xf32> to vector<64x32xf32>
    %c7 = arith.constant 7 : index
    %c0_46 = arith.constant 0 : index
    %c0_47 = arith.constant 0 : index
    %59 = vector.load %arg2[%c7, %c0_46, %c0_47] : memref<9x32x16xf32, #tpu.memory_space<vmem>>, vector<1x32x16xf32>
    %60 = vector.shape_cast %59 : vector<1x32x16xf32> to vector<32x16xf32>
    %cst_48 = arith.constant dense<0.000000e+00> : vector<64x16xf32>
    %61 = tpu.matmul %58, %60, %cst_48 {dimension_numbers = #tpu.dot_dimension_numbers<[1], [0], [0], [1], [0, 0, 1, 1], [], []>} : vector<64x32xf32>, vector<32x16xf32>, vector<64x16xf32> -> vector<64x16xf32>
    %62 = arith.addf %56, %61 : vector<64x16xf32>
    %c0_49 = arith.constant 0 : index
    %c18 = arith.constant 18 : index
    %c0_50 = arith.constant 0 : index
    %63 = vector.load %arg1[%c0_49, %c18, %c0_50] : memref<1x82x32xf32, #tpu.memory_space<vmem>>, vector<1x64x32xf32>
    %64 = vector.shape_cast %63 : vector<1x64x32xf32> to vector<64x32xf32>
    %65 = vector.broadcast %3 : vector<64x1xf32> to vector<64x32xf32>
    %66 = arith.mulf %64, %65 : vector<64x32xf32>
    %c8_51 = arith.constant 8 : index
    %c0_52 = arith.constant 0 : index
    %c0_53 = arith.constant 0 : index
    %67 = vector.load %arg2[%c8_51, %c0_52, %c0_53] : memref<9x32x16xf32, #tpu.memory_space<vmem>>, vector<1x32x16xf32>
    %68 = vector.shape_cast %67 : vector<1x32x16xf32> to vector<32x16xf32>
    %cst_54 = arith.constant dense<0.000000e+00> : vector<64x16xf32>
    %69 = tpu.matmul %66, %68, %cst_54 {dimension_numbers = #tpu.dot_dimension_numbers<[1], [0], [0], [1], [0, 0, 1, 1], [], []>} : vector<64x32xf32>, vector<32x16xf32>, vector<64x16xf32> -> vector<64x16xf32>
    %70 = arith.addf %62, %69 : vector<64x16xf32>
    %c0_55 = arith.constant 0 : index
    %c0_56 = arith.constant 0 : index
    %71 = vector.load %arg3[%c0_55, %c0_56] : memref<1x16xf32, #tpu.memory_space<vmem>>, vector<1x16xf32>
    %72 = vector.broadcast %71 : vector<1x16xf32> to vector<64x16xf32>
    %73 = arith.addf %70, %72 : vector<64x16xf32>
    %cst_57 = arith.constant 0.000000e+00 : f32
    %74 = vector.broadcast %cst_57 : f32 to vector<64x16xf32>
    %75 = arith.maximumf %73, %74 : vector<64x16xf32>
    %c0_58 = arith.constant 0 : index
    %c0_59 = arith.constant 0 : index
    %c0_60 = arith.constant 0 : index
    %76 = vector.load %arg5[%c0_58, %c0_59, %c0_60] : memref<1x64x16xf32, #tpu.memory_space<vmem>>, vector<1x64x16xf32>
    %77 = vector.shape_cast %76 : vector<1x64x16xf32> to vector<64x16xf32>
    %78 = vector.shape_cast %75 : vector<64x16xf32> to vector<1x64x16xf32>
    tpu.vector_store %arg5[%c0_58, %c0_59, %c0_60], %78 {strides = array<i32>} : memref<1x64x16xf32, #tpu.memory_space<vmem>>, vector<1x64x16xf32>,
    return
  }
  func.func @transform_0(%arg0: i32) -> (i32, i32, i32) {
    %c0_i32 = arith.constant 0 : i32
    %c0_i32_0 = arith.constant 0 : i32
    %c0_i32_1 = arith.constant 0 : i32
    return %arg0, %c0_i32, %c0_i32_0 : i32, i32, i32
  }
  func.func @transform_1(%arg0: i32) -> (i32, i32, i32) {
    %c0_i32 = arith.constant 0 : i32
    %c0_i32_0 = arith.constant 0 : i32
    %c0_i32_1 = arith.constant 0 : i32
    %c0_i32_2 = arith.constant 0 : i32
    return %c0_i32, %c0_i32_0, %c0_i32_1 : i32, i32, i32
  }
  func.func @transform_2(%arg0: i32) -> (i32, i32) {
    %c0_i32 = arith.constant 0 : i32
    %c0_i32_0 = arith.constant 0 : i32
    %c0_i32_1 = arith.constant 0 : i32
    return %c0_i32, %c0_i32_0 : i32, i32
  }
  func.func @transform_3(%arg0: i32) -> (i32, i32, i32) {
    %c0_i32 = arith.constant 0 : i32
    %c0_i32_0 = arith.constant 0 : i32
    %c0_i32_1 = arith.constant 0 : i32
    %c0_i32_2 = arith.constant 0 : i32
    return %c0_i32, %c0_i32_0, %c0_i32_1 : i32, i32, i32
  }
  func.func @transform_4(%arg0: i32) -> (i32, i32, i32) {
    %c0_i32 = arith.constant 0 : i32
    %c0_i32_0 = arith.constant 0 : i32
    %c0_i32_1 = arith.constant 0 : i32
    return %arg0, %c0_i32, %c0_i32_0 : i32, i32, i32
  }
}

module attributes {stable_mosaic.version = 11 : i64} {
  func.func @_deconv_cls_kernel(%arg0: i32, %arg1: memref<1x290x16xf32, #tpu.memory_space<vmem>>, %arg2: memref<9x16x8xf32, #tpu.memory_space<vmem>>, %arg3: memref<1x8xf32, #tpu.memory_space<vmem>>, %arg4: memref<1x8xf32, #tpu.memory_space<vmem>>, %arg5: memref<1x1xf32, #tpu.memory_space<vmem>>, %arg6: memref<2x256x1xf32, #tpu.memory_space<vmem>>, %arg7: memref<1x256x1xf32, #tpu.memory_space<vmem>>) attributes {dimension_semantics = [#tpu.dimension_semantics<parallel>], iteration_bounds = array<i64: 1>, scalar_prefetch = 0 : i64, scratch_operands = 0 : i64, tpu.core_type = #tpu.core_type<tc>, window_params = [{transform_indices = @transform_0, window_bounds = array<i64: 1, 290, 16>}, {pipeline_mode = #tpu.pipeline_mode<synchronous>, transform_indices = @transform_1, window_bounds = array<i64: 9, 16, 8>}, {pipeline_mode = #tpu.pipeline_mode<synchronous>, transform_indices = @transform_2, window_bounds = array<i64: 1, 8>}, {pipeline_mode = #tpu.pipeline_mode<synchronous>, transform_indices = @transform_3, window_bounds = array<i64: 1, 8>}, {pipeline_mode = #tpu.pipeline_mode<synchronous>, transform_indices = @transform_4, window_bounds = array<i64: 1, 1>}, {pipeline_mode = #tpu.pipeline_mode<synchronous>, transform_indices = @transform_5, window_bounds = array<i64: 2, 256, 1>}, {transform_indices = @transform_6, window_bounds = array<i64: 1, 256, 1>}]} {
    %c0 = arith.constant 0 : index
    %c0_0 = arith.constant 0 : index
    %c0_1 = arith.constant 0 : index
    %0 = vector.load %arg6[%c0, %c0_0, %c0_1] : memref<2x256x1xf32, #tpu.memory_space<vmem>>, vector<1x256x1xf32>
    %1 = vector.shape_cast %0 : vector<1x256x1xf32> to vector<256x1xf32>
    %c1 = arith.constant 1 : index
    %c0_2 = arith.constant 0 : index
    %c0_3 = arith.constant 0 : index
    %2 = vector.load %arg6[%c1, %c0_2, %c0_3] : memref<2x256x1xf32, #tpu.memory_space<vmem>>, vector<1x256x1xf32>
    %3 = vector.shape_cast %2 : vector<1x256x1xf32> to vector<256x1xf32>
    %cst = arith.constant 0.000000e+00 : f32
    %4 = vector.broadcast %cst : f32 to vector<256x8xf32>
    %c0_4 = arith.constant 0 : index
    %c0_5 = arith.constant 0 : index
    %c0_6 = arith.constant 0 : index
    %5 = vector.load %arg1[%c0_4, %c0_5, %c0_6] : memref<1x290x16xf32, #tpu.memory_space<vmem>>, vector<1x256x16xf32>
    %6 = vector.shape_cast %5 : vector<1x256x16xf32> to vector<256x16xf32>
    %7 = vector.broadcast %1 : vector<256x1xf32> to vector<256x16xf32>
    %8 = arith.mulf %6, %7 : vector<256x16xf32>
    %c0_7 = arith.constant 0 : index
    %c0_8 = arith.constant 0 : index
    %c0_9 = arith.constant 0 : index
    %9 = vector.load %arg2[%c0_7, %c0_8, %c0_9] : memref<9x16x8xf32, #tpu.memory_space<vmem>>, vector<1x16x8xf32>
    %10 = vector.shape_cast %9 : vector<1x16x8xf32> to vector<16x8xf32>
    %cst_10 = arith.constant dense<0.000000e+00> : vector<256x8xf32>
    %11 = tpu.matmul %8, %10, %cst_10 {dimension_numbers = #tpu.dot_dimension_numbers<[1], [0], [0], [1], [0, 0, 1, 1], [], []>} : vector<256x16xf32>, vector<16x8xf32>, vector<256x8xf32> -> vector<256x8xf32>
    %12 = arith.addf %4, %11 : vector<256x8xf32>
    %c0_11 = arith.constant 0 : index
    %c1_12 = arith.constant 1 : index
    %c0_13 = arith.constant 0 : index
    %13 = vector.load %arg1[%c0_11, %c1_12, %c0_13] : memref<1x290x16xf32, #tpu.memory_space<vmem>>, vector<1x256x16xf32>
    %14 = vector.shape_cast %13 : vector<1x256x16xf32> to vector<256x16xf32>
    %c1_14 = arith.constant 1 : index
    %c0_15 = arith.constant 0 : index
    %c0_16 = arith.constant 0 : index
    %15 = vector.load %arg2[%c1_14, %c0_15, %c0_16] : memref<9x16x8xf32, #tpu.memory_space<vmem>>, vector<1x16x8xf32>
    %16 = vector.shape_cast %15 : vector<1x16x8xf32> to vector<16x8xf32>
    %cst_17 = arith.constant dense<0.000000e+00> : vector<256x8xf32>
    %17 = tpu.matmul %14, %16, %cst_17 {dimension_numbers = #tpu.dot_dimension_numbers<[1], [0], [0], [1], [0, 0, 1, 1], [], []>} : vector<256x16xf32>, vector<16x8xf32>, vector<256x8xf32> -> vector<256x8xf32>
    %18 = arith.addf %12, %17 : vector<256x8xf32>
    %c0_18 = arith.constant 0 : index
    %c2 = arith.constant 2 : index
    %c0_19 = arith.constant 0 : index
    %19 = vector.load %arg1[%c0_18, %c2, %c0_19] : memref<1x290x16xf32, #tpu.memory_space<vmem>>, vector<1x256x16xf32>
    %20 = vector.shape_cast %19 : vector<1x256x16xf32> to vector<256x16xf32>
    %21 = vector.broadcast %3 : vector<256x1xf32> to vector<256x16xf32>
    %22 = arith.mulf %20, %21 : vector<256x16xf32>
    %c2_20 = arith.constant 2 : index
    %c0_21 = arith.constant 0 : index
    %c0_22 = arith.constant 0 : index
    %23 = vector.load %arg2[%c2_20, %c0_21, %c0_22] : memref<9x16x8xf32, #tpu.memory_space<vmem>>, vector<1x16x8xf32>
    %24 = vector.shape_cast %23 : vector<1x16x8xf32> to vector<16x8xf32>
    %cst_23 = arith.constant dense<0.000000e+00> : vector<256x8xf32>
    %25 = tpu.matmul %22, %24, %cst_23 {dimension_numbers = #tpu.dot_dimension_numbers<[1], [0], [0], [1], [0, 0, 1, 1], [], []>} : vector<256x16xf32>, vector<16x8xf32>, vector<256x8xf32> -> vector<256x8xf32>
    %26 = arith.addf %18, %25 : vector<256x8xf32>
    %c0_24 = arith.constant 0 : index
    %c16 = arith.constant 16 : index
    %c0_25 = arith.constant 0 : index
    %27 = vector.load %arg1[%c0_24, %c16, %c0_25] : memref<1x290x16xf32, #tpu.memory_space<vmem>>, vector<1x256x16xf32>
    %28 = vector.shape_cast %27 : vector<1x256x16xf32> to vector<256x16xf32>
    %29 = vector.broadcast %1 : vector<256x1xf32> to vector<256x16xf32>
    %30 = arith.mulf %28, %29 : vector<256x16xf32>
    %c3 = arith.constant 3 : index
    %c0_26 = arith.constant 0 : index
    %c0_27 = arith.constant 0 : index
    %31 = vector.load %arg2[%c3, %c0_26, %c0_27] : memref<9x16x8xf32, #tpu.memory_space<vmem>>, vector<1x16x8xf32>
    %32 = vector.shape_cast %31 : vector<1x16x8xf32> to vector<16x8xf32>
    %cst_28 = arith.constant dense<0.000000e+00> : vector<256x8xf32>
    %33 = tpu.matmul %30, %32, %cst_28 {dimension_numbers = #tpu.dot_dimension_numbers<[1], [0], [0], [1], [0, 0, 1, 1], [], []>} : vector<256x16xf32>, vector<16x8xf32>, vector<256x8xf32> -> vector<256x8xf32>
    %34 = arith.addf %26, %33 : vector<256x8xf32>
    %c0_29 = arith.constant 0 : index
    %c17 = arith.constant 17 : index
    %c0_30 = arith.constant 0 : index
    %35 = vector.load %arg1[%c0_29, %c17, %c0_30] : memref<1x290x16xf32, #tpu.memory_space<vmem>>, vector<1x256x16xf32>
    %36 = vector.shape_cast %35 : vector<1x256x16xf32> to vector<256x16xf32>
    %c4 = arith.constant 4 : index
    %c0_31 = arith.constant 0 : index
    %c0_32 = arith.constant 0 : index
    %37 = vector.load %arg2[%c4, %c0_31, %c0_32] : memref<9x16x8xf32, #tpu.memory_space<vmem>>, vector<1x16x8xf32>
    %38 = vector.shape_cast %37 : vector<1x16x8xf32> to vector<16x8xf32>
    %cst_33 = arith.constant dense<0.000000e+00> : vector<256x8xf32>
    %39 = tpu.matmul %36, %38, %cst_33 {dimension_numbers = #tpu.dot_dimension_numbers<[1], [0], [0], [1], [0, 0, 1, 1], [], []>} : vector<256x16xf32>, vector<16x8xf32>, vector<256x8xf32> -> vector<256x8xf32>
    %40 = arith.addf %34, %39 : vector<256x8xf32>
    %c0_34 = arith.constant 0 : index
    %c18 = arith.constant 18 : index
    %c0_35 = arith.constant 0 : index
    %41 = vector.load %arg1[%c0_34, %c18, %c0_35] : memref<1x290x16xf32, #tpu.memory_space<vmem>>, vector<1x256x16xf32>
    %42 = vector.shape_cast %41 : vector<1x256x16xf32> to vector<256x16xf32>
    %43 = vector.broadcast %3 : vector<256x1xf32> to vector<256x16xf32>
    %44 = arith.mulf %42, %43 : vector<256x16xf32>
    %c5 = arith.constant 5 : index
    %c0_36 = arith.constant 0 : index
    %c0_37 = arith.constant 0 : index
    %45 = vector.load %arg2[%c5, %c0_36, %c0_37] : memref<9x16x8xf32, #tpu.memory_space<vmem>>, vector<1x16x8xf32>
    %46 = vector.shape_cast %45 : vector<1x16x8xf32> to vector<16x8xf32>
    %cst_38 = arith.constant dense<0.000000e+00> : vector<256x8xf32>
    %47 = tpu.matmul %44, %46, %cst_38 {dimension_numbers = #tpu.dot_dimension_numbers<[1], [0], [0], [1], [0, 0, 1, 1], [], []>} : vector<256x16xf32>, vector<16x8xf32>, vector<256x8xf32> -> vector<256x8xf32>
    %48 = arith.addf %40, %47 : vector<256x8xf32>
    %c0_39 = arith.constant 0 : index
    %c32 = arith.constant 32 : index
    %c0_40 = arith.constant 0 : index
    %49 = vector.load %arg1[%c0_39, %c32, %c0_40] : memref<1x290x16xf32, #tpu.memory_space<vmem>>, vector<1x256x16xf32>
    %50 = vector.shape_cast %49 : vector<1x256x16xf32> to vector<256x16xf32>
    %51 = vector.broadcast %1 : vector<256x1xf32> to vector<256x16xf32>
    %52 = arith.mulf %50, %51 : vector<256x16xf32>
    %c6 = arith.constant 6 : index
    %c0_41 = arith.constant 0 : index
    %c0_42 = arith.constant 0 : index
    %53 = vector.load %arg2[%c6, %c0_41, %c0_42] : memref<9x16x8xf32, #tpu.memory_space<vmem>>, vector<1x16x8xf32>
    %54 = vector.shape_cast %53 : vector<1x16x8xf32> to vector<16x8xf32>
    %cst_43 = arith.constant dense<0.000000e+00> : vector<256x8xf32>
    %55 = tpu.matmul %52, %54, %cst_43 {dimension_numbers = #tpu.dot_dimension_numbers<[1], [0], [0], [1], [0, 0, 1, 1], [], []>} : vector<256x16xf32>, vector<16x8xf32>, vector<256x8xf32> -> vector<256x8xf32>
    %56 = arith.addf %48, %55 : vector<256x8xf32>
    %c0_44 = arith.constant 0 : index
    %c33 = arith.constant 33 : index
    %c0_45 = arith.constant 0 : index
    %57 = vector.load %arg1[%c0_44, %c33, %c0_45] : memref<1x290x16xf32, #tpu.memory_space<vmem>>, vector<1x256x16xf32>
    %58 = vector.shape_cast %57 : vector<1x256x16xf32> to vector<256x16xf32>
    %c7 = arith.constant 7 : index
    %c0_46 = arith.constant 0 : index
    %c0_47 = arith.constant 0 : index
    %59 = vector.load %arg2[%c7, %c0_46, %c0_47] : memref<9x16x8xf32, #tpu.memory_space<vmem>>, vector<1x16x8xf32>
    %60 = vector.shape_cast %59 : vector<1x16x8xf32> to vector<16x8xf32>
    %cst_48 = arith.constant dense<0.000000e+00> : vector<256x8xf32>
    %61 = tpu.matmul %58, %60, %cst_48 {dimension_numbers = #tpu.dot_dimension_numbers<[1], [0], [0], [1], [0, 0, 1, 1], [], []>} : vector<256x16xf32>, vector<16x8xf32>, vector<256x8xf32> -> vector<256x8xf32>
    %62 = arith.addf %56, %61 : vector<256x8xf32>
    %c0_49 = arith.constant 0 : index
    %c34 = arith.constant 34 : index
    %c0_50 = arith.constant 0 : index
    %63 = vector.load %arg1[%c0_49, %c34, %c0_50] : memref<1x290x16xf32, #tpu.memory_space<vmem>>, vector<1x256x16xf32>
    %64 = vector.shape_cast %63 : vector<1x256x16xf32> to vector<256x16xf32>
    %65 = vector.broadcast %3 : vector<256x1xf32> to vector<256x16xf32>
    %66 = arith.mulf %64, %65 : vector<256x16xf32>
    %c8 = arith.constant 8 : index
    %c0_51 = arith.constant 0 : index
    %c0_52 = arith.constant 0 : index
    %67 = vector.load %arg2[%c8, %c0_51, %c0_52] : memref<9x16x8xf32, #tpu.memory_space<vmem>>, vector<1x16x8xf32>
    %68 = vector.shape_cast %67 : vector<1x16x8xf32> to vector<16x8xf32>
    %cst_53 = arith.constant dense<0.000000e+00> : vector<256x8xf32>
    %69 = tpu.matmul %66, %68, %cst_53 {dimension_numbers = #tpu.dot_dimension_numbers<[1], [0], [0], [1], [0, 0, 1, 1], [], []>} : vector<256x16xf32>, vector<16x8xf32>, vector<256x8xf32> -> vector<256x8xf32>
    %70 = arith.addf %62, %69 : vector<256x8xf32>
    %c0_54 = arith.constant 0 : index
    %c0_55 = arith.constant 0 : index
    %71 = vector.load %arg3[%c0_54, %c0_55] : memref<1x8xf32, #tpu.memory_space<vmem>>, vector<1x8xf32>
    %72 = vector.broadcast %71 : vector<1x8xf32> to vector<256x8xf32>
    %73 = arith.addf %70, %72 : vector<256x8xf32>
    %cst_56 = arith.constant 0.000000e+00 : f32
    %74 = vector.broadcast %cst_56 : f32 to vector<256x8xf32>
    %75 = arith.maximumf %73, %74 : vector<256x8xf32>
    %c0_57 = arith.constant 0 : index
    %c0_58 = arith.constant 0 : index
    %76 = vector.load %arg4[%c0_57, %c0_58] : memref<1x8xf32, #tpu.memory_space<vmem>>, vector<1x8xf32>
    %77 = vector.broadcast %76 : vector<1x8xf32> to vector<256x8xf32>
    %78 = arith.mulf %75, %77 : vector<256x8xf32>
    %cst_59 = arith.constant dense<0.000000e+00> : vector<256xf32>
    %79 = vector.multi_reduction <add>, %78, %cst_59 [1] : vector<256x8xf32> to vector<256xf32>
    %80 = vector.shape_cast %79 : vector<256xf32> to vector<256x1xf32>
    %c0_60 = arith.constant 0 : index
    %c0_61 = arith.constant 0 : index
    %81 = vector.load %arg5[%c0_60, %c0_61] : memref<1x1xf32, #tpu.memory_space<vmem>>, vector<1x1xf32>
    %82 = vector.broadcast %81 : vector<1x1xf32> to vector<256x1xf32>
    %83 = arith.addf %80, %82 : vector<256x1xf32>
    %c0_62 = arith.constant 0 : index
    %c0_63 = arith.constant 0 : index
    %c0_64 = arith.constant 0 : index
    %84 = vector.load %arg7[%c0_62, %c0_63, %c0_64] : memref<1x256x1xf32, #tpu.memory_space<vmem>>, vector<1x256x1xf32>
    %85 = vector.shape_cast %84 : vector<1x256x1xf32> to vector<256x1xf32>
    %86 = vector.shape_cast %83 : vector<256x1xf32> to vector<1x256x1xf32>
    tpu.vector_store %arg7[%c0_62, %c0_63, %c0_64], %86 {strides = array<i32>} : memref<1x256x1xf32, #tpu.memory_space<vmem>>, vector<1x256x1xf32>,
    return
  }
  func.func @transform_0(%arg0: i32) -> (i32, i32, i32) {
    %c0_i32 = arith.constant 0 : i32
    %c0_i32_0 = arith.constant 0 : i32
    %c0_i32_1 = arith.constant 0 : i32
    return %arg0, %c0_i32, %c0_i32_0 : i32, i32, i32
  }
  func.func @transform_1(%arg0: i32) -> (i32, i32, i32) {
    %c0_i32 = arith.constant 0 : i32
    %c0_i32_0 = arith.constant 0 : i32
    %c0_i32_1 = arith.constant 0 : i32
    %c0_i32_2 = arith.constant 0 : i32
    return %c0_i32, %c0_i32_0, %c0_i32_1 : i32, i32, i32
  }
  func.func @transform_2(%arg0: i32) -> (i32, i32) {
    %c0_i32 = arith.constant 0 : i32
    %c0_i32_0 = arith.constant 0 : i32
    %c0_i32_1 = arith.constant 0 : i32
    return %c0_i32, %c0_i32_0 : i32, i32
  }
  func.func @transform_3(%arg0: i32) -> (i32, i32) {
    %c0_i32 = arith.constant 0 : i32
    %c0_i32_0 = arith.constant 0 : i32
    %c0_i32_1 = arith.constant 0 : i32
    return %c0_i32, %c0_i32_0 : i32, i32
  }
  func.func @transform_4(%arg0: i32) -> (i32, i32) {
    %c0_i32 = arith.constant 0 : i32
    %c0_i32_0 = arith.constant 0 : i32
    %c0_i32_1 = arith.constant 0 : i32
    return %c0_i32, %c0_i32_0 : i32, i32
  }
  func.func @transform_5(%arg0: i32) -> (i32, i32, i32) {
    %c0_i32 = arith.constant 0 : i32
    %c0_i32_0 = arith.constant 0 : i32
    %c0_i32_1 = arith.constant 0 : i32
    %c0_i32_2 = arith.constant 0 : i32
    return %c0_i32, %c0_i32_0, %c0_i32_1 : i32, i32, i32
  }
  func.func @transform_6(%arg0: i32) -> (i32, i32, i32) {
    %c0_i32 = arith.constant 0 : i32
    %c0_i32_0 = arith.constant 0 : i32
    %c0_i32_1 = arith.constant 0 : i32
    return %arg0, %c0_i32, %c0_i32_0 : i32, i32, i32
  }
}

</mosaic_0001>

<bundles_post_ra>
// kernel: _lambda_.8
= control target key start
LH: loop header
LB: loop body
LE: loop exit
PB: predicated region body
PF: predicated region fallthrough
CT: control target
= control target key end

     0   :  { %v1950_v0 = vmov 0   ;;  %vm103_vm0 = vcmask 130048   ;;  %vm1501_vm1 = vcmask 261120   ;;  %s2475_s3 = inlined_call_operand.vmem [shape: f32[2,64,1], index: 3, kind: input, shape index: {}]   ;;  %s2476_s1 = inlined_call_operand.vmem [shape: f32[9,16,32], index: 1, kind: input, shape index: {}]   ;;  %s2477_s0 = inlined_call_operand.vmem [shape: f32[1,82,16], index: 0, kind: input, shape index: {}]   ;;  %s2478_s2 = inlined_call_operand.vmem [shape: f32[1,32], index: 2, kind: input, shape index: {}]   ;;  %s2479_s4 = inlined_call_operand.vmem [shape: f32[1,64,32], index: 4, kind: output, shape index: {}]  }
   0x1   :  { %1949 = vset.pattern.permute.xlu1 %v1950_v0  ;;  %1948 = vset.pattern.permute.xlu0 %v1950_v0  ;;  %v1516_v1 = vld [vmem:[%s2475_s3 + $0x50] sm:$0xff]  ;;  %v1514_v2 = vld [vmem:[%s2475_s3 + $0x40] sm:$0xff]  ;;  %v1517_v3 = vld [vmem:[%s2475_s3 + $0x58] sm:$0xff] }
   0x2   :  { %382 = vperm.xlu1 %1949, %v1516_v1   ;;  %372 = vperm.xlu0 %1948, %v1514_v2   ;;  %v1515_v4 = vld [vmem:[%s2475_s3 + $0x48] sm:$0xff]  ;;  %v1518_v5 = vld [vmem:[%s2475_s3 + $0x60] sm:$0xff]  ;;  %v1522_v7 = vld [vmem:[%s2476_s1 + $0x10] sm:$0xff] }
   0x3   :  { %v17_v6 = vld [vmem:[%s2475_s3] sm:$0xff]  ;;  %v1523_v8 = vld [vmem:[%s2476_s1 + $0x18] sm:$0xff]  ;;  %v1561_v11 = vld [vmem:[%s2476_s1 + $0x48] sm:$0xff] }
   0x4   :  { %v1845_v9 = vpack.c.bf16 %v1523_v8, %v1522_v7  ;;  %v1560_v10 = vld [vmem:[%s2476_s1 + $0x40] sm:$0xff]  ;;  %v714_v14 = vld [vmem:[%s2477_s0 + $0x9] sm:$0xff]  ;;  %v2036_v20 = vld [vmem:[%s2477_s0 + $0x11] sm:$0xff] }
   0x5   :  { %v92_v12 = vld [vmem:[%s2477_s0 + $0x1] sm:$0xff]  ;;  %v2009_v13 = vpack.c.bf16 %v1561_v11, %v1560_v10  ;;  %1769 = vmatprep.mubr.msk.f32.mxu0 %vm103_vm0, %v714_v14  ;;  %v1570_v19 = vld [vmem:[%s2476_s1 + $0x50] sm:$0xff]  ;;  %v1571_v21 = vld [vmem:[%s2476_s1 + $0x58] sm:$0xff] }
   0x6   :  { %387 = vperm.xlu1 %1949, %v1517_v3   ;;  %377 = vperm.xlu0 %1948, %v1515_v4   ;;  %v1519_v15 = vld [vmem:[%s2475_s3 + $0x68] sm:$0xff]  ;;  %v90_v17 = vld [vmem:[%s2476_s1] sm:$0xff]  ;;  %v1865_v24 = vpack.c.bf16 %v1571_v21, %v1570_v19  ;;  %v1520_v25 = vld [vmem:[%s2475_s3 + $0x70] sm:$0xff] }
   0x7   :  { %1705 = vmatprep.mubr.msk.f32.mxu1 %vm103_vm0, %v92_v12  ;;  %1846 = vmatprep.subr.bf16.mxu1 %v1845_v9  ;;  %v18_v16 = vld [vmem:[%s2475_s3 + $0x8] sm:$0xff]  ;;  %v2044_v22 = vld [vmem:[%s2477_s0 + $0x19] sm:$0xff]  ;;  %v19_v26 = vld [vmem:[%s2475_s3 + $0x10] sm:$0xff] }
   0x8   :  { %1862 = vmatprep.subr.bf16.mxu0 %v2009_v13  ;;  %1848 = vmatpush3.bf16.msra.mxu1 %v1845_v9  ;;  %v91_v18 = vld [vmem:[%s2476_s1 + $0x8] sm:$0xff]  ;;  %v1580_v27 = vld [vmem:[%s2476_s1 + $0x60] sm:$0xff]  ;;  %v1521_v31 = vld [vmem:[%s2475_s3 + $0x78] sm:$0xff] }
   0x9   :  { %1864 = vmatpush3.bf16.msra.mxu0 %v2009_v13  ;;  %v1849_v23 = vpack.c.bf16 %v91_v18, %v90_v17  ;;  %v1581_v28 = vld [vmem:[%s2476_s1 + $0x68] sm:$0xff]  ;;  %v20_v32 = vld [vmem:[%s2475_s3 + $0x18] sm:$0xff]  ;;  %v1540_v34 = vld [vmem:[%s2476_s1 + $0x20] sm:$0xff] }
   0xa   :  { %392 = vperm.xlu1 %1949, %v1518_v5   ;;  %44 = vperm.xlu0 %1948, %v17_v6   ;;  %v2068_v29 = vld [vmem:[%s2477_s0 + $0x21] sm:$0xff]  ;;  %v1869_v30 = vpack.c.bf16 %v1581_v28, %v1580_v27  ;;  %v2083_v33 = vld [vmem:[%s2477_s0 + $0x29] sm:$0xff]  ;;  %v2096_v36 = vld [vmem:[%s2477_s0 + $0x31] sm:$0xff] }
   0xb   :  { %1706 = vmatmul.mubr.msk.f32.vlgmr.msra.gmra.mrb[0].mxu1 %vm103_vm0, %v714_v14  ;;  %1850 = vmatprep.subr.bf16.mxu1 %v1849_v23  ;;  %v1541_v35 = vld [vmem:[%s2476_s1 + $0x28] sm:$0xff]  ;;  %v21_v39 = vld [vmem:[%s2475_s3 + $0x20] sm:$0xff]  ;;  %v24_v41 = vld [vmem:[%s2475_s3 + $0x38] sm:$0xff] }
   0xc   :  { %1770 = vmatmul.mubr.msk.f32.vlgmr.msra.gmra.mrb[0].mxu0 %vm103_vm0, %v2036_v20  ;;  %1708 = vmatprep.mubr.msk.f32.mxu1 %vm103_vm0, %v2036_v20  ;;  %v1853_v37 = vpack.c.bf16 %v1541_v35, %v1540_v34  ;;  %v22_v38 = vld [vmem:[%s2475_s3 + $0x28] sm:$0xff]  ;;  %v2111_v40 = vld [vmem:[%s2477_s0 + $0x39] sm:$0xff]  ;;  %v23_v42 = vld [vmem:[%s2475_s3 + $0x30] sm:$0xff] }
   0xd   :  { %1772 = vmatprep.mubr.msk.f32.mxu0 %vm103_vm0, %v2044_v22  ;;  %1866 = vmatprep.subr.bf16.mxu0 %v1865_v24  ;;  %v2124_v43 = vld [vmem:[%s2477_s0 + $0xa] sm:$0xff]  ;;  %v2135_v47 = vld [vmem:[%s2477_s0 + $0x1a] sm:$0xff]  ;;  %v2151_v52 = vld [vmem:[%s2477_s0 + $0x12] sm:$0xff] }
   0xe   :  { %397 = vperm.xlu1 %1949, %v1519_v15   ;;  %49 = vperm.xlu0 %1948, %v18_v16   ;;  %v1590_v50 = vld [vmem:[%s2476_s1 + $0x70] sm:$0xff]  ;;  %v1591_v51 = vld [vmem:[%s2476_s1 + $0x78] sm:$0xff]  ;;  %v34_v54 = vld [vmem:[%s2477_s0] sm:$0xff] }
   0xf   :  { %1709 = vmatmul.mubr.msk.f32.gmra.mrb[2].mxu1 %vm103_vm0, %v2044_v22  ;;  %1868 = vmatpush3.bf16.msra.mxu0 %v1865_v24  ;;  %v2160_v56 = vpack.c.bf16 %v1591_v51, %v1590_v50  ;;  %v2165_v57 = vld [vmem:[%s2477_s0 + $0x2a] sm:$0xff]  ;;  %v2175_v60 = vld [vmem:[%s2477_s0 + $0x22] sm:$0xff]  ;;  %v1551_v1 = vld [vmem:[%s2476_s1 + $0x38] sm:$0xff] }
  0x10   :  { %1773 = vmatmul.mubr.msk.f32.gmra.mrb[2].mxu0 %vm103_vm0, %v2068_v29  ;;  %1852 = vmatpush3.bf16.msra.mxu1 %v1849_v23  ;;  %v1550_v0 = vld [vmem:[%s2476_s1 + $0x30] sm:$0xff]  ;;  %v2199_v3 = vld [vmem:[%s2477_s0 + $0x8] sm:$0xff]  ;;  %v2222_v10 = vld [vmem:[%s2477_s0 + $0x3a] sm:$0xff] }
  0x11   :  { %1711 = vmatprep.mubr.msk.f32.mxu1 %vm103_vm0, %v2068_v29  ;;  %1870 = vmatprep.subr.bf16.mxu0 %v1869_v30  ;;  %v2194_v2 = vld [vmem:[%s2477_s0 + $0x32] sm:$0xff]  ;;  %v2211_v8 = vpack.c.bf16 %v1551_v1, %v1550_v0  ;;  %v2244_v17 = vld [vmem:[%s2477_s0 + $0x42] sm:$0xff] }
  0x12   :  { %402 = vperm.xlu1 %1949, %v1520_v25   ;;  %54 = vperm.xlu0 %1948, %v19_v26   ;;  %v2217_v9 = vld [vmem:[%s2477_s0 + $0x10] sm:$0xff]  ;;  %v2239_v16 = vld [vmem:[%s2477_s0 + $0x18] sm:$0xff]  ;;  %v2259_v25 = vld [vmem:[%s2477_s0 + $0x20] sm:$0xff] }
  0x13   :  { %1712 = vmatmul.mubr.msk.f32.gmra.mrb[4].mxu1 %vm103_vm0, %v2083_v33  ;;  %1854 = vmatprep.subr.bf16.mxu1 %v1853_v37  ;;  %v1600_v26 = vld [vmem:[%s2476_s1 + $0x80] sm:$0xff]  ;;  %v1601_v27 = vld [vmem:[%s2476_s1 + $0x88] sm:$0xff] }
  0x14   :  { %1714 = vmatprep.mubr.msk.f32.mxu1 %vm103_vm0, %v2096_v36  ;;  %v2272_v28 = vld [vmem:[%s2477_s0 + $0x28] sm:$0xff] }
  0x15   :  { %v1025_v0 = vld [vmem:[%s2477_s0 + $0x48] sm:$0xff] }
  0x16   :  { %407 = vperm.xlu1 %1949, %v1521_v31   ;;  %59 = vperm.xlu0 %1948, %v20_v32  }
  0x17   :  { %1715 = vmatmul.mubr.msk.f32.gmra.mrb[6].mxu1 %vm103_vm0, %v2111_v40 }
  0x1a   :  { %69 = vperm.xlu1 %1949, %v22_v38   ;;  %64 = vperm.xlu0 %1948, %v21_v39   ;;  %v1877_v38 = vpack.c.bf16 %v1601_v27, %v1600_v26  ;;  %v2290_v39 = vld [vmem:[%s2477_s0 + $0x30] sm:$0xff] }
  0x1e   :  { %79 = vperm.xlu1 %1949, %v24_v41   ;;  %74 = vperm.xlu0 %1948, %v23_v42   ;;  %v362_v41 = vld [vmem:[%s2477_s0 + $0x2] sm:$0xff]  ;;  %v2300_v42 = vld [vmem:[%s2477_s0 + $0x38] sm:$0xff] }
  0x81   :  { %v2126_v44 = vpop.permute.xlu1 %382  ;;  %v2128_v45 = vpop.permute.xlu0 %372 }
  0x82   :  { %v870_v46 = vmul.f32 %v2124_v43, %v2128_v45  ;;  %v872_v55 = vmul.f32 %v2135_v47, %v2126_v44 }
  0x84   :  { %1785 = vmatprep.mubr.msk.f32.mxu0 %vm103_vm0, %v870_v46 }
  0x85   :  { %v2138_v48 = vpop.permute.xlu1 %387  ;;  %v2140_v49 = vpop.permute.xlu0 %377 }
  0x86   :  { %v871_v53 = vmul.f32 %v2140_v49, %v2151_v52  ;;  %v873_v63 = vmul.f32 %v2175_v60, %v2138_v48 }
  0x88   :  { %1786 = vmatmul.mubr.msk.f32.vlgmr.msra.gmra.mrb[0].mxu0 %vm103_vm0, %v871_v53 }
  0x89   :  { %v2168_v58 = vpop.permute.xlu1 %392  ;;  %v2170_v59 = vpop.permute.xlu0 %44  ;;  %1788 = vmatprep.mubr.msk.f32.mxu0 %vm103_vm0, %v872_v55  ;;  %1872 = vmatpush3.bf16.msra.mxu0 %v1869_v30 }
  0x8a   :  { %v874_v61 = vmul.f32 %v2165_v57, %v2168_v58  ;;  %v82_v62 = vmul.f32 %v2170_v59, %v34_v54  ;;  %1874 = vmatprep.subr.bf16.mxu0 %v2160_v56  ;;  %v1026_v24 = vmul.f32 %v2217_v9, %v2170_v59 }
  0x8c   :  { %1721 = vmatprep.mubr.msk.f32.mxu1 %vm103_vm0, %v82_v62  ;;  %1789 = vmatmul.mubr.msk.f32.gmra.mrb[2].mxu0 %vm103_vm0, %v873_v63  ;;  %v2321_v62 = vld [vmem:[%s2477_s0 + $0x40] sm:$0xff]  ;;  %v411_v63 = vmul.f32 %v2124_v43, %v2140_v49  ;;  %v413_v43 = vmul.f32 %v2135_v47, %v2138_v48 }
  0x8d   :  { %v2202_v4 = vpop.permute.xlu1 %397  ;;  %v2204_v5 = vpop.permute.xlu0 %49  ;;  %1791 = vmatprep.mubr.msk.f32.mxu0 %vm103_vm0, %v874_v61  ;;  %v410_v61 = vmul.f32 %v2128_v45, %v362_v41 }
  0x8e   :  { %v875_v6 = vmul.f32 %v2194_v2, %v2202_v4  ;;  %v83_v7 = vmul.f32 %v2199_v3, %v2204_v5  ;;  %v1027_v32 = vmul.f32 %v2239_v16, %v2204_v5 }
  0x90   :  { %1722 = vmatmul.mubr.msk.f32.vlgmr.msra.gmra.mrb[0].mxu1 %vm103_vm0, %v83_v7  ;;  %1792 = vmatmul.mubr.msk.f32.gmra.mrb[4].mxu0 %vm103_vm0, %v875_v6  ;;  %v412_v6 = vmul.f32 %v2126_v44, %v2151_v52 }
  0x91   :  { %v2225_v11 = vpop.permute.xlu1 %402  ;;  %v2227_v12 = vpop.permute.xlu0 %54  ;;  %1856 = vmatpush3.bf16.msra.mxu1 %v1853_v37 }
  0x92   :  { %v876_v14 = vmul.f32 %v2222_v10, %v2225_v11  ;;  %v84_v15 = vmul.f32 %v2217_v9, %v2227_v12  ;;  %1858 = vmatprep.subr.bf16.mxu1 %v2211_v8  ;;  %v1028_v37 = vmul.f32 %v2259_v25, %v2227_v12 }
  0x94   :  { %1724 = vmatprep.mubr.msk.f32.mxu1 %vm103_vm0, %v84_v15  ;;  %1794 = vmatprep.mubr.msk.f32.mxu0 %vm103_vm0, %v876_v14  ;;  %v414_v14 = vmul.f32 %v2175_v60, %v2168_v58  ;;  %v416_v15 = vmul.f32 %v2194_v2, %v2225_v11 }
  0x95   :  { %v2246_v18 = vpop.permute.xlu1 %407  ;;  %v2248_v19 = vpop.permute.xlu0 %59 }
  0x96   :  { %v877_v21 = vmul.f32 %v2244_v17, %v2246_v18  ;;  %v85_v23 = vmul.f32 %v2239_v16, %v2248_v19  ;;  %v1029_v51 = vmul.f32 %v2272_v28, %v2248_v19 }
  0x98   :  { %1725 = vmatmul.mubr.msk.f32.gmra.mrb[2].mxu1 %vm103_vm0, %v85_v23  ;;  %1795 = vmatmul.mubr.msk.f32.gmra.mrb[6].mxu0 %vm103_vm0, %v877_v21  ;;  %v566_v21 = vmul.f32 %v2199_v3, %v2170_v59  ;;  %v568_v59 = vmul.f32 %v2239_v16, %v2227_v12  ;;  %v1181_v3 = vld [vmem:[%s2477_s0 + $0x49] sm:$0xff] }
  0x99   :  { %v2274_v30 = vpop.permute.xlu1 %69  ;;  %v2276_v31 = vpop.permute.xlu0 %64  ;;  %1801 = vmatprep.mubr.msk.f32.mxu0 %vm103_vm0, %v1026_v24 }
  0x9a   :  { %v87_v34 = vmul.f32 %v2272_v28, %v2274_v30  ;;  %v86_v35 = vmul.f32 %v2259_v25, %v2276_v31  ;;  %v1030_v55 = vmul.f32 %v2290_v39, %v2276_v31  ;;  %v570_v12 = vmul.f32 %v2272_v28, %v2276_v31 }
  0x9c   :  { %1727 = vmatprep.mubr.msk.f32.mxu1 %vm103_vm0, %v86_v35  ;;  %1802 = vmatmul.mubr.msk.f32.vlgmr.msra.gmra.mrb[0].mxu0 %vm103_vm0, %v1027_v32 }
  0x9d   :  { %v2302_v46 = vpop.permute.xlu1 %79  ;;  %v2304_v50 = vpop.permute.xlu0 %74  ;;  %1728 = vmatmul.mubr.msk.f32.gmra.mrb[4].mxu1 %vm103_vm0, %v87_v34  ;;  %1804 = vmatprep.mubr.msk.f32.mxu0 %vm103_vm0, %v1028_v37 }
  0x9e   :  { %v89_v53 = vmul.f32 %v2300_v42, %v2302_v46  ;;  %v88_v54 = vmul.f32 %v2290_v39, %v2304_v50  ;;  %1876 = vmatpush3.bf16.msra.mxu0 %v2160_v56  ;;  %v1031_v56 = vmul.f32 %v2300_v42, %v2274_v30  ;;  %v1032_v1 = vmul.f32 %v2321_v62, %v2304_v50 }
  0x9f   :  { %1878 = vmatprep.subr.bf16.mxu0 %v1877_v38  ;;  %v1033_v7 = vmul.f32 %v1025_v0, %v2302_v46  ;;  %v572_v16 = vmul.f32 %v2300_v42, %v2304_v50 }
  0xa0   :  { %1730 = vmatprep.mubr.msk.f32.mxu1 %vm103_vm0, %v88_v54  ;;  %1805 = vmatmul.mubr.msk.f32.gmra.mrb[2].mxu0 %vm103_vm0, %v1029_v51 }
  0xa1   :  { %1731 = vmatmul.mubr.msk.f32.gmra.mrb[6].mxu1 %vm103_vm0, %v89_v53  ;;  %1807 = vmatprep.mubr.msk.f32.mxu0 %vm103_vm0, %v1030_v55 }
  0xa2   :  { %1737 = vmatprep.mubr.msk.f32.mxu1 %vm103_vm0, %v410_v61 }
  0xa4   :  { %1808 = vmatmul.mubr.msk.f32.gmra.mrb[4].mxu0 %vm103_vm0, %v1031_v56 }
  0xa5   :  { %1738 = vmatmul.mubr.msk.f32.vlgmr.msra.gmra.mrb[0].mxu1 %vm103_vm0, %v411_v63  ;;  %1810 = vmatprep.mubr.msk.f32.mxu0 %vm103_vm0, %v1032_v1 }
  0xa6   :  { %1860 = vmatpush3.bf16.msra.mxu1 %v2211_v8  ;;  %1740 = vmatprep.mubr.msk.f32.mxu1 %vm103_vm0, %v412_v6  ;;  %v415_v8 = vmul.f32 %v2165_v57, %v2202_v4 }
  0xa7   :  { %1881 = vmatprep.subr.bf16.mxu1 %v2009_v13 }
  0xa8   :  { %1811 = vmatmul.mubr.msk.f32.gmra.mrb[6].mxu0 %vm103_vm0, %v1033_v7 }
  0xa9   :  { %1741 = vmatmul.mubr.msk.f32.gmra.mrb[2].mxu1 %vm103_vm0, %v413_v43  ;;  %1817 = vmatprep.mubr.msk.f32.mxu0 %vm103_vm0, %v2036_v20  ;;  %v417_v20 = vmul.f32 %v2222_v10, %v2246_v18 }
  0xaa   :  { %1743 = vmatprep.mubr.msk.f32.mxu1 %vm103_vm0, %v414_v14 }
  0xac   :  { %1818 = vmatmul.mubr.msk.f32.vlgmr.msra.gmra.mrb[0].mxu0 %vm103_vm0, %v2044_v22  ;;  %v1180_v22 = vld [vmem:[%s2477_s0 + $0x41] sm:$0xff] }
  0xad   :  { %1744 = vmatmul.mubr.msk.f32.gmra.mrb[4].mxu1 %vm103_vm0, %v415_v8  ;;  %1880 = vmatpush3.bf16.msra.mxu0 %v1877_v38 }
  0xae   :  { %1746 = vmatprep.mubr.msk.f32.mxu1 %vm103_vm0, %v416_v15  ;;  %1820 = vmatprep.mubr.msk.f32.mxu0 %vm103_vm0, %v2068_v29  ;;  %v567_v29 = vmul.f32 %v2217_v9, %v2204_v5  ;;  %v1330_v5 = vmul.f32 %v2128_v45, %v2151_v52  ;;  %v569_v9 = vmul.f32 %v2259_v25, %v2248_v19 }
  0xaf   :  { %v1332_v45 = vmul.f32 %v2175_v60, %v2126_v44  ;;  %v571_v52 = vmul.f32 %v2290_v39, %v2274_v30  ;;  %v1334_v44 = vmul.f32 %v2194_v2, %v2168_v58  ;;  %v1335_v60 = vmul.f32 %v2222_v10, %v2202_v4 }
  0xb0   :  { %1821 = vmatmul.mubr.msk.f32.gmra.mrb[2].mxu0 %vm103_vm0, %v2083_v33 }
  0xb1   :  { %1747 = vmatmul.mubr.msk.f32.gmra.mrb[6].mxu1 %vm103_vm0, %v417_v20  ;;  %1823 = vmatprep.mubr.msk.f32.mxu0 %vm103_vm0, %v2096_v36 }
  0xb2   :  { %1753 = vmatprep.mubr.msk.f32.mxu1 %vm103_vm0, %v566_v21 }
  0xb4   :  { %1824 = vmatmul.mubr.msk.f32.gmra.mrb[4].mxu0 %vm103_vm0, %v2111_v40 }
  0xb5   :  { %1754 = vmatmul.mubr.msk.f32.vlgmr.msra.gmra.mrb[0].mxu1 %vm103_vm0, %v567_v29  ;;  %1826 = vmatprep.mubr.msk.f32.mxu0 %vm103_vm0, %v1180_v22 }
  0xb6   :  { %1882 = vmatpush3.bf16.msra.mxu1 %v2009_v13  ;;  %1756 = vmatprep.mubr.msk.f32.mxu1 %vm103_vm0, %v568_v59  ;;  %v1331_v13 = vmul.f32 %v2135_v47, %v2140_v49  ;;  %v1333_v47 = vmul.f32 %v2165_v57, %v2138_v48  ;;  %v573_v49 = vmul.f32 %v2321_v62, %v2302_v46  ;;  %v1329_v57 = vld [vmem:[%s2477_s0 + $0x4a] sm:$0xff] }
  0xb7   :  { %v1336_v48 = vmul.f32 %v2244_v17, %v2225_v11  ;;  %v1337_v58 = vmul.f32 %v1329_v57, %v2246_v18 }
  0xb8   :  { %1827 = vmatmul.mubr.msk.f32.gmra.mrb[6].mxu0 %vm103_vm0, %v1181_v3 }
  0xb9   :  { %1757 = vmatmul.mubr.msk.f32.gmra.mrb[2].mxu1 %vm103_vm0, %v569_v9  ;;  %1833 = vmatprep.mubr.msk.f32.mxu0 %vm103_vm0, %v1330_v5 }
  0xba   :  { %1759 = vmatprep.mubr.msk.f32.mxu1 %vm103_vm0, %v570_v12 }
  0xbc   :  { %1834 = vmatmul.mubr.msk.f32.vlgmr.msra.gmra.mrb[0].mxu0 %vm103_vm0, %v1331_v13 }
  0xbd   :  { %1760 = vmatmul.mubr.msk.f32.gmra.mrb[4].mxu1 %vm103_vm0, %v571_v52  ;;  %1836 = vmatprep.mubr.msk.f32.mxu0 %vm103_vm0, %v1332_v45 }
  0xbe   :  { %1762 = vmatprep.mubr.msk.f32.mxu1 %vm103_vm0, %v572_v16 }
  0xc0   :  { %1837 = vmatmul.mubr.msk.f32.gmra.mrb[2].mxu0 %vm103_vm0, %v1333_v47 }
  0xc1   :  { %1763 = vmatmul.mubr.msk.f32.gmra.mrb[6].mxu1 %vm103_vm0, %v573_v49  ;;  %1839 = vmatprep.mubr.msk.f32.mxu0 %vm103_vm0, %v1334_v44 }
  0xc2   :  { %1775 = vmatprep.mubr.msk.f32.mxu1 %vm103_vm0, %v2083_v33 }
  0xc4   :  { %1840 = vmatmul.mubr.msk.f32.gmra.mrb[4].mxu0 %vm103_vm0, %v1335_v60 }
  0xc5   :  { %1776 = vmatmul.mubr.msk.f32.vlgmr.msra.gmra.mrb[4].mxu1 %vm103_vm0, %v2096_v36  ;;  %1842 = vmatprep.mubr.msk.f32.mxu0 %vm103_vm0, %v1336_v48  ;;  %v1610_v36 = vld [vmem:[%s2478_s2] ss:$0 sm:$0xff] }
  0xc6   :  { %1778 = vmatprep.mubr.msk.f32.mxu1 %vm103_vm0, %v2111_v40 }
  0xc8   :  { %1843 = vmatmul.mubr.msk.f32.gmra.mrb[6].mxu0 %vm103_vm0, %v1337_v58 }
  0xc9   :  { %1779 = vmatmul.mubr.msk.f32.gmra.mrb[6].mxu1 %vm103_vm0, %v1180_v22 }
 0x188   :  { %v1755_v33 = vpop.f32.mrb[0].mxu1 }
 0x189   :  { %v667_v2 = vpop.f32.mrb[1].mxu1 }
 0x18c   :  { %v1758_v4 = vpop.f32.mrb[2].mxu1 }
 0x18d   :  { %v677_v10 = vpop.f32.mrb[3].mxu1 }
 0x18f   :  { %v1835_v11 = vpop.f32.mrb[0].mxu0 }
 0x190   :  { %v1883_v17 = vadd.f32 %v1835_v11, %v1755_v33  ;;  %v1431_v19 = vpop.f32.mrb[1].mxu0 }
 0x191   :  { %v1884_v23 = vadd.f32 %v1431_v19, %v667_v2 }
 0x192   :  { %v1486_v18 = vadd.f32 %v1883_v17, %v1610_v36 }
 0x193   :  { %v1485_v24 = vadd.f32 %v1884_v23, %v1610_v36  ;;  %v1838_v40 = vpop.f32.mrb[2].mxu0 }
 0x194   :  { %v1494_v25 = vmax.f32 %v1486_v18, 0.0  ;;  %v1885_v26 = vadd.f32 %v1838_v40, %v1758_v4  ;;  %v1441_v27 = vpop.f32.mrb[3].mxu0 }
 0x195   :  { %v1493_v28 = vmax.f32 %v1485_v24, 0.0  ;;  %v1886_v30 = vadd.f32 %v1441_v27, %v677_v10 }
 0x196   :  { %1503 = vst.msk [vmem:[%s2479_s4 + $0x8] sm:$0xff] %vm1501_vm1, %v1494_v25  ;;  %v1488_v31 = vadd.f32 %v1885_v26, %v1610_v36 }
 0x197   :  { %1502 = vst.msk [vmem:[%s2479_s4] sm:$0xff] %vm1501_vm1, %v1493_v28  ;;  %v1487_v32 = vadd.f32 %v1886_v30, %v1610_v36  ;;  %v1841_v34 = vpop.f32.mrb[4].mxu0 }
 0x198   :  { %v1496_v35 = vmax.f32 %v1488_v31, 0.0  ;;  %v1777_v37 = vpop.f32.mrb[4].mxu1  ;;  %v1451_v38 = vpop.f32.mrb[5].mxu0 }
 0x199   :  { %v1495_v39 = vmax.f32 %v1487_v32, 0.0  ;;  %v1887_v41 = vadd.f32 %v1841_v34, %v1777_v37  ;;  %v835_v42 = vpop.f32.mrb[5].mxu1 }
 0x19a   :  { %1505 = vst.msk [vmem:[%s2479_s4 + $0x18] sm:$0xff] %vm1501_vm1, %v1496_v35  ;;  %v1888_v46 = vadd.f32 %v1451_v38, %v835_v42 }
 0x19b   :  { %1504 = vst.msk [vmem:[%s2479_s4 + $0x10] sm:$0xff] %vm1501_vm1, %v1495_v39  ;;  %v1490_v50 = vadd.f32 %v1887_v41, %v1610_v36  ;;  %v1844_v51 = vpop.f32.mrb[6].mxu0 }
 0x19c   :  { %v1489_v53 = vadd.f32 %v1888_v46, %v1610_v36  ;;  %v1780_v54 = vpop.f32.mrb[6].mxu1  ;;  %v1461_v55 = vpop.f32.mrb[7].mxu0 }
 0x19d   :  { %v1498_v61 = vmax.f32 %v1490_v50, 0.0  ;;  %v1889_v62 = vadd.f32 %v1844_v51, %v1780_v54  ;;  %v845_v56 = vpop.f32.mrb[7].mxu1 }
 0x19e   :  { %v1497_v63 = vmax.f32 %v1489_v53, 0.0  ;;  %v1890_v0 = vadd.f32 %v1461_v55, %v845_v56 }
 0x19f   :  { %1507 = vst.msk [vmem:[%s2479_s4 + $0x28] sm:$0xff] %vm1501_vm1, %v1498_v61  ;;  %v1492_v1 = vadd.f32 %v1889_v62, %v1610_v36 }
 0x1a0   :  { %1506 = vst.msk [vmem:[%s2479_s4 + $0x20] sm:$0xff] %vm1501_vm1, %v1497_v63  ;;  %v1491_v6 = vadd.f32 %v1890_v0, %v1610_v36 }
 0x1a1   :  { %v1500_v7 = vmax.f32 %v1492_v1, 0.0 }
 0x1a2   :  { %v1499_v43 = vmax.f32 %v1491_v6, 0.0 }
 0x1a3   :  { %1509 = vst.msk [vmem:[%s2479_s4 + $0x38] sm:$0xff] %vm1501_vm1, %v1500_v7 }
 0x1a4   :  { %1508 = vst.msk [vmem:[%s2479_s4 + $0x30] sm:$0xff] %vm1501_vm1, %v1499_v43 }

// kernel: _lambda_.9
= control target key start
LH: loop header
LB: loop body
LE: loop exit
PB: predicated region body
PF: predicated region fallthrough
CT: control target
= control target key end

     0   :  { %v1175_v0 = vmov 0   ;;  %vm47_vm0 = vcmask 261120   ;;  %vm871_vm1 = vcmask 523264   ;;  %s1407_s3 = inlined_call_operand.vmem [shape: f32[2,16,1], index: 3, kind: input, shape index: {}]   ;;  %s1408_s1 = inlined_call_operand.vmem [shape: f32[9,32,64], index: 1, kind: input, shape index: {}]   ;;  %s1409_s0 = inlined_call_operand.vmem [shape: f32[1,26,32], index: 0, kind: input, shape index: {}]   ;;  %s1410_s2 = inlined_call_operand.vmem [shape: f32[1,64], index: 2, kind: input, shape index: {}]   ;;  %s1411_s4 = inlined_call_operand.vmem [shape: f32[1,16,64], index: 4, kind: output, shape index: {}]  }
   0x1   :  { %1174 = vset.pattern.permute.xlu1 %v1175_v0  ;;  %1173 = vset.pattern.permute.xlu0 %v1175_v0  ;;  %v878_v1 = vld [vmem:[%s1407_s3 + $0x10] sm:$0xff]  ;;  %v17_v2 = vld [vmem:[%s1407_s3] sm:$0xff]  ;;  %v879_v3 = vld [vmem:[%s1407_s3 + $0x18] sm:$0xff] }
   0x2   :  { %214 = vperm.xlu0 %1173, %v878_v1   ;;  %26 = vperm.xlu1 %1174, %v17_v2   ;;  %v18_v4 = vld [vmem:[%s1407_s3 + $0x8] sm:$0xff]  ;;  %v900_v5 = vld [vmem:[%s1408_s1 + $0x80] sm:$0xff]  ;;  %v902_v10 = vld [vmem:[%s1408_s1 + $0x90] sm:$0xff] }
   0x3   :  { %v901_v6 = vld [vmem:[%s1408_s1 + $0x88] sm:$0xff]  ;;  %v880_v8 = vld [vmem:[%s1408_s1 + $0x20] sm:$0xff]  ;;  %v903_v12 = vld [vmem:[%s1408_s1 + $0x98] sm:$0xff] }
   0x4   :  { %v1116_v7 = vpack.c.bf16 %v901_v6, %v900_v5  ;;  %v881_v9 = vld [vmem:[%s1408_s1 + $0x28] sm:$0xff]  ;;  %v882_v13 = vld [vmem:[%s1408_s1 + $0x30] sm:$0xff]  ;;  %v883_v14 = vld [vmem:[%s1408_s1 + $0x38] sm:$0xff]  ;;  %v1120_v15 = vpack.c.bf16 %v903_v12, %v902_v10 }
   0x5   :  { %v1084_v11 = vpack.c.bf16 %v881_v9, %v880_v8  ;;  %v1088_v16 = vpack.c.bf16 %v883_v14, %v882_v13  ;;  %v906_v17 = vld [vmem:[%s1408_s1 + $0xa0] sm:$0xff]  ;;  %v907_v19 = vld [vmem:[%s1408_s1 + $0xa8] sm:$0xff]  ;;  %v908_v25 = vld [vmem:[%s1408_s1 + $0xb0] sm:$0xff] }
   0x6   :  { %1117 = vmatprep.subr.bf16.mxu0 %v1116_v7  ;;  %219 = vperm.xlu0 %1173, %v879_v3   ;;  %v40_v18 = vld [vmem:[%s1409_s0 + $0x1] sm:$0xff]  ;;  %v1124_v23 = vpack.c.bf16 %v907_v19, %v906_v17  ;;  %v909_v26 = vld [vmem:[%s1408_s1 + $0xb8] sm:$0xff]  ;;  %v38_v27 = vld [vmem:[%s1408_s1 + $0x10] sm:$0xff] }
   0x7   :  { %31 = vperm.xlu1 %1174, %v18_v4   ;;  %v36_v20 = vld [vmem:[%s1408_s1] sm:$0xff]  ;;  %1085 = vmatprep.subr.bf16.mxu1 %v1084_v11  ;;  %v37_v22 = vld [vmem:[%s1408_s1 + $0x8] sm:$0xff]  ;;  %v39_v28 = vld [vmem:[%s1408_s1 + $0x18] sm:$0xff]  ;;  %v1128_v31 = vpack.c.bf16 %v909_v26, %v908_v25 }
   0x8   :  { %1119 = vmatpush3.bf16.msra.mxu0 %v1116_v7  ;;  %v404_v21 = vld [vmem:[%s1409_s0 + $0x5] sm:$0xff]  ;;  %1087 = vmatpush3.bf16.msra.mxu1 %v1084_v11  ;;  %v1092_v24 = vpack.c.bf16 %v37_v22, %v36_v20  ;;  %v405_v29 = vld [vmem:[%s1409_s0 + $0xd] sm:$0xff]  ;;  %v1096_v32 = vpack.c.bf16 %v39_v28, %v38_v27  ;;  %v915_v48 = vld [vmem:[%s1408_s1 + $0xd8] sm:$0xff] }
   0x9   :  { %1121 = vmatprep.subr.bf16.mxu0 %v1120_v15  ;;  %1089 = vmatprep.subr.bf16.mxu1 %v1088_v16  ;;  %v1275_v30 = vld [vmem:[%s1409_s0 + $0x9] sm:$0xff]  ;;  %v912_v33 = vld [vmem:[%s1408_s1 + $0xc0] sm:$0xff]  ;;  %v891_v50 = vld [vmem:[%s1408_s1 + $0x58] sm:$0xff] }
   0xa   :  { %993 = vmatprep.mubr.msk.f32.mxu1 %vm47_vm0, %v40_v18  ;;  %1037 = vmatprep.mubr.msk.f32.mxu0 %vm47_vm0, %v404_v21  ;;  %v913_v34 = vld [vmem:[%s1408_s1 + $0xc8] sm:$0xff]  ;;  %v888_v35 = vld [vmem:[%s1408_s1 + $0x40] sm:$0xff]  ;;  %v914_v47 = vld [vmem:[%s1408_s1 + $0xd0] sm:$0xff] }
   0xb   :  { %v889_v36 = vld [vmem:[%s1408_s1 + $0x48] sm:$0xff]  ;;  %v1132_v37 = vpack.c.bf16 %v913_v34, %v912_v33  ;;  %v22_v40 = vld [vmem:[%s1409_s0] sm:$0xff]  ;;  %v890_v49 = vld [vmem:[%s1408_s1 + $0x50] sm:$0xff]  ;;  %v1136_v56 = vpack.c.bf16 %v915_v48, %v914_v47 }
   0xc   :  { %1123 = vmatpush3.bf16.msra.mxu0 %v1120_v15  ;;  %1091 = vmatpush3.bf16.msra.mxu1 %v1088_v16  ;;  %v1100_v38 = vpack.c.bf16 %v889_v36, %v888_v35  ;;  %v494_v39 = vld [vmem:[%s1409_s0 + $0x6] sm:$0xff]  ;;  %v495_v46 = vld [vmem:[%s1409_s0 + $0xe] sm:$0xff]  ;;  %v1104_v59 = vpack.c.bf16 %v891_v50, %v890_v49  ;;  %v921_v4 = vld [vmem:[%s1408_s1 + $0xf8] sm:$0xff] }
   0xd   :  { %1125 = vmatprep.subr.bf16.mxu0 %v1124_v23  ;;  %1093 = vmatprep.subr.bf16.mxu1 %v1092_v24  ;;  %v586_v45 = vld [vmem:[%s1409_s0 + $0x8] sm:$0xff]  ;;  %v918_v57 = vld [vmem:[%s1408_s1 + $0xe0] sm:$0xff]  ;;  %v587_v2 = vld [vmem:[%s1409_s0 + $0x10] sm:$0xff] }
   0xe   :  { %v210_v51 = vld [vmem:[%s1409_s0 + $0x2] sm:$0xff]  ;;  %v920_v3 = vld [vmem:[%s1408_s1 + $0xf0] sm:$0xff]  ;;  %v897_v6 = vld [vmem:[%s1408_s1 + $0x78] sm:$0xff] }
   0xf   :  { %1038 = vmatmul.mubr.msk.f32.vlgmr.msra.gmra.mrb[0].mxu0 %vm47_vm0, %v405_v29  ;;  %994 = vmatmul.mubr.msk.f32.vlgmr.msra.gmra.mrb[0].mxu1 %vm47_vm0, %v1275_v30  ;;  %v919_v60 = vld [vmem:[%s1408_s1 + $0xe8] sm:$0xff]  ;;  %v894_v61 = vld [vmem:[%s1408_s1 + $0x60] sm:$0xff]  ;;  %v896_v5 = vld [vmem:[%s1408_s1 + $0x70] sm:$0xff]  ;;  %v1144_v11 = vpack.c.bf16 %v921_v4, %v920_v3 }
  0x10   :  { %1127 = vmatpush3.bf16.msra.mxu0 %v1124_v23  ;;  %1095 = vmatpush3.bf16.msra.mxu1 %v1092_v24  ;;  %v895_v62 = vld [vmem:[%s1408_s1 + $0x68] sm:$0xff]  ;;  %v1140_v0 = vpack.c.bf16 %v919_v60, %v918_v57  ;;  %v1112_v12 = vpack.c.bf16 %v897_v6, %v896_v5  ;;  %v924_v13 = vld [vmem:[%s1408_s1 + $0x100] sm:$0xff]  ;;  %v926_v18 = vld [vmem:[%s1408_s1 + $0x110] sm:$0xff] }
  0x11   :  { %1129 = vmatprep.subr.bf16.mxu0 %v1128_v31  ;;  %1097 = vmatprep.subr.bf16.mxu1 %v1096_v32  ;;  %v1108_v1 = vpack.c.bf16 %v895_v62, %v894_v61  ;;  %v768_v7 = vld [vmem:[%s1409_s0 + $0xa] sm:$0xff]  ;;  %v927_v19 = vld [vmem:[%s1408_s1 + $0x118] sm:$0xff]  ;;  %v930_v29 = vld [vmem:[%s1410_s2] ss:$0 sm:$0xff] }
  0x12   :  { %v312_v8 = vld [vmem:[%s1409_s0 + $0x4] sm:$0xff]  ;;  %v313_v17 = vld [vmem:[%s1409_s0 + $0xc] sm:$0xff]  ;;  %v1152_v22 = vpack.c.bf16 %v927_v19, %v926_v18 }
  0x13   :  { %v925_v14 = vld [vmem:[%s1408_s1 + $0x108] sm:$0xff]  ;;  %v679_v20 = vld [vmem:[%s1409_s0 + $0x11] sm:$0xff] }
  0x14   :  { %1131 = vmatpush3.bf16.msra.mxu0 %v1128_v31  ;;  %1099 = vmatpush3.bf16.msra.mxu1 %v1096_v32  ;;  %v1148_v16 = vpack.c.bf16 %v925_v14, %v924_v13  ;;  %v769_v24 = vld [vmem:[%s1409_s0 + $0x12] sm:$0xff] }
  0x15   :  { %1133 = vmatprep.subr.bf16.mxu0 %v1132_v37  ;;  %1101 = vmatprep.subr.bf16.mxu1 %v1100_v38 }
  0x81   :  { %v1298_v41 = vpop.permute.xlu0 %214  ;;  %v27_v42 = vpop.permute.xlu1 %26 }
  0x82   :  { %v496_v43 = vmul.f32 %v494_v39, %v1298_v41  ;;  %v34_v44 = vmul.f32 %v27_v42, %v22_v40  ;;  %v588_v58 = vmul.f32 %v586_v45, %v27_v42  ;;  %v222_v63 = vmul.f32 %v1298_v41, %v210_v51 }
  0x83   :  { %v314_v15 = vmul.f32 %v312_v8, %v27_v42  ;;  %v770_v23 = vmul.f32 %v768_v7, %v1298_v41 }
  0x84   :  { %1048 = vmatprep.mubr.msk.f32.mxu0 %vm47_vm0, %v496_v43  ;;  %1004 = vmatprep.mubr.msk.f32.mxu1 %vm47_vm0, %v34_v44 }
  0x85   :  { %v1324_v52 = vpop.permute.xlu0 %219 }
  0x86   :  { %v32_v53 = vpop.permute.xlu1 %31  ;;  %v497_v54 = vmul.f32 %v495_v46, %v1324_v52  ;;  %v223_v9 = vmul.f32 %v768_v7, %v1324_v52  ;;  %v771_v25 = vmul.f32 %v769_v24, %v1324_v52 }
  0x87   :  { %v35_v55 = vmul.f32 %v586_v45, %v32_v53  ;;  %v589_v10 = vmul.f32 %v587_v2, %v32_v53  ;;  %v315_v21 = vmul.f32 %v313_v17, %v32_v53 }
  0x88   :  { %1049 = vmatmul.mubr.msk.f32.vlgmr.msra.gmra.mrb[0].mxu0 %vm47_vm0, %v497_v54 }
  0x89   :  { %1005 = vmatmul.mubr.msk.f32.vlgmr.msra.gmra.mrb[0].mxu1 %vm47_vm0, %v35_v55  ;;  %1135 = vmatpush3.bf16.msra.mxu0 %v1132_v37 }
  0x8a   :  { %1103 = vmatpush3.bf16.msra.mxu1 %v1100_v38  ;;  %1015 = vmatprep.mubr.msk.f32.mxu1 %vm47_vm0, %v222_v63 }
  0x8b   :  { %1137 = vmatprep.subr.bf16.mxu0 %v1136_v56  ;;  %1105 = vmatprep.subr.bf16.mxu1 %v1104_v59 }
  0x8c   :  { %1059 = vmatprep.mubr.msk.f32.mxu0 %vm47_vm0, %v588_v58 }
  0x8d   :  { %1139 = vmatpush3.bf16.msra.mxu0 %v1136_v56 }
  0x8e   :  { %1107 = vmatpush3.bf16.msra.mxu1 %v1104_v59  ;;  %1141 = vmatprep.subr.bf16.mxu0 %v1140_v0 }
  0x8f   :  { %1109 = vmatprep.subr.bf16.mxu1 %v1108_v1 }
  0x90   :  { %1060 = vmatmul.mubr.msk.f32.vlgmr.msra.gmra.mrb[0].mxu0 %vm47_vm0, %v589_v10 }
  0x91   :  { %1016 = vmatmul.mubr.msk.f32.vlgmr.msra.gmra.mrb[0].mxu1 %vm47_vm0, %v223_v9  ;;  %1143 = vmatpush3.bf16.msra.mxu0 %v1140_v0 }
  0x92   :  { %1111 = vmatpush3.bf16.msra.mxu1 %v1108_v1  ;;  %1026 = vmatprep.mubr.msk.f32.mxu1 %vm47_vm0, %v314_v15 }
  0x93   :  { %1145 = vmatprep.subr.bf16.mxu0 %v1144_v11  ;;  %1113 = vmatprep.subr.bf16.mxu1 %v1112_v12 }
  0x94   :  { %1070 = vmatprep.mubr.msk.f32.mxu0 %vm47_vm0, %v1275_v30 }
  0x95   :  { %1147 = vmatpush3.bf16.msra.mxu0 %v1144_v11 }
  0x96   :  { %1115 = vmatpush3.bf16.msra.mxu1 %v1112_v12  ;;  %1149 = vmatprep.subr.bf16.mxu0 %v1148_v16 }
  0x98   :  { %1071 = vmatmul.mubr.msk.f32.vlgmr.msra.gmra.mrb[0].mxu0 %vm47_vm0, %v679_v20 }
  0x99   :  { %1027 = vmatmul.mubr.msk.f32.vlgmr.msra.gmra.mrb[0].mxu1 %vm47_vm0, %v315_v21  ;;  %1151 = vmatpush3.bf16.msra.mxu0 %v1148_v16 }
  0x9a   :  { %1081 = vmatprep.mubr.msk.f32.mxu0 %vm47_vm0, %v770_v23  ;;  %1153 = vmatprep.subr.bf16.mxu0 %v1152_v22 }
  0x9d   :  { %1155 = vmatpush3.bf16.msra.mxu0 %v1152_v22 }
  0xa0   :  { %1082 = vmatmul.mubr.msk.f32.vlgmr.msra.gmra.mrb[0].mxu0 %vm47_vm0, %v771_v25 }
 0x16c   :  { %v1028_v26 = vpop.f32.mrb[0].mxu1 }
 0x16d   :  { %v393_v27 = vpop.f32.mrb[1].mxu1 }
 0x173   :  { %v1083_v28 = vpop.f32.mrb[0].mxu0 }
 0x174   :  { %v1156_v30 = vadd.f32 %v1083_v28, %v1028_v26  ;;  %v849_v31 = vpop.f32.mrb[1].mxu0 }
 0x175   :  { %v1157_v32 = vadd.f32 %v849_v31, %v393_v27 }
 0x176   :  { %v868_v33 = vadd.f32 %v1156_v30, %v930_v29 }
 0x177   :  { %v867_v34 = vadd.f32 %v1157_v32, %v930_v29 }
 0x178   :  { %v870_v35 = vmax.f32 %v868_v33, 0.0 }
 0x179   :  { %v869_v36 = vmax.f32 %v867_v34, 0.0 }
 0x17a   :  { %873 = vst.msk [vmem:[%s1411_s4 + $0x8] sm:$0xff] %vm871_vm1, %v870_v35 }
 0x17b   :  { %872 = vst.msk [vmem:[%s1411_s4] sm:$0xff] %vm871_vm1, %v869_v36 }

// kernel: _lambda_.7
= control target key start
LH: loop header
LB: loop body
LE: loop exit
PB: predicated region body
PF: predicated region fallthrough
CT: control target
= control target key end

     0   :  { %v5496_v0 = vmov 0   ;;  %vm438_vm0 = vcmask 1043456   ;;  %vm341_vm1 = vcmask 31744   ;;  %vm4112_vm2 = vcmask 130048   ;;  %s7311_s3 = inlined_call_operand.vmem [shape: f32[2,256,1], index: 3, kind: input, shape index: {}]   ;;  %s7312_s1 = inlined_call_operand.vmem [shape: f32[9,4,16], index: 1, kind: input, shape index: {}]   ;;  %s7313_s0 = inlined_call_operand.vmem [shape: f32[1,290,4], index: 0, kind: input, shape index: {}]   ;;  %s7314_s2 = inlined_call_operand.vmem [shape: f32[1,16], index: 2, kind: input, shape index: {}]   ;;  %s7315_s4 = inlined_call_operand.vmem [shape: f32[1,256,16], index: 4, kind: output, shape index: {}]  }
   0x1   :  { %5494 = vset.pattern.permute.xlu1 %v5496_v0  ;;  %5493 = vset.pattern.permute.xlu0 %v5496_v0  ;;  %v4151_v1 = vld [vmem:[%s7311_s3 + $0x110] sm:$0xff]  ;;  %v4149_v2 = vld [vmem:[%s7311_s3 + $0x100] sm:$0xff]  ;;  %v4152_v3 = vld [vmem:[%s7311_s3 + $0x118] sm:$0xff] }
   0x2   :  { %1035 = vperm.xlu1 %5494, %v4151_v1   ;;  %1025 = vperm.xlu0 %5493, %v4149_v2   ;;  %v4150_v4 = vld [vmem:[%s7311_s3 + $0x108] sm:$0xff]  ;;  %v4153_v6 = vld [vmem:[%s7311_s3 + $0x120] sm:$0xff]  ;;  %v4156_v7 = vld [vmem:[%s7311_s3 + $0x138] sm:$0xff] }
   0x3   :  { %v4154_v5 = vld [vmem:[%s7311_s3 + $0x128] sm:$0xff]  ;;  %v4155_v8 = vld [vmem:[%s7311_s3 + $0x130] sm:$0xff]  ;;  %v4157_v10 = vld [vmem:[%s7311_s3 + $0x140] sm:$0xff] }
   0x4   :  { %v4158_v9 = vld [vmem:[%s7311_s3 + $0x148] sm:$0xff]  ;;  %v4181_v11 = vld [vmem:[%s7312_s1 + $0x4] sm:$0xf]  ;;  %v4160_v12 = vld [vmem:[%s7311_s3 + $0x158] sm:$0xff] }
   0x5   :  { %v4316_v13 = vld [vmem:[%s7312_s1 + $0x10] sm:$0xf]  ;;  %4784 = vmatprep.subr.msk.mxu1 %vm438_vm0, %v4181_v11  ;;  %v307_v15 = vld [vmem:[%s7313_s0 + $0x1] sm:$0xff]  ;;  %v1996_v18 = vld [vmem:[%s7313_s0 + $0x19] sm:$0xff] }
   0x6   :  { %1040 = vperm.xlu1 %5494, %v4152_v3   ;;  %1030 = vperm.xlu0 %5493, %v4150_v4   ;;  %v4159_v14 = vld [vmem:[%s7311_s3 + $0x150] sm:$0xff]  ;;  %v1997_v19 = vld [vmem:[%s7313_s0 + $0x21] sm:$0xff]  ;;  %v4164_v24 = vld [vmem:[%s7311_s3 + $0x178] sm:$0xff] }
   0x7   :  { %4984 = vmatprep.subr.msk.mxu0 %vm438_vm0, %v4316_v13  ;;  %v1995_v16 = vld [vmem:[%s7313_s0 + $0x11] sm:$0xff]  ;;  %4785 = vmatpush3.msk.msra.mxu1 %vm438_vm0, %v4181_v11  ;;  %v308_v17 = vld [vmem:[%s7313_s0 + $0x9] sm:$0xff]  ;;  %v4161_v21 = vld [vmem:[%s7311_s3 + $0x160] sm:$0xff] }
   0x8   :  { %4786 = vmatprep.mubr.msk.f32.mxu1 %vm341_vm1, %v307_v15  ;;  %4985 = vmatpush3.msk.msra.mxu0 %vm438_vm0, %v4316_v13  ;;  %v4162_v20 = vld [vmem:[%s7311_s3 + $0x168] sm:$0xff]  ;;  %v1999_v23 = vld [vmem:[%s7313_s0 + $0x31] sm:$0xff]  ;;  %v2000_v26 = vld [vmem:[%s7313_s0 + $0x39] sm:$0xff] }
   0x9   :  { %4986 = vmatprep.mubr.msk.f32.mxu0 %vm341_vm1, %v1995_v16  ;;  %4787 = vmatmul.mubr.msk.f32.vlgmr.msra.gmra.mrb[0].mxu1 %vm341_vm1, %v308_v17  ;;  %v1998_v22 = vld [vmem:[%s7313_s0 + $0x29] sm:$0xff]  ;;  %v2001_v27 = vld [vmem:[%s7313_s0 + $0x41] sm:$0xff]  ;;  %v4350_v29 = vld [vmem:[%s7312_s1 + $0x14] sm:$0xf] }
   0xa   :  { %1050 = vperm.xlu1 %5494, %v4154_v5   ;;  %1045 = vperm.xlu0 %5493, %v4153_v6   ;;  %v4163_v25 = vld [vmem:[%s7311_s3 + $0x170] sm:$0xff]  ;;  %v306_v28 = vld [vmem:[%s7312_s1] sm:$0xf]  ;;  %v4166_v34 = vld [vmem:[%s7311_s3 + $0x188] sm:$0xff] }
   0xb   :  { %4987 = vmatmul.mubr.msk.f32.vlgmr.msra.gmra.mrb[0].mxu0 %vm341_vm1, %v1996_v18  ;;  %4789 = vmatprep.mubr.msk.f32.mxu1 %vm341_vm1, %v1995_v16  ;;  %v4165_v30 = vld [vmem:[%s7311_s3 + $0x180] sm:$0xff]  ;;  %v2002_v32 = vld [vmem:[%s7313_s0 + $0x49] sm:$0xff]  ;;  %v2003_v33 = vld [vmem:[%s7313_s0 + $0x51] sm:$0xff] }
   0xc   :  { %4989 = vmatprep.mubr.msk.f32.mxu0 %vm341_vm1, %v1997_v19  ;;  %v17_v31 = vld [vmem:[%s7311_s3] sm:$0xff]  ;;  %4834 = vmatprep.subr.msk.mxu1 %vm438_vm0, %v306_v28  ;;  %v18_v35 = vld [vmem:[%s7311_s3 + $0x8] sm:$0xff]  ;;  %v4167_v38 = vld [vmem:[%s7311_s3 + $0x190] sm:$0xff] }
   0xd   :  { %4790 = vmatmul.mubr.msk.f32.gmra.mrb[2].mxu1 %vm341_vm1, %v1996_v18  ;;  %5034 = vmatprep.subr.msk.mxu0 %vm438_vm0, %v4350_v29  ;;  %v2004_v36 = vld [vmem:[%s7313_s0 + $0x59] sm:$0xff]  ;;  %v2005_v37 = vld [vmem:[%s7313_s0 + $0x61] sm:$0xff]  ;;  %v19_v39 = vld [vmem:[%s7311_s3 + $0x10] sm:$0xff] }
   0xe   :  { %1060 = vperm.xlu1 %5494, %v4156_v7   ;;  %1055 = vperm.xlu0 %5493, %v4155_v8   ;;  %v2006_v40 = vld [vmem:[%s7313_s0 + $0x69] sm:$0xff]  ;;  %v2007_v41 = vld [vmem:[%s7313_s0 + $0x71] sm:$0xff]  ;;  %v2008_v45 = vld [vmem:[%s7313_s0 + $0x79] sm:$0xff] }
   0xf   :  { %4990 = vmatmul.mubr.msk.f32.gmra.mrb[2].mxu0 %vm341_vm1, %v1998_v22  ;;  %4792 = vmatprep.mubr.msk.f32.mxu1 %vm341_vm1, %v1997_v19  ;;  %v5678_v42 = vld [vmem:[%s7312_s1 + $0x18] sm:$0xf]  ;;  %v2009_v46 = vld [vmem:[%s7313_s0 + $0x81] sm:$0xff]  ;;  %v2010_v49 = vld [vmem:[%s7313_s0 + $0x89] sm:$0xff] }
  0x10   :  { %4992 = vmatprep.mubr.msk.f32.mxu0 %vm341_vm1, %v1999_v23  ;;  %4835 = vmatpush3.msk.msra.mxu1 %vm438_vm0, %v306_v28  ;;  %v4168_v43 = vld [vmem:[%s7311_s3 + $0x198] sm:$0xff]  ;;  %v4169_v47 = vld [vmem:[%s7311_s3 + $0x1a0] sm:$0xff]  ;;  %v4170_v50 = vld [vmem:[%s7311_s3 + $0x1a8] sm:$0xff] }
  0x11   :  { %4793 = vmatmul.mubr.msk.f32.gmra.mrb[4].mxu1 %vm341_vm1, %v1998_v22  ;;  %5035 = vmatpush3.msk.msra.mxu0 %vm438_vm0, %v4350_v29  ;;  %v20_v44 = vld [vmem:[%s7311_s3 + $0x18] sm:$0xff]  ;;  %v21_v48 = vld [vmem:[%s7311_s3 + $0x20] sm:$0xff]  ;;  %v22_v51 = vld [vmem:[%s7311_s3 + $0x28] sm:$0xff] }
  0x12   :  { %1070 = vperm.xlu1 %5494, %v4158_v9   ;;  %1065 = vperm.xlu0 %5493, %v4157_v10   ;;  %v325_v52 = vld [vmem:[%s7313_s0 + $0x91] sm:$0xff]  ;;  %v326_v55 = vld [vmem:[%s7313_s0 + $0x99] sm:$0xff]  ;;  %v327_v56 = vld [vmem:[%s7313_s0 + $0xa1] sm:$0xff] }
  0x13   :  { %4993 = vmatmul.mubr.msk.f32.gmra.mrb[4].mxu0 %vm341_vm1, %v2000_v26  ;;  %4795 = vmatprep.mubr.msk.f32.mxu1 %vm341_vm1, %v1999_v23  ;;  %v4171_v53 = vld [vmem:[%s7311_s3 + $0x1b0] sm:$0xff]  ;;  %v4172_v57 = vld [vmem:[%s7311_s3 + $0x1b8] sm:$0xff]  ;;  %v4173_v61 = vld [vmem:[%s7311_s3 + $0x1c0] sm:$0xff] }
  0x14   :  { %4995 = vmatprep.mubr.msk.f32.mxu0 %vm341_vm1, %v2001_v27  ;;  %5084 = vmatprep.subr.msk.mxu0 %vm438_vm0, %v5678_v42  ;;  %v23_v54 = vld [vmem:[%s7311_s3 + $0x30] sm:$0xff]  ;;  %v24_v58 = vld [vmem:[%s7311_s3 + $0x38] sm:$0xff]  ;;  %v25_v62 = vld [vmem:[%s7311_s3 + $0x40] sm:$0xff] }
  0x15   :  { %4796 = vmatmul.mubr.msk.f32.gmra.mrb[6].mxu1 %vm341_vm1, %v2000_v26  ;;  %v328_v59 = vld [vmem:[%s7313_s0 + $0xa9] sm:$0xff]  ;;  %v329_v60 = vld [vmem:[%s7313_s0 + $0xb1] sm:$0xff]  ;;  %v330_v63 = vld [vmem:[%s7313_s0 + $0xb9] sm:$0xff] }
  0x16   :  { %1080 = vperm.xlu1 %5494, %v4160_v12   ;;  %1075 = vperm.xlu0 %5493, %v4159_v14   ;;  %v331_v0 = vld [vmem:[%s7313_s0 + $0xc1] sm:$0xff]  ;;  %v332_v3 = vld [vmem:[%s7313_s0 + $0xc9] sm:$0xff]  ;;  %v333_v5 = vld [vmem:[%s7313_s0 + $0xd1] sm:$0xff] }
  0x17   :  { %4996 = vmatmul.mubr.msk.f32.gmra.mrb[6].mxu0 %vm341_vm1, %v2002_v32  ;;  %4798 = vmatprep.mubr.msk.f32.mxu1 %vm341_vm1, %v2001_v27  ;;  %v4174_v1 = vld [vmem:[%s7311_s3 + $0x1c8] sm:$0xff]  ;;  %v4175_v6 = vld [vmem:[%s7311_s3 + $0x1d0] sm:$0xff]  ;;  %v334_v8 = vld [vmem:[%s7313_s0 + $0xd9] sm:$0xff] }
  0x18   :  { %4998 = vmatprep.mubr.msk.f32.mxu0 %vm341_vm1, %v2003_v33  ;;  %v26_v2 = vld [vmem:[%s7311_s3 + $0x48] sm:$0xff]  ;;  %v27_v7 = vld [vmem:[%s7311_s3 + $0x50] sm:$0xff]  ;;  %v4176_v10 = vld [vmem:[%s7311_s3 + $0x1d8] sm:$0xff] }
  0x19   :  { %4799 = vmatmul.mubr.msk.f32.gmra.mrb[8].mxu1 %vm341_vm1, %v2002_v32  ;;  %v5779_v4 = vld [vmem:[%s7312_s1 + $0x8] sm:$0xf]  ;;  %v28_v11 = vld [vmem:[%s7311_s3 + $0x58] sm:$0xff]  ;;  %v4177_v14 = vld [vmem:[%s7311_s3 + $0x1e0] sm:$0xff] }
  0x1a   :  { %1090 = vperm.xlu1 %5494, %v4162_v20   ;;  %1085 = vperm.xlu0 %5493, %v4161_v21   ;;  %v335_v9 = vld [vmem:[%s7313_s0 + $0xe1] sm:$0xff]  ;;  %v336_v12 = vld [vmem:[%s7313_s0 + $0xe9] sm:$0xff]  ;;  %v337_v13 = vld [vmem:[%s7313_s0 + $0xf1] sm:$0xff] }
  0x1b   :  { %4999 = vmatmul.mubr.msk.f32.gmra.mrb[8].mxu0 %vm341_vm1, %v2004_v36  ;;  %4801 = vmatprep.mubr.msk.f32.mxu1 %vm341_vm1, %v2003_v33  ;;  %v29_v15 = vld [vmem:[%s7311_s3 + $0x60] sm:$0xff]  ;;  %v4178_v17 = vld [vmem:[%s7311_s3 + $0x1e8] sm:$0xff]  ;;  %v4179_v19 = vld [vmem:[%s7311_s3 + $0x1f0] sm:$0xff] }
  0x1c   :  { %5001 = vmatprep.mubr.msk.f32.mxu0 %vm341_vm1, %v2005_v37  ;;  %4884 = vmatprep.subr.msk.mxu1 %vm438_vm0, %v5779_v4  ;;  %v338_v16 = vld [vmem:[%s7313_s0 + $0xf9] sm:$0xff]  ;;  %v30_v18 = vld [vmem:[%s7311_s3 + $0x68] sm:$0xff]  ;;  %v31_v20 = vld [vmem:[%s7311_s3 + $0x70] sm:$0xff] }
  0x1d   :  { %4802 = vmatmul.mubr.msk.f32.gmra.mrb[10].mxu1 %vm341_vm1, %v2004_v36  ;;  %v4180_v21 = vld [vmem:[%s7311_s3 + $0x1f8] sm:$0xff]  ;;  %v34_v23 = vld [vmem:[%s7311_s3 + $0x88] sm:$0xff]  ;;  %v35_v26 = vld [vmem:[%s7311_s3 + $0x90] sm:$0xff] }
  0x1e   :  { %1100 = vperm.xlu1 %5494, %v4164_v24   ;;  %1095 = vperm.xlu0 %5493, %v4163_v25   ;;  %v32_v22 = vld [vmem:[%s7311_s3 + $0x78] sm:$0xff]  ;;  %v33_v24 = vld [vmem:[%s7311_s3 + $0x80] sm:$0xff]  ;;  %v38_v27 = vld [vmem:[%s7311_s3 + $0xa8] sm:$0xff] }
  0x1f   :  { %5002 = vmatmul.mubr.msk.f32.gmra.mrb[10].mxu0 %vm341_vm1, %v2006_v40  ;;  %4804 = vmatprep.mubr.msk.f32.mxu1 %vm341_vm1, %v2005_v37  ;;  %v36_v25 = vld [vmem:[%s7311_s3 + $0x98] sm:$0xff]  ;;  %v37_v28 = vld [vmem:[%s7311_s3 + $0xa0] sm:$0xff] }
  0x20   :  { %5004 = vmatprep.mubr.msk.f32.mxu0 %vm341_vm1, %v2007_v41  ;;  %v40_v29 = vld [vmem:[%s7311_s3 + $0xb8] sm:$0xff]  ;;  %v41_v32 = vld [vmem:[%s7311_s3 + $0xc0] sm:$0xff] }
  0x21   :  { %4805 = vmatmul.mubr.msk.f32.gmra.mrb[12].mxu1 %vm341_vm1, %v2006_v40  ;;  %v44_v33 = vld [vmem:[%s7311_s3 + $0xd8] sm:$0xff]  ;;  %v45_v36 = vld [vmem:[%s7311_s3 + $0xe0] sm:$0xff] }
  0x22   :  { %1105 = vperm.xlu1 %5494, %v4165_v30   ;;  %116 = vperm.xlu0 %5493, %v17_v31   ;;  %v39_v30 = vld [vmem:[%s7311_s3 + $0xb0] sm:$0xff]  ;;  %v42_v31 = vld [vmem:[%s7311_s3 + $0xc8] sm:$0xff]  ;;  %v48_v37 = vld [vmem:[%s7311_s3 + $0xf8] sm:$0xff] }
  0x23   :  { %5005 = vmatmul.mubr.msk.f32.gmra.mrb[12].mxu0 %vm341_vm1, %v2008_v45  ;;  %4807 = vmatprep.mubr.msk.f32.mxu1 %vm341_vm1, %v2007_v41  ;;  %v3621_v40 = vld [vmem:[%s7313_s0 + $0x32] sm:$0xff]  ;;  %v2387_v41 = vld [vmem:[%s7313_s0 + $0x22] sm:$0xff] }
  0x24   :  { %5007 = vmatprep.mubr.msk.f32.mxu0 %vm341_vm1, %v2009_v46 }
  0x25   :  { %4808 = vmatmul.mubr.msk.f32.gmra.mrb[14].mxu1 %vm341_vm1, %v2008_v45 }
  0x26   :  { %1110 = vperm.xlu1 %5494, %v4166_v34   ;;  %121 = vperm.xlu0 %5493, %v18_v35   ;;  %v43_v34 = vld [vmem:[%s7311_s3 + $0xd0] sm:$0xff]  ;;  %v46_v35 = vld [vmem:[%s7311_s3 + $0xe8] sm:$0xff] }
  0x27   :  { %5008 = vmatmul.mubr.msk.f32.gmra.mrb[14].mxu0 %vm341_vm1, %v2010_v49  ;;  %4810 = vmatprep.mubr.msk.f32.mxu1 %vm341_vm1, %v2009_v46 }
  0x29   :  { %4811 = vmatmul.mubr.msk.f32.gmra.mrb[16].mxu1 %vm341_vm1, %v2010_v49  ;;  %v994_v49 = vld [vmem:[%s7313_s0 + $0x1a] sm:$0xff] }
  0x2a   :  { %1115 = vperm.xlu1 %5494, %v4167_v38   ;;  %126 = vperm.xlu0 %5493, %v19_v39   ;;  %v47_v38 = vld [vmem:[%s7311_s3 + $0xf0] sm:$0xff] }
  0x2b   :  { %4813 = vmatprep.mubr.msk.f32.mxu1 %vm341_vm1, %v325_v52  ;;  %v993_v39 = vld [vmem:[%s7313_s0 + $0x12] sm:$0xff] }
  0x2d   :  { %4814 = vmatmul.mubr.msk.f32.gmra.mrb[18].mxu1 %vm341_vm1, %v326_v55 }
  0x2e   :  { %1120 = vperm.xlu1 %5494, %v4168_v43   ;;  %131 = vperm.xlu0 %5493, %v20_v44  }
  0x2f   :  { %4816 = vmatprep.mubr.msk.f32.mxu1 %vm341_vm1, %v327_v56 }
  0x31   :  { %4817 = vmatmul.mubr.msk.f32.gmra.mrb[20].mxu1 %vm341_vm1, %v328_v59 }
  0x32   :  { %1125 = vperm.xlu1 %5494, %v4169_v47   ;;  %136 = vperm.xlu0 %5493, %v21_v48  }
  0x33   :  { %4819 = vmatprep.mubr.msk.f32.mxu1 %vm341_vm1, %v329_v60  ;;  %v3623_v60 = vld [vmem:[%s7313_s0 + $0x42] sm:$0xff] }
  0x35   :  { %4820 = vmatmul.mubr.msk.f32.gmra.mrb[22].mxu1 %vm341_vm1, %v330_v63  ;;  %v5941_v63 = vld [vmem:[%s7312_s1 + $0x1c] sm:$0xf] }
  0x36   :  { %1130 = vperm.xlu1 %5494, %v4170_v50   ;;  %141 = vperm.xlu0 %5493, %v22_v51   ;;  %v3622_v50 = vld [vmem:[%s7313_s0 + $0x3a] sm:$0xff]  ;;  %v2388_v51 = vld [vmem:[%s7313_s0 + $0x2a] sm:$0xff] }
  0x37   :  { %4822 = vmatprep.mubr.msk.f32.mxu1 %vm341_vm1, %v331_v0 }
  0x39   :  { %4823 = vmatmul.mubr.msk.f32.gmra.mrb[24].mxu1 %vm341_vm1, %v332_v3 }
  0x3a   :  { %1135 = vperm.xlu1 %5494, %v4171_v53   ;;  %146 = vperm.xlu0 %5493, %v23_v54  }
  0x3b   :  { %4825 = vmatprep.mubr.msk.f32.mxu1 %vm341_vm1, %v333_v5 }
  0x3d   :  { %4826 = vmatmul.mubr.msk.f32.gmra.mrb[26].mxu1 %vm341_vm1, %v334_v8  ;;  %v3625_v8 = vld [vmem:[%s7313_s0 + $0x52] sm:$0xff] }
  0x3e   :  { %1140 = vperm.xlu1 %5494, %v4172_v57   ;;  %151 = vperm.xlu0 %5493, %v24_v58   ;;  %v3624_v58 = vld [vmem:[%s7313_s0 + $0x4a] sm:$0xff] }
  0x3f   :  { %4828 = vmatprep.mubr.msk.f32.mxu1 %vm341_vm1, %v335_v9 }
  0x41   :  { %4829 = vmatmul.mubr.msk.f32.gmra.mrb[28].mxu1 %vm341_vm1, %v336_v12 }
  0x42   :  { %1145 = vperm.xlu1 %5494, %v4173_v61   ;;  %156 = vperm.xlu0 %5493, %v25_v62  }
  0x43   :  { %4831 = vmatprep.mubr.msk.f32.mxu1 %vm341_vm1, %v337_v13 }
  0x45   :  { %4832 = vmatmul.mubr.msk.f32.gmra.mrb[30].mxu1 %vm341_vm1, %v338_v16  ;;  %v3628_v16 = vld [vmem:[%s7313_s0 + $0x6a] sm:$0xff] }
  0x46   :  { %1150 = vperm.xlu1 %5494, %v4174_v1   ;;  %161 = vperm.xlu0 %5493, %v26_v2  }
  0x4a   :  { %1155 = vperm.xlu1 %5494, %v4175_v6   ;;  %166 = vperm.xlu0 %5493, %v27_v7   ;;  %v3626_v7 = vld [vmem:[%s7313_s0 + $0x5a] sm:$0xff] }
  0x4e   :  { %1160 = vperm.xlu1 %5494, %v4176_v10   ;;  %171 = vperm.xlu0 %5493, %v28_v11  }
  0x52   :  { %1165 = vperm.xlu1 %5494, %v4177_v14   ;;  %176 = vperm.xlu0 %5493, %v29_v15  }
  0x56   :  { %1170 = vperm.xlu1 %5494, %v4178_v17   ;;  %181 = vperm.xlu0 %5493, %v30_v18   ;;  %v3627_v17 = vld [vmem:[%s7313_s0 + $0x62] sm:$0xff] }
  0x5a   :  { %1175 = vperm.xlu1 %5494, %v4179_v19   ;;  %186 = vperm.xlu0 %5493, %v31_v20  }
  0x5e   :  { %1180 = vperm.xlu1 %5494, %v4180_v21   ;;  %191 = vperm.xlu0 %5493, %v32_v22  }
  0x62   :  { %201 = vperm.xlu1 %5494, %v34_v23   ;;  %196 = vperm.xlu0 %5493, %v33_v24  }
  0x66   :  { %211 = vperm.xlu1 %5494, %v36_v25   ;;  %206 = vperm.xlu0 %5493, %v35_v26   ;;  %v3630_v26 = vld [vmem:[%s7313_s0 + $0x7a] sm:$0xff] }
  0x6a   :  { %221 = vperm.xlu1 %5494, %v38_v27   ;;  %216 = vperm.xlu0 %5493, %v37_v28   ;;  %v3629_v27 = vld [vmem:[%s7313_s0 + $0x72] sm:$0xff] }
  0x6e   :  { %231 = vperm.xlu1 %5494, %v40_v29   ;;  %226 = vperm.xlu0 %5493, %v39_v30  }
  0x72   :  { %241 = vperm.xlu1 %5494, %v42_v31   ;;  %236 = vperm.xlu0 %5493, %v41_v32  }
  0x76   :  { %251 = vperm.xlu1 %5494, %v44_v33   ;;  %246 = vperm.xlu0 %5493, %v43_v34  }
  0x7a   :  { %261 = vperm.xlu1 %5494, %v46_v35   ;;  %256 = vperm.xlu0 %5493, %v45_v36   ;;  %v3632_v36 = vld [vmem:[%s7313_s0 + $0x8a] sm:$0xff] }
  0x7e   :  { %271 = vperm.xlu1 %5494, %v48_v37   ;;  %266 = vperm.xlu0 %5493, %v47_v38   ;;  %v3631_v37 = vld [vmem:[%s7313_s0 + $0x82] sm:$0xff] }
  0x81   :  { %v1036_v43 = vpop.permute.xlu1 %1035  ;;  %v5901_v44 = vpop.permute.xlu0 %1025 }
  0x82   :  { %v5903_v45 = vmul.f32 %v1036_v43, %v993_v39  ;;  %v5905_v46 = vmul.f32 %v3621_v40, %v1036_v43  ;;  %v2417_v47 = vmul.f32 %v5901_v44, %v993_v39  ;;  %v5909_v48 = vmul.f32 %v2387_v41, %v5901_v44 }
  0x83   :  { %v2419_v59 = vmul.f32 %v2387_v41, %v1036_v43 }
  0x84   :  { %7318 = vst [vmem:[#allocation2_spill] sm:$0xff] %v5905_v46  ;;  %7319 = vst [vmem:[#allocation3_spill] sm:$0xff] %v5909_v48  ;;  %5036 = vmatprep.mubr.msk.f32.mxu0 %vm341_vm1, %v2417_v47 }
  0x85   :  { %v1041_v52 = vpop.permute.xlu1 %1040  ;;  %v5921_v53 = vpop.permute.xlu0 %1030 }
  0x86   :  { %v5923_v54 = vmul.f32 %v1041_v52, %v994_v49  ;;  %v5925_v55 = vmul.f32 %v3622_v50, %v1041_v52  ;;  %v2418_v56 = vmul.f32 %v5921_v53, %v994_v49  ;;  %v5929_v57 = vmul.f32 %v2388_v51, %v5921_v53 }
  0x87   :  { %v2420_v3 = vmul.f32 %v2388_v51, %v1041_v52  ;;  %v3633_v52 = vld [vmem:[%s7313_s0 + $0x92] sm:$0xff] }
  0x88   :  { %7320 = vst [vmem:[#allocation4_spill] sm:$0xff] %v5925_v55  ;;  %7321 = vst [vmem:[#allocation5_spill] sm:$0xff] %v5929_v57  ;;  %5037 = vmatmul.mubr.msk.f32.vlgmr.msra.gmra.mrb[0].mxu0 %vm341_vm1, %v2418_v56 }
  0x89   :  { %v1051_v61 = vpop.permute.xlu1 %1050  ;;  %v1046_v62 = vpop.permute.xlu0 %1045  ;;  %5039 = vmatprep.mubr.msk.f32.mxu0 %vm341_vm1, %v2419_v59  ;;  %5085 = vmatpush3.msk.msra.mxu0 %vm438_vm0, %v5678_v42 }
  0x8a   :  { %v5943_v0 = vmul.f32 %v2388_v51, %v1051_v61  ;;  %v5945_v1 = vmul.f32 %v3624_v58, %v1051_v61  ;;  %v5947_v2 = vmul.f32 %v2387_v41, %v1046_v62  ;;  %v2421_v5 = vmul.f32 %v3621_v40, %v1046_v62  ;;  %5134 = vmatprep.subr.msk.mxu0 %vm438_vm0, %v5941_v63  ;;  %v3634_v51 = vld [vmem:[%s7313_s0 + $0x9a] sm:$0xff] }
  0x8b   :  { %v5950_v6 = vmul.f32 %v3623_v60, %v1046_v62  ;;  %v2422_v42 = vmul.f32 %v3622_v50, %v1051_v61 }
  0x8c   :  { %7322 = vst [vmem:[#allocation6_spill] sm:$0xff] %v5945_v1  ;;  %5040 = vmatmul.mubr.msk.f32.gmra.mrb[2].mxu0 %vm341_vm1, %v2420_v3 }
  0x8d   :  { %7323 = vst [vmem:[#allocation7_spill] sm:$0xff] %v5950_v6  ;;  %v1061_v9 = vpop.permute.xlu1 %1060  ;;  %v1056_v10 = vpop.permute.xlu0 %1055  ;;  %5042 = vmatprep.mubr.msk.f32.mxu0 %vm341_vm1, %v2421_v5 }
  0x8e   :  { %v5963_v11 = vmul.f32 %v3622_v50, %v1061_v9  ;;  %v5965_v12 = vmul.f32 %v3626_v7, %v1061_v9  ;;  %v5967_v13 = vmul.f32 %v3621_v40, %v1056_v10  ;;  %v2423_v14 = vmul.f32 %v3623_v60, %v1056_v10 }
  0x8f   :  { %v5970_v15 = vmul.f32 %v3625_v8, %v1056_v10  ;;  %v2424_v23 = vmul.f32 %v3624_v58, %v1061_v9  ;;  %v1573_v9 = vld [vmem:[%s7313_s0 + $0x10] sm:$0xff] }
  0x90   :  { %7324 = vst [vmem:[#allocation8_spill] sm:$0xff] %v5965_v12  ;;  %5043 = vmatmul.mubr.msk.f32.gmra.mrb[4].mxu0 %vm341_vm1, %v2422_v42 }
  0x91   :  { %7325 = vst [vmem:[#allocation9_spill] sm:$0xff] %v5970_v15  ;;  %v1071_v18 = vpop.permute.xlu1 %1070  ;;  %v1066_v19 = vpop.permute.xlu0 %1065  ;;  %5045 = vmatprep.mubr.msk.f32.mxu0 %vm341_vm1, %v2423_v14 }
  0x92   :  { %v5979_v20 = vmul.f32 %v3624_v58, %v1071_v18  ;;  %v5981_v21 = vmul.f32 %v3628_v16, %v1071_v18  ;;  %v5983_v22 = vmul.f32 %v3623_v60, %v1066_v19  ;;  %v2425_v24 = vmul.f32 %v3625_v8, %v1066_v19 }
  0x93   :  { %v5986_v25 = vmul.f32 %v3627_v17, %v1066_v19  ;;  %v2426_v33 = vmul.f32 %v3626_v7, %v1071_v18 }
  0x94   :  { %7326 = vst [vmem:[#allocation10_spill] sm:$0xff] %v5981_v21  ;;  %5046 = vmatmul.mubr.msk.f32.gmra.mrb[6].mxu0 %vm341_vm1, %v2424_v23 }
  0x95   :  { %7327 = vst [vmem:[#allocation11_spill] sm:$0xff] %v5986_v25  ;;  %v1081_v28 = vpop.permute.xlu1 %1080  ;;  %v1076_v29 = vpop.permute.xlu0 %1075  ;;  %5048 = vmatprep.mubr.msk.f32.mxu0 %vm341_vm1, %v2425_v24  ;;  %v3636_v24 = vld [vmem:[%s7313_s0 + $0xaa] sm:$0xff] }
  0x96   :  { %v5995_v30 = vmul.f32 %v3626_v7, %v1081_v28  ;;  %v5997_v31 = vmul.f32 %v3630_v26, %v1081_v28  ;;  %v5999_v32 = vmul.f32 %v3625_v8, %v1076_v29  ;;  %v2427_v34 = vmul.f32 %v3627_v17, %v1076_v29  ;;  %v3635_v7 = vld [vmem:[%s7313_s0 + $0xa2] sm:$0xff] }
  0x97   :  { %v6002_v35 = vmul.f32 %v3629_v27, %v1076_v29  ;;  %v2428_v47 = vmul.f32 %v3628_v16, %v1081_v28  ;;  %v82_v8 = vld [vmem:[%s7313_s0] sm:$0xff] }
  0x98   :  { %7328 = vst [vmem:[#allocation12_spill] sm:$0xff] %v5997_v31  ;;  %5049 = vmatmul.mubr.msk.f32.gmra.mrb[8].mxu0 %vm341_vm1, %v2426_v33 }
  0x99   :  { %7329 = vst [vmem:[#allocation13_spill] sm:$0xff] %v6002_v35  ;;  %v1091_v38 = vpop.permute.xlu1 %1090  ;;  %v1086_v39 = vpop.permute.xlu0 %1085  ;;  %5051 = vmatprep.mubr.msk.f32.mxu0 %vm341_vm1, %v2427_v34 }
  0x9a   :  { %v6011_v40 = vmul.f32 %v3628_v16, %v1091_v38  ;;  %v6013_v41 = vmul.f32 %v3632_v36, %v1091_v38  ;;  %v6015_v43 = vmul.f32 %v3627_v17, %v1086_v39  ;;  %v2429_v49 = vmul.f32 %v3629_v27, %v1086_v39 }
  0x9b   :  { %v6018_v50 = vmul.f32 %v3631_v37, %v1086_v39  ;;  %v2430_v62 = vmul.f32 %v3630_v26, %v1091_v38 }
  0x9c   :  { %7330 = vst [vmem:[#allocation14_spill] sm:$0xff] %v6013_v41  ;;  %5052 = vmatmul.mubr.msk.f32.gmra.mrb[10].mxu0 %vm341_vm1, %v2428_v47  ;;  %v3637_v47 = vld [vmem:[%s7313_s0 + $0xb2] sm:$0xff] }
  0x9d   :  { %7331 = vst [vmem:[#allocation15_spill] sm:$0xff] %v6018_v50  ;;  %v1101_v56 = vpop.permute.xlu1 %1100  ;;  %v1096_v58 = vpop.permute.xlu0 %1095  ;;  %5054 = vmatprep.mubr.msk.f32.mxu0 %vm341_vm1, %v2429_v49  ;;  %v6085_v49 = vld [vmem:[%s7312_s1 + $0xc] sm:$0xf] }
  0x9e   :  { %v6027_v59 = vmul.f32 %v3630_v26, %v1101_v56  ;;  %v6029_v60 = vmul.f32 %v3634_v51, %v1101_v56  ;;  %v6031_v61 = vmul.f32 %v3629_v27, %v1096_v58  ;;  %v2431_v3 = vmul.f32 %v3631_v37, %v1096_v58  ;;  %v83_v26 = vld [vmem:[%s7313_s0 + $0x8] sm:$0xff]  ;;  %v1574_v27 = vld [vmem:[%s7313_s0 + $0x18] sm:$0xff] }
  0x9f   :  { %v6034_v5 = vmul.f32 %v3633_v52, %v1096_v58  ;;  %v2432_v19 = vmul.f32 %v3632_v36, %v1101_v56  ;;  %v6096_v58 = vld [vmem:[%s7313_s0 + $0x20] sm:$0xff] }
  0xa0   :  { %7332 = vst [vmem:[#allocation16_spill] sm:$0xff] %v6029_v60  ;;  %5055 = vmatmul.mubr.msk.f32.gmra.mrb[12].mxu0 %vm341_vm1, %v2430_v62 }
  0xa1   :  { %7333 = vst [vmem:[#allocation17_spill] sm:$0xff] %v6034_v5  ;;  %v1106_v10 = vpop.permute.xlu1 %1105  ;;  %v6046_v42 = vpop.permute.xlu0 %116  ;;  %5057 = vmatprep.mubr.msk.f32.mxu0 %vm341_vm1, %v2431_v3 }
  0xa2   :  { %v6048_v14 = vmul.f32 %v3631_v37, %v1106_v10  ;;  %v2433_v16 = vmul.f32 %v3633_v52, %v1106_v10  ;;  %v6050_v17 = vmul.f32 %v3635_v7, %v1106_v10  ;;  %v274_v18 = vmul.f32 %v6046_v42, %v82_v8 }
  0xa3   :  { %v6055_v23 = vmul.f32 %v1573_v9, %v6046_v42 }
  0xa4   :  { %7334 = vst [vmem:[#allocation18_spill] sm:$0xff] %v6050_v17  ;;  %4836 = vmatprep.mubr.msk.f32.mxu1 %vm341_vm1, %v274_v18  ;;  %5058 = vmatmul.mubr.msk.f32.gmra.mrb[14].mxu0 %vm341_vm1, %v2432_v19 }
  0xa5   :  { %7335 = vst [vmem:[#allocation19_spill] sm:$0xff] %v6055_v23  ;;  %v1111_v28 = vpop.permute.xlu1 %1110  ;;  %v6068_v29 = vpop.permute.xlu0 %121  ;;  %5060 = vmatprep.mubr.msk.f32.mxu0 %vm341_vm1, %v2433_v16 }
  0xa6   :  { %v6070_v33 = vmul.f32 %v3632_v36, %v1111_v28  ;;  %v2434_v34 = vmul.f32 %v3634_v51, %v1111_v28  ;;  %v6072_v37 = vmul.f32 %v3636_v24, %v1111_v28  ;;  %v275_v38 = vmul.f32 %v6068_v29, %v83_v26 }
  0xa7   :  { %v6077_v39 = vmul.f32 %v1574_v27, %v6068_v29 }
  0xa8   :  { %7336 = vst [vmem:[#allocation20_spill] sm:$0xff] %v6072_v37  ;;  %4837 = vmatmul.mubr.msk.f32.vlgmr.msra.gmra.mrb[0].mxu1 %vm341_vm1, %v275_v38  ;;  %5061 = vmatmul.mubr.msk.f32.gmra.mrb[16].mxu0 %vm341_vm1, %v2434_v34 }
  0xa9   :  { %7337 = vst [vmem:[#allocation21_spill] sm:$0xff] %v6077_v39  ;;  %v1116_v36 = vpop.permute.xlu1 %1115  ;;  %v6089_v56 = vpop.permute.xlu0 %126  ;;  %4885 = vmatpush3.msk.msra.mxu1 %vm438_vm0, %v5779_v4  ;;  %v3638_v4 = vld [vmem:[%s7313_s0 + $0xba] sm:$0xff] }
  0xaa   :  { %v6098_v62 = vmul.f32 %v3633_v52, %v1116_v36  ;;  %v2435_v3 = vmul.f32 %v3635_v7, %v1116_v36  ;;  %v6100_v8 = vmul.f32 %v3637_v47, %v1116_v36  ;;  %v276_v10 = vmul.f32 %v1573_v9, %v6089_v56  ;;  %4934 = vmatprep.subr.msk.mxu1 %vm438_vm0, %v6085_v49  ;;  %v6119_v9 = vld [vmem:[%s7313_s0 + $0x28] sm:$0xff] }
  0xab   :  { %v6107_v16 = vmul.f32 %v6096_v58, %v6089_v56  ;;  %v3639_v36 = vld [vmem:[%s7313_s0 + $0xc2] sm:$0xff] }
  0xac   :  { %7338 = vst [vmem:[#allocation22_spill] sm:$0xff] %v6100_v8  ;;  %4839 = vmatprep.mubr.msk.f32.mxu1 %vm341_vm1, %v276_v10  ;;  %5063 = vmatprep.mubr.msk.f32.mxu0 %vm341_vm1, %v2435_v3  ;;  %v6140_v10 = vld [vmem:[%s7313_s0 + $0x30] sm:$0xff] }
  0xad   :  { %7339 = vst [vmem:[#allocation23_spill] sm:$0xff] %v6107_v16  ;;  %v1121_v52 = vpop.permute.xlu1 %1120  ;;  %v6114_v18 = vpop.permute.xlu0 %131 }
  0xae   :  { %v6121_v19 = vmul.f32 %v3634_v51, %v1121_v52  ;;  %v2436_v26 = vmul.f32 %v3636_v24, %v1121_v52  ;;  %v6123_v28 = vmul.f32 %v3638_v4, %v1121_v52  ;;  %v277_v34 = vmul.f32 %v1574_v27, %v6114_v18 }
  0xaf   :  { %v6128_v38 = vmul.f32 %v6119_v9, %v6114_v18 }
  0xb0   :  { %7340 = vst [vmem:[#allocation24_spill] sm:$0xff] %v6123_v28  ;;  %4840 = vmatmul.mubr.msk.f32.gmra.mrb[2].mxu1 %vm341_vm1, %v277_v34  ;;  %5064 = vmatmul.mubr.msk.f32.gmra.mrb[18].mxu0 %vm341_vm1, %v2436_v26  ;;  %v3640_v26 = vld [vmem:[%s7313_s0 + $0xca] sm:$0xff] }
  0xb1   :  { %7341 = vst [vmem:[#allocation25_spill] sm:$0xff] %v6128_v38  ;;  %v1126_v3 = vpop.permute.xlu1 %1125  ;;  %v6135_v51 = vpop.permute.xlu0 %136 }
  0xb2   :  { %v6142_v27 = vmul.f32 %v3635_v7, %v1126_v3  ;;  %v2437_v52 = vmul.f32 %v3637_v47, %v1126_v3  ;;  %v6144_v28 = vmul.f32 %v3639_v36, %v1126_v3  ;;  %v278_v8 = vmul.f32 %v6096_v58, %v6135_v51  ;;  %v6162_v3 = vld [vmem:[%s7313_s0 + $0x38] sm:$0xff] }
  0xb3   :  { %v6150_v34 = vmul.f32 %v6140_v10, %v6135_v51 }
  0xb4   :  { %7342 = vst [vmem:[#allocation26_spill] sm:$0xff] %v6144_v28  ;;  %4842 = vmatprep.mubr.msk.f32.mxu1 %vm341_vm1, %v278_v8  ;;  %5066 = vmatprep.mubr.msk.f32.mxu0 %vm341_vm1, %v2437_v52  ;;  %v3641_v52 = vld [vmem:[%s7313_s0 + $0xd2] sm:$0xff] }
  0xb5   :  { %7343 = vst [vmem:[#allocation27_spill] sm:$0xff] %v6150_v34  ;;  %v1131_v7 = vpop.permute.xlu1 %1130  ;;  %v6157_v37 = vpop.permute.xlu0 %141 }
  0xb6   :  { %v6164_v28 = vmul.f32 %v3636_v24, %v1131_v7  ;;  %v2438_v17 = vmul.f32 %v3638_v4, %v1131_v7  ;;  %v6166_v60 = vmul.f32 %v3640_v26, %v1131_v7  ;;  %v279_v5 = vmul.f32 %v6119_v9, %v6157_v37  ;;  %v6184_v7 = vld [vmem:[%s7313_s0 + $0x40] sm:$0xff] }
  0xb7   :  { %v6172_v8 = vmul.f32 %v6162_v3, %v6157_v37 }
  0xb8   :  { %7344 = vst [vmem:[#allocation28_spill] sm:$0xff] %v6166_v60  ;;  %4843 = vmatmul.mubr.msk.f32.gmra.mrb[4].mxu1 %vm341_vm1, %v279_v5  ;;  %5067 = vmatmul.mubr.msk.f32.gmra.mrb[20].mxu0 %vm341_vm1, %v2438_v17  ;;  %v3642_v17 = vld [vmem:[%s7313_s0 + $0xda] sm:$0xff] }
  0xb9   :  { %7345 = vst [vmem:[#allocation29_spill] sm:$0xff] %v6172_v8  ;;  %v1136_v24 = vpop.permute.xlu1 %1135  ;;  %v6179_v41 = vpop.permute.xlu0 %146 }
  0xba   :  { %v6186_v60 = vmul.f32 %v3637_v47, %v1136_v24  ;;  %v2439_v50 = vmul.f32 %v3639_v36, %v1136_v24  ;;  %v6188_v31 = vmul.f32 %v3641_v52, %v1136_v24  ;;  %v280_v35 = vmul.f32 %v6140_v10, %v6179_v41  ;;  %v6206_v24 = vld [vmem:[%s7313_s0 + $0x48] sm:$0xff] }
  0xbb   :  { %v6194_v5 = vmul.f32 %v6184_v7, %v6179_v41 }
  0xbc   :  { %7346 = vst [vmem:[#allocation30_spill] sm:$0xff] %v6186_v60  ;;  %7347 = vst [vmem:[#allocation31_spill] sm:$0xff] %v6188_v31  ;;  %4845 = vmatprep.mubr.msk.f32.mxu1 %vm341_vm1, %v280_v35  ;;  %5069 = vmatprep.mubr.msk.f32.mxu0 %vm341_vm1, %v2439_v50  ;;  %v3643_v50 = vld [vmem:[%s7313_s0 + $0xe2] sm:$0xff] }
  0xbd   :  { %7348 = vst [vmem:[#allocation32_spill] sm:$0xff] %v6194_v5  ;;  %v1141_v47 = vpop.permute.xlu1 %1140  ;;  %v6201_v21 = vpop.permute.xlu0 %151 }
  0xbe   :  { %v6208_v31 = vmul.f32 %v3638_v4, %v1141_v47  ;;  %v2440_v25 = vmul.f32 %v3640_v26, %v1141_v47  ;;  %v6210_v12 = vmul.f32 %v3642_v17, %v1141_v47  ;;  %v281_v15 = vmul.f32 %v6162_v3, %v6201_v21  ;;  %v6228_v47 = vld [vmem:[%s7313_s0 + $0x50] sm:$0xff] }
  0xbf   :  { %v6216_v35 = vmul.f32 %v6206_v24, %v6201_v21 }
  0xc0   :  { %7349 = vst [vmem:[#allocation33_spill] sm:$0xff] %v6208_v31  ;;  %7350 = vst [vmem:[#allocation34_spill] sm:$0xff] %v6210_v12  ;;  %4846 = vmatmul.mubr.msk.f32.gmra.mrb[6].mxu1 %vm341_vm1, %v281_v15  ;;  %5070 = vmatmul.mubr.msk.f32.gmra.mrb[22].mxu0 %vm341_vm1, %v2440_v25  ;;  %v3644_v25 = vld [vmem:[%s7313_s0 + $0xea] sm:$0xff] }
  0xc1   :  { %7351 = vst [vmem:[#allocation35_spill] sm:$0xff] %v6216_v35  ;;  %v1146_v4 = vpop.permute.xlu1 %1145  ;;  %v6223_v1 = vpop.permute.xlu0 %156 }
  0xc2   :  { %v6230_v12 = vmul.f32 %v3639_v36, %v1146_v4  ;;  %v2441_v6 = vmul.f32 %v3641_v52, %v1146_v4  ;;  %v6232_v55 = vmul.f32 %v3643_v50, %v1146_v4  ;;  %v282_v46 = vmul.f32 %v6184_v7, %v6223_v1  ;;  %v6250_v4 = vld [vmem:[%s7313_s0 + $0x58] sm:$0xff] }
  0xc3   :  { %v6238_v15 = vmul.f32 %v6228_v47, %v6223_v1 }
  0xc4   :  { %7352 = vst [vmem:[#allocation36_spill] sm:$0xff] %v6230_v12  ;;  %7353 = vst [vmem:[#allocation37_spill] sm:$0xff] %v6232_v55  ;;  %4848 = vmatprep.mubr.msk.f32.mxu1 %vm341_vm1, %v282_v46  ;;  %5072 = vmatprep.mubr.msk.f32.mxu0 %vm341_vm1, %v2441_v6  ;;  %v3645_v6 = vld [vmem:[%s7313_s0 + $0xf2] sm:$0xff] }
  0xc5   :  { %7354 = vst [vmem:[#allocation38_spill] sm:$0xff] %v6238_v15  ;;  %v1151_v36 = vpop.permute.xlu1 %1150  ;;  %v6245_v57 = vpop.permute.xlu0 %161 }
  0xc6   :  { %v6252_v55 = vmul.f32 %v3640_v26, %v1151_v36  ;;  %v2442_v48 = vmul.f32 %v3642_v17, %v1151_v36  ;;  %v6254_v15 = vmul.f32 %v3644_v25, %v1151_v36  ;;  %v283_v35 = vmul.f32 %v6206_v24, %v6245_v57  ;;  %v6272_v36 = vld [vmem:[%s7313_s0 + $0x60] sm:$0xff] }
  0xc7   :  { %v6260_v46 = vmul.f32 %v6250_v4, %v6245_v57 }
  0xc8   :  { %7355 = vst [vmem:[#allocation39_spill] sm:$0xff] %v6252_v55  ;;  %7356 = vst [vmem:[#allocation40_spill] sm:$0xff] %v6254_v15  ;;  %4849 = vmatmul.mubr.msk.f32.gmra.mrb[8].mxu1 %vm341_vm1, %v283_v35  ;;  %5073 = vmatmul.mubr.msk.f32.gmra.mrb[24].mxu0 %vm341_vm1, %v2442_v48  ;;  %v3646_v48 = vld [vmem:[%s7313_s0 + $0xfa] sm:$0xff] }
  0xc9   :  { %7357 = vst [vmem:[#allocation41_spill] sm:$0xff] %v6260_v46  ;;  %v1156_v26 = vpop.permute.xlu1 %1155  ;;  %v6267_v5 = vpop.permute.xlu0 %166 }
  0xca   :  { %v6274_v15 = vmul.f32 %v3641_v52, %v1156_v26  ;;  %v2443_v8 = vmul.f32 %v3643_v50, %v1156_v26  ;;  %v6276_v46 = vmul.f32 %v3645_v6, %v1156_v26  ;;  %v284_v34 = vmul.f32 %v6228_v47, %v6267_v5  ;;  %v6294_v26 = vld [vmem:[%s7313_s0 + $0x68] sm:$0xff] }
  0xcb   :  { %v6282_v35 = vmul.f32 %v6272_v36, %v6267_v5 }
  0xcc   :  { %7358 = vst [vmem:[#allocation42_spill] sm:$0xff] %v6274_v15  ;;  %7359 = vst [vmem:[#allocation43_spill] sm:$0xff] %v6276_v46  ;;  %4851 = vmatprep.mubr.msk.f32.mxu1 %vm341_vm1, %v284_v34  ;;  %5075 = vmatprep.mubr.msk.f32.mxu0 %vm341_vm1, %v2443_v8  ;;  %v3647_v8 = vld [vmem:[%s7313_s0 + $0x102] sm:$0xff] }
  0xcd   :  { %7360 = vst [vmem:[#allocation44_spill] sm:$0xff] %v6282_v35  ;;  %v1161_v52 = vpop.permute.xlu1 %1160  ;;  %v6289_v38 = vpop.permute.xlu0 %171 }
  0xce   :  { %v6296_v46 = vmul.f32 %v3642_v17, %v1161_v52  ;;  %v2444_v16 = vmul.f32 %v3644_v25, %v1161_v52  ;;  %v6298_v35 = vmul.f32 %v3646_v48, %v1161_v52  ;;  %v285_v39 = vmul.f32 %v6250_v4, %v6289_v38  ;;  %v6316_v52 = vld [vmem:[%s7313_s0 + $0x70] sm:$0xff] }
  0xcf   :  { %v6304_v34 = vmul.f32 %v6294_v26, %v6289_v38 }
  0xd0   :  { %7361 = vst [vmem:[#allocation45_spill] sm:$0xff] %v6296_v46  ;;  %7362 = vst [vmem:[#allocation46_spill] sm:$0xff] %v6298_v35  ;;  %4852 = vmatmul.mubr.msk.f32.gmra.mrb[10].mxu1 %vm341_vm1, %v285_v39  ;;  %5076 = vmatmul.mubr.msk.f32.gmra.mrb[26].mxu0 %vm341_vm1, %v2444_v16  ;;  %v3648_v16 = vld [vmem:[%s7313_s0 + $0x10a] sm:$0xff] }
  0xd1   :  { %7363 = vst [vmem:[#allocation47_spill] sm:$0xff] %v6304_v34  ;;  %v1166_v17 = vpop.permute.xlu1 %1165  ;;  %v6311_v23 = vpop.permute.xlu0 %176 }
  0xd2   :  { %v6318_v35 = vmul.f32 %v3643_v50, %v1166_v17  ;;  %v2445_v46 = vmul.f32 %v3645_v6, %v1166_v17  ;;  %v6320_v34 = vmul.f32 %v3647_v8, %v1166_v17  ;;  %v286_v15 = vmul.f32 %v6272_v36, %v6311_v23  ;;  %v6338_v17 = vld [vmem:[%s7313_s0 + $0x78] sm:$0xff] }
  0xd3   :  { %v6326_v39 = vmul.f32 %v6316_v52, %v6311_v23 }
  0xd4   :  { %7364 = vst [vmem:[#allocation48_spill] sm:$0xff] %v6318_v35  ;;  %7365 = vst [vmem:[#allocation49_spill] sm:$0xff] %v6320_v34  ;;  %4854 = vmatprep.mubr.msk.f32.mxu1 %vm341_vm1, %v286_v15  ;;  %5078 = vmatprep.mubr.msk.f32.mxu0 %vm341_vm1, %v2445_v46 }
  0xd5   :  { %7366 = vst [vmem:[#allocation50_spill] sm:$0xff] %v6326_v39  ;;  %v1171_v50 = vpop.permute.xlu1 %1170  ;;  %v6333_v35 = vpop.permute.xlu0 %181 }
  0xd6   :  { %v6340_v34 = vmul.f32 %v3644_v25, %v1171_v50  ;;  %v2446_v55 = vmul.f32 %v3646_v48, %v1171_v50  ;;  %v6342_v39 = vmul.f32 %v3648_v16, %v1171_v50  ;;  %v287_v12 = vmul.f32 %v6294_v26, %v6333_v35  ;;  %v6359_v25 = vld [vmem:[%s7313_s0 + $0x80] sm:$0xff] }
  0xd7   :  { %v6348_v15 = vmul.f32 %v6338_v17, %v6333_v35 }
  0xd8   :  { %7367 = vst [vmem:[#allocation51_spill] sm:$0xff] %v6340_v34  ;;  %7368 = vst [vmem:[#allocation52_spill] sm:$0xff] %v6342_v39  ;;  %4855 = vmatmul.mubr.msk.f32.gmra.mrb[12].mxu1 %vm341_vm1, %v287_v12  ;;  %5079 = vmatmul.mubr.msk.f32.gmra.mrb[28].mxu0 %vm341_vm1, %v2446_v55 }
  0xd9   :  { %7369 = vst [vmem:[#allocation53_spill] sm:$0xff] %v6348_v15  ;;  %v6352_v46 = vpop.permute.xlu1 %1175  ;;  %v6354_v31 = vpop.permute.xlu0 %186 }
  0xda   :  { %7370 = vst [vmem:[#allocation54_spill] sm:$0xff] %v6352_v46  ;;  %v6362_v50 = vmul.f32 %v3645_v6, %v6352_v46  ;;  %v2447_v39 = vmul.f32 %v3647_v8, %v6352_v46  ;;  %v288_v15 = vmul.f32 %v6316_v52, %v6354_v31  ;;  %v6369_v55 = vmul.f32 %v6359_v25, %v6354_v31  ;;  %v6380_v6 = vld [vmem:[%s7313_s0 + $0x88] sm:$0xff] }
  0xdc   :  { %7371 = vst [vmem:[#allocation55_spill] sm:$0xff] %v6362_v50  ;;  %7372 = vst [vmem:[#allocation56_spill] sm:$0xff] %v6369_v55  ;;  %4857 = vmatprep.mubr.msk.f32.mxu1 %vm341_vm1, %v288_v15  ;;  %5081 = vmatprep.mubr.msk.f32.mxu0 %vm341_vm1, %v2447_v39  ;;  %v2839_v39 = vmul.f32 %v6096_v58, %v6046_v42  ;;  %v2840_v42 = vmul.f32 %v6119_v9, %v6068_v29  ;;  %v6411_v58 = vld [vmem:[%s7313_s0 + $0x90] sm:$0xff]  ;;  %v6432_v9 = vld [vmem:[%s7312_s1 + $0x20] sm:$0xf] }
  0xdd   :  { %v6373_v12 = vpop.permute.xlu1 %1180  ;;  %v6375_v34 = vpop.permute.xlu0 %191 }
  0xde   :  { %7373 = vst [vmem:[#allocation57_spill] sm:$0xff] %v6373_v12  ;;  %v6383_v8 = vmul.f32 %v3646_v48, %v6373_v12  ;;  %v2448_v46 = vmul.f32 %v3648_v16, %v6373_v12  ;;  %v289_v55 = vmul.f32 %v6338_v17, %v6375_v34  ;;  %v6392_v15 = vmul.f32 %v6380_v6, %v6375_v34  ;;  %v6399_v48 = vld [vmem:[%s7313_s0 + $0x98] sm:$0xff] }
  0xe0   :  { %7374 = vst [vmem:[#allocation58_spill] sm:$0xff] %v6383_v8  ;;  %7375 = vst [vmem:[#allocation59_spill] sm:$0xff] %v6392_v15  ;;  %4858 = vmatmul.mubr.msk.f32.gmra.mrb[14].mxu1 %vm341_vm1, %v289_v55  ;;  %5082 = vmatmul.mubr.msk.f32.gmra.mrb[30].mxu0 %vm341_vm1, %v2448_v46 }
  0xe1   :  { %v6401_v16 = vpop.permute.xlu1 %201  ;;  %v6403_v12 = vpop.permute.xlu0 %196  ;;  %5086 = vmatprep.mubr.msk.f32.mxu0 %vm341_vm1, %v2839_v39  ;;  %v2841_v39 = vmul.f32 %v6140_v10, %v6089_v56  ;;  %v2842_v10 = vmul.f32 %v6162_v3, %v6114_v18  ;;  %v2843_v18 = vmul.f32 %v6184_v7, %v6135_v51  ;;  %v2844_v51 = vmul.f32 %v6206_v24, %v6157_v37  ;;  %v6488_v7 = vld [vmem:[%s7313_s0 + $0xb0] sm:$0xff]  ;;  %v6509_v24 = vld [vmem:[%s7313_s0 + $0xc8] sm:$0xff] }
  0xe2   :  { %v291_v46 = vmul.f32 %v6380_v6, %v6401_v16  ;;  %v6417_v55 = vmul.f32 %v6399_v48, %v6401_v16  ;;  %v290_v15 = vmul.f32 %v6359_v25, %v6403_v12  ;;  %v6425_v29 = vmul.f32 %v6411_v58, %v6403_v12 }
  0xe4   :  { %7376 = vst [vmem:[#allocation60_spill] sm:$0xff] %v6417_v55  ;;  %7377 = vst [vmem:[#allocation61_spill] sm:$0xff] %v6425_v29  ;;  %4860 = vmatprep.mubr.msk.f32.mxu1 %vm341_vm1, %v290_v15  ;;  %5087 = vmatmul.mubr.msk.f32.vlgmr.msra.gmra.mrb[0].mxu0 %vm341_vm1, %v2840_v42  ;;  %v6437_v55 = vld [vmem:[%s7313_s0 + $0xa8] sm:$0xff]  ;;  %v6450_v15 = vld [vmem:[%s7313_s0 + $0xa0] sm:$0xff] }
  0xe5   :  { %v6439_v8 = vpop.permute.xlu1 %211  ;;  %v6441_v56 = vpop.permute.xlu0 %206  ;;  %4861 = vmatmul.mubr.msk.f32.gmra.mrb[16].mxu1 %vm341_vm1, %v291_v46  ;;  %5089 = vmatprep.mubr.msk.f32.mxu0 %vm341_vm1, %v2841_v39  ;;  %v6475_v39 = vld [vmem:[%s7313_s0 + $0xb8] sm:$0xff]  ;;  %v2855_v60 = vmul.f32 %v6450_v15, %v6403_v12 }
  0xe6   :  { %v293_v42 = vmul.f32 %v6399_v48, %v6439_v8  ;;  %v6456_v29 = vmul.f32 %v6437_v55, %v6439_v8  ;;  %v292_v46 = vmul.f32 %v6411_v58, %v6441_v56  ;;  %5135 = vmatpush3.msk.msra.mxu0 %vm438_vm0, %v5941_v63  ;;  %v6466_v3 = vmul.f32 %v6450_v15, %v6441_v56 }
  0xe7   :  { %5184 = vmatprep.subr.msk.mxu0 %vm438_vm0, %v6432_v9 }
  0xe8   :  { %7378 = vst [vmem:[#allocation62_spill] sm:$0xff] %v6456_v29  ;;  %7379 = vst [vmem:[#allocation63_spill] sm:$0xff] %v6466_v3  ;;  %4863 = vmatprep.mubr.msk.f32.mxu1 %vm341_vm1, %v292_v46  ;;  %5090 = vmatmul.mubr.msk.f32.gmra.mrb[2].mxu0 %vm341_vm1, %v2842_v10 }
  0xe9   :  { %v6477_v63 = vpop.permute.xlu1 %221  ;;  %v6479_v29 = vpop.permute.xlu0 %216  ;;  %4864 = vmatmul.mubr.msk.f32.gmra.mrb[18].mxu1 %vm341_vm1, %v293_v42  ;;  %5092 = vmatprep.mubr.msk.f32.mxu0 %vm341_vm1, %v2843_v18  ;;  %v2845_v18 = vmul.f32 %v6228_v47, %v6179_v41  ;;  %v2846_v41 = vmul.f32 %v6250_v4, %v6201_v21  ;;  %v6522_v47 = vld [vmem:[%s7313_s0 + $0xc0] sm:$0xff]  ;;  %v6543_v4 = vld [vmem:[%s7313_s0 + $0xd8] sm:$0xff] }
  0xea   :  { %v295_v10 = vmul.f32 %v6437_v55, %v6477_v63  ;;  %v6494_v46 = vmul.f32 %v6475_v39, %v6477_v63  ;;  %v294_v42 = vmul.f32 %v6450_v15, %v6479_v29  ;;  %v6502_v37 = vmul.f32 %v6488_v7, %v6479_v29 }
  0xeb   :  { %v2858_v15 = vmul.f32 %v6475_v39, %v6439_v8 }
  0xec   :  { %7380 = vst [vmem:[#allocation64_spill] sm:$0xff] %v6494_v46  ;;  %7381 = vst [vmem:[#allocation65_spill] sm:$0xff] %v6502_v37  ;;  %4866 = vmatprep.mubr.msk.f32.mxu1 %vm341_vm1, %v294_v42  ;;  %5093 = vmatmul.mubr.msk.f32.gmra.mrb[4].mxu0 %vm341_vm1, %v2844_v51 }
  0xed   :  { %v6511_v46 = vpop.permute.xlu1 %231  ;;  %v6513_v3 = vpop.permute.xlu0 %226  ;;  %4867 = vmatmul.mubr.msk.f32.gmra.mrb[20].mxu1 %vm341_vm1, %v295_v10  ;;  %5095 = vmatprep.mubr.msk.f32.mxu0 %vm341_vm1, %v2845_v18  ;;  %v2847_v18 = vmul.f32 %v6272_v36, %v6223_v1  ;;  %v2848_v1 = vmul.f32 %v6294_v26, %v6245_v57  ;;  %v6556_v36 = vld [vmem:[%s7313_s0 + $0xd0] sm:$0xff]  ;;  %v6577_v26 = vld [vmem:[%s7313_s0 + $0xe8] sm:$0xff] }
  0xee   :  { %v297_v51 = vmul.f32 %v6475_v39, %v6511_v46  ;;  %v6528_v42 = vmul.f32 %v6509_v24, %v6511_v46  ;;  %v296_v10 = vmul.f32 %v6488_v7, %v6513_v3  ;;  %v6536_v21 = vmul.f32 %v6522_v47, %v6513_v3  ;;  %v7394_v39 = vld [vmem:[#allocation42_spill] sm:$0xff] }
  0xf0   :  { %7382 = vst [vmem:[#allocation66_spill] sm:$0xff] %v6528_v42  ;;  %7383 = vst [vmem:[#allocation67_spill] sm:$0xff] %v6536_v21  ;;  %4869 = vmatprep.mubr.msk.f32.mxu1 %vm341_vm1, %v296_v10  ;;  %5096 = vmatmul.mubr.msk.f32.gmra.mrb[6].mxu0 %vm341_vm1, %v2846_v41 }
  0xf1   :  { %v6545_v42 = vpop.permute.xlu1 %241  ;;  %v6547_v37 = vpop.permute.xlu0 %236  ;;  %4870 = vmatmul.mubr.msk.f32.gmra.mrb[22].mxu1 %vm341_vm1, %v297_v51  ;;  %5098 = vmatprep.mubr.msk.f32.mxu0 %vm341_vm1, %v2847_v18  ;;  %v2849_v18 = vmul.f32 %v6316_v52, %v6267_v5  ;;  %v2850_v5 = vmul.f32 %v6338_v17, %v6289_v38  ;;  %v6590_v52 = vld [vmem:[%s7313_s0 + $0xe0] sm:$0xff]  ;;  %v6611_v17 = vld [vmem:[%s7313_s0 + $0xf8] sm:$0xff] }
  0xf2   :  { %v299_v41 = vmul.f32 %v6509_v24, %v6545_v42  ;;  %v6562_v10 = vmul.f32 %v6543_v4, %v6545_v42  ;;  %v298_v51 = vmul.f32 %v6522_v47, %v6547_v37  ;;  %v6570_v57 = vmul.f32 %v6556_v36, %v6547_v37 }
  0xf3   :  { %v2863_v8 = vmul.f32 %v6590_v52, %v6547_v37  ;;  %v7396_v37 = vld [vmem:[#allocation48_spill] sm:$0xff] }
  0xf4   :  { %7384 = vst [vmem:[#allocation68_spill] sm:$0xff] %v6562_v10  ;;  %7385 = vst [vmem:[#allocation69_spill] sm:$0xff] %v6570_v57  ;;  %4872 = vmatprep.mubr.msk.f32.mxu1 %vm341_vm1, %v298_v51  ;;  %5099 = vmatmul.mubr.msk.f32.gmra.mrb[8].mxu0 %vm341_vm1, %v2848_v1 }
  0xf5   :  { %v6579_v10 = vpop.permute.xlu1 %251  ;;  %v6581_v21 = vpop.permute.xlu0 %246  ;;  %4873 = vmatmul.mubr.msk.f32.gmra.mrb[24].mxu1 %vm341_vm1, %v299_v41  ;;  %5101 = vmatprep.mubr.msk.f32.mxu0 %vm341_vm1, %v2849_v18  ;;  %v2851_v18 = vmul.f32 %v6359_v25, %v6311_v23  ;;  %v2852_v23 = vmul.f32 %v6380_v6, %v6333_v35  ;;  %v2833_v25 = vld [vmem:[%s7313_s0 + $0xf0] sm:$0xff]  ;;  %v991_v35 = vld [vmem:[%s7313_s0 + $0x2] sm:$0xff] }
  0xf6   :  { %v301_v1 = vmul.f32 %v6543_v4, %v6579_v10  ;;  %v6596_v51 = vmul.f32 %v6577_v26, %v6579_v10  ;;  %v300_v41 = vmul.f32 %v6556_v36, %v6581_v21  ;;  %v6604_v38 = vmul.f32 %v6590_v52, %v6581_v21  ;;  %v2836_v6 = vld [vmem:[%s7313_s0 + $0x108] sm:$0xff] }
  0xf8   :  { %7386 = vst [vmem:[#allocation70_spill] sm:$0xff] %v6596_v51  ;;  %7387 = vst [vmem:[#allocation71_spill] sm:$0xff] %v6604_v38  ;;  %4875 = vmatprep.mubr.msk.f32.mxu1 %vm341_vm1, %v300_v41  ;;  %5102 = vmatmul.mubr.msk.f32.gmra.mrb[10].mxu0 %vm341_vm1, %v2850_v5 }
  0xf9   :  { %v6613_v51 = vpop.permute.xlu1 %261  ;;  %v6615_v57 = vpop.permute.xlu0 %256  ;;  %4876 = vmatmul.mubr.msk.f32.gmra.mrb[26].mxu1 %vm341_vm1, %v301_v1  ;;  %5104 = vmatprep.mubr.msk.f32.mxu0 %vm341_vm1, %v2851_v18  ;;  %v2853_v1 = vmul.f32 %v6411_v58, %v6354_v31  ;;  %v2854_v31 = vmul.f32 %v6399_v48, %v6375_v34  ;;  %v2835_v58 = vld [vmem:[%s7313_s0 + $0x100] sm:$0xff]  ;;  %v992_v34 = vld [vmem:[%s7313_s0 + $0xa] sm:$0xff]  ;;  %v2856_v48 = vmul.f32 %v6437_v55, %v6401_v16  ;;  %v7391_v55 = vld [vmem:[#allocation33_spill] sm:$0xff] }
  0xfa   :  { %v303_v5 = vmul.f32 %v6577_v26, %v6613_v51  ;;  %v6628_v41 = vmul.f32 %v6611_v17, %v6613_v51  ;;  %v302_v38 = vmul.f32 %v6590_v52, %v6615_v57  ;;  %v6635_v18 = vmul.f32 %v2833_v25, %v6615_v57  ;;  %v7401_v52 = vld [vmem:[#allocation21_spill] sm:$0xff] }
  0xfb   :  { %v1184_v12 = vmul.f32 %v5921_v53, %v992_v34  ;;  %v2859_v53 = vmul.f32 %v6522_v47, %v6479_v29  ;;  %v7392_v29 = vld [vmem:[#allocation36_spill] sm:$0xff]  ;;  %v7397_v47 = vld [vmem:[#allocation51_spill] sm:$0xff] }
  0xfc   :  { %7388 = vst [vmem:[#allocation72_spill] sm:$0xff] %v6628_v41  ;;  %7389 = vst [vmem:[#allocation73_spill] sm:$0xff] %v6635_v18  ;;  %4878 = vmatprep.mubr.msk.f32.mxu1 %vm341_vm1, %v302_v38  ;;  %5105 = vmatmul.mubr.msk.f32.gmra.mrb[12].mxu0 %vm341_vm1, %v2852_v23  ;;  %v7407_v34 = vld [vmem:[#allocation35_spill] sm:$0xff] }
  0xfd   :  { %v6645_v41 = vpop.permute.xlu1 %271  ;;  %v267_v50 = vpop.permute.xlu0 %266  ;;  %4879 = vmatmul.mubr.msk.f32.gmra.mrb[28].mxu1 %vm341_vm1, %v303_v5  ;;  %5107 = vmatprep.mubr.msk.f32.mxu0 %vm341_vm1, %v2853_v1  ;;  %v1183_v1 = vmul.f32 %v5901_v44, %v991_v35  ;;  %v2857_v44 = vmul.f32 %v6488_v7, %v6441_v56  ;;  %v7393_v56 = vld [vmem:[#allocation39_spill] sm:$0xff]  ;;  %v7395_v7 = vld [vmem:[#allocation45_spill] sm:$0xff] }
  0xfe   :  { %v305_v38 = vmul.f32 %v6611_v17, %v6645_v41  ;;  %v6657_v23 = vmul.f32 %v2836_v6, %v6645_v41  ;;  %v304_v18 = vmul.f32 %v2833_v25, %v267_v50  ;;  %v6661_v5 = vmul.f32 %v2835_v58, %v267_v50  ;;  %v7404_v35 = vld [vmem:[#allocation27_spill] sm:$0xff] }
 0x100   :  { %4881 = vmatprep.mubr.msk.f32.mxu1 %vm341_vm1, %v304_v18  ;;  %5108 = vmatmul.mubr.msk.f32.gmra.mrb[14].mxu0 %vm341_vm1, %v2854_v31  ;;  %v6908_v18 = vld [vmem:[%s7313_s0 + $0xc9] sm:$0xff]  ;;  %v7405_v31 = vld [vmem:[#allocation29_spill] sm:$0xff] }
 0x101   :  { %4882 = vmatmul.mubr.msk.f32.gmra.mrb[30].mxu1 %vm341_vm1, %v305_v38  ;;  %5110 = vmatprep.mubr.msk.f32.mxu0 %vm341_vm1, %v2855_v60  ;;  %v6691_v60 = vld [vmem:[%s7312_s1 + $0x10] sm:$0xf] }
 0x102   :  { %4886 = vmatprep.mubr.msk.f32.mxu1 %vm341_vm1, %v1183_v1  ;;  %v7406_v38 = vld [vmem:[#allocation32_spill] sm:$0xff]  ;;  %v6933_v1 = vld [vmem:[%s7313_s0 + $0xe1] sm:$0xff] }
 0x104   :  { %5111 = vmatmul.mubr.msk.f32.gmra.mrb[16].mxu0 %vm341_vm1, %v2856_v48  ;;  %v6944_v48 = vld [vmem:[%s7313_s0 + $0xe9] sm:$0xff] }
 0x105   :  { %4887 = vmatmul.mubr.msk.f32.vlgmr.msra.gmra.mrb[0].mxu1 %vm341_vm1, %v1184_v12  ;;  %5113 = vmatprep.mubr.msk.f32.mxu0 %vm341_vm1, %v2857_v44  ;;  %v7408_v12 = vld [vmem:[#allocation38_spill] sm:$0xff]  ;;  %v6951_v44 = vld [vmem:[%s7313_s0 + $0xf1] sm:$0xff] }
 0x106   :  { %4935 = vmatpush3.msk.msra.mxu1 %vm438_vm0, %v6085_v49  ;;  %4889 = vmatprep.mubr.msk.f32.mxu1 %vm341_vm1, %v5903_v45  ;;  %v2860_v45 = vmul.f32 %v6509_v24, %v6477_v63  ;;  %v2861_v49 = vmul.f32 %v6556_v36, %v6513_v3  ;;  %v3240_v3 = vld [vmem:[%s7313_s0 + $0x79] sm:$0xff]  ;;  %v3241_v63 = vld [vmem:[%s7313_s0 + $0x81] sm:$0xff]  ;;  %v6842_v24 = vld [vmem:[%s7313_s0 + $0x91] sm:$0xff] }
 0x107   :  { %5234 = vmatprep.subr.msk.mxu1 %vm438_vm0, %v6691_v60  ;;  %v7399_v36 = vld [vmem:[#allocation58_spill] sm:$0xff] }
 0x108   :  { %5114 = vmatmul.mubr.msk.f32.gmra.mrb[18].mxu0 %vm341_vm1, %v2858_v15  ;;  %v7409_v15 = vld [vmem:[#allocation41_spill] sm:$0xff] }
 0x109   :  { %4890 = vmatmul.mubr.msk.f32.gmra.mrb[2].mxu1 %vm341_vm1, %v5923_v54  ;;  %5116 = vmatprep.mubr.msk.f32.mxu0 %vm341_vm1, %v2859_v53  ;;  %v2862_v54 = vmul.f32 %v6543_v4, %v6511_v46  ;;  %v3242_v46 = vld [vmem:[%s7313_s0 + $0x89] sm:$0xff]  ;;  %v6859_v4 = vld [vmem:[%s7313_s0 + $0xa1] sm:$0xff]  ;;  %v6962_v53 = vld [vmem:[%s7313_s0 + $0xf9] sm:$0xff] }
 0x10a   :  { %4892 = vmatprep.mubr.msk.f32.mxu1 %vm341_vm1, %v5947_v2  ;;  %v2865_v2 = vmul.f32 %v2833_v25, %v6581_v21  ;;  %v7398_v21 = vld [vmem:[#allocation55_spill] sm:$0xff] }
 0x10b   :  { %v6897_v25 = vld [vmem:[%s7313_s0 + $0xc1] sm:$0xff] }
 0x10c   :  { %5117 = vmatmul.mubr.msk.f32.gmra.mrb[20].mxu0 %vm341_vm1, %v2860_v45  ;;  %v6969_v45 = vld [vmem:[%s7313_s0 + $0x101] sm:$0xff] }
 0x10d   :  { %4893 = vmatmul.mubr.msk.f32.gmra.mrb[4].mxu1 %vm341_vm1, %v5943_v0  ;;  %5119 = vmatprep.mubr.msk.f32.mxu0 %vm341_vm1, %v2861_v49  ;;  %v2864_v0 = vmul.f32 %v6577_v26, %v6545_v42  ;;  %v6852_v42 = vld [vmem:[%s7313_s0 + $0x99] sm:$0xff]  ;;  %v6877_v26 = vld [vmem:[%s7313_s0 + $0xb1] sm:$0xff]  ;;  %v7411_v49 = vld [vmem:[#allocation47_spill] sm:$0xff] }
 0x10e   :  { %4895 = vmatprep.mubr.msk.f32.mxu1 %vm341_vm1, %v5967_v13  ;;  %v2867_v13 = vmul.f32 %v2835_v58, %v6615_v57  ;;  %v7400_v57 = vld [vmem:[#allocation19_spill] sm:$0xff]  ;;  %v6926_v58 = vld [vmem:[%s7313_s0 + $0xd9] sm:$0xff] }
 0x110   :  { %5120 = vmatmul.mubr.msk.f32.gmra.mrb[22].mxu0 %vm341_vm1, %v2862_v54  ;;  %v6980_v54 = vld [vmem:[%s7313_s0 + $0x109] sm:$0xff] }
 0x111   :  { %4896 = vmatmul.mubr.msk.f32.gmra.mrb[6].mxu1 %vm341_vm1, %v5963_v11  ;;  %5122 = vmatprep.mubr.msk.f32.mxu0 %vm341_vm1, %v2863_v8  ;;  %v2866_v11 = vmul.f32 %v6611_v17, %v6579_v10  ;;  %v6870_v10 = vld [vmem:[%s7313_s0 + $0xa9] sm:$0xff]  ;;  %v7412_v8 = vld [vmem:[#allocation50_spill] sm:$0xff] }
 0x112   :  { %4898 = vmatprep.mubr.msk.f32.mxu1 %vm341_vm1, %v5983_v22  ;;  %v2837_v22 = vld [vmem:[%s7313_s0 + $0x110] sm:$0xff]  ;;  %v7402_v17 = vld [vmem:[#allocation23_spill] sm:$0xff] }
 0x113   :  { %v2869_v16 = vmul.f32 %v2837_v22, %v267_v50  ;;  %v7390_v50 = vld [vmem:[#allocation30_spill] sm:$0xff]  ;;  %v7415_v22 = vld [vmem:[#allocation59_spill] sm:$0xff] }
 0x114   :  { %5123 = vmatmul.mubr.msk.f32.gmra.mrb[24].mxu0 %vm341_vm1, %v2864_v0  ;;  %v3259_v0 = vld [vmem:[%s7313_s0 + $0x111] sm:$0xff] }
 0x115   :  { %4899 = vmatmul.mubr.msk.f32.gmra.mrb[8].mxu1 %vm341_vm1, %v5979_v20  ;;  %5125 = vmatprep.mubr.msk.f32.mxu0 %vm341_vm1, %v2865_v2  ;;  %v2868_v20 = vmul.f32 %v2836_v6, %v6613_v51  ;;  %v6888_v51 = vld [vmem:[%s7313_s0 + $0xb9] sm:$0xff]  ;;  %v6915_v6 = vld [vmem:[%s7313_s0 + $0xd1] sm:$0xff] }
 0x116   :  { %4901 = vmatprep.mubr.msk.f32.mxu1 %vm341_vm1, %v5999_v32  ;;  %v2838_v32 = vld [vmem:[%s7313_s0 + $0x118] sm:$0xff] }
 0x117   :  { %v7413_v2 = vld [vmem:[#allocation53_spill] sm:$0xff] }
 0x118   :  { %5126 = vmatmul.mubr.msk.f32.gmra.mrb[26].mxu0 %vm341_vm1, %v2866_v11  ;;  %v3260_v11 = vld [vmem:[%s7313_s0 + $0x119] sm:$0xff] }
 0x119   :  { %4902 = vmatmul.mubr.msk.f32.gmra.mrb[10].mxu1 %vm341_vm1, %v5995_v30  ;;  %5128 = vmatprep.mubr.msk.f32.mxu0 %vm341_vm1, %v2867_v13  ;;  %v2870_v30 = vmul.f32 %v2838_v32, %v6645_v41  ;;  %v7403_v41 = vld [vmem:[#allocation25_spill] sm:$0xff]  ;;  %v7414_v13 = vld [vmem:[#allocation56_spill] sm:$0xff] }
 0x11a   :  { %4904 = vmatprep.mubr.msk.f32.mxu1 %vm341_vm1, %v6015_v43  ;;  %v3229_v43 = vld [vmem:[%s7313_s0 + $0x21] sm:$0xff]  ;;  %v7417_v32 = vld [vmem:[#allocation61_spill] sm:$0xff] }
 0x11c   :  { %5129 = vmatmul.mubr.msk.f32.gmra.mrb[28].mxu0 %vm341_vm1, %v2868_v20  ;;  %v7416_v20 = vld [vmem:[#allocation3_spill] sm:$0xff] }
 0x11d   :  { %4905 = vmatmul.mubr.msk.f32.gmra.mrb[12].mxu1 %vm341_vm1, %v6011_v40  ;;  %5131 = vmatprep.mubr.msk.f32.mxu0 %vm341_vm1, %v2869_v16  ;;  %v3230_v40 = vld [vmem:[%s7313_s0 + $0x29] sm:$0xff]  ;;  %v7418_v16 = vld [vmem:[#allocation5_spill] sm:$0xff] }
 0x11e   :  { %4907 = vmatprep.mubr.msk.f32.mxu1 %vm341_vm1, %v6031_v61  ;;  %v3231_v61 = vld [vmem:[%s7313_s0 + $0x31] sm:$0xff] }
 0x120   :  { %5132 = vmatmul.mubr.msk.f32.gmra.mrb[30].mxu0 %vm341_vm1, %v2870_v30  ;;  %v7419_v30 = vld [vmem:[#allocation60_spill] sm:$0xff] }
 0x121   :  { %4908 = vmatmul.mubr.msk.f32.gmra.mrb[14].mxu1 %vm341_vm1, %v6027_v59  ;;  %5136 = vmatprep.mubr.msk.f32.mxu0 %vm341_vm1, %v3229_v43  ;;  %v3232_v59 = vld [vmem:[%s7313_s0 + $0x39] sm:$0xff] }
 0x122   :  { %4910 = vmatprep.mubr.msk.f32.mxu1 %vm341_vm1, %v6048_v14  ;;  %v3233_v14 = vld [vmem:[%s7313_s0 + $0x41] sm:$0xff] }
 0x123   :  { %v7420_v43 = vld [vmem:[#allocation2_spill] sm:$0xff] }
 0x124   :  { %5137 = vmatmul.mubr.msk.f32.vlgmr.msra.gmra.mrb[0].mxu0 %vm341_vm1, %v3230_v40  ;;  %v7421_v40 = vld [vmem:[#allocation63_spill] sm:$0xff] }
 0x125   :  { %4911 = vmatmul.mubr.msk.f32.gmra.mrb[16].mxu1 %vm341_vm1, %v6070_v33  ;;  %5185 = vmatpush3.msk.msra.mxu0 %vm438_vm0, %v6432_v9  ;;  %v3234_v33 = vld [vmem:[%s7313_s0 + $0x49] sm:$0xff]  ;;  %v3239_v9 = vld [vmem:[%s7313_s0 + $0x71] sm:$0xff] }
 0x126   :  { %4913 = vmatprep.mubr.msk.f32.mxu1 %vm341_vm1, %v6098_v62  ;;  %5139 = vmatprep.mubr.msk.f32.mxu0 %vm341_vm1, %v3231_v61  ;;  %v3235_v62 = vld [vmem:[%s7313_s0 + $0x51] sm:$0xff] }
 0x127   :  { %v7422_v61 = vld [vmem:[#allocation4_spill] sm:$0xff] }
 0x128   :  { %5140 = vmatmul.mubr.msk.f32.gmra.mrb[2].mxu0 %vm341_vm1, %v3232_v59  ;;  %v7423_v59 = vld [vmem:[#allocation62_spill] sm:$0xff] }
 0x129   :  { %4914 = vmatmul.mubr.msk.f32.gmra.mrb[18].mxu1 %vm341_vm1, %v6121_v19  ;;  %5142 = vmatprep.mubr.msk.f32.mxu0 %vm341_vm1, %v3233_v14  ;;  %v3236_v19 = vld [vmem:[%s7313_s0 + $0x59] sm:$0xff]  ;;  %v7424_v14 = vld [vmem:[#allocation7_spill] sm:$0xff] }
 0x12a   :  { %4916 = vmatprep.mubr.msk.f32.mxu1 %vm341_vm1, %v6142_v27  ;;  %v3237_v27 = vld [vmem:[%s7313_s0 + $0x61] sm:$0xff] }
 0x12c   :  { %5143 = vmatmul.mubr.msk.f32.gmra.mrb[4].mxu0 %vm341_vm1, %v3234_v33  ;;  %v7425_v33 = vld [vmem:[#allocation65_spill] sm:$0xff] }
 0x12d   :  { %4917 = vmatmul.mubr.msk.f32.gmra.mrb[20].mxu1 %vm341_vm1, %v6164_v28  ;;  %5145 = vmatprep.mubr.msk.f32.mxu0 %vm341_vm1, %v3235_v62  ;;  %v3238_v28 = vld [vmem:[%s7313_s0 + $0x69] sm:$0xff]  ;;  %v7426_v62 = vld [vmem:[#allocation6_spill] sm:$0xff] }
 0x12e   :  { %4919 = vmatprep.mubr.msk.f32.mxu1 %vm341_vm1, %v7390_v50  ;;  %v7428_v50 = vld [vmem:[#allocation9_spill] sm:$0xff] }
 0x130   :  { %5146 = vmatmul.mubr.msk.f32.gmra.mrb[6].mxu0 %vm341_vm1, %v3236_v19  ;;  %v7427_v19 = vld [vmem:[#allocation64_spill] sm:$0xff] }
 0x131   :  { %4920 = vmatmul.mubr.msk.f32.gmra.mrb[22].mxu1 %vm341_vm1, %v7391_v55  ;;  %5148 = vmatprep.mubr.msk.f32.mxu0 %vm341_vm1, %v3237_v27  ;;  %v7429_v27 = vld [vmem:[#allocation67_spill] sm:$0xff]  ;;  %v7430_v55 = vld [vmem:[#allocation8_spill] sm:$0xff] }
 0x132   :  { %4922 = vmatprep.mubr.msk.f32.mxu1 %vm341_vm1, %v7392_v29  ;;  %v7432_v29 = vld [vmem:[#allocation11_spill] sm:$0xff] }
 0x134   :  { %5149 = vmatmul.mubr.msk.f32.gmra.mrb[8].mxu0 %vm341_vm1, %v3238_v28  ;;  %v7431_v28 = vld [vmem:[#allocation66_spill] sm:$0xff] }
 0x135   :  { %4923 = vmatmul.mubr.msk.f32.gmra.mrb[24].mxu1 %vm341_vm1, %v7393_v56  ;;  %5151 = vmatprep.mubr.msk.f32.mxu0 %vm341_vm1, %v3239_v9  ;;  %v7433_v9 = vld [vmem:[#allocation69_spill] sm:$0xff]  ;;  %v7434_v56 = vld [vmem:[#allocation10_spill] sm:$0xff] }
 0x136   :  { %4925 = vmatprep.mubr.msk.f32.mxu1 %vm341_vm1, %v7394_v39  ;;  %v7436_v39 = vld [vmem:[#allocation13_spill] sm:$0xff] }
 0x138   :  { %5152 = vmatmul.mubr.msk.f32.gmra.mrb[10].mxu0 %vm341_vm1, %v3240_v3  ;;  %v7435_v3 = vld [vmem:[#allocation68_spill] sm:$0xff] }
 0x139   :  { %4926 = vmatmul.mubr.msk.f32.gmra.mrb[26].mxu1 %vm341_vm1, %v7395_v7  ;;  %5154 = vmatprep.mubr.msk.f32.mxu0 %vm341_vm1, %v3241_v63  ;;  %v7437_v63 = vld [vmem:[#allocation71_spill] sm:$0xff]  ;;  %v7438_v7 = vld [vmem:[#allocation12_spill] sm:$0xff] }
 0x13a   :  { %4928 = vmatprep.mubr.msk.f32.mxu1 %vm341_vm1, %v7396_v37  ;;  %v7440_v37 = vld [vmem:[#allocation15_spill] sm:$0xff] }
 0x13c   :  { %5155 = vmatmul.mubr.msk.f32.gmra.mrb[12].mxu0 %vm341_vm1, %v3242_v46  ;;  %v7439_v46 = vld [vmem:[#allocation70_spill] sm:$0xff] }
 0x13d   :  { %4929 = vmatmul.mubr.msk.f32.gmra.mrb[28].mxu1 %vm341_vm1, %v7397_v47  ;;  %5157 = vmatprep.mubr.msk.f32.mxu0 %vm341_vm1, %v6842_v24  ;;  %v7441_v47 = vld [vmem:[#allocation73_spill] sm:$0xff] }
 0x13e   :  { %4931 = vmatprep.mubr.msk.f32.mxu1 %vm341_vm1, %v7398_v21  ;;  %v7442_v21 = vld [vmem:[#allocation14_spill] sm:$0xff] }
 0x140   :  { %5158 = vmatmul.mubr.msk.f32.gmra.mrb[14].mxu0 %vm341_vm1, %v6852_v42 }
 0x141   :  { %4932 = vmatmul.mubr.msk.f32.gmra.mrb[30].mxu1 %vm341_vm1, %v7399_v36  ;;  %5160 = vmatprep.mubr.msk.f32.mxu0 %vm341_vm1, %v6859_v4  ;;  %v7443_v36 = vld [vmem:[#allocation72_spill] sm:$0xff] }
 0x142   :  { %4936 = vmatprep.mubr.msk.f32.mxu1 %vm341_vm1, %v7400_v57  ;;  %v7444_v57 = vld [vmem:[#allocation17_spill] sm:$0xff] }
 0x144   :  { %5161 = vmatmul.mubr.msk.f32.gmra.mrb[16].mxu0 %vm341_vm1, %v6870_v10 }
 0x145   :  { %4937 = vmatmul.mubr.msk.f32.vlgmr.msra.gmra.mrb[0].mxu1 %vm341_vm1, %v7401_v52  ;;  %5163 = vmatprep.mubr.msk.f32.mxu0 %vm341_vm1, %v6877_v26  ;;  %v7445_v52 = vld [vmem:[#allocation16_spill] sm:$0xff] }
 0x146   :  { %5235 = vmatpush3.msk.msra.mxu1 %vm438_vm0, %v6691_v60  ;;  %4939 = vmatprep.mubr.msk.f32.mxu1 %vm341_vm1, %v7402_v17  ;;  %v7410_v60 = vld [vmem:[#allocation44_spill] sm:$0xff]  ;;  %v7446_v17 = vld [vmem:[#allocation18_spill] sm:$0xff] }
 0x148   :  { %5164 = vmatmul.mubr.msk.f32.gmra.mrb[18].mxu0 %vm341_vm1, %v6888_v51 }
 0x149   :  { %4940 = vmatmul.mubr.msk.f32.gmra.mrb[2].mxu1 %vm341_vm1, %v7403_v41  ;;  %5166 = vmatprep.mubr.msk.f32.mxu0 %vm341_vm1, %v6897_v25  ;;  %v7447_v41 = vld [vmem:[#allocation20_spill] sm:$0xff] }
 0x14a   :  { %4942 = vmatprep.mubr.msk.f32.mxu1 %vm341_vm1, %v7404_v35  ;;  %v7448_v35 = vld [vmem:[#allocation22_spill] sm:$0xff] }
 0x14c   :  { %5167 = vmatmul.mubr.msk.f32.gmra.mrb[20].mxu0 %vm341_vm1, %v6908_v18 }
 0x14d   :  { %4943 = vmatmul.mubr.msk.f32.gmra.mrb[4].mxu1 %vm341_vm1, %v7405_v31  ;;  %5169 = vmatprep.mubr.msk.f32.mxu0 %vm341_vm1, %v6915_v6  ;;  %v7459_v31 = vld [vmem:[#allocation54_spill] sm:$0xff] }
 0x14e   :  { %4945 = vmatprep.mubr.msk.f32.mxu1 %vm341_vm1, %v7406_v38  ;;  %v3650_v38 = vld [vmem:[%s7313_s0 + $0x11a] sm:$0xff] }
 0x150   :  { %5170 = vmatmul.mubr.msk.f32.gmra.mrb[22].mxu0 %vm341_vm1, %v6926_v58 }
 0x151   :  { %4946 = vmatmul.mubr.msk.f32.gmra.mrb[6].mxu1 %vm341_vm1, %v7407_v34  ;;  %5172 = vmatprep.mubr.msk.f32.mxu0 %vm341_vm1, %v6933_v1  ;;  %v7461_v34 = vld [vmem:[#allocation57_spill] sm:$0xff] }
 0x152   :  { %4948 = vmatprep.mubr.msk.f32.mxu1 %vm341_vm1, %v7408_v12 }
 0x154   :  { %5173 = vmatmul.mubr.msk.f32.gmra.mrb[24].mxu0 %vm341_vm1, %v6944_v48 }
 0x155   :  { %4949 = vmatmul.mubr.msk.f32.gmra.mrb[8].mxu1 %vm341_vm1, %v7409_v15  ;;  %5175 = vmatprep.mubr.msk.f32.mxu0 %vm341_vm1, %v6951_v44 }
 0x156   :  { %4951 = vmatprep.mubr.msk.f32.mxu1 %vm341_vm1, %v7410_v60 }
 0x158   :  { %5176 = vmatmul.mubr.msk.f32.gmra.mrb[26].mxu0 %vm341_vm1, %v6962_v53 }
 0x159   :  { %4952 = vmatmul.mubr.msk.f32.gmra.mrb[10].mxu1 %vm341_vm1, %v7411_v49  ;;  %5178 = vmatprep.mubr.msk.f32.mxu0 %vm341_vm1, %v6969_v45 }
 0x15a   :  { %4954 = vmatprep.mubr.msk.f32.mxu1 %vm341_vm1, %v7412_v8 }
 0x15c   :  { %5179 = vmatmul.mubr.msk.f32.gmra.mrb[28].mxu0 %vm341_vm1, %v6980_v54 }
 0x15d   :  { %4955 = vmatmul.mubr.msk.f32.gmra.mrb[12].mxu1 %vm341_vm1, %v7413_v2  ;;  %5181 = vmatprep.mubr.msk.f32.mxu0 %vm341_vm1, %v3259_v0 }
 0x15e   :  { %4957 = vmatprep.mubr.msk.f32.mxu1 %vm341_vm1, %v7414_v13 }
 0x160   :  { %5182 = vmatmul.mubr.msk.f32.gmra.mrb[30].mxu0 %vm341_vm1, %v3260_v11 }
 0x161   :  { %4958 = vmatmul.mubr.msk.f32.gmra.mrb[14].mxu1 %vm341_vm1, %v7415_v22  ;;  %5186 = vmatprep.mubr.msk.f32.mxu0 %vm341_vm1, %v7416_v20 }
 0x162   :  { %4960 = vmatprep.mubr.msk.f32.mxu1 %vm341_vm1, %v7417_v32 }
 0x164   :  { %5187 = vmatmul.mubr.msk.f32.vlgmr.msra.gmra.mrb[0].mxu0 %vm341_vm1, %v7418_v16 }
 0x165   :  { %4961 = vmatmul.mubr.msk.f32.gmra.mrb[16].mxu1 %vm341_vm1, %v7419_v30  ;;  %5189 = vmatprep.mubr.msk.f32.mxu0 %vm341_vm1, %v7420_v43  ;;  %v7145_v30 = vld [vmem:[%s7314_s2] ss:$0 sm:$0xff] }
 0x166   :  { %4963 = vmatprep.mubr.msk.f32.mxu1 %vm341_vm1, %v7421_v40 }
 0x168   :  { %5190 = vmatmul.mubr.msk.f32.gmra.mrb[2].mxu0 %vm341_vm1, %v7422_v61 }
 0x169   :  { %4964 = vmatmul.mubr.msk.f32.gmra.mrb[18].mxu1 %vm341_vm1, %v7423_v59  ;;  %5192 = vmatprep.mubr.msk.f32.mxu0 %vm341_vm1, %v7424_v14 }
 0x16a   :  { %4966 = vmatprep.mubr.msk.f32.mxu1 %vm341_vm1, %v7425_v33 }
 0x16c   :  { %5193 = vmatmul.mubr.msk.f32.gmra.mrb[4].mxu0 %vm341_vm1, %v7426_v62 }
 0x16d   :  { %4967 = vmatmul.mubr.msk.f32.gmra.mrb[20].mxu1 %vm341_vm1, %v7427_v19  ;;  %5195 = vmatprep.mubr.msk.f32.mxu0 %vm341_vm1, %v7428_v50 }
 0x16e   :  { %4969 = vmatprep.mubr.msk.f32.mxu1 %vm341_vm1, %v7429_v27 }
 0x170   :  { %5196 = vmatmul.mubr.msk.f32.gmra.mrb[6].mxu0 %vm341_vm1, %v7430_v55 }
 0x171   :  { %4970 = vmatmul.mubr.msk.f32.gmra.mrb[22].mxu1 %vm341_vm1, %v7431_v28  ;;  %5198 = vmatprep.mubr.msk.f32.mxu0 %vm341_vm1, %v7432_v29 }
 0x172   :  { %4972 = vmatprep.mubr.msk.f32.mxu1 %vm341_vm1, %v7433_v9 }
 0x174   :  { %5199 = vmatmul.mubr.msk.f32.gmra.mrb[8].mxu0 %vm341_vm1, %v7434_v56 }
 0x175   :  { %4973 = vmatmul.mubr.msk.f32.gmra.mrb[24].mxu1 %vm341_vm1, %v7435_v3  ;;  %5201 = vmatprep.mubr.msk.f32.mxu0 %vm341_vm1, %v7436_v39 }
 0x176   :  { %4975 = vmatprep.mubr.msk.f32.mxu1 %vm341_vm1, %v7437_v63 }
 0x178   :  { %5202 = vmatmul.mubr.msk.f32.gmra.mrb[10].mxu0 %vm341_vm1, %v7438_v7 }
 0x179   :  { %4976 = vmatmul.mubr.msk.f32.gmra.mrb[26].mxu1 %vm341_vm1, %v7439_v46  ;;  %5204 = vmatprep.mubr.msk.f32.mxu0 %vm341_vm1, %v7440_v37 }
 0x17a   :  { %4978 = vmatprep.mubr.msk.f32.mxu1 %vm341_vm1, %v7441_v47 }
 0x17c   :  { %5205 = vmatmul.mubr.msk.f32.gmra.mrb[12].mxu0 %vm341_vm1, %v7442_v21 }
 0x17d   :  { %4979 = vmatmul.mubr.msk.f32.gmra.mrb[28].mxu1 %vm341_vm1, %v7443_v36  ;;  %5207 = vmatprep.mubr.msk.f32.mxu0 %vm341_vm1, %v7444_v57 }
 0x17e   :  { %4981 = vmatprep.mubr.msk.f32.mxu1 %vm341_vm1, %v6661_v5  ;;  %v7449_v5 = vld [vmem:[#allocation24_spill] sm:$0xff] }
 0x180   :  { %5208 = vmatmul.mubr.msk.f32.gmra.mrb[14].mxu0 %vm341_vm1, %v7445_v52 }
 0x181   :  { %4982 = vmatmul.mubr.msk.f32.gmra.mrb[30].mxu1 %vm341_vm1, %v6657_v23  ;;  %5210 = vmatprep.mubr.msk.f32.mxu0 %vm341_vm1, %v7446_v17  ;;  %v7450_v23 = vld [vmem:[#allocation26_spill] sm:$0xff] }
 0x182   :  { %5010 = vmatprep.mubr.msk.f32.mxu1 %vm341_vm1, %v6842_v24  ;;  %v7451_v24 = vld [vmem:[#allocation28_spill] sm:$0xff] }
 0x184   :  { %5211 = vmatmul.mubr.msk.f32.gmra.mrb[16].mxu0 %vm341_vm1, %v7447_v41 }
 0x185   :  { %5011 = vmatmul.mubr.msk.f32.vlgmr.msra.gmra.mrb[16].mxu1 %vm341_vm1, %v6852_v42  ;;  %5213 = vmatprep.mubr.msk.f32.mxu0 %vm341_vm1, %v7448_v35  ;;  %v7452_v42 = vld [vmem:[#allocation31_spill] sm:$0xff] }
 0x186   :  { %5013 = vmatprep.mubr.msk.f32.mxu1 %vm341_vm1, %v6859_v4  ;;  %v7453_v4 = vld [vmem:[#allocation34_spill] sm:$0xff] }
 0x188   :  { %5214 = vmatmul.mubr.msk.f32.gmra.mrb[18].mxu0 %vm341_vm1, %v7449_v5 }
 0x189   :  { %5014 = vmatmul.mubr.msk.f32.gmra.mrb[18].mxu1 %vm341_vm1, %v6870_v10  ;;  %5216 = vmatprep.mubr.msk.f32.mxu0 %vm341_vm1, %v7450_v23  ;;  %v7454_v10 = vld [vmem:[#allocation37_spill] sm:$0xff] }
 0x18a   :  { %5016 = vmatprep.mubr.msk.f32.mxu1 %vm341_vm1, %v6877_v26  ;;  %v7455_v26 = vld [vmem:[#allocation40_spill] sm:$0xff] }
 0x18c   :  { %5217 = vmatmul.mubr.msk.f32.gmra.mrb[20].mxu0 %vm341_vm1, %v7451_v24 }
 0x18d   :  { %5017 = vmatmul.mubr.msk.f32.gmra.mrb[20].mxu1 %vm341_vm1, %v6888_v51  ;;  %5219 = vmatprep.mubr.msk.f32.mxu0 %vm341_vm1, %v7452_v42  ;;  %v7456_v51 = vld [vmem:[#allocation43_spill] sm:$0xff] }
 0x18e   :  { %5019 = vmatprep.mubr.msk.f32.mxu1 %vm341_vm1, %v6897_v25  ;;  %v3649_v25 = vld [vmem:[%s7313_s0 + $0x112] sm:$0xff] }
 0x190   :  { %5220 = vmatmul.mubr.msk.f32.gmra.mrb[22].mxu0 %vm341_vm1, %v7453_v4 }
 0x191   :  { %5020 = vmatmul.mubr.msk.f32.gmra.mrb[22].mxu1 %vm341_vm1, %v6908_v18  ;;  %5222 = vmatprep.mubr.msk.f32.mxu0 %vm341_vm1, %v7454_v10  ;;  %v7457_v18 = vld [vmem:[#allocation46_spill] sm:$0xff] }
 0x192   :  { %5022 = vmatprep.mubr.msk.f32.mxu1 %vm341_vm1, %v6915_v6  ;;  %v7458_v6 = vld [vmem:[#allocation49_spill] sm:$0xff] }
 0x194   :  { %5223 = vmatmul.mubr.msk.f32.gmra.mrb[24].mxu0 %vm341_vm1, %v7455_v26 }
 0x195   :  { %5023 = vmatmul.mubr.msk.f32.gmra.mrb[24].mxu1 %vm341_vm1, %v6926_v58  ;;  %5225 = vmatprep.mubr.msk.f32.mxu0 %vm341_vm1, %v7456_v51  ;;  %v3681_v58 = vmul.f32 %v3649_v25, %v7459_v31 }
 0x196   :  { %5025 = vmatprep.mubr.msk.f32.mxu1 %vm341_vm1, %v6933_v1  ;;  %v7460_v1 = vld [vmem:[#allocation52_spill] sm:$0xff] }
 0x198   :  { %5226 = vmatmul.mubr.msk.f32.gmra.mrb[26].mxu0 %vm341_vm1, %v7457_v18 }
 0x199   :  { %5026 = vmatmul.mubr.msk.f32.gmra.mrb[26].mxu1 %vm341_vm1, %v6944_v48  ;;  %5228 = vmatprep.mubr.msk.f32.mxu0 %vm341_vm1, %v7458_v6  ;;  %v3682_v48 = vmul.f32 %v3650_v38, %v7461_v34 }
 0x19a   :  { %5028 = vmatprep.mubr.msk.f32.mxu1 %vm341_vm1, %v6951_v44 }
 0x19c   :  { %5229 = vmatmul.mubr.msk.f32.gmra.mrb[28].mxu0 %vm341_vm1, %v7460_v1 }
 0x19d   :  { %5029 = vmatmul.mubr.msk.f32.gmra.mrb[28].mxu1 %vm341_vm1, %v6962_v53  ;;  %5231 = vmatprep.mubr.msk.f32.mxu0 %vm341_vm1, %v3681_v58 }
 0x19e   :  { %5031 = vmatprep.mubr.msk.f32.mxu1 %vm341_vm1, %v6969_v45 }
 0x1a0   :  { %5232 = vmatmul.mubr.msk.f32.gmra.mrb[30].mxu0 %vm341_vm1, %v3682_v48 }
 0x1a1   :  { %5032 = vmatmul.mubr.msk.f32.gmra.mrb[30].mxu1 %vm341_vm1, %v6980_v54 }
 0x218   :  { %v4938_v12 = vpop.f32.mrb[0].mxu1 }
 0x219   :  { %v1804_v44 = vpop.f32.mrb[1].mxu1 }
 0x21c   :  { %v4941_v15 = vpop.f32.mrb[2].mxu1 }
 0x21d   :  { %v1814_v60 = vpop.f32.mrb[3].mxu1 }
 0x220   :  { %v4944_v49 = vpop.f32.mrb[4].mxu1 }
 0x221   :  { %v1824_v8 = vpop.f32.mrb[5].mxu1 }
 0x224   :  { %v4947_v0 = vpop.f32.mrb[6].mxu1 }
 0x225   :  { %v1834_v53 = vpop.f32.mrb[7].mxu1 }
 0x228   :  { %v4950_v2 = vpop.f32.mrb[8].mxu1 }
 0x229   :  { %v1844_v11 = vpop.f32.mrb[9].mxu1 }
 0x22c   :  { %v4953_v13 = vpop.f32.mrb[10].mxu1 }
 0x22d   :  { %v1854_v22 = vpop.f32.mrb[11].mxu1 }
 0x230   :  { %v7134_v20 = vpop.f32.mrb[12].mxu1 }
 0x231   :  { %v7136_v45 = vpop.f32.mrb[13].mxu1 }
 0x234   :  { %v7138_v32 = vpop.f32.mrb[14].mxu1 }
 0x235   :  { %v7140_v16 = vpop.f32.mrb[15].mxu1 }
 0x237   :  { %v5188_v54 = vpop.f32.mrb[0].mxu0 }
 0x238   :  { %v5236_v43 = vadd.f32 %v5188_v54, %v4938_v12  ;;  %v3850_v40 = vpop.f32.mrb[1].mxu0 }
 0x239   :  { %v5237_v61 = vadd.f32 %v3850_v40, %v1804_v44 }
 0x23a   :  { %v4049_v59 = vadd.f32 %v5236_v43, %v7145_v30 }
 0x23b   :  { %v4048_v14 = vadd.f32 %v5237_v61, %v7145_v30  ;;  %v5191_v33 = vpop.f32.mrb[2].mxu0 }
 0x23c   :  { %v4081_v62 = vmax.f32 %v4049_v59, 0.0  ;;  %v5238_v19 = vadd.f32 %v5191_v33, %v4941_v15  ;;  %v3860_v50 = vpop.f32.mrb[3].mxu0 }
 0x23d   :  { %v4080_v27 = vmax.f32 %v4048_v14, 0.0  ;;  %v5239_v55 = vadd.f32 %v3860_v50, %v1814_v60 }
 0x23e   :  { %4114 = vst.msk [vmem:[%s7315_s4 + $0x8] sm:$0xff] %vm4112_vm2, %v4081_v62  ;;  %v4051_v28 = vadd.f32 %v5238_v19, %v7145_v30 }
 0x23f   :  { %4113 = vst.msk [vmem:[%s7315_s4] sm:$0xff] %vm4112_vm2, %v4080_v27  ;;  %v4050_v29 = vadd.f32 %v5239_v55, %v7145_v30  ;;  %v5194_v9 = vpop.f32.mrb[4].mxu0 }
 0x240   :  { %v4083_v56 = vmax.f32 %v4051_v28, 0.0  ;;  %v5240_v3 = vadd.f32 %v5194_v9, %v4944_v49  ;;  %v3870_v39 = vpop.f32.mrb[5].mxu0 }
 0x241   :  { %v4082_v63 = vmax.f32 %v4050_v29, 0.0  ;;  %v5241_v7 = vadd.f32 %v3870_v39, %v1824_v8 }
 0x242   :  { %4116 = vst.msk [vmem:[%s7315_s4 + $0x18] sm:$0xff] %vm4112_vm2, %v4083_v56  ;;  %v4053_v46 = vadd.f32 %v5240_v3, %v7145_v30 }
 0x243   :  { %4115 = vst.msk [vmem:[%s7315_s4 + $0x10] sm:$0xff] %vm4112_vm2, %v4082_v63  ;;  %v4052_v37 = vadd.f32 %v5241_v7, %v7145_v30  ;;  %v5197_v47 = vpop.f32.mrb[6].mxu0 }
 0x244   :  { %v4085_v21 = vmax.f32 %v4053_v46, 0.0  ;;  %v5242_v36 = vadd.f32 %v5197_v47, %v4947_v0  ;;  %v3880_v57 = vpop.f32.mrb[7].mxu0 }
 0x245   :  { %v4084_v52 = vmax.f32 %v4052_v37, 0.0  ;;  %v5243_v17 = vadd.f32 %v3880_v57, %v1834_v53 }
 0x246   :  { %4118 = vst.msk [vmem:[%s7315_s4 + $0x28] sm:$0xff] %vm4112_vm2, %v4085_v21  ;;  %v4055_v41 = vadd.f32 %v5242_v36, %v7145_v30 }
 0x247   :  { %4117 = vst.msk [vmem:[%s7315_s4 + $0x20] sm:$0xff] %vm4112_vm2, %v4084_v52  ;;  %v4054_v35 = vadd.f32 %v5243_v17, %v7145_v30  ;;  %v5200_v5 = vpop.f32.mrb[8].mxu0 }
 0x248   :  { %v4087_v23 = vmax.f32 %v4055_v41, 0.0  ;;  %v5244_v24 = vadd.f32 %v5200_v5, %v4950_v2  ;;  %v3890_v42 = vpop.f32.mrb[9].mxu0 }
 0x249   :  { %v4086_v4 = vmax.f32 %v4054_v35, 0.0  ;;  %v5245_v10 = vadd.f32 %v3890_v42, %v1844_v11 }
 0x24a   :  { %4120 = vst.msk [vmem:[%s7315_s4 + $0x38] sm:$0xff] %vm4112_vm2, %v4087_v23  ;;  %v4057_v26 = vadd.f32 %v5244_v24, %v7145_v30 }
 0x24b   :  { %4119 = vst.msk [vmem:[%s7315_s4 + $0x30] sm:$0xff] %vm4112_vm2, %v4086_v4  ;;  %v4056_v51 = vadd.f32 %v5245_v10, %v7145_v30  ;;  %v5203_v25 = vpop.f32.mrb[10].mxu0 }
 0x24c   :  { %v4089_v18 = vmax.f32 %v4057_v26, 0.0  ;;  %v5246_v6 = vadd.f32 %v5203_v25, %v4953_v13  ;;  %v3900_v31 = vpop.f32.mrb[11].mxu0 }
 0x24d   :  { %v4088_v58 = vmax.f32 %v4056_v51, 0.0  ;;  %v5247_v38 = vadd.f32 %v3900_v31, %v1854_v22 }
 0x24e   :  { %4122 = vst.msk [vmem:[%s7315_s4 + $0x48] sm:$0xff] %vm4112_vm2, %v4089_v18  ;;  %v4059_v1 = vadd.f32 %v5246_v6, %v7145_v30 }
 0x24f   :  { %4121 = vst.msk [vmem:[%s7315_s4 + $0x40] sm:$0xff] %vm4112_vm2, %v4088_v58  ;;  %v4058_v34 = vadd.f32 %v5247_v38, %v7145_v30  ;;  %v5206_v48 = vpop.f32.mrb[12].mxu0 }
 0x250   :  { %v4091_v12 = vmax.f32 %v4059_v1, 0.0  ;;  %v5248_v44 = vadd.f32 %v5206_v48, %v7134_v20  ;;  %v3910_v15 = vpop.f32.mrb[13].mxu0 }
 0x251   :  { %v4090_v60 = vmax.f32 %v4058_v34, 0.0  ;;  %v5249_v49 = vadd.f32 %v3910_v15, %v7136_v45 }
 0x252   :  { %4124 = vst.msk [vmem:[%s7315_s4 + $0x58] sm:$0xff] %vm4112_vm2, %v4091_v12  ;;  %v4061_v8 = vadd.f32 %v5248_v44, %v7145_v30 }
 0x253   :  { %4123 = vst.msk [vmem:[%s7315_s4 + $0x50] sm:$0xff] %vm4112_vm2, %v4090_v60  ;;  %v4060_v0 = vadd.f32 %v5249_v49, %v7145_v30  ;;  %v5209_v53 = vpop.f32.mrb[14].mxu0 }
 0x254   :  { %v4093_v2 = vmax.f32 %v4061_v8, 0.0  ;;  %v5250_v11 = vadd.f32 %v5209_v53, %v7138_v32  ;;  %v3920_v13 = vpop.f32.mrb[15].mxu0 }
 0x255   :  { %v4092_v22 = vmax.f32 %v4060_v0, 0.0  ;;  %v5251_v20 = vadd.f32 %v3920_v13, %v7140_v16 }
 0x256   :  { %4126 = vst.msk [vmem:[%s7315_s4 + $0x68] sm:$0xff] %vm4112_vm2, %v4093_v2  ;;  %v4063_v45 = vadd.f32 %v5250_v11, %v7145_v30 }
 0x257   :  { %4125 = vst.msk [vmem:[%s7315_s4 + $0x60] sm:$0xff] %vm4112_vm2, %v4092_v22  ;;  %v4062_v54 = vadd.f32 %v5251_v20, %v7145_v30  ;;  %v5212_v43 = vpop.f32.mrb[16].mxu0 }
 0x258   :  { %v4095_v32 = vmax.f32 %v4063_v45, 0.0  ;;  %v5012_v40 = vpop.f32.mrb[16].mxu1  ;;  %v3930_v61 = vpop.f32.mrb[17].mxu0 }
 0x259   :  { %v4094_v59 = vmax.f32 %v4062_v54, 0.0  ;;  %v5252_v16 = vadd.f32 %v5212_v43, %v5012_v40  ;;  %v2274_v14 = vpop.f32.mrb[17].mxu1 }
 0x25a   :  { %4128 = vst.msk [vmem:[%s7315_s4 + $0x78] sm:$0xff] %vm4112_vm2, %v4095_v32  ;;  %v5253_v33 = vadd.f32 %v3930_v61, %v2274_v14 }
 0x25b   :  { %4127 = vst.msk [vmem:[%s7315_s4 + $0x70] sm:$0xff] %vm4112_vm2, %v4094_v59  ;;  %v4065_v62 = vadd.f32 %v5252_v16, %v7145_v30  ;;  %v5215_v19 = vpop.f32.mrb[18].mxu0 }
 0x25c   :  { %v4064_v50 = vadd.f32 %v5253_v33, %v7145_v30  ;;  %v5015_v27 = vpop.f32.mrb[18].mxu1  ;;  %v3940_v55 = vpop.f32.mrb[19].mxu0 }
 0x25d   :  { %v4097_v28 = vmax.f32 %v4065_v62, 0.0  ;;  %v5254_v29 = vadd.f32 %v5215_v19, %v5015_v27  ;;  %v2284_v9 = vpop.f32.mrb[19].mxu1 }
 0x25e   :  { %v4096_v56 = vmax.f32 %v4064_v50, 0.0  ;;  %v5255_v3 = vadd.f32 %v3940_v55, %v2284_v9 }
 0x25f   :  { %4130 = vst.msk [vmem:[%s7315_s4 + $0x88] sm:$0xff] %vm4112_vm2, %v4097_v28  ;;  %v4067_v39 = vadd.f32 %v5254_v29, %v7145_v30  ;;  %v5218_v63 = vpop.f32.mrb[20].mxu0 }
 0x260   :  { %4129 = vst.msk [vmem:[%s7315_s4 + $0x80] sm:$0xff] %vm4112_vm2, %v4096_v56  ;;  %v4066_v7 = vadd.f32 %v5255_v3, %v7145_v30  ;;  %v5018_v46 = vpop.f32.mrb[20].mxu1  ;;  %v3950_v37 = vpop.f32.mrb[21].mxu0 }
 0x261   :  { %v4099_v47 = vmax.f32 %v4067_v39, 0.0  ;;  %v5256_v21 = vadd.f32 %v5218_v63, %v5018_v46  ;;  %v2294_v36 = vpop.f32.mrb[21].mxu1 }
 0x262   :  { %v4098_v57 = vmax.f32 %v4066_v7, 0.0  ;;  %v5257_v52 = vadd.f32 %v3950_v37, %v2294_v36 }
 0x263   :  { %4132 = vst.msk [vmem:[%s7315_s4 + $0x98] sm:$0xff] %vm4112_vm2, %v4099_v47  ;;  %v4069_v17 = vadd.f32 %v5256_v21, %v7145_v30  ;;  %v5221_v41 = vpop.f32.mrb[22].mxu0 }
 0x264   :  { %4131 = vst.msk [vmem:[%s7315_s4 + $0x90] sm:$0xff] %vm4112_vm2, %v4098_v57  ;;  %v4068_v35 = vadd.f32 %v5257_v52, %v7145_v30  ;;  %v5021_v5 = vpop.f32.mrb[22].mxu1  ;;  %v3960_v23 = vpop.f32.mrb[23].mxu0 }
 0x265   :  { %v4101_v24 = vmax.f32 %v4069_v17, 0.0  ;;  %v5258_v42 = vadd.f32 %v5221_v41, %v5021_v5  ;;  %v2304_v4 = vpop.f32.mrb[23].mxu1 }
 0x266   :  { %v4100_v10 = vmax.f32 %v4068_v35, 0.0  ;;  %v5259_v26 = vadd.f32 %v3960_v23, %v2304_v4 }
 0x267   :  { %4134 = vst.msk [vmem:[%s7315_s4 + $0xa8] sm:$0xff] %vm4112_vm2, %v4101_v24  ;;  %v4071_v51 = vadd.f32 %v5258_v42, %v7145_v30  ;;  %v5224_v25 = vpop.f32.mrb[24].mxu0 }
 0x268   :  { %4133 = vst.msk [vmem:[%s7315_s4 + $0xa0] sm:$0xff] %vm4112_vm2, %v4100_v10  ;;  %v4070_v18 = vadd.f32 %v5259_v26, %v7145_v30  ;;  %v5024_v6 = vpop.f32.mrb[24].mxu1  ;;  %v3970_v31 = vpop.f32.mrb[25].mxu0 }
 0x269   :  { %v4103_v58 = vmax.f32 %v4071_v51, 0.0  ;;  %v5260_v38 = vadd.f32 %v5224_v25, %v5024_v6  ;;  %v2314_v1 = vpop.f32.mrb[25].mxu1 }
 0x26a   :  { %v4102_v34 = vmax.f32 %v4070_v18, 0.0  ;;  %v5261_v48 = vadd.f32 %v3970_v31, %v2314_v1 }
 0x26b   :  { %4136 = vst.msk [vmem:[%s7315_s4 + $0xb8] sm:$0xff] %vm4112_vm2, %v4103_v58  ;;  %v4073_v12 = vadd.f32 %v5260_v38, %v7145_v30  ;;  %v5227_v44 = vpop.f32.mrb[26].mxu0 }
 0x26c   :  { %4135 = vst.msk [vmem:[%s7315_s4 + $0xb0] sm:$0xff] %vm4112_vm2, %v4102_v34  ;;  %v4072_v15 = vadd.f32 %v5261_v48, %v7145_v30  ;;  %v5027_v60 = vpop.f32.mrb[26].mxu1  ;;  %v3980_v49 = vpop.f32.mrb[27].mxu0 }
 0x26d   :  { %v4105_v8 = vmax.f32 %v4073_v12, 0.0  ;;  %v5262_v0 = vadd.f32 %v5227_v44, %v5027_v60  ;;  %v2324_v53 = vpop.f32.mrb[27].mxu1 }
 0x26e   :  { %v4104_v2 = vmax.f32 %v4072_v15, 0.0  ;;  %v5263_v11 = vadd.f32 %v3980_v49, %v2324_v53 }
 0x26f   :  { %4138 = vst.msk [vmem:[%s7315_s4 + $0xc8] sm:$0xff] %vm4112_vm2, %v4105_v8  ;;  %v4075_v13 = vadd.f32 %v5262_v0, %v7145_v30  ;;  %v5230_v22 = vpop.f32.mrb[28].mxu0 }
 0x270   :  { %4137 = vst.msk [vmem:[%s7315_s4 + $0xc0] sm:$0xff] %vm4112_vm2, %v4104_v2  ;;  %v4074_v20 = vadd.f32 %v5263_v11, %v7145_v30  ;;  %v5030_v45 = vpop.f32.mrb[28].mxu1  ;;  %v3990_v54 = vpop.f32.mrb[29].mxu0 }
 0x271   :  { %v4107_v43 = vmax.f32 %v4075_v13, 0.0  ;;  %v5264_v32 = vadd.f32 %v5230_v22, %v5030_v45  ;;  %v2334_v40 = vpop.f32.mrb[29].mxu1 }
 0x272   :  { %v4106_v61 = vmax.f32 %v4074_v20, 0.0  ;;  %v5265_v59 = vadd.f32 %v3990_v54, %v2334_v40 }
 0x273   :  { %4140 = vst.msk [vmem:[%s7315_s4 + $0xd8] sm:$0xff] %vm4112_vm2, %v4107_v43  ;;  %v4077_v16 = vadd.f32 %v5264_v32, %v7145_v30  ;;  %v5233_v14 = vpop.f32.mrb[30].mxu0 }
 0x274   :  { %4139 = vst.msk [vmem:[%s7315_s4 + $0xd0] sm:$0xff] %vm4112_vm2, %v4106_v61  ;;  %v4076_v33 = vadd.f32 %v5265_v59, %v7145_v30  ;;  %v5033_v62 = vpop.f32.mrb[30].mxu1  ;;  %v4000_v19 = vpop.f32.mrb[31].mxu0 }
 0x275   :  { %v4109_v50 = vmax.f32 %v4077_v16, 0.0  ;;  %v5266_v27 = vadd.f32 %v5233_v14, %v5033_v62  ;;  %v2344_v55 = vpop.f32.mrb[31].mxu1 }
 0x276   :  { %v4108_v28 = vmax.f32 %v4076_v33, 0.0  ;;  %v5267_v29 = vadd.f32 %v4000_v19, %v2344_v55 }
 0x277   :  { %4142 = vst.msk [vmem:[%s7315_s4 + $0xe8] sm:$0xff] %vm4112_vm2, %v4109_v50  ;;  %v4079_v9 = vadd.f32 %v5266_v27, %v7145_v30 }
 0x278   :  { %4141 = vst.msk [vmem:[%s7315_s4 + $0xe0] sm:$0xff] %vm4112_vm2, %v4108_v28  ;;  %v4078_v56 = vadd.f32 %v5267_v29, %v7145_v30 }
 0x279   :  { %v4111_v3 = vmax.f32 %v4079_v9, 0.0 }
 0x27a   :  { %v4110_v39 = vmax.f32 %v4078_v56, 0.0 }
 0x27b   :  { %4144 = vst.msk [vmem:[%s7315_s4 + $0xf8] sm:$0xff] %vm4112_vm2, %v4111_v3 }
 0x27c   :  { %4143 = vst.msk [vmem:[%s7315_s4 + $0xf0] sm:$0xff] %vm4112_vm2, %v4110_v39 }

// kernel: _lambda_.10
= control target key start
LH: loop header
LB: loop body
LE: loop exit
PB: predicated region body
PF: predicated region fallthrough
CT: control target
= control target key end

     0   :  { %v3590_v0 = vmov 0   ;;  %v3591_v2 = vmov 0.0|0.0   ;;  %vm3592_vm0 = vmmov 0   ;;  %v3593_v7 = vmov 0.0   ;;  %s4568_s5 = inlined_call_operand.vmem [shape: f32[2,4,1], index: 5, kind: input, shape index: {}]   ;;  %s4569_s1 = inlined_call_operand.vmem [shape: f32[9,64,64], index: 1, kind: input, shape index: {}]   ;;  %s4570_s2 = inlined_call_operand.vmem [shape: f32[9,64,64], index: 2, kind: input, shape index: {}]   ;;  %s4571_s0 = inlined_call_operand.vmem [shape: f32[1,10,64], index: 0, kind: input, shape index: {}]   ;;  %s4572_s3 = inlined_call_operand.vmem [shape: f32[9,64,64], index: 3, kind: input, shape index: {}]   ;;  %s4573_s4 = inlined_call_operand.vmem [shape: f32[3,64], index: 4, kind: input, shape index: {}]   ;;  %s4574_s6 = inlined_call_operand.vmem [shape: f32[1,4,64], index: 6, kind: output, shape index: {}]  }
   0x1   :  { %3577 = vset.pattern.permute.xlu0 %v3590_v0  ;;  %v23_v1 = vld [vmem:[%s4568_s5] sm:$0xf]  ;;  %3249 = vmatprep.subr.bf16.mxu0 %v3591_v2  ;;  %v2270_v4 = vld [vmem:[%s4569_s1 + $0x48] sm:$0xff]  ;;  %v2271_v5 = vld [vmem:[%s4569_s1 + $0x50] sm:$0xff]  ;;  %vm67_vm1 = vcmask 523264   ;;  %vm2262_vm2 = vcmask 519168  }
   0x2   :  { %v2269_v3 = vld [vmem:[%s4569_s1 + $0x40] sm:$0xff]  ;;  %29 = vperm.xlu0 %3577, %v23_v1   ;;  %v2272_v6 = vld [vmem:[%s4569_s1 + $0x58] sm:$0xff]  ;;  %2752 = vmatprep.mubr.msk.f32.mxu0 %vm3592_vm0, %v3593_v7  ;;  %v2274_v12 = vld [vmem:[%s4569_s1 + $0x68] sm:$0xff] }
   0x3   :  { %v2268_v8 = vld [vmem:[%s4568_s5 + $0x4] sm:$0xf]  ;;  %v3250_v9 = vpack.c.bf16 %v2270_v4, %v2269_v3  ;;  %3261 = vmatprep.subr.bf16.mxu1 %v3591_v2  ;;  %2771 = vmatprep.mubr.msk.f32.mxu1 %vm3592_vm0, %v3593_v7  ;;  %v3253_v10 = vpack.c.bf16 %v2272_v6, %v2271_v5  ;;  %v34_v15 = vld [vmem:[%s4569_s1 + $0x8] sm:$0xff]  ;;  %v2275_v16 = vld [vmem:[%s4569_s1 + $0x70] sm:$0xff] }
   0x4   :  { %v2273_v11 = vld [vmem:[%s4569_s1 + $0x60] sm:$0xff]  ;;  %v2276_v17 = vld [vmem:[%s4569_s1 + $0x78] sm:$0xff]  ;;  %v35_v19 = vld [vmem:[%s4569_s1 + $0x10] sm:$0xff] }
   0x5   :  { %3251 = vmatpush3.bf16.msra.mxu0 %v3250_v9  ;;  %v3256_v13 = vpack.c.bf16 %v2274_v12, %v2273_v11  ;;  %v33_v14 = vld [vmem:[%s4569_s1] sm:$0xff]  ;;  %v36_v20 = vld [vmem:[%s4569_s1 + $0x18] sm:$0xff]  ;;  %v3259_v22 = vpack.c.bf16 %v2276_v17, %v2275_v16  ;;  %v38_v24 = vld [vmem:[%s4569_s1 + $0x28] sm:$0xff] }
   0x6   :  { %515 = vperm.xlu0 %3577, %v2268_v8   ;;  %3252 = vmatprep.subr.bf16.mxu0 %v3591_v2  ;;  %v3262_v18 = vpack.c.bf16 %v34_v15, %v33_v14  ;;  %v3265_v21 = vpack.c.bf16 %v36_v20, %v35_v19  ;;  %v37_v23 = vld [vmem:[%s4569_s1 + $0x20] sm:$0xff]  ;;  %v2280_v26 = vld [vmem:[%s4570_s2 + $0x48] sm:$0xff]  ;;  %v39_v30 = vld [vmem:[%s4569_s1 + $0x30] sm:$0xff] }
   0x7   :  { %v2279_v25 = vld [vmem:[%s4570_s2 + $0x40] sm:$0xff]  ;;  %v3268_v27 = vpack.c.bf16 %v38_v24, %v37_v23  ;;  %v40_v31 = vld [vmem:[%s4569_s1 + $0x38] sm:$0xff]  ;;  %v2281_v32 = vld [vmem:[%s4570_s2 + $0x50] sm:$0xff] }
   0x8   :  { %3263 = vmatpush3.bf16.msra.mxu1 %v3262_v18  ;;  %v57_v28 = vld [vmem:[%s4571_s0 + $0x1] sm:$0xf]  ;;  %v3274_v29 = vpack.c.bf16 %v2280_v26, %v2279_v25  ;;  %v2282_v33 = vld [vmem:[%s4570_s2 + $0x58] sm:$0xff]  ;;  %v3271_v34 = vpack.c.bf16 %v40_v31, %v39_v30  ;;  %v2284_v37 = vld [vmem:[%s4570_s2 + $0x68] sm:$0xff] }
   0x9   :  { %3254 = vmatpush3.bf16.msra.mxu0 %v3253_v10  ;;  %3264 = vmatprep.subr.bf16.mxu1 %v3591_v2  ;;  %v3277_v35 = vpack.c.bf16 %v2282_v33, %v2281_v32  ;;  %v2283_v36 = vld [vmem:[%s4570_s2 + $0x60] sm:$0xff]  ;;  %v2285_v39 = vld [vmem:[%s4570_s2 + $0x70] sm:$0xff]  ;;  %v2286_v40 = vld [vmem:[%s4570_s2 + $0x78] sm:$0xff] }
   0xa   :  { %3255 = vmatprep.subr.bf16.mxu0 %v3591_v2  ;;  %v3280_v38 = vpack.c.bf16 %v2284_v37, %v2283_v36  ;;  %v3283_v41 = vpack.c.bf16 %v2286_v40, %v2285_v39  ;;  %v2289_v42 = vld [vmem:[%s4572_s3 + $0x40] sm:$0xff]  ;;  %v2290_v43 = vld [vmem:[%s4572_s3 + $0x48] sm:$0xff]  ;;  %v2291_v45 = vld [vmem:[%s4572_s3 + $0x50] sm:$0xff] }
   0xb   :  { %v3298_v44 = vpack.c.bf16 %v2290_v43, %v2289_v42  ;;  %v2292_v46 = vld [vmem:[%s4572_s3 + $0x58] sm:$0xff]  ;;  %v2293_v48 = vld [vmem:[%s4572_s3 + $0x60] sm:$0xff]  ;;  %v2294_v49 = vld [vmem:[%s4572_s3 + $0x68] sm:$0xff] }
   0xc   :  { %3266 = vmatpush3.bf16.msra.mxu1 %v3265_v21  ;;  %v3301_v47 = vpack.c.bf16 %v2292_v46, %v2291_v45  ;;  %v3304_v50 = vpack.c.bf16 %v2294_v49, %v2293_v48  ;;  %v2295_v51 = vld [vmem:[%s4572_s3 + $0x70] sm:$0xff]  ;;  %v2296_v52 = vld [vmem:[%s4572_s3 + $0x78] sm:$0xff]  ;;  %v2299_v54 = vld [vmem:[%s4569_s1 + $0x80] sm:$0xff] }
   0xd   :  { %3257 = vmatpush3.bf16.msra.mxu0 %v3256_v13  ;;  %3267 = vmatprep.subr.bf16.mxu1 %v3591_v2  ;;  %v3307_v53 = vpack.c.bf16 %v2296_v52, %v2295_v51  ;;  %v2300_v55 = vld [vmem:[%s4569_s1 + $0x88] sm:$0xff]  ;;  %v2301_v57 = vld [vmem:[%s4569_s1 + $0x90] sm:$0xff]  ;;  %v2302_v58 = vld [vmem:[%s4569_s1 + $0x98] sm:$0xff] }
   0xe   :  { %3258 = vmatprep.subr.bf16.mxu0 %v3591_v2  ;;  %v3322_v56 = vpack.c.bf16 %v2300_v55, %v2299_v54  ;;  %v3325_v59 = vpack.c.bf16 %v2302_v58, %v2301_v57  ;;  %v2303_v60 = vld [vmem:[%s4569_s1 + $0xa0] sm:$0xff]  ;;  %v2304_v61 = vld [vmem:[%s4569_s1 + $0xa8] sm:$0xff]  ;;  %v2305_v63 = vld [vmem:[%s4569_s1 + $0xb0] sm:$0xff] }
   0xf   :  { %v3328_v62 = vpack.c.bf16 %v2304_v61, %v2303_v60  ;;  %v2306_v0 = vld [vmem:[%s4569_s1 + $0xb8] sm:$0xff]  ;;  %v41_v3 = vld [vmem:[%s4570_s2] sm:$0xff]  ;;  %v42_v4 = vld [vmem:[%s4570_s2 + $0x8] sm:$0xff] }
  0x10   :  { %3269 = vmatpush3.bf16.msra.mxu1 %v3268_v27  ;;  %v3331_v1 = vpack.c.bf16 %v2306_v0, %v2305_v63  ;;  %v26_v5 = vld [vmem:[%s4571_s0] sm:$0xf]  ;;  %v3286_v8 = vpack.c.bf16 %v42_v4, %v41_v3  ;;  %v43_v9 = vld [vmem:[%s4570_s2 + $0x10] sm:$0xff]  ;;  %v44_v11 = vld [vmem:[%s4570_s2 + $0x18] sm:$0xff] }
  0x11   :  { %3260 = vmatpush3.bf16.msra.mxu0 %v3259_v22  ;;  %3270 = vmatprep.subr.bf16.mxu1 %v3591_v2  ;;  %v2317_v12 = vld [vmem:[%s4572_s3 + $0x80] sm:$0xff]  ;;  %v2318_v13 = vld [vmem:[%s4572_s3 + $0x88] sm:$0xff]  ;;  %v3289_v16 = vpack.c.bf16 %v44_v11, %v43_v9  ;;  %v2319_v21 = vld [vmem:[%s4572_s3 + $0x90] sm:$0xff] }
  0x12   :  { %3273 = vmatprep.subr.bf16.mxu0 %v3591_v2  ;;  %v3826_v15 = vld [vmem:[%s4571_s0 + $0x2] sm:$0xf]  ;;  %v3346_v17 = vpack.c.bf16 %v2318_v13, %v2317_v12  ;;  %v46_v20 = vld [vmem:[%s4570_s2 + $0x28] sm:$0xff]  ;;  %v2320_v22 = vld [vmem:[%s4572_s3 + $0x98] sm:$0xff] }
  0x13   :  { %v45_v18 = vld [vmem:[%s4570_s2 + $0x20] sm:$0xff]  ;;  %v3349_v24 = vpack.c.bf16 %v2320_v22, %v2319_v21  ;;  %v47_v25 = vld [vmem:[%s4570_s2 + $0x30] sm:$0xff]  ;;  %v48_v26 = vld [vmem:[%s4570_s2 + $0x38] sm:$0xff] }
  0x14   :  { %2753 = vmatmul.mubr.msk.f32.vlgmr.msra.gmra.mrb[0].mxu0 %vm67_vm1, %v57_v28  ;;  %3272 = vmatpush3.bf16.msra.mxu1 %v3271_v34  ;;  %v3292_v23 = vpack.c.bf16 %v46_v20, %v45_v18  ;;  %v2321_v27 = vld [vmem:[%s4572_s3 + $0xa0] sm:$0xff]  ;;  %v50_v32 = vld [vmem:[%s4572_s3 + $0x8] sm:$0xff]  ;;  %v2323_v33 = vld [vmem:[%s4572_s3 + $0xb0] sm:$0xff] }
  0x15   :  { %3275 = vmatpush3.bf16.msra.mxu0 %v3274_v29  ;;  %2790 = vmatprep.mubr.msk.f32.mxu0 %vm3592_vm0, %v3593_v7  ;;  %v3295_v29 = vpack.c.bf16 %v48_v26, %v47_v25  ;;  %v49_v31 = vld [vmem:[%s4572_s3] sm:$0xff]  ;;  %v2324_v34 = vld [vmem:[%s4572_s3 + $0xb8] sm:$0xff]  ;;  %v51_v37 = vld [vmem:[%s4572_s3 + $0x10] sm:$0xff] }
  0x16   :  { %3276 = vmatprep.subr.bf16.mxu0 %v3591_v2  ;;  %3285 = vmatprep.subr.bf16.mxu1 %v3591_v2  ;;  %v3355_v36 = vpack.c.bf16 %v2324_v34, %v2323_v33  ;;  %v2335_v39 = vld [vmem:[%s4570_s2 + $0xc0] sm:$0xff]  ;;  %v2336_v40 = vld [vmem:[%s4570_s2 + $0xc8] sm:$0xff]  ;;  %v2337_v45 = vld [vmem:[%s4570_s2 + $0xd0] sm:$0xff] }
  0x17   :  { %v3370_v42 = vpack.c.bf16 %v2336_v40, %v2335_v39  ;;  %v53_v43 = vld [vmem:[%s4572_s3 + $0x20] sm:$0xff]  ;;  %v2338_v46 = vld [vmem:[%s4570_s2 + $0xd8] sm:$0xff]  ;;  %v55_v49 = vld [vmem:[%s4572_s3 + $0x30] sm:$0xff] }
  0x18   :  { %v3373_v48 = vpack.c.bf16 %v2338_v46, %v2337_v45  ;;  %v2339_v51 = vld [vmem:[%s4570_s2 + $0xe0] sm:$0xff]  ;;  %v2340_v52 = vld [vmem:[%s4570_s2 + $0xe8] sm:$0xff]  ;;  %v2341_v57 = vld [vmem:[%s4570_s2 + $0xf0] sm:$0xff] }
  0x19   :  { %3278 = vmatpush3.bf16.msra.mxu0 %v3277_v35  ;;  %v3310_v35 = vpack.c.bf16 %v50_v32, %v49_v31  ;;  %v3376_v54 = vpack.c.bf16 %v2340_v52, %v2339_v51  ;;  %v2308_v55 = vld [vmem:[%s4570_s2 + $0x80] sm:$0xff]  ;;  %v2342_v58 = vld [vmem:[%s4570_s2 + $0xf8] sm:$0xff]  ;;  %v2310_v61 = vld [vmem:[%s4570_s2 + $0x90] sm:$0xff] }
  0x1a   :  { %3279 = vmatprep.subr.bf16.mxu0 %v3591_v2  ;;  %v3379_v60 = vpack.c.bf16 %v2342_v58, %v2341_v57  ;;  %v2353_v63 = vld [vmem:[%s4569_s1 + $0x100] sm:$0xff]  ;;  %v2354_v0 = vld [vmem:[%s4569_s1 + $0x108] sm:$0xff]  ;;  %v2355_v9 = vld [vmem:[%s4569_s1 + $0x110] sm:$0xff] }
  0x1b   :  { %v3394_v3 = vpack.c.bf16 %v2354_v0, %v2353_v63  ;;  %v2312_v4 = vld [vmem:[%s4570_s2 + $0xa0] sm:$0xff]  ;;  %v2314_v13 = vld [vmem:[%s4570_s2 + $0xb0] sm:$0xff]  ;;  %v2327_v22 = vld [vmem:[%s4569_s1 + $0xc8] sm:$0xff] }
  0x1c   :  { %v2326_v21 = vld [vmem:[%s4569_s1 + $0xc0] sm:$0xff]  ;;  %v2332_v39 = vld [vmem:[%s4569_s1 + $0xf0] sm:$0xff]  ;;  %v2333_v40 = vld [vmem:[%s4569_s1 + $0xf8] sm:$0xff] }
  0x1d   :  { %3281 = vmatpush3.bf16.msra.mxu0 %v3280_v38  ;;  %v52_v38 = vld [vmem:[%s4572_s3 + $0x18] sm:$0xff]  ;;  %v3358_v25 = vpack.c.bf16 %v2327_v22, %v2326_v21  ;;  %v4030_v32 = vld [vmem:[%s4571_s0 + $0x3] sm:$0xf]  ;;  %v2345_v46 = vld [vmem:[%s4572_s3 + $0xc8] sm:$0xff] }
  0x1e   :  { %3282 = vmatprep.subr.bf16.mxu0 %v3591_v2  ;;  %v2330_v34 = vld [vmem:[%s4569_s1 + $0xe0] sm:$0xff]  ;;  %v2346_v51 = vld [vmem:[%s4572_s3 + $0xd0] sm:$0xff]  ;;  %v2347_v52 = vld [vmem:[%s4572_s3 + $0xd8] sm:$0xff] }
  0x1f   :  { %v2344_v45 = vld [vmem:[%s4572_s3 + $0xc0] sm:$0xff]  ;;  %v2349_v58 = vld [vmem:[%s4572_s3 + $0xe8] sm:$0xff]  ;;  %v2350_v63 = vld [vmem:[%s4572_s3 + $0xf0] sm:$0xff] }
  0x20   :  { %v2348_v57 = vld [vmem:[%s4572_s3 + $0xe0] sm:$0xff]  ;;  %v2351_v0 = vld [vmem:[%s4572_s3 + $0xf8] sm:$0xff] }
  0x21   :  { %3284 = vmatpush3.bf16.msra.mxu0 %v3283_v41  ;;  %v3313_v41 = vpack.c.bf16 %v52_v38, %v51_v37  ;;  %v1250_v21 = vld [vmem:[%s4571_s0 + $0x4] sm:$0xf] }
  0x22   :  { %3297 = vmatprep.subr.bf16.mxu0 %v3591_v2 }
  0x24   :  { %2791 = vmatmul.mubr.msk.f32.vlgmr.msra.gmra.mrb[2].mxu0 %vm67_vm1, %v57_v28 }
  0x25   :  { %3299 = vmatpush3.bf16.msra.mxu0 %v3298_v44  ;;  %2828 = vmatprep.mubr.msk.f32.mxu0 %vm3592_vm0, %v3593_v7  ;;  %v54_v44 = vld [vmem:[%s4572_s3 + $0x28] sm:$0xff] }
  0x26   :  { %3300 = vmatprep.subr.bf16.mxu0 %v3591_v2 }
  0x29   :  { %3302 = vmatpush3.bf16.msra.mxu0 %v3301_v47  ;;  %v3316_v47 = vpack.c.bf16 %v54_v44, %v53_v43  ;;  %v3367_v43 = vpack.c.bf16 %v2333_v40, %v2332_v39  ;;  %v2414_v39 = vld [vmem:[%s4569_s1 + $0x1b8] sm:$0xff] }
  0x2a   :  { %3303 = vmatprep.subr.bf16.mxu0 %v3591_v2 }
  0x2d   :  { %3305 = vmatpush3.bf16.msra.mxu0 %v3304_v50  ;;  %v56_v50 = vld [vmem:[%s4572_s3 + $0x38] sm:$0xff] }
  0x2e   :  { %3306 = vmatprep.subr.bf16.mxu0 %v3591_v2 }
  0x31   :  { %3308 = vmatpush3.bf16.msra.mxu0 %v3307_v53  ;;  %v3319_v53 = vpack.c.bf16 %v56_v50, %v55_v49  ;;  %v3382_v49 = vpack.c.bf16 %v2345_v46, %v2344_v45  ;;  %v2426_v45 = vld [vmem:[%s4572_s3 + $0x188] sm:$0xff] }
  0x32   :  { %3321 = vmatprep.subr.bf16.mxu0 %v3591_v2 }
  0x34   :  { %2829 = vmatmul.mubr.msk.f32.vlgmr.msra.gmra.mrb[4].mxu0 %vm67_vm1, %v57_v28  ;;  %v2322_v28 = vld [vmem:[%s4572_s3 + $0xa8] sm:$0xff] }
  0x35   :  { %3323 = vmatpush3.bf16.msra.mxu0 %v3322_v56  ;;  %2866 = vmatprep.mubr.msk.f32.mxu0 %vm3592_vm0, %v3593_v7  ;;  %v3352_v30 = vpack.c.bf16 %v2322_v28, %v2321_v27  ;;  %v2309_v56 = vld [vmem:[%s4570_s2 + $0x88] sm:$0xff]  ;;  %v2328_v27 = vld [vmem:[%s4569_s1 + $0xd0] sm:$0xff]  ;;  %v2329_v28 = vld [vmem:[%s4569_s1 + $0xd8] sm:$0xff] }
  0x36   :  { %3324 = vmatprep.subr.bf16.mxu0 %v3591_v2  ;;  %v3361_v31 = vpack.c.bf16 %v2329_v28, %v2328_v27  ;;  %v2410_v27 = vld [vmem:[%s4569_s1 + $0x198] sm:$0xff] }
  0x39   :  { %3326 = vmatpush3.bf16.msra.mxu0 %v3325_v59  ;;  %v3334_v59 = vpack.c.bf16 %v2309_v56, %v2308_v55  ;;  %v3385_v55 = vpack.c.bf16 %v2347_v52, %v2346_v51  ;;  %v2428_v51 = vld [vmem:[%s4572_s3 + $0x198] sm:$0xff] }
  0x3a   :  { %3327 = vmatprep.subr.bf16.mxu0 %v3591_v2 }
  0x3d   :  { %3329 = vmatpush3.bf16.msra.mxu0 %v3328_v62  ;;  %v2311_v62 = vld [vmem:[%s4570_s2 + $0x98] sm:$0xff] }
  0x3e   :  { %3330 = vmatprep.subr.bf16.mxu0 %v3591_v2 }
  0x41   :  { %3332 = vmatpush3.bf16.msra.mxu0 %v3331_v1  ;;  %v3337_v1 = vpack.c.bf16 %v2311_v62, %v2310_v61  ;;  %v3388_v61 = vpack.c.bf16 %v2349_v58, %v2348_v57  ;;  %v2429_v57 = vld [vmem:[%s4572_s3 + $0x1a0] sm:$0xff]  ;;  %v2430_v58 = vld [vmem:[%s4572_s3 + $0x1a8] sm:$0xff] }
  0x42   :  { %3345 = vmatprep.subr.bf16.mxu0 %v3591_v2 }
  0x81   :  { %v3802_v6 = vpop.permute.xlu0 %29 }
  0x82   :  { %v3808_v10 = vmul.f32 %v3802_v6, %v26_v5  ;;  %v3964_v5 = vmul.f32 %v3826_v15, %v3802_v6 }
  0x84   :  { %2772 = vmatmul.mubr.msk.f32.vlgmr.msra.gmra.mrb[0].mxu1 %vm67_vm1, %v3808_v10 }
  0x85   :  { %3287 = vmatpush3.bf16.msra.mxu1 %v3286_v8  ;;  %v3821_v14 = vpop.permute.xlu0 %515  ;;  %2809 = vmatprep.mubr.msk.f32.mxu1 %vm3592_vm0, %v3593_v7  ;;  %v2313_v8 = vld [vmem:[%s4570_s2 + $0xa8] sm:$0xff] }
  0x86   :  { %v3835_v19 = vmul.f32 %v3821_v14, %v3826_v15  ;;  %3288 = vmatprep.subr.bf16.mxu1 %v3591_v2  ;;  %v3340_v11 = vpack.c.bf16 %v2313_v8, %v2312_v4  ;;  %v2315_v15 = vld [vmem:[%s4570_s2 + $0xb8] sm:$0xff]  ;;  %v3391_v4 = vpack.c.bf16 %v2351_v0, %v2350_v63  ;;  %v2431_v63 = vld [vmem:[%s4572_s3 + $0x1b0] sm:$0xff] }
  0x87   :  { %v3343_v18 = vpack.c.bf16 %v2315_v15, %v2314_v13  ;;  %v2432_v0 = vld [vmem:[%s4572_s3 + $0x1b8] sm:$0xff] }
  0x88   :  { %2867 = vmatmul.mubr.msk.f32.vlgmr.msra.gmra.mrb[6].mxu0 %vm67_vm1, %v3835_v19 }
  0x89   :  { %3290 = vmatpush3.bf16.msra.mxu1 %v3289_v16  ;;  %3347 = vmatpush3.bf16.msra.mxu0 %v3346_v17  ;;  %v2357_v16 = vld [vmem:[%s4569_s1 + $0x120] sm:$0xff]  ;;  %v2358_v17 = vld [vmem:[%s4569_s1 + $0x128] sm:$0xff] }
  0x8a   :  { %3291 = vmatprep.subr.bf16.mxu1 %v3591_v2  ;;  %3348 = vmatprep.subr.bf16.mxu0 %v3591_v2  ;;  %v3400_v20 = vpack.c.bf16 %v2358_v17, %v2357_v16  ;;  %v2364_v16 = vld [vmem:[%s4570_s2 + $0x110] sm:$0xff]  ;;  %v2365_v17 = vld [vmem:[%s4570_s2 + $0x118] sm:$0xff] }
  0x8b   :  { %2904 = vmatprep.mubr.msk.f32.mxu0 %vm3592_vm0, %v3593_v7  ;;  %v3409_v22 = vpack.c.bf16 %v2365_v17, %v2364_v16  ;;  %v2445_v16 = vld [vmem:[%s4570_s2 + $0x1d0] sm:$0xff]  ;;  %v2446_v17 = vld [vmem:[%s4570_s2 + $0x1d8] sm:$0xff] }
  0x8d   :  { %3293 = vmatpush3.bf16.msra.mxu1 %v3292_v23  ;;  %3350 = vmatpush3.bf16.msra.mxu0 %v3349_v24  ;;  %v2359_v23 = vld [vmem:[%s4569_s1 + $0x130] sm:$0xff]  ;;  %v2360_v24 = vld [vmem:[%s4569_s1 + $0x138] sm:$0xff] }
  0x8e   :  { %3294 = vmatprep.subr.bf16.mxu1 %v3591_v2  ;;  %3351 = vmatprep.subr.bf16.mxu0 %v3591_v2  ;;  %v3403_v26 = vpack.c.bf16 %v2360_v24, %v2359_v23  ;;  %v2366_v24 = vld [vmem:[%s4570_s2 + $0x120] sm:$0xff] }
  0x91   :  { %3296 = vmatpush3.bf16.msra.mxu1 %v3295_v29  ;;  %3353 = vmatpush3.bf16.msra.mxu0 %v3352_v30  ;;  %v2371_v29 = vld [vmem:[%s4572_s3 + $0x100] sm:$0xff]  ;;  %v2372_v30 = vld [vmem:[%s4572_s3 + $0x108] sm:$0xff] }
  0x92   :  { %3309 = vmatprep.subr.bf16.mxu1 %v3591_v2  ;;  %3354 = vmatprep.subr.bf16.mxu0 %v3591_v2  ;;  %v3418_v33 = vpack.c.bf16 %v2372_v30, %v2371_v29  ;;  %v2368_v30 = vld [vmem:[%s4570_s2 + $0x130] sm:$0xff] }
  0x94   :  { %2810 = vmatmul.mubr.msk.f32.vlgmr.msra.gmra.mrb[2].mxu1 %vm67_vm1, %v3808_v10 }
  0x95   :  { %3311 = vmatpush3.bf16.msra.mxu1 %v3310_v35  ;;  %3356 = vmatpush3.bf16.msra.mxu0 %v3355_v36  ;;  %v2373_v35 = vld [vmem:[%s4572_s3 + $0x110] sm:$0xff]  ;;  %v2374_v36 = vld [vmem:[%s4572_s3 + $0x118] sm:$0xff] }
  0x96   :  { %3312 = vmatprep.subr.bf16.mxu1 %v3591_v2  ;;  %3369 = vmatprep.subr.bf16.mxu0 %v3591_v2  ;;  %v3421_v38 = vpack.c.bf16 %v2374_v36, %v2373_v35  ;;  %v2380_v36 = vld [vmem:[%s4569_s1 + $0x140] sm:$0xff] }
  0x97   :  { %2847 = vmatprep.mubr.msk.f32.mxu1 %vm3592_vm0, %v3593_v7 }
  0x98   :  { %2905 = vmatmul.mubr.msk.f32.vlgmr.msra.gmra.mrb[8].mxu0 %vm67_vm1, %v3835_v19 }
  0x99   :  { %3314 = vmatpush3.bf16.msra.mxu1 %v3313_v41  ;;  %3371 = vmatpush3.bf16.msra.mxu0 %v3370_v42  ;;  %v2375_v41 = vld [vmem:[%s4572_s3 + $0x120] sm:$0xff]  ;;  %v2376_v42 = vld [vmem:[%s4572_s3 + $0x128] sm:$0xff] }
  0x9a   :  { %3315 = vmatprep.subr.bf16.mxu1 %v3591_v2  ;;  %3372 = vmatprep.subr.bf16.mxu0 %v3591_v2  ;;  %v3424_v44 = vpack.c.bf16 %v2376_v42, %v2375_v41  ;;  %v2382_v42 = vld [vmem:[%s4569_s1 + $0x150] sm:$0xff] }
  0x9b   :  { %2942 = vmatprep.mubr.msk.f32.mxu0 %vm3592_vm0, %v3593_v7 }
  0x9d   :  { %3317 = vmatpush3.bf16.msra.mxu1 %v3316_v47  ;;  %3374 = vmatpush3.bf16.msra.mxu0 %v3373_v48  ;;  %v2377_v47 = vld [vmem:[%s4572_s3 + $0x130] sm:$0xff]  ;;  %v2378_v48 = vld [vmem:[%s4572_s3 + $0x138] sm:$0xff] }
  0x9e   :  { %3318 = vmatprep.subr.bf16.mxu1 %v3591_v2  ;;  %3375 = vmatprep.subr.bf16.mxu0 %v3591_v2  ;;  %v3427_v50 = vpack.c.bf16 %v2378_v48, %v2377_v47  ;;  %v2384_v48 = vld [vmem:[%s4569_s1 + $0x160] sm:$0xff] }
  0xa1   :  { %3320 = vmatpush3.bf16.msra.mxu1 %v3319_v53  ;;  %3377 = vmatpush3.bf16.msra.mxu0 %v3376_v54  ;;  %v2389_v53 = vld [vmem:[%s4570_s2 + $0x140] sm:$0xff]  ;;  %v2390_v54 = vld [vmem:[%s4570_s2 + $0x148] sm:$0xff] }
  0xa2   :  { %3333 = vmatprep.subr.bf16.mxu1 %v3591_v2  ;;  %3378 = vmatprep.subr.bf16.mxu0 %v3591_v2  ;;  %v3442_v56 = vpack.c.bf16 %v2390_v54, %v2389_v53 }
  0xa4   :  { %2848 = vmatmul.mubr.msk.f32.vlgmr.msra.gmra.mrb[4].mxu1 %vm67_vm1, %v3808_v10  ;;  %v2356_v10 = vld [vmem:[%s4569_s1 + $0x118] sm:$0xff] }
  0xa5   :  { %3335 = vmatpush3.bf16.msra.mxu1 %v3334_v59  ;;  %3380 = vmatpush3.bf16.msra.mxu0 %v3379_v60  ;;  %v3397_v12 = vpack.c.bf16 %v2356_v10, %v2355_v9  ;;  %v2391_v59 = vld [vmem:[%s4570_s2 + $0x150] sm:$0xff]  ;;  %v2392_v60 = vld [vmem:[%s4570_s2 + $0x158] sm:$0xff]  ;;  %v2362_v9 = vld [vmem:[%s4570_s2 + $0x100] sm:$0xff] }
  0xa6   :  { %3336 = vmatprep.subr.bf16.mxu1 %v3591_v2  ;;  %3393 = vmatprep.subr.bf16.mxu0 %v3591_v2  ;;  %v3445_v62 = vpack.c.bf16 %v2392_v60, %v2391_v59  ;;  %v2363_v10 = vld [vmem:[%s4570_s2 + $0x108] sm:$0xff]  ;;  %v3496_v60 = vpack.c.bf16 %v2430_v58, %v2429_v57  ;;  %v2467_v57 = vld [vmem:[%s4569_s1 + $0x230] sm:$0xff]  ;;  %v2468_v58 = vld [vmem:[%s4569_s1 + $0x238] sm:$0xff] }
  0xa7   :  { %2885 = vmatprep.mubr.msk.f32.mxu1 %vm3592_vm0, %v3593_v7  ;;  %v3406_v13 = vpack.c.bf16 %v2363_v10, %v2362_v9  ;;  %v2443_v9 = vld [vmem:[%s4570_s2 + $0x1c0] sm:$0xff]  ;;  %v2444_v10 = vld [vmem:[%s4570_s2 + $0x1c8] sm:$0xff] }
  0xa8   :  { %2943 = vmatmul.mubr.msk.f32.vlgmr.msra.gmra.mrb[10].mxu0 %vm67_vm1, %v3964_v5 }
  0xa9   :  { %3338 = vmatpush3.bf16.msra.mxu1 %v3337_v1  ;;  %3395 = vmatpush3.bf16.msra.mxu0 %v3394_v3  ;;  %v2393_v1 = vld [vmem:[%s4570_s2 + $0x160] sm:$0xff]  ;;  %v2394_v3 = vld [vmem:[%s4570_s2 + $0x168] sm:$0xff] }
  0xaa   :  { %3339 = vmatprep.subr.bf16.mxu1 %v3591_v2  ;;  %3396 = vmatprep.subr.bf16.mxu0 %v3591_v2  ;;  %v3448_v8 = vpack.c.bf16 %v2394_v3, %v2393_v1  ;;  %v3499_v3 = vpack.c.bf16 %v2432_v0, %v2431_v63  ;;  %v2479_v63 = vld [vmem:[%s4572_s3 + $0x200] sm:$0xff]  ;;  %v2480_v0 = vld [vmem:[%s4572_s3 + $0x208] sm:$0xff] }
  0xab   :  { %2980 = vmatprep.mubr.msk.f32.mxu0 %vm3592_vm0, %v3593_v7 }
  0xad   :  { %3341 = vmatpush3.bf16.msra.mxu1 %v3340_v11  ;;  %3398 = vmatpush3.bf16.msra.mxu0 %v3397_v12  ;;  %v2395_v11 = vld [vmem:[%s4570_s2 + $0x170] sm:$0xff]  ;;  %v2396_v12 = vld [vmem:[%s4570_s2 + $0x178] sm:$0xff] }
  0xae   :  { %3342 = vmatprep.subr.bf16.mxu1 %v3591_v2  ;;  %3399 = vmatprep.subr.bf16.mxu0 %v3591_v2  ;;  %v3451_v15 = vpack.c.bf16 %v2396_v12, %v2395_v11  ;;  %v3514_v12 = vpack.c.bf16 %v2444_v10, %v2443_v9  ;;  %v2439_v10 = vld [vmem:[%s4569_s1 + $0x1e8] sm:$0xff] }
  0xb1   :  { %3344 = vmatpush3.bf16.msra.mxu1 %v3343_v18  ;;  %3401 = vmatpush3.bf16.msra.mxu0 %v3400_v20  ;;  %v2407_v18 = vld [vmem:[%s4569_s1 + $0x180] sm:$0xff]  ;;  %v2408_v20 = vld [vmem:[%s4569_s1 + $0x188] sm:$0xff] }
  0xb2   :  { %3357 = vmatprep.subr.bf16.mxu1 %v3591_v2  ;;  %3402 = vmatprep.subr.bf16.mxu0 %v3591_v2  ;;  %v3466_v23 = vpack.c.bf16 %v2408_v20, %v2407_v18 }
  0xb4   :  { %2886 = vmatmul.mubr.msk.f32.vlgmr.msra.gmra.mrb[6].mxu1 %vm67_vm1, %v3835_v19  ;;  %v2331_v19 = vld [vmem:[%s4569_s1 + $0xe8] sm:$0xff] }
  0xb5   :  { %3359 = vmatpush3.bf16.msra.mxu1 %v3358_v25  ;;  %3404 = vmatpush3.bf16.msra.mxu0 %v3403_v26  ;;  %v3364_v37 = vpack.c.bf16 %v2331_v19, %v2330_v34  ;;  %v4167_v25 = vmul.f32 %v1250_v21, %v3821_v14  ;;  %v2409_v26 = vld [vmem:[%s4569_s1 + $0x190] sm:$0xff]  ;;  %v2412_v34 = vld [vmem:[%s4569_s1 + $0x1a8] sm:$0xff] }
  0xb6   :  { %3360 = vmatprep.subr.bf16.mxu1 %v3591_v2  ;;  %3417 = vmatprep.subr.bf16.mxu0 %v3591_v2  ;;  %v3469_v29 = vpack.c.bf16 %v2410_v27, %v2409_v26  ;;  %v2448_v26 = vld [vmem:[%s4570_s2 + $0x1e8] sm:$0xff] }
  0xb7   :  { %2923 = vmatprep.mubr.msk.f32.mxu1 %vm3592_vm0, %v3593_v7 }
  0xb8   :  { %2981 = vmatmul.mubr.msk.f32.vlgmr.msra.gmra.mrb[12].mxu0 %vm67_vm1, %v4030_v32 }
  0xb9   :  { %3362 = vmatpush3.bf16.msra.mxu1 %v3361_v31  ;;  %3419 = vmatpush3.bf16.msra.mxu0 %v3418_v33  ;;  %v2369_v31 = vld [vmem:[%s4570_s2 + $0x138] sm:$0xff]  ;;  %v2411_v33 = vld [vmem:[%s4569_s1 + $0x1a0] sm:$0xff] }
  0xba   :  { %3363 = vmatprep.subr.bf16.mxu1 %v3591_v2  ;;  %3420 = vmatprep.subr.bf16.mxu0 %v3591_v2  ;;  %v3415_v19 = vpack.c.bf16 %v2369_v31, %v2368_v30  ;;  %v3472_v35 = vpack.c.bf16 %v2412_v34, %v2411_v33  ;;  %v2417_v30 = vld [vmem:[%s4570_s2 + $0x188] sm:$0xff]  ;;  %v2449_v31 = vld [vmem:[%s4570_s2 + $0x1f0] sm:$0xff]  ;;  %v2450_v33 = vld [vmem:[%s4570_s2 + $0x1f8] sm:$0xff] }
  0xbb   :  { %3018 = vmatprep.mubr.msk.f32.mxu0 %vm3592_vm0, %v3593_v7 }
  0xbd   :  { %3365 = vmatpush3.bf16.msra.mxu1 %v3364_v37  ;;  %3422 = vmatpush3.bf16.msra.mxu0 %v3421_v38  ;;  %v2381_v37 = vld [vmem:[%s4569_s1 + $0x148] sm:$0xff]  ;;  %v2413_v38 = vld [vmem:[%s4569_s1 + $0x1b0] sm:$0xff] }
  0xbe   :  { %3366 = vmatprep.subr.bf16.mxu1 %v3591_v2  ;;  %3423 = vmatprep.subr.bf16.mxu0 %v3591_v2  ;;  %v3430_v40 = vpack.c.bf16 %v2381_v37, %v2380_v36  ;;  %v3475_v41 = vpack.c.bf16 %v2414_v39, %v2413_v38  ;;  %v2419_v36 = vld [vmem:[%s4570_s2 + $0x198] sm:$0xff]  ;;  %v2461_v37 = vld [vmem:[%s4569_s1 + $0x200] sm:$0xff]  ;;  %v2462_v38 = vld [vmem:[%s4569_s1 + $0x208] sm:$0xff] }
  0xc1   :  { %3368 = vmatpush3.bf16.msra.mxu1 %v3367_v43  ;;  %3425 = vmatpush3.bf16.msra.mxu0 %v3424_v44  ;;  %v2383_v43 = vld [vmem:[%s4569_s1 + $0x158] sm:$0xff]  ;;  %v2425_v44 = vld [vmem:[%s4572_s3 + $0x180] sm:$0xff] }
  0xc2   :  { %3381 = vmatprep.subr.bf16.mxu1 %v3591_v2  ;;  %3426 = vmatprep.subr.bf16.mxu0 %v3591_v2  ;;  %v3433_v46 = vpack.c.bf16 %v2383_v43, %v2382_v42  ;;  %v3490_v47 = vpack.c.bf16 %v2426_v45, %v2425_v44  ;;  %v2420_v42 = vld [vmem:[%s4570_s2 + $0x1a0] sm:$0xff]  ;;  %v2463_v43 = vld [vmem:[%s4569_s1 + $0x210] sm:$0xff]  ;;  %v2464_v44 = vld [vmem:[%s4569_s1 + $0x218] sm:$0xff] }
  0xc4   :  { %2924 = vmatmul.mubr.msk.f32.vlgmr.msra.gmra.mrb[8].mxu1 %vm67_vm1, %v3964_v5 }
  0xc5   :  { %3383 = vmatpush3.bf16.msra.mxu1 %v3382_v49  ;;  %3428 = vmatpush3.bf16.msra.mxu0 %v3427_v50  ;;  %v4234_v49 = vmul.f32 %v1250_v21, %v3802_v6  ;;  %v2385_v50 = vld [vmem:[%s4569_s1 + $0x168] sm:$0xff] }
  0xc6   :  { %3384 = vmatprep.subr.bf16.mxu1 %v3591_v2  ;;  %3441 = vmatprep.subr.bf16.mxu0 %v3591_v2  ;;  %v3436_v53 = vpack.c.bf16 %v2385_v50, %v2384_v48  ;;  %v3541_v48 = vpack.c.bf16 %v2464_v44, %v2463_v43  ;;  %v2422_v50 = vld [vmem:[%s4570_s2 + $0x1b0] sm:$0xff]  ;;  %v2474_v43 = vld [vmem:[%s4570_s2 + $0x220] sm:$0xff]  ;;  %v2475_v44 = vld [vmem:[%s4570_s2 + $0x228] sm:$0xff] }
  0xc7   :  { %2961 = vmatprep.mubr.msk.f32.mxu1 %vm3592_vm0, %v3593_v7 }
  0xc8   :  { %3019 = vmatmul.mubr.msk.f32.vlgmr.msra.gmra.mrb[14].mxu0 %vm67_vm1, %v4030_v32 }
  0xc9   :  { %3386 = vmatpush3.bf16.msra.mxu1 %v3385_v55  ;;  %3443 = vmatpush3.bf16.msra.mxu0 %v3442_v56  ;;  %v2386_v55 = vld [vmem:[%s4569_s1 + $0x170] sm:$0xff]  ;;  %v2387_v56 = vld [vmem:[%s4569_s1 + $0x178] sm:$0xff] }
  0xca   :  { %3387 = vmatprep.subr.bf16.mxu1 %v3591_v2  ;;  %3444 = vmatprep.subr.bf16.mxu0 %v3591_v2  ;;  %v3439_v59 = vpack.c.bf16 %v2387_v56, %v2386_v55  ;;  %v2434_v55 = vld [vmem:[%s4569_s1 + $0x1c0] sm:$0xff]  ;;  %v2435_v56 = vld [vmem:[%s4569_s1 + $0x1c8] sm:$0xff] }
  0xcb   :  { %3056 = vmatprep.mubr.msk.f32.mxu0 %vm3592_vm0, %v3593_v7 }
  0xcd   :  { %3389 = vmatpush3.bf16.msra.mxu1 %v3388_v61  ;;  %3446 = vmatpush3.bf16.msra.mxu0 %v3445_v62  ;;  %v2398_v61 = vld [vmem:[%s4572_s3 + $0x140] sm:$0xff]  ;;  %v2399_v62 = vld [vmem:[%s4572_s3 + $0x148] sm:$0xff] }
  0xce   :  { %3390 = vmatprep.subr.bf16.mxu1 %v3591_v2  ;;  %3447 = vmatprep.subr.bf16.mxu0 %v3591_v2  ;;  %v3454_v1 = vpack.c.bf16 %v2399_v62, %v2398_v61  ;;  %v2436_v61 = vld [vmem:[%s4569_s1 + $0x1d0] sm:$0xff]  ;;  %v2437_v62 = vld [vmem:[%s4569_s1 + $0x1d8] sm:$0xff] }
  0xd1   :  { %3392 = vmatpush3.bf16.msra.mxu1 %v3391_v4  ;;  %3449 = vmatpush3.bf16.msra.mxu0 %v3448_v8  ;;  %v2400_v4 = vld [vmem:[%s4572_s3 + $0x150] sm:$0xff]  ;;  %v2401_v8 = vld [vmem:[%s4572_s3 + $0x158] sm:$0xff] }
  0xd2   :  { %3405 = vmatprep.subr.bf16.mxu1 %v3591_v2  ;;  %3450 = vmatprep.subr.bf16.mxu0 %v3591_v2  ;;  %v3457_v11 = vpack.c.bf16 %v2401_v8, %v2400_v4  ;;  %v3562_v4 = vpack.c.bf16 %v2480_v0, %v2479_v63  ;;  %v2438_v8 = vld [vmem:[%s4569_s1 + $0x1e0] sm:$0xff] }
  0xd4   :  { %2962 = vmatmul.mubr.msk.f32.vlgmr.msra.gmra.mrb[10].mxu1 %vm67_vm1, %v3964_v5  ;;  %v2367_v5 = vld [vmem:[%s4570_s2 + $0x128] sm:$0xff] }
  0xd5   :  { %3407 = vmatpush3.bf16.msra.mxu1 %v3406_v13  ;;  %3452 = vmatpush3.bf16.msra.mxu0 %v3451_v15  ;;  %v3412_v28 = vpack.c.bf16 %v2367_v5, %v2366_v24  ;;  %v2402_v13 = vld [vmem:[%s4572_s3 + $0x160] sm:$0xff]  ;;  %v2403_v15 = vld [vmem:[%s4572_s3 + $0x168] sm:$0xff]  ;;  %v2405_v24 = vld [vmem:[%s4572_s3 + $0x178] sm:$0xff] }
  0xd6   :  { %3408 = vmatprep.subr.bf16.mxu1 %v3591_v2  ;;  %3465 = vmatprep.subr.bf16.mxu0 %v3591_v2  ;;  %v3460_v21 = vpack.c.bf16 %v2403_v15, %v2402_v13  ;;  %v2447_v5 = vld [vmem:[%s4570_s2 + $0x1e0] sm:$0xff]  ;;  %v2440_v13 = vld [vmem:[%s4569_s1 + $0x1f0] sm:$0xff]  ;;  %v2441_v15 = vld [vmem:[%s4569_s1 + $0x1f8] sm:$0xff] }
  0xd7   :  { %2999 = vmatprep.mubr.msk.f32.mxu1 %vm3592_vm0, %v3593_v7 }
  0xd8   :  { %3057 = vmatmul.mubr.msk.f32.vlgmr.msra.gmra.mrb[16].mxu0 %vm67_vm1, %v4167_v25 }
  0xd9   :  { %3410 = vmatpush3.bf16.msra.mxu1 %v3409_v22  ;;  %3467 = vmatpush3.bf16.msra.mxu0 %v3466_v23  ;;  %v3517_v22 = vpack.c.bf16 %v2446_v17, %v2445_v16  ;;  %v2404_v23 = vld [vmem:[%s4572_s3 + $0x170] sm:$0xff]  ;;  %v2483_v16 = vld [vmem:[%s4572_s3 + $0x220] sm:$0xff]  ;;  %v2484_v17 = vld [vmem:[%s4572_s3 + $0x228] sm:$0xff] }
  0xda   :  { %3411 = vmatprep.subr.bf16.mxu1 %v3591_v2  ;;  %3468 = vmatprep.subr.bf16.mxu0 %v3591_v2  ;;  %v3463_v27 = vpack.c.bf16 %v2405_v24, %v2404_v23  ;;  %v2453_v23 = vld [vmem:[%s4572_s3 + $0x1c8] sm:$0xff]  ;;  %v2485_v24 = vld [vmem:[%s4572_s3 + $0x230] sm:$0xff] }
  0xdb   :  { %3094 = vmatprep.mubr.msk.f32.mxu0 %vm3592_vm0, %v3593_v7 }
  0xdd   :  { %3413 = vmatpush3.bf16.msra.mxu1 %v3412_v28  ;;  %3470 = vmatpush3.bf16.msra.mxu0 %v3469_v29  ;;  %v3520_v28 = vpack.c.bf16 %v2448_v26, %v2447_v5  ;;  %v2416_v29 = vld [vmem:[%s4570_s2 + $0x180] sm:$0xff]  ;;  %v2486_v5 = vld [vmem:[%s4572_s3 + $0x238] sm:$0xff] }
  0xde   :  { %3414 = vmatprep.subr.bf16.mxu1 %v3591_v2  ;;  %3471 = vmatprep.subr.bf16.mxu0 %v3591_v2  ;;  %v3478_v34 = vpack.c.bf16 %v2417_v30, %v2416_v29  ;;  %v2455_v29 = vld [vmem:[%s4572_s3 + $0x1d8] sm:$0xff] }
  0xe1   :  { %3416 = vmatpush3.bf16.msra.mxu1 %v3415_v19  ;;  %3473 = vmatpush3.bf16.msra.mxu0 %v3472_v35  ;;  %v3523_v19 = vpack.c.bf16 %v2450_v33, %v2449_v31  ;;  %v2418_v35 = vld [vmem:[%s4570_s2 + $0x190] sm:$0xff]  ;;  %v2456_v31 = vld [vmem:[%s4572_s3 + $0x1e0] sm:$0xff]  ;;  %v2457_v33 = vld [vmem:[%s4572_s3 + $0x1e8] sm:$0xff] }
  0xe2   :  { %3429 = vmatprep.subr.bf16.mxu1 %v3591_v2  ;;  %3474 = vmatprep.subr.bf16.mxu0 %v3591_v2  ;;  %v3481_v39 = vpack.c.bf16 %v2419_v36, %v2418_v35  ;;  %v2459_v35 = vld [vmem:[%s4572_s3 + $0x1f8] sm:$0xff] }
  0xe4   :  { %3000 = vmatmul.mubr.msk.f32.vlgmr.msra.gmra.mrb[12].mxu1 %vm67_vm1, %v4030_v32  ;;  %v2427_v32 = vld [vmem:[%s4572_s3 + $0x190] sm:$0xff] }
  0xe5   :  { %3431 = vmatpush3.bf16.msra.mxu1 %v3430_v40  ;;  %3476 = vmatpush3.bf16.msra.mxu0 %v3475_v41  ;;  %v3493_v54 = vpack.c.bf16 %v2428_v51, %v2427_v32  ;;  %v4368_v40 = vld [vmem:[%s4571_s0 + $0x5] sm:$0xf]  ;;  %v3538_v41 = vpack.c.bf16 %v2462_v38, %v2461_v37  ;;  %v2423_v32 = vld [vmem:[%s4570_s2 + $0x1b8] sm:$0xff] }
  0xe6   :  { %3432 = vmatprep.subr.bf16.mxu1 %v3591_v2  ;;  %3489 = vmatprep.subr.bf16.mxu0 %v3591_v2  ;;  %v2465_v51 = vld [vmem:[%s4569_s1 + $0x220] sm:$0xff]  ;;  %v2471_v38 = vld [vmem:[%s4570_s2 + $0x208] sm:$0xff] }
  0xe7   :  { %3037 = vmatprep.mubr.msk.f32.mxu1 %vm3592_vm0, %v3593_v7  ;;  %v4249_v6 = vpop.f32.mrb[0].mxu0  ;;  %v2470_v37 = vld [vmem:[%s4570_s2 + $0x200] sm:$0xff] }
  0xe8   :  { %3095 = vmatmul.mubr.msk.f32.vlgmr.msra.gmra.mrb[18].mxu0 %vm67_vm1, %v4234_v49  ;;  %v2754_v52 = vpop.f32.mrb[1].mxu0 }
  0xe9   :  { %3434 = vmatpush3.bf16.msra.mxu1 %v3433_v46  ;;  %3491 = vmatpush3.bf16.msra.mxu0 %v3490_v47  ;;  %v2466_v52 = vld [vmem:[%s4569_s1 + $0x228] sm:$0xff] }
  0xea   :  { %3435 = vmatprep.subr.bf16.mxu1 %v3591_v2  ;;  %3492 = vmatprep.subr.bf16.mxu0 %v3591_v2 }
  0xeb   :  { %3132 = vmatprep.mubr.msk.f32.mxu0 %vm3592_vm0, %v3593_v7 }
  0xed   :  { %3437 = vmatpush3.bf16.msra.mxu1 %v3436_v53  ;;  %3494 = vmatpush3.bf16.msra.mxu0 %v3493_v54  ;;  %v3487_v53 = vpack.c.bf16 %v2423_v32, %v2422_v50  ;;  %v3544_v54 = vpack.c.bf16 %v2466_v52, %v2465_v51 }
  0xee   :  { %3438 = vmatprep.subr.bf16.mxu1 %v3591_v2  ;;  %3495 = vmatprep.subr.bf16.mxu0 %v3591_v2 }
  0xf1   :  { %3440 = vmatpush3.bf16.msra.mxu1 %v3439_v59  ;;  %3497 = vmatpush3.bf16.msra.mxu0 %v3496_v60  ;;  %v3502_v59 = vpack.c.bf16 %v2435_v56, %v2434_v55  ;;  %v3547_v60 = vpack.c.bf16 %v2468_v58, %v2467_v57 }
  0xf2   :  { %3453 = vmatprep.subr.bf16.mxu1 %v3591_v2  ;;  %3498 = vmatprep.subr.bf16.mxu0 %v3591_v2 }
  0xf4   :  { %3038 = vmatmul.mubr.msk.f32.vlgmr.msra.gmra.mrb[14].mxu1 %vm67_vm1, %v4167_v25 }
  0xf5   :  { %3455 = vmatpush3.bf16.msra.mxu1 %v3454_v1  ;;  %3500 = vmatpush3.bf16.msra.mxu0 %v3499_v3  ;;  %v1983_v1 = vld [vmem:[%s4571_s0 + $0x6] sm:$0xf]  ;;  %v3505_v3 = vpack.c.bf16 %v2437_v62, %v2436_v61 }
  0xf6   :  { %3456 = vmatprep.subr.bf16.mxu1 %v3591_v2  ;;  %3513 = vmatprep.subr.bf16.mxu0 %v3591_v2  ;;  %v4443_v9 = vmul.f32 %v1983_v1, %v3821_v14  ;;  %v3508_v14 = vpack.c.bf16 %v2439_v10, %v2438_v8 }
  0xf7   :  { %3075 = vmatprep.mubr.msk.f32.mxu1 %vm3592_vm0, %v3593_v7  ;;  %v4315_v18 = vpop.f32.mrb[2].mxu0 }
  0xf8   :  { %3133 = vmatmul.mubr.msk.f32.vlgmr.msra.gmra.mrb[20].mxu0 %vm67_vm1, %v4234_v49  ;;  %v2792_v20 = vpop.f32.mrb[3].mxu0 }
  0xf9   :  { %3458 = vmatpush3.bf16.msra.mxu1 %v3457_v11  ;;  %3515 = vmatpush3.bf16.msra.mxu0 %v3514_v12  ;;  %v2482_v11 = vld [vmem:[%s4572_s3 + $0x218] sm:$0xff]  ;;  %v3511_v20 = vpack.c.bf16 %v2441_v15, %v2440_v13 }
  0xfa   :  { %3459 = vmatprep.subr.bf16.mxu1 %v3591_v2  ;;  %3516 = vmatprep.subr.bf16.mxu0 %v3591_v2 }
  0xfb   :  { %3170 = vmatprep.mubr.msk.f32.mxu0 %vm3592_vm0, %v3593_v7 }
  0xfd   :  { %3461 = vmatpush3.bf16.msra.mxu1 %v3460_v21  ;;  %3518 = vmatpush3.bf16.msra.mxu0 %v3517_v22  ;;  %v3568_v21 = vpack.c.bf16 %v2484_v17, %v2483_v16  ;;  %v2452_v22 = vld [vmem:[%s4572_s3 + $0x1c0] sm:$0xff] }
  0xfe   :  { %3462 = vmatprep.subr.bf16.mxu1 %v3591_v2  ;;  %3519 = vmatprep.subr.bf16.mxu0 %v3591_v2  ;;  %v3526_v26 = vpack.c.bf16 %v2453_v23, %v2452_v22 }
 0x101   :  { %3464 = vmatpush3.bf16.msra.mxu1 %v3463_v27  ;;  %3521 = vmatpush3.bf16.msra.mxu0 %v3520_v28  ;;  %v3571_v27 = vpack.c.bf16 %v2486_v5, %v2485_v24  ;;  %v2454_v28 = vld [vmem:[%s4572_s3 + $0x1d0] sm:$0xff] }
 0x102   :  { %3477 = vmatprep.subr.bf16.mxu1 %v3591_v2  ;;  %3522 = vmatprep.subr.bf16.mxu0 %v3591_v2  ;;  %v3529_v30 = vpack.c.bf16 %v2455_v29, %v2454_v28 }
 0x104   :  { %3076 = vmatmul.mubr.msk.f32.vlgmr.msra.gmra.mrb[16].mxu1 %vm67_vm1, %v4167_v25  ;;  %v2421_v25 = vld [vmem:[%s4570_s2 + $0x1a8] sm:$0xff] }
 0x105   :  { %3479 = vmatpush3.bf16.msra.mxu1 %v3478_v34  ;;  %3524 = vmatpush3.bf16.msra.mxu0 %v3523_v19  ;;  %v3484_v47 = vpack.c.bf16 %v2421_v25, %v2420_v42  ;;  %v3532_v34 = vpack.c.bf16 %v2457_v33, %v2456_v31  ;;  %v2458_v19 = vld [vmem:[%s4572_s3 + $0x1f0] sm:$0xff]  ;;  %v2473_v42 = vld [vmem:[%s4570_s2 + $0x218] sm:$0xff] }
 0x106   :  { %3480 = vmatprep.subr.bf16.mxu1 %v3591_v2  ;;  %3537 = vmatprep.subr.bf16.mxu0 %v3591_v2  ;;  %v3535_v36 = vpack.c.bf16 %v2459_v35, %v2458_v19 }
 0x107   :  { %3113 = vmatprep.mubr.msk.f32.mxu1 %vm3592_vm0, %v3593_v7  ;;  %v4386_v45 = vpop.f32.mrb[4].mxu0 }
 0x108   :  { %3171 = vmatmul.mubr.msk.f32.vlgmr.msra.gmra.mrb[22].mxu0 %vm67_vm1, %v4368_v40  ;;  %v2830_v46 = vpop.f32.mrb[5].mxu0 }
 0x109   :  { %3482 = vmatpush3.bf16.msra.mxu1 %v3481_v39  ;;  %3539 = vmatpush3.bf16.msra.mxu0 %v3538_v41  ;;  %v3550_v39 = vpack.c.bf16 %v2471_v38, %v2470_v37  ;;  %v2472_v41 = vld [vmem:[%s4570_s2 + $0x210] sm:$0xff]  ;;  %v3556_v46 = vpack.c.bf16 %v2475_v44, %v2474_v43 }
 0x10a   :  { %3483 = vmatprep.subr.bf16.mxu1 %v3591_v2  ;;  %3540 = vmatprep.subr.bf16.mxu0 %v3591_v2  ;;  %v3553_v25 = vpack.c.bf16 %v2473_v42, %v2472_v41 }
 0x10b   :  { %3208 = vmatprep.mubr.msk.f32.mxu0 %vm3592_vm0, %v3593_v7 }
 0x10d   :  { %3485 = vmatpush3.bf16.msra.mxu1 %v3484_v47  ;;  %3542 = vmatpush3.bf16.msra.mxu0 %v3541_v48 }
 0x10e   :  { %3486 = vmatprep.subr.bf16.mxu1 %v3591_v2  ;;  %3543 = vmatprep.subr.bf16.mxu0 %v3591_v2 }
 0x111   :  { %3488 = vmatpush3.bf16.msra.mxu1 %v3487_v53  ;;  %3545 = vmatpush3.bf16.msra.mxu0 %v3544_v54 }
 0x112   :  { %3501 = vmatprep.subr.bf16.mxu1 %v3591_v2  ;;  %3546 = vmatprep.subr.bf16.mxu0 %v3591_v2 }
 0x114   :  { %3114 = vmatmul.mubr.msk.f32.vlgmr.msra.gmra.mrb[18].mxu1 %vm67_vm1, %v4234_v49  ;;  %v2481_v49 = vld [vmem:[%s4572_s3 + $0x210] sm:$0xff] }
 0x115   :  { %3503 = vmatpush3.bf16.msra.mxu1 %v3502_v59  ;;  %3548 = vmatpush3.bf16.msra.mxu0 %v3547_v60  ;;  %v3565_v12 = vpack.c.bf16 %v2482_v11, %v2481_v49 }
 0x116   :  { %3504 = vmatprep.subr.bf16.mxu1 %v3591_v2  ;;  %3561 = vmatprep.subr.bf16.mxu0 %v3591_v2 }
 0x117   :  { %3151 = vmatprep.mubr.msk.f32.mxu1 %vm3592_vm0, %v3593_v7 }
 0x118   :  { %3209 = vmatmul.mubr.msk.f32.vlgmr.msra.gmra.mrb[24].mxu0 %vm67_vm1, %v4443_v9 }
 0x119   :  { %3506 = vmatpush3.bf16.msra.mxu1 %v3505_v3  ;;  %3563 = vmatpush3.bf16.msra.mxu0 %v3562_v4 }
 0x11a   :  { %3507 = vmatprep.subr.bf16.mxu1 %v3591_v2  ;;  %3564 = vmatprep.subr.bf16.mxu0 %v3591_v2 }
 0x11b   :  { %3246 = vmatprep.mubr.msk.f32.mxu0 %vm3592_vm0, %v3593_v7 }
 0x11d   :  { %3509 = vmatpush3.bf16.msra.mxu1 %v3508_v14  ;;  %3566 = vmatpush3.bf16.msra.mxu0 %v3565_v12 }
 0x11e   :  { %3510 = vmatprep.subr.bf16.mxu1 %v3591_v2  ;;  %3567 = vmatprep.subr.bf16.mxu0 %v3591_v2 }
 0x121   :  { %3512 = vmatpush3.bf16.msra.mxu1 %v3511_v20  ;;  %3569 = vmatpush3.bf16.msra.mxu0 %v3568_v21 }
 0x122   :  { %3525 = vmatprep.subr.bf16.mxu1 %v3591_v2  ;;  %3570 = vmatprep.subr.bf16.mxu0 %v3591_v2 }
 0x124   :  { %3152 = vmatmul.mubr.msk.f32.vlgmr.msra.gmra.mrb[20].mxu1 %vm67_vm1, %v4368_v40 }
 0x125   :  { %3527 = vmatpush3.bf16.msra.mxu1 %v3526_v26  ;;  %3572 = vmatpush3.bf16.msra.mxu0 %v3571_v27 }
 0x126   :  { %3528 = vmatprep.subr.bf16.mxu1 %v3591_v2  ;;  %3189 = vmatprep.mubr.msk.f32.mxu1 %vm3592_vm0, %v3593_v7 }
 0x128   :  { %3247 = vmatmul.mubr.msk.f32.vlgmr.msra.gmra.mrb[26].mxu0 %vm67_vm1, %v4443_v9 }
 0x129   :  { %3530 = vmatpush3.bf16.msra.mxu1 %v3529_v30 }
 0x12a   :  { %3531 = vmatprep.subr.bf16.mxu1 %v3591_v2 }
 0x12d   :  { %3533 = vmatpush3.bf16.msra.mxu1 %v3532_v34 }
 0x12e   :  { %3534 = vmatprep.subr.bf16.mxu1 %v3591_v2 }
 0x131   :  { %3536 = vmatpush3.bf16.msra.mxu1 %v3535_v36 }
 0x132   :  { %3549 = vmatprep.subr.bf16.mxu1 %v3591_v2 }
 0x134   :  { %3190 = vmatmul.mubr.msk.f32.vlgmr.msra.gmra.mrb[22].mxu1 %vm67_vm1, %v4368_v40  ;;  %v2476_v40 = vld [vmem:[%s4570_s2 + $0x230] sm:$0xff] }
 0x135   :  { %3551 = vmatpush3.bf16.msra.mxu1 %v3550_v39  ;;  %3227 = vmatprep.mubr.msk.f32.mxu1 %vm3592_vm0, %v3593_v7  ;;  %v2477_v7 = vld [vmem:[%s4570_s2 + $0x238] sm:$0xff] }
 0x136   :  { %3552 = vmatprep.subr.bf16.mxu1 %v3591_v2  ;;  %v3559_v47 = vpack.c.bf16 %v2477_v7, %v2476_v40  ;;  %v2488_v7 = vld [vmem:[%s4573_s4] ss:$0 sm:$0xff] }
 0x139   :  { %3554 = vmatpush3.bf16.msra.mxu1 %v3553_v25 }
 0x13a   :  { %3555 = vmatprep.subr.bf16.mxu1 %v3591_v2 }
 0x13d   :  { %3557 = vmatpush3.bf16.msra.mxu1 %v3556_v46 }
 0x13e   :  { %3558 = vmatprep.subr.bf16.mxu1 %v3591_v2 }
 0x141   :  { %3560 = vmatpush3.bf16.msra.mxu1 %v3559_v47 }
 0x144   :  { %3228 = vmatmul.mubr.msk.f32.vlgmr.msra.gmra.mrb[24].mxu1 %vm67_vm1, %v4443_v9 }
 0x157   :  { %v210_v48 = vpop.f32.mrb[0].mxu1 }
 0x158   :  { %v211_v50 = vadd.f32 %v210_v48, %v4249_v6  ;;  %v2773_v32 = vpop.f32.mrb[1].mxu1 }
 0x15b   :  { %v597_v51 = vpop.f32.mrb[6].mxu0 }
 0x15c   :  { %v601_v52 = vadd.f32 %v597_v51, %v211_v50  ;;  %v2868_v53 = vpop.f32.mrb[7].mxu0 }
 0x167   :  { %v359_v54 = vpop.f32.mrb[2].mxu1 }
 0x168   :  { %v360_v55 = vadd.f32 %v359_v54, %v4315_v18  ;;  %v2811_v56 = vpop.f32.mrb[3].mxu1 }
 0x16b   :  { %v757_v57 = vpop.f32.mrb[8].mxu0 }
 0x16c   :  { %v2906_v58 = vpop.f32.mrb[9].mxu0 }
 0x177   :  { %v508_v59 = vpop.f32.mrb[4].mxu1 }
 0x178   :  { %v509_v2 = vadd.f32 %v508_v59, %v4386_v45  ;;  %v2849_v60 = vpop.f32.mrb[5].mxu1 }
 0x17a   :  { %v761_v61 = vadd.f32 %v757_v57, %v509_v2 }
 0x17b   :  { %v921_v62 = vpop.f32.mrb[10].mxu0 }
 0x17c   :  { %v2944_v63 = vpop.f32.mrb[11].mxu0 }
 0x187   :  { %v677_v0 = vpop.f32.mrb[6].mxu1 }
 0x188   :  { %v681_v1 = vadd.f32 %v677_v0, %v360_v55  ;;  %v2887_v6 = vpop.f32.mrb[7].mxu1  ;;  %v2492_v55 = vld [vmem:[%s4573_s4 + $0x2] ss:$0 sm:$0xff] }
 0x18a   :  { %v925_v3 = vadd.f32 %v921_v62, %v681_v1 }
 0x18b   :  { %v1085_v4 = vpop.f32.mrb[12].mxu0 }
 0x18c   :  { %v2982_v8 = vpop.f32.mrb[13].mxu0 }
 0x197   :  { %v841_v9 = vpop.f32.mrb[8].mxu1 }
 0x198   :  { %v845_v10 = vadd.f32 %v841_v9, %v601_v52  ;;  %v2925_v49 = vpop.f32.mrb[9].mxu1 }
 0x19a   :  { %v1089_v18 = vadd.f32 %v1085_v4, %v845_v10 }
 0x19b   :  { %v1245_v11 = vpop.f32.mrb[14].mxu0 }
 0x19c   :  { %v3020_v14 = vpop.f32.mrb[15].mxu0 }
 0x1a7   :  { %v1001_v12 = vpop.f32.mrb[10].mxu1 }
 0x1a8   :  { %v1005_v13 = vadd.f32 %v1001_v12, %v761_v61  ;;  %v2963_v15 = vpop.f32.mrb[11].mxu1  ;;  %v2490_v61 = vld [vmem:[%s4573_s4 + $0x1] ss:$0 sm:$0xff] }
 0x1aa   :  { %v1249_v45 = vadd.f32 %v1245_v11, %v1005_v13 }
 0x1ab   :  { %v1410_v16 = vpop.f32.mrb[16].mxu0 }
 0x1ac   :  { %v3058_v17 = vpop.f32.mrb[17].mxu0 }
 0x1b7   :  { %v1165_v20 = vpop.f32.mrb[12].mxu1 }
 0x1b8   :  { %v1169_v21 = vadd.f32 %v1165_v20, %v925_v3  ;;  %v3001_v22 = vpop.f32.mrb[13].mxu1 }
 0x1ba   :  { %v1414_v23 = vadd.f32 %v1410_v16, %v1169_v21 }
 0x1bb   :  { %v1574_v24 = vpop.f32.mrb[18].mxu0 }
 0x1bc   :  { %v3096_v5 = vpop.f32.mrb[19].mxu0 }
 0x1c7   :  { %v1330_v26 = vpop.f32.mrb[14].mxu1 }
 0x1c8   :  { %v1334_v27 = vadd.f32 %v1330_v26, %v1089_v18  ;;  %v3039_v28 = vpop.f32.mrb[15].mxu1 }
 0x1ca   :  { %v1578_v29 = vadd.f32 %v1574_v24, %v1334_v27 }
 0x1cb   :  { %v1734_v30 = vpop.f32.mrb[20].mxu0 }
 0x1cc   :  { %v3134_v31 = vpop.f32.mrb[21].mxu0 }
 0x1d7   :  { %v1490_v33 = vpop.f32.mrb[16].mxu1 }
 0x1d8   :  { %v1494_v34 = vadd.f32 %v1490_v33, %v1249_v45  ;;  %v3077_v19 = vpop.f32.mrb[17].mxu1 }
 0x1da   :  { %v1738_v35 = vadd.f32 %v1734_v30, %v1494_v34 }
 0x1db   :  { %v1898_v36 = vpop.f32.mrb[22].mxu0 }
 0x1dc   :  { %v3172_v37 = vpop.f32.mrb[23].mxu0 }
 0x1e7   :  { %v1654_v38 = vpop.f32.mrb[18].mxu1 }
 0x1e8   :  { %v1658_v39 = vadd.f32 %v1654_v38, %v1414_v23  ;;  %v3115_v41 = vpop.f32.mrb[19].mxu1 }
 0x1ea   :  { %v1902_v42 = vadd.f32 %v1898_v36, %v1658_v39 }
 0x1eb   :  { %v2063_v25 = vpop.f32.mrb[24].mxu0 }
 0x1ec   :  { %v3210_v43 = vpop.f32.mrb[25].mxu0 }
 0x1f7   :  { %v1818_v44 = vpop.f32.mrb[20].mxu1 }
 0x1f8   :  { %v1822_v46 = vadd.f32 %v1818_v44, %v1578_v29  ;;  %v3153_v40 = vpop.f32.mrb[21].mxu1 }
 0x1fa   :  { %v2067_v47 = vadd.f32 %v2063_v25, %v1822_v46 }
 0x1fb   :  { %v2223_v48 = vpop.f32.mrb[26].mxu0 }
 0x1fc   :  { %v2233_v50 = vadd.f32 %v2488_v7, %v2067_v47  ;;  %v3248_v32 = vpop.f32.mrb[27].mxu0 }
 0x1fe   :  { %v2489_v51 = vmul.f32 -1.442695, %v2233_v50 }
 0x200   :  { %3578 = vpow2.f32 %v2489_v51 }
 0x207   :  { %v1978_v52 = vpop.f32.mrb[22].mxu1 }
 0x208   :  { %v1982_v53 = vadd.f32 %v1978_v52, %v1738_v35  ;;  %v3191_v54 = vpop.f32.mrb[23].mxu1 }
 0x20a   :  { %v3579_v56 = vpop.eup %3578  ;;  %v2227_v57 = vadd.f32 %v2223_v48, %v1982_v53 }
 0x20b   :  { %v2237_v58 = vadd.f32 1.0, %v3579_v56 }
 0x20c   :  { %v2257_v59 = vadd.f32 %v2492_v55, %v2227_v57 }
 0x20d   :  { %3580 = vrcp.f32 %v2237_v58 }
 0x20e   :  { %3582 = vtanh.f32 %v2257_v59 }
 0x217   :  { %v3581_v2 = vpop.eup %3580  ;;  %v2143_v60 = vpop.f32.mrb[24].mxu1 }
 0x218   :  { %v3583_v62 = vpop.eup %3582  ;;  %v2147_v63 = vadd.f32 %v2143_v60, %v1902_v42  ;;  %v3229_v0 = vpop.f32.mrb[25].mxu1 }
 0x219   :  { %v2259_v1 = vmul.f32 %v3583_v62, %v3581_v2 }
 0x21a   :  { %v2245_v6 = vadd.f32 %v2490_v61, %v2147_v63 }
 0x21c   :  { %v2491_v3 = vmul.f32 -1.442695, %v2245_v6 }
 0x21e   :  { %3584 = vpow2.f32 %v2491_v3 }
 0x21f   :  { %3586 = vtanh.f32 %v2259_v1 }
 0x228   :  { %v3585_v4 = vpop.eup %3584 }
 0x229   :  { %v2249_v8 = vadd.f32 1.0, %v3585_v4  ;;  %v3587_v9 = vpop.eup %3586 }
 0x22b   :  { %3588 = vrcp.f32 %v2249_v8 }
 0x235   :  { %v3589_v10 = vpop.eup %3588 }
 0x236   :  { %v2261_v49 = vmul.f32 %v3589_v10, %v3587_v9 }
 0x238   :  { %2263 = vst.msk [vmem:[%s4574_s6] sm:$0xf] %vm2262_vm2, %v2261_v49 }

// kernel: _lambda_.11
= control target key start
LH: loop header
LB: loop body
LE: loop exit
PB: predicated region body
PF: predicated region fallthrough
CT: control target
= control target key end

     0   :  { %v1423_v0 = vmov 0   ;;  %vm55_vm0 = vcmask 523264   ;;  %vm907_vm1 = vcmask 261120   ;;  %s1773_s3 = inlined_call_operand.vmem [shape: f32[2,16,1], index: 3, kind: input, shape index: {}]   ;;  %s1774_s1 = inlined_call_operand.vmem [shape: f32[9,64,32], index: 1, kind: input, shape index: {}]   ;;  %s1775_s0 = inlined_call_operand.vmem [shape: f32[1,26,64], index: 0, kind: input, shape index: {}]   ;;  %s1776_s2 = inlined_call_operand.vmem [shape: f32[1,32], index: 2, kind: input, shape index: {}]   ;;  %s1777_s4 = inlined_call_operand.vmem [shape: f32[1,16,32], index: 4, kind: output, shape index: {}]  }
   0x1   :  { %1422 = vset.pattern.permute.xlu1 %v1423_v0  ;;  %1421 = vset.pattern.permute.xlu0 %v1423_v0  ;;  %v914_v1 = vld [vmem:[%s1773_s3 + $0x10] sm:$0xff]  ;;  %v17_v2 = vld [vmem:[%s1773_s3] sm:$0xff]  ;;  %v915_v3 = vld [vmem:[%s1773_s3 + $0x18] sm:$0xff] }
   0x2   :  { %222 = vperm.xlu0 %1421, %v914_v1   ;;  %26 = vperm.xlu1 %1422, %v17_v2   ;;  %v18_v4 = vld [vmem:[%s1773_s3 + $0x8] sm:$0xff]  ;;  %v916_v5 = vld [vmem:[%s1774_s1 + $0x40] sm:$0xff]  ;;  %v918_v10 = vld [vmem:[%s1774_s1 + $0x50] sm:$0xff] }
   0x3   :  { %v917_v6 = vld [vmem:[%s1774_s1 + $0x48] sm:$0xff]  ;;  %v948_v8 = vld [vmem:[%s1774_s1 + $0x100] sm:$0xff]  ;;  %v919_v12 = vld [vmem:[%s1774_s1 + $0x58] sm:$0xff] }
   0x4   :  { %v1260_v7 = vpack.c.bf16 %v917_v6, %v916_v5  ;;  %v949_v9 = vld [vmem:[%s1774_s1 + $0x108] sm:$0xff]  ;;  %v950_v13 = vld [vmem:[%s1774_s1 + $0x110] sm:$0xff]  ;;  %v951_v14 = vld [vmem:[%s1774_s1 + $0x118] sm:$0xff]  ;;  %v1264_v15 = vpack.c.bf16 %v919_v12, %v918_v10 }
   0x5   :  { %v1324_v11 = vpack.c.bf16 %v949_v9, %v948_v8  ;;  %v1328_v16 = vpack.c.bf16 %v951_v14, %v950_v13  ;;  %v920_v17 = vld [vmem:[%s1774_s1 + $0x60] sm:$0xff]  ;;  %v921_v18 = vld [vmem:[%s1774_s1 + $0x68] sm:$0xff]  ;;  %v922_v25 = vld [vmem:[%s1774_s1 + $0x70] sm:$0xff] }
   0x6   :  { %1261 = vmatprep.subr.bf16.mxu1 %v1260_v7  ;;  %227 = vperm.xlu0 %1421, %v915_v3   ;;  %v952_v19 = vld [vmem:[%s1774_s1 + $0x120] sm:$0xff]  ;;  %v953_v20 = vld [vmem:[%s1774_s1 + $0x128] sm:$0xff]  ;;  %v1268_v22 = vpack.c.bf16 %v921_v18, %v920_v17  ;;  %v923_v26 = vld [vmem:[%s1774_s1 + $0x78] sm:$0xff] }
   0x7   :  { %31 = vperm.xlu1 %1422, %v18_v4   ;;  %1325 = vmatprep.subr.bf16.mxu0 %v1324_v11  ;;  %v44_v21 = vld [vmem:[%s1775_s0 + $0x1] sm:$0xff]  ;;  %v1332_v24 = vpack.c.bf16 %v953_v20, %v952_v19  ;;  %v954_v27 = vld [vmem:[%s1774_s1 + $0x130] sm:$0xff]  ;;  %v955_v28 = vld [vmem:[%s1774_s1 + $0x138] sm:$0xff]  ;;  %v1272_v29 = vpack.c.bf16 %v923_v26, %v922_v25 }
   0x8   :  { %1263 = vmatpush3.bf16.msra.mxu1 %v1260_v7  ;;  %1327 = vmatpush3.bf16.msra.mxu0 %v1324_v11  ;;  %v420_v23 = vld [vmem:[%s1775_s0 + $0x5] sm:$0xff]  ;;  %v1336_v30 = vpack.c.bf16 %v955_v28, %v954_v27  ;;  %v38_v37 = vld [vmem:[%s1774_s1 + $0x10] sm:$0xff]  ;;  %v39_v38 = vld [vmem:[%s1774_s1 + $0x18] sm:$0xff] }
   0x9   :  { %1265 = vmatprep.subr.bf16.mxu1 %v1264_v15  ;;  %1329 = vmatprep.subr.bf16.mxu0 %v1328_v16  ;;  %v36_v31 = vld [vmem:[%s1774_s1] sm:$0xff]  ;;  %v37_v32 = vld [vmem:[%s1774_s1 + $0x8] sm:$0xff]  ;;  %v960_v39 = vld [vmem:[%s1774_s1 + $0x150] sm:$0xff]  ;;  %v1280_v43 = vpack.c.bf16 %v39_v38, %v38_v37 }
   0xa   :  { %1105 = vmatprep.mubr.msk.f32.mxu1 %vm55_vm0, %v44_v21  ;;  %1181 = vmatprep.mubr.msk.f32.mxu0 %vm55_vm0, %v420_v23  ;;  %v958_v33 = vld [vmem:[%s1774_s1 + $0x140] sm:$0xff]  ;;  %v959_v34 = vld [vmem:[%s1774_s1 + $0x148] sm:$0xff]  ;;  %v1276_v35 = vpack.c.bf16 %v37_v32, %v36_v31  ;;  %v961_v40 = vld [vmem:[%s1774_s1 + $0x158] sm:$0xff] }
   0xb   :  { %v1340_v36 = vpack.c.bf16 %v959_v34, %v958_v33  ;;  %v1544_v41 = vld [vmem:[%s1775_s0 + $0x9] sm:$0xff]  ;;  %v1344_v44 = vpack.c.bf16 %v961_v40, %v960_v39  ;;  %v40_v45 = vld [vmem:[%s1774_s1 + $0x20] sm:$0xff]  ;;  %v43_v52 = vld [vmem:[%s1774_s1 + $0x38] sm:$0xff] }
   0xc   :  { %1267 = vmatpush3.bf16.msra.mxu1 %v1264_v15  ;;  %1331 = vmatpush3.bf16.msra.mxu0 %v1328_v16  ;;  %v421_v42 = vld [vmem:[%s1775_s0 + $0xd] sm:$0xff]  ;;  %v962_v47 = vld [vmem:[%s1774_s1 + $0x160] sm:$0xff]  ;;  %v965_v54 = vld [vmem:[%s1774_s1 + $0x178] sm:$0xff] }
   0xd   :  { %1269 = vmatprep.subr.bf16.mxu1 %v1268_v22  ;;  %1333 = vmatprep.subr.bf16.mxu0 %v1332_v24  ;;  %v41_v46 = vld [vmem:[%s1774_s1 + $0x28] sm:$0xff]  ;;  %v42_v51 = vld [vmem:[%s1774_s1 + $0x30] sm:$0xff]  ;;  %v928_v57 = vld [vmem:[%s1774_s1 + $0x80] sm:$0xff] }
   0xe   :  { %v963_v48 = vld [vmem:[%s1774_s1 + $0x168] sm:$0xff]  ;;  %v1284_v49 = vpack.c.bf16 %v41_v46, %v40_v45  ;;  %v964_v53 = vld [vmem:[%s1774_s1 + $0x170] sm:$0xff]  ;;  %v1288_v55 = vpack.c.bf16 %v43_v52, %v42_v51  ;;  %v968_v59 = vld [vmem:[%s1774_s1 + $0x180] sm:$0xff] }
   0xf   :  { %v1348_v50 = vpack.c.bf16 %v963_v48, %v962_v47  ;;  %v1352_v56 = vpack.c.bf16 %v965_v54, %v964_v53  ;;  %v929_v58 = vld [vmem:[%s1774_s1 + $0x88] sm:$0xff]  ;;  %v22_v0 = vld [vmem:[%s1775_s0] sm:$0xff]  ;;  %v930_v7 = vld [vmem:[%s1774_s1 + $0x90] sm:$0xff] }
  0x10   :  { %1271 = vmatpush3.bf16.msra.mxu1 %v1268_v22  ;;  %1335 = vmatpush3.bf16.msra.mxu0 %v1332_v24  ;;  %v969_v60 = vld [vmem:[%s1774_s1 + $0x188] sm:$0xff]  ;;  %v1292_v61 = vpack.c.bf16 %v929_v58, %v928_v57  ;;  %v931_v8 = vld [vmem:[%s1774_s1 + $0x98] sm:$0xff]  ;;  %v970_v9 = vld [vmem:[%s1774_s1 + $0x190] sm:$0xff] }
  0x11   :  { %1273 = vmatprep.subr.bf16.mxu1 %v1272_v29  ;;  %1337 = vmatprep.subr.bf16.mxu0 %v1336_v30  ;;  %v1356_v62 = vpack.c.bf16 %v969_v60, %v968_v59  ;;  %v514_v63 = vld [vmem:[%s1775_s0 + $0x6] sm:$0xff]  ;;  %v515_v6 = vld [vmem:[%s1775_s0 + $0xe] sm:$0xff]  ;;  %v971_v10 = vld [vmem:[%s1774_s1 + $0x198] sm:$0xff]  ;;  %v1296_v16 = vpack.c.bf16 %v931_v8, %v930_v7 }
  0x12   :  { %v610_v5 = vld [vmem:[%s1775_s0 + $0x8] sm:$0xff]  ;;  %v932_v17 = vld [vmem:[%s1774_s1 + $0xa0] sm:$0xff]  ;;  %v1360_v19 = vpack.c.bf16 %v971_v10, %v970_v9  ;;  %v934_v26 = vld [vmem:[%s1774_s1 + $0xb0] sm:$0xff] }
  0x13   :  { %v218_v11 = vld [vmem:[%s1775_s0 + $0x2] sm:$0xff]  ;;  %v935_v27 = vld [vmem:[%s1774_s1 + $0xb8] sm:$0xff]  ;;  %v974_v28 = vld [vmem:[%s1774_s1 + $0x1b0] sm:$0xff] }
  0x14   :  { %1275 = vmatpush3.bf16.msra.mxu1 %v1272_v29  ;;  %1339 = vmatpush3.bf16.msra.mxu0 %v1336_v30  ;;  %v933_v20 = vld [vmem:[%s1774_s1 + $0xa8] sm:$0xff]  ;;  %v972_v21 = vld [vmem:[%s1774_s1 + $0x1a0] sm:$0xff]  ;;  %v975_v29 = vld [vmem:[%s1774_s1 + $0x1b8] sm:$0xff]  ;;  %v1304_v30 = vpack.c.bf16 %v935_v27, %v934_v26 }
  0x15   :  { %1277 = vmatprep.subr.bf16.mxu1 %v1276_v35  ;;  %1341 = vmatprep.subr.bf16.mxu0 %v1340_v36  ;;  %v973_v22 = vld [vmem:[%s1774_s1 + $0x1a8] sm:$0xff]  ;;  %v1300_v24 = vpack.c.bf16 %v933_v20, %v932_v17  ;;  %v1368_v31 = vpack.c.bf16 %v975_v29, %v974_v28  ;;  %v938_v32 = vld [vmem:[%s1774_s1 + $0xc0] sm:$0xff]  ;;  %v611_v38 = vld [vmem:[%s1775_s0 + $0x10] sm:$0xff] }
  0x16   :  { %v1364_v25 = vpack.c.bf16 %v973_v22, %v972_v21  ;;  %v939_v33 = vld [vmem:[%s1774_s1 + $0xc8] sm:$0xff]  ;;  %v978_v34 = vld [vmem:[%s1774_s1 + $0x1c0] sm:$0xff]  ;;  %v940_v39 = vld [vmem:[%s1774_s1 + $0xd0] sm:$0xff] }
  0x17   :  { %1106 = vmatmul.mubr.msk.f32.vlgmr.msra.gmra.mrb[0].mxu1 %vm55_vm0, %v1544_v41  ;;  %1182 = vmatmul.mubr.msk.f32.vlgmr.msra.gmra.mrb[0].mxu0 %vm55_vm0, %v421_v42  ;;  %v941_v40 = vld [vmem:[%s1774_s1 + $0xd8] sm:$0xff]  ;;  %v324_v42 = vld [vmem:[%s1775_s0 + $0x4] sm:$0xff]  ;;  %v944_v57 = vld [vmem:[%s1774_s1 + $0xf0] sm:$0xff] }
  0x18   :  { %1279 = vmatpush3.bf16.msra.mxu1 %v1276_v35  ;;  %1343 = vmatpush3.bf16.msra.mxu0 %v1340_v36  ;;  %v979_v35 = vld [vmem:[%s1774_s1 + $0x1c8] sm:$0xff]  ;;  %v1308_v36 = vpack.c.bf16 %v939_v33, %v938_v32  ;;  %v1312_v48 = vpack.c.bf16 %v941_v40, %v940_v39  ;;  %v942_v51 = vld [vmem:[%s1774_s1 + $0xe0] sm:$0xff]  ;;  %v945_v58 = vld [vmem:[%s1774_s1 + $0xf8] sm:$0xff] }
  0x19   :  { %1281 = vmatprep.subr.bf16.mxu1 %v1280_v43  ;;  %1345 = vmatprep.subr.bf16.mxu0 %v1344_v44  ;;  %v1372_v37 = vpack.c.bf16 %v979_v35, %v978_v34  ;;  %v800_v45 = vld [vmem:[%s1775_s0 + $0xa] sm:$0xff]  ;;  %v982_v53 = vld [vmem:[%s1774_s1 + $0x1e0] sm:$0xff]  ;;  %v985_v60 = vld [vmem:[%s1774_s1 + $0x1f8] sm:$0xff] }
  0x1a   :  { %v943_v52 = vld [vmem:[%s1774_s1 + $0xe8] sm:$0xff]  ;;  %v984_v59 = vld [vmem:[%s1774_s1 + $0x1f0] sm:$0xff]  ;;  %v992_v9 = vld [vmem:[%s1774_s1 + $0x220] sm:$0xff] }
  0x1b   :  { %v983_v54 = vld [vmem:[%s1774_s1 + $0x1e8] sm:$0xff]  ;;  %v998_v20 = vld [vmem:[%s1776_s2] ss:$0 sm:$0xff] }
  0x1c   :  { %1283 = vmatpush3.bf16.msra.mxu1 %v1280_v43  ;;  %1347 = vmatpush3.bf16.msra.mxu0 %v1344_v44  ;;  %v980_v43 = vld [vmem:[%s1774_s1 + $0x1d0] sm:$0xff]  ;;  %v981_v44 = vld [vmem:[%s1774_s1 + $0x1d8] sm:$0xff]  ;;  %v993_v10 = vld [vmem:[%s1774_s1 + $0x228] sm:$0xff] }
  0x1d   :  { %1285 = vmatprep.subr.bf16.mxu1 %v1284_v49  ;;  %1349 = vmatprep.subr.bf16.mxu0 %v1348_v50 }
  0x20   :  { %1287 = vmatpush3.bf16.msra.mxu1 %v1284_v49  ;;  %1351 = vmatpush3.bf16.msra.mxu0 %v1348_v50  ;;  %v1376_v50 = vpack.c.bf16 %v981_v44, %v980_v43 }
  0x21   :  { %1289 = vmatprep.subr.bf16.mxu1 %v1288_v55  ;;  %1353 = vmatprep.subr.bf16.mxu0 %v1352_v56 }
  0x24   :  { %1291 = vmatpush3.bf16.msra.mxu1 %v1288_v55  ;;  %1355 = vmatpush3.bf16.msra.mxu0 %v1352_v56  ;;  %v1316_v55 = vpack.c.bf16 %v943_v52, %v942_v51  ;;  %v1380_v56 = vpack.c.bf16 %v983_v54, %v982_v53 }
  0x25   :  { %1293 = vmatprep.subr.bf16.mxu1 %v1292_v61  ;;  %1357 = vmatprep.subr.bf16.mxu0 %v1356_v62 }
  0x81   :  { %v1594_v1 = vpop.permute.xlu0 %222  ;;  %v1596_v2 = vpop.permute.xlu1 %26 }
  0x82   :  { %v516_v3 = vmul.f32 %v514_v63, %v1594_v1  ;;  %v34_v4 = vmul.f32 %v1596_v2, %v22_v0  ;;  %v612_v18 = vmul.f32 %v610_v5, %v1596_v2  ;;  %v230_v23 = vmul.f32 %v1594_v1, %v218_v11  ;;  %v988_v63 = vld [vmem:[%s1774_s1 + $0x200] sm:$0xff]  ;;  %v325_v0 = vld [vmem:[%s1775_s0 + $0xc] sm:$0xff] }
  0x83   :  { %v326_v49 = vmul.f32 %v324_v42, %v1596_v2  ;;  %v802_v8 = vmul.f32 %v800_v45, %v1594_v1  ;;  %v1396_v11 = vpack.c.bf16 %v993_v10, %v992_v9  ;;  %v994_v1 = vld [vmem:[%s1774_s1 + $0x230] sm:$0xff] }
  0x84   :  { %1200 = vmatprep.mubr.msk.f32.mxu0 %vm55_vm0, %v516_v3  ;;  %1124 = vmatprep.mubr.msk.f32.mxu1 %vm55_vm0, %v34_v4  ;;  %v990_v3 = vld [vmem:[%s1774_s1 + $0x210] sm:$0xff]  ;;  %v991_v4 = vld [vmem:[%s1774_s1 + $0x218] sm:$0xff] }
  0x85   :  { %v1623_v12 = vpop.permute.xlu0 %227  ;;  %v1392_v7 = vpack.c.bf16 %v991_v4, %v990_v3 }
  0x86   :  { %v1625_v13 = vpop.permute.xlu1 %31  ;;  %v517_v14 = vmul.f32 %v515_v6, %v1623_v12  ;;  %v231_v46 = vmul.f32 %v800_v45, %v1623_v12  ;;  %v707_v6 = vld [vmem:[%s1775_s0 + $0x11] sm:$0xff] }
  0x87   :  { %v35_v15 = vmul.f32 %v610_v5, %v1625_v13  ;;  %v613_v47 = vmul.f32 %v611_v38, %v1625_v13  ;;  %v327_v5 = vmul.f32 %v325_v0, %v1625_v13  ;;  %v995_v13 = vld [vmem:[%s1774_s1 + $0x238] sm:$0xff] }
  0x88   :  { %1201 = vmatmul.mubr.msk.f32.vlgmr.msra.gmra.mrb[0].mxu0 %vm55_vm0, %v517_v14  ;;  %v1400_v14 = vpack.c.bf16 %v995_v13, %v994_v1 }
  0x89   :  { %1125 = vmatmul.mubr.msk.f32.vlgmr.msra.gmra.mrb[0].mxu1 %vm55_vm0, %v35_v15  ;;  %1359 = vmatpush3.bf16.msra.mxu0 %v1356_v62  ;;  %v1384_v62 = vpack.c.bf16 %v985_v60, %v984_v59  ;;  %v801_v15 = vld [vmem:[%s1775_s0 + $0x12] sm:$0xff] }
  0x8a   :  { %1295 = vmatpush3.bf16.msra.mxu1 %v1292_v61  ;;  %1143 = vmatprep.mubr.msk.f32.mxu1 %vm55_vm0, %v230_v23  ;;  %v1320_v61 = vpack.c.bf16 %v945_v58, %v944_v57 }
  0x8b   :  { %1297 = vmatprep.subr.bf16.mxu1 %v1296_v16  ;;  %1361 = vmatprep.subr.bf16.mxu0 %v1360_v19 }
  0x8c   :  { %1219 = vmatprep.mubr.msk.f32.mxu0 %vm55_vm0, %v612_v18 }
  0x8d   :  { %1363 = vmatpush3.bf16.msra.mxu0 %v1360_v19 }
  0x8e   :  { %1299 = vmatpush3.bf16.msra.mxu1 %v1296_v16  ;;  %1365 = vmatprep.subr.bf16.mxu0 %v1364_v25  ;;  %v803_v16 = vmul.f32 %v801_v15, %v1623_v12 }
  0x8f   :  { %1301 = vmatprep.subr.bf16.mxu1 %v1300_v24 }
  0x91   :  { %1367 = vmatpush3.bf16.msra.mxu0 %v1364_v25 }
  0x92   :  { %1303 = vmatpush3.bf16.msra.mxu1 %v1300_v24  ;;  %1369 = vmatprep.subr.bf16.mxu0 %v1368_v31 }
  0x93   :  { %1305 = vmatprep.subr.bf16.mxu1 %v1304_v30 }
  0x95   :  { %1371 = vmatpush3.bf16.msra.mxu0 %v1368_v31 }
  0x96   :  { %1307 = vmatpush3.bf16.msra.mxu1 %v1304_v30  ;;  %1373 = vmatprep.subr.bf16.mxu0 %v1372_v37 }
  0x97   :  { %1309 = vmatprep.subr.bf16.mxu1 %v1308_v36 }
  0x98   :  { %1220 = vmatmul.mubr.msk.f32.vlgmr.msra.gmra.mrb[0].mxu0 %vm55_vm0, %v613_v47 }
  0x99   :  { %1144 = vmatmul.mubr.msk.f32.vlgmr.msra.gmra.mrb[0].mxu1 %vm55_vm0, %v231_v46  ;;  %1375 = vmatpush3.bf16.msra.mxu0 %v1372_v37 }
  0x9a   :  { %1311 = vmatpush3.bf16.msra.mxu1 %v1308_v36  ;;  %1162 = vmatprep.mubr.msk.f32.mxu1 %vm55_vm0, %v326_v49 }
  0x9b   :  { %1313 = vmatprep.subr.bf16.mxu1 %v1312_v48  ;;  %1377 = vmatprep.subr.bf16.mxu0 %v1376_v50 }
  0x9c   :  { %1238 = vmatprep.mubr.msk.f32.mxu0 %vm55_vm0, %v1544_v41  ;;  %v989_v41 = vld [vmem:[%s1774_s1 + $0x208] sm:$0xff] }
  0x9d   :  { %1379 = vmatpush3.bf16.msra.mxu0 %v1376_v50  ;;  %v1388_v2 = vpack.c.bf16 %v989_v41, %v988_v63 }
  0x9e   :  { %1315 = vmatpush3.bf16.msra.mxu1 %v1312_v48  ;;  %1381 = vmatprep.subr.bf16.mxu0 %v1380_v56 }
  0x9f   :  { %1317 = vmatprep.subr.bf16.mxu1 %v1316_v55 }
  0xa1   :  { %1383 = vmatpush3.bf16.msra.mxu0 %v1380_v56 }
  0xa2   :  { %1319 = vmatpush3.bf16.msra.mxu1 %v1316_v55  ;;  %1385 = vmatprep.subr.bf16.mxu0 %v1384_v62 }
  0xa3   :  { %1321 = vmatprep.subr.bf16.mxu1 %v1320_v61 }
  0xa5   :  { %1387 = vmatpush3.bf16.msra.mxu0 %v1384_v62 }
  0xa6   :  { %1323 = vmatpush3.bf16.msra.mxu1 %v1320_v61  ;;  %1389 = vmatprep.subr.bf16.mxu0 %v1388_v2 }
  0xa8   :  { %1239 = vmatmul.mubr.msk.f32.vlgmr.msra.gmra.mrb[0].mxu0 %vm55_vm0, %v707_v6 }
  0xa9   :  { %1163 = vmatmul.mubr.msk.f32.vlgmr.msra.gmra.mrb[0].mxu1 %vm55_vm0, %v327_v5  ;;  %1391 = vmatpush3.bf16.msra.mxu0 %v1388_v2 }
  0xaa   :  { %1257 = vmatprep.mubr.msk.f32.mxu0 %vm55_vm0, %v802_v8  ;;  %1393 = vmatprep.subr.bf16.mxu0 %v1392_v7 }
  0xad   :  { %1395 = vmatpush3.bf16.msra.mxu0 %v1392_v7 }
  0xae   :  { %1397 = vmatprep.subr.bf16.mxu0 %v1396_v11 }
  0xb1   :  { %1399 = vmatpush3.bf16.msra.mxu0 %v1396_v11 }
  0xb2   :  { %1401 = vmatprep.subr.bf16.mxu0 %v1400_v14 }
  0xb5   :  { %1403 = vmatpush3.bf16.msra.mxu0 %v1400_v14 }
  0xb8   :  { %1258 = vmatmul.mubr.msk.f32.vlgmr.msra.gmra.mrb[0].mxu0 %vm55_vm0, %v803_v16 }
 0x17c   :  { %v1164_v17 = vpop.f32.mrb[0].mxu1 }
 0x17d   :  { %v409_v18 = vpop.f32.mrb[1].mxu1 }
 0x18b   :  { %v1259_v19 = vpop.f32.mrb[0].mxu0 }
 0x18c   :  { %v1404_v21 = vadd.f32 %v1259_v19, %v1164_v17  ;;  %v885_v22 = vpop.f32.mrb[1].mxu0 }
 0x18d   :  { %v1405_v23 = vadd.f32 %v885_v22, %v409_v18 }
 0x18e   :  { %v904_v24 = vadd.f32 %v1404_v21, %v998_v20 }
 0x18f   :  { %v903_v25 = vadd.f32 %v1405_v23, %v998_v20 }
 0x190   :  { %v906_v26 = vmax.f32 %v904_v24, 0.0 }
 0x191   :  { %v905_v27 = vmax.f32 %v903_v25, 0.0 }
 0x192   :  { %909 = vst.msk [vmem:[%s1777_s4 + $0x8] sm:$0xff] %vm907_vm1, %v906_v26 }
 0x193   :  { %908 = vst.msk [vmem:[%s1777_s4] sm:$0xff] %vm907_vm1, %v905_v27 }

// kernel: _lambda_.12
= control target key start
LH: loop header
LB: loop body
LE: loop exit
PB: predicated region body
PF: predicated region fallthrough
CT: control target
= control target key end

     0   :  { %v2076_v0 = vmov 0   ;;  %vm107_vm0 = vcmask 261120   ;;  %vm1519_vm1 = vcmask 130048   ;;  %s2665_s3 = inlined_call_operand.vmem [shape: f32[2,64,1], index: 3, kind: input, shape index: {}]   ;;  %s2666_s1 = inlined_call_operand.vmem [shape: f32[9,32,16], index: 1, kind: input, shape index: {}]   ;;  %s2667_s0 = inlined_call_operand.vmem [shape: f32[1,82,32], index: 0, kind: input, shape index: {}]   ;;  %s2668_s2 = inlined_call_operand.vmem [shape: f32[1,16], index: 2, kind: input, shape index: {}]   ;;  %s2669_s4 = inlined_call_operand.vmem [shape: f32[1,64,16], index: 4, kind: output, shape index: {}]  }
   0x1   :  { %2075 = vset.pattern.permute.xlu1 %v2076_v0  ;;  %2074 = vset.pattern.permute.xlu0 %v2076_v0  ;;  %v1534_v1 = vld [vmem:[%s2665_s3 + $0x50] sm:$0xff]  ;;  %v1532_v2 = vld [vmem:[%s2665_s3 + $0x40] sm:$0xff]  ;;  %v1535_v3 = vld [vmem:[%s2665_s3 + $0x58] sm:$0xff] }
   0x2   :  { %386 = vperm.xlu1 %2075, %v1534_v1   ;;  %376 = vperm.xlu0 %2074, %v1532_v2   ;;  %v1533_v4 = vld [vmem:[%s2665_s3 + $0x48] sm:$0xff]  ;;  %v1536_v5 = vld [vmem:[%s2665_s3 + $0x60] sm:$0xff]  ;;  %v1542_v12 = vld [vmem:[%s2666_s1 + $0x30] sm:$0xff] }
   0x3   :  { %v17_v6 = vld [vmem:[%s2665_s3] sm:$0xff]  ;;  %v1541_v8 = vld [vmem:[%s2666_s1 + $0x28] sm:$0xff]  ;;  %v1543_v14 = vld [vmem:[%s2666_s1 + $0x38] sm:$0xff] }
   0x4   :  { %v1540_v7 = vld [vmem:[%s2666_s1 + $0x20] sm:$0xff]  ;;  %v1585_v11 = vld [vmem:[%s2666_s1 + $0x88] sm:$0xff]  ;;  %v1586_v15 = vld [vmem:[%s2666_s1 + $0x90] sm:$0xff]  ;;  %v1937_v17 = vpack.c.bf16 %v1543_v14, %v1542_v12 }
   0x5   :  { %v1933_v9 = vpack.c.bf16 %v1541_v8, %v1540_v7  ;;  %v1584_v10 = vld [vmem:[%s2666_s1 + $0x80] sm:$0xff]  ;;  %v1587_v16 = vld [vmem:[%s2666_s1 + $0x98] sm:$0xff]  ;;  %v1597_v21 = vld [vmem:[%s2666_s1 + $0xa8] sm:$0xff] }
   0x6   :  { %391 = vperm.xlu1 %2075, %v1535_v3   ;;  %381 = vperm.xlu0 %2074, %v1533_v4   ;;  %v2135_v13 = vpack.c.bf16 %v1585_v11, %v1584_v10  ;;  %v2146_v18 = vpack.c.bf16 %v1587_v16, %v1586_v15  ;;  %v94_v19 = vld [vmem:[%s2667_s0 + $0x1] sm:$0xff]  ;;  %v722_v24 = vld [vmem:[%s2667_s0 + $0x9] sm:$0xff]  ;;  %v1599_v30 = vld [vmem:[%s2666_s1 + $0xb8] sm:$0xff] }
   0x7   :  { %1934 = vmatprep.subr.bf16.mxu1 %v1933_v9  ;;  %v1596_v20 = vld [vmem:[%s2666_s1 + $0xa0] sm:$0xff]  ;;  %v1537_v22 = vld [vmem:[%s2665_s3 + $0x68] sm:$0xff]  ;;  %1761 = vmatprep.mubr.msk.f32.mxu1 %vm107_vm0, %v94_v19  ;;  %v1598_v29 = vld [vmem:[%s2666_s1 + $0xb0] sm:$0xff] }
   0x8   :  { %v18_v23 = vld [vmem:[%s2665_s3 + $0x8] sm:$0xff]  ;;  %1966 = vmatprep.subr.bf16.mxu0 %v2135_v13  ;;  %1936 = vmatpush3.bf16.msra.mxu1 %v1933_v9  ;;  %v1973_v25 = vpack.c.bf16 %v1597_v21, %v1596_v20  ;;  %v90_v26 = vld [vmem:[%s2666_s1] sm:$0xff]  ;;  %v1538_v31 = vld [vmem:[%s2665_s3 + $0x70] sm:$0xff]  ;;  %v1977_v34 = vpack.c.bf16 %v1599_v30, %v1598_v29 }
   0x9   :  { %1968 = vmatpush3.bf16.msra.mxu0 %v2135_v13  ;;  %1938 = vmatprep.subr.bf16.mxu1 %v1937_v17  ;;  %v91_v27 = vld [vmem:[%s2666_s1 + $0x8] sm:$0xff]  ;;  %v19_v32 = vld [vmem:[%s2665_s3 + $0x10] sm:$0xff]  ;;  %v2198_v35 = vld [vmem:[%s2667_s0 + $0x19] sm:$0xff] }
   0xa   :  { %396 = vperm.xlu1 %2075, %v1536_v5   ;;  %44 = vperm.xlu0 %2074, %v17_v6   ;;  %v1941_v28 = vpack.c.bf16 %v91_v27, %v90_v26  ;;  %v2193_v33 = vld [vmem:[%s2667_s0 + $0x11] sm:$0xff]  ;;  %v2220_v40 = vld [vmem:[%s2667_s0 + $0x21] sm:$0xff]  ;;  %v2249_v49 = vld [vmem:[%s2667_s0 + $0x29] sm:$0xff] }
   0xb   :  { %1970 = vmatprep.subr.bf16.mxu0 %v2146_v18  ;;  %1841 = vmatprep.mubr.msk.f32.mxu0 %vm107_vm0, %v722_v24  ;;  %v92_v36 = vld [vmem:[%s2666_s1 + $0x10] sm:$0xff]  ;;  %v93_v37 = vld [vmem:[%s2666_s1 + $0x18] sm:$0xff]  ;;  %v1608_v41 = vld [vmem:[%s2666_s1 + $0xc0] sm:$0xff] }
   0xc   :  { %1940 = vmatpush3.bf16.msra.mxu1 %v1937_v17  ;;  %v1539_v38 = vld [vmem:[%s2665_s3 + $0x78] sm:$0xff]  ;;  %v1609_v42 = vld [vmem:[%s2666_s1 + $0xc8] sm:$0xff]  ;;  %v1945_v43 = vpack.c.bf16 %v93_v37, %v92_v36  ;;  %v1560_v44 = vld [vmem:[%s2666_s1 + $0x40] sm:$0xff] }
   0xd   :  { %1972 = vmatpush3.bf16.msra.mxu0 %v2146_v18  ;;  %1942 = vmatprep.subr.bf16.mxu1 %v1941_v28  ;;  %v20_v39 = vld [vmem:[%s2665_s3 + $0x18] sm:$0xff]  ;;  %v1561_v45 = vld [vmem:[%s2666_s1 + $0x48] sm:$0xff]  ;;  %v21_v47 = vld [vmem:[%s2665_s3 + $0x20] sm:$0xff]  ;;  %v1981_v48 = vpack.c.bf16 %v1609_v42, %v1608_v41 }
   0xe   :  { %401 = vperm.xlu1 %2075, %v1537_v22   ;;  %49 = vperm.xlu0 %2074, %v18_v23   ;;  %v22_v46 = vld [vmem:[%s2665_s3 + $0x28] sm:$0xff]  ;;  %v2256_v50 = vld [vmem:[%s2667_s0 + $0x31] sm:$0xff]  ;;  %v2258_v51 = vpack.c.bf16 %v1561_v45, %v1560_v44  ;;  %v2273_v54 = vld [vmem:[%s2667_s0 + $0x39] sm:$0xff] }
   0xf   :  { %1974 = vmatprep.subr.bf16.mxu0 %v1973_v25  ;;  %1762 = vmatmul.mubr.msk.f32.vlgmr.msra.gmra.mrb[0].mxu1 %vm107_vm0, %v722_v24  ;;  %v24_v52 = vld [vmem:[%s2665_s3 + $0x38] sm:$0xff]  ;;  %v23_v53 = vld [vmem:[%s2665_s3 + $0x30] sm:$0xff]  ;;  %v34_v2 = vld [vmem:[%s2667_s0] sm:$0xff] }
  0x10   :  { %1842 = vmatmul.mubr.msk.f32.vlgmr.msra.gmra.mrb[0].mxu0 %vm107_vm0, %v2193_v33  ;;  %1764 = vmatprep.mubr.msk.f32.mxu1 %vm107_vm0, %v2193_v33  ;;  %v2281_v55 = vld [vmem:[%s2667_s0 + $0xa] sm:$0xff]  ;;  %v2292_v59 = vld [vmem:[%s2667_s0 + $0x1a] sm:$0xff]  ;;  %v2308_v0 = vld [vmem:[%s2667_s0 + $0x12] sm:$0xff] }
  0x11   :  { %1976 = vmatpush3.bf16.msra.mxu0 %v1973_v25  ;;  %1844 = vmatprep.mubr.msk.f32.mxu0 %vm107_vm0, %v2198_v35  ;;  %v1610_v62 = vld [vmem:[%s2666_s1 + $0xd0] sm:$0xff]  ;;  %v1611_v63 = vld [vmem:[%s2666_s1 + $0xd8] sm:$0xff]  ;;  %v1620_v8 = vld [vmem:[%s2666_s1 + $0xe0] sm:$0xff] }
  0x12   :  { %406 = vperm.xlu1 %2075, %v1538_v31   ;;  %54 = vperm.xlu0 %2074, %v19_v32   ;;  %v1985_v4 = vpack.c.bf16 %v1611_v63, %v1610_v62  ;;  %v2320_v5 = vld [vmem:[%s2667_s0 + $0x2a] sm:$0xff]  ;;  %v2336_v10 = vld [vmem:[%s2667_s0 + $0x22] sm:$0xff]  ;;  %v1563_v16 = vld [vmem:[%s2666_s1 + $0x58] sm:$0xff] }
  0x13   :  { %1978 = vmatprep.subr.bf16.mxu0 %v1977_v34  ;;  %1765 = vmatmul.mubr.msk.f32.gmra.mrb[2].mxu1 %vm107_vm0, %v2198_v35  ;;  %v1621_v9 = vld [vmem:[%s2666_s1 + $0xe8] sm:$0xff]  ;;  %v1562_v15 = vld [vmem:[%s2666_s1 + $0x50] sm:$0xff]  ;;  %v1572_v26 = vld [vmem:[%s2666_s1 + $0x60] sm:$0xff] }
  0x14   :  { %1845 = vmatmul.mubr.msk.f32.gmra.mrb[2].mxu0 %vm107_vm0, %v2220_v40  ;;  %1944 = vmatpush3.bf16.msra.mxu1 %v1941_v28  ;;  %v2351_v17 = vpack.c.bf16 %v1621_v9, %v1620_v8  ;;  %v2356_v19 = vld [vmem:[%s2667_s0 + $0x32] sm:$0xff]  ;;  %v2361_v20 = vld [vmem:[%s2667_s0 + $0x8] sm:$0xff]  ;;  %v1953_v25 = vpack.c.bf16 %v1563_v16, %v1562_v15  ;;  %v2389_v29 = vld [vmem:[%s2667_s0 + $0x3a] sm:$0xff] }
  0x15   :  { %1980 = vmatpush3.bf16.msra.mxu0 %v1977_v34  ;;  %1767 = vmatprep.mubr.msk.f32.mxu1 %vm107_vm0, %v2220_v40  ;;  %v1573_v27 = vld [vmem:[%s2666_s1 + $0x68] sm:$0xff]  ;;  %v2384_v28 = vld [vmem:[%s2667_s0 + $0x10] sm:$0xff]  ;;  %v2408_v37 = vld [vmem:[%s2667_s0 + $0x18] sm:$0xff] }
  0x16   :  { %411 = vperm.xlu1 %2075, %v1539_v38   ;;  %59 = vperm.xlu0 %2074, %v20_v39   ;;  %v2401_v36 = vpack.c.bf16 %v1573_v27, %v1572_v26  ;;  %v2413_v38 = vld [vmem:[%s2667_s0 + $0x42] sm:$0xff]  ;;  %v2476_v9 = vld [vmem:[%s2667_s0 + $0x38] sm:$0xff] }
  0x17   :  { %1946 = vmatprep.subr.bf16.mxu1 %v1945_v43  ;;  %1768 = vmatmul.mubr.msk.f32.gmra.mrb[4].mxu1 %vm107_vm0, %v2249_v49  ;;  %v2429_v45 = vld [vmem:[%s2667_s0 + $0x20] sm:$0xff]  ;;  %v1575_v27 = vld [vmem:[%s2666_s1 + $0x78] sm:$0xff] }
  0x18   :  { %1982 = vmatprep.subr.bf16.mxu0 %v1981_v48  ;;  %1770 = vmatprep.mubr.msk.f32.mxu1 %vm107_vm0, %v2256_v50  ;;  %v366_v8 = vld [vmem:[%s2667_s0 + $0x2] sm:$0xff] }
  0x19   :  { %1948 = vmatpush3.bf16.msra.mxu1 %v1945_v43  ;;  %v2497_v26 = vld [vmem:[%s2667_s0 + $0x40] sm:$0xff] }
  0x1a   :  { %69 = vperm.xlu1 %2075, %v22_v46   ;;  %64 = vperm.xlu0 %2074, %v21_v47   ;;  %v1622_v46 = vld [vmem:[%s2666_s1 + $0xf0] sm:$0xff]  ;;  %v1623_v47 = vld [vmem:[%s2666_s1 + $0xf8] sm:$0xff] }
  0x1b   :  { %1950 = vmatprep.subr.bf16.mxu1 %v2258_v51  ;;  %1771 = vmatmul.mubr.msk.f32.gmra.mrb[6].mxu1 %vm107_vm0, %v2273_v54 }
  0x1e   :  { %79 = vperm.xlu1 %2075, %v24_v52   ;;  %74 = vperm.xlu0 %2074, %v23_v53  }
  0x81   :  { %v2283_v56 = vpop.permute.xlu1 %386  ;;  %v2285_v57 = vpop.permute.xlu0 %376 }
  0x82   :  { %v880_v58 = vmul.f32 %v2281_v55, %v2285_v57  ;;  %v882_v3 = vmul.f32 %v2292_v59, %v2283_v56 }
  0x84   :  { %1861 = vmatprep.mubr.msk.f32.mxu0 %vm107_vm0, %v880_v58 }
  0x85   :  { %v2295_v60 = vpop.permute.xlu1 %391  ;;  %v2297_v61 = vpop.permute.xlu0 %381 }
  0x86   :  { %v881_v1 = vmul.f32 %v2297_v61, %v2308_v0  ;;  %v883_v14 = vmul.f32 %v2336_v10, %v2295_v60 }
  0x88   :  { %1862 = vmatmul.mubr.msk.f32.vlgmr.msra.gmra.mrb[0].mxu0 %vm107_vm0, %v881_v1  ;;  %v1993_v1 = vpack.c.bf16 %v1623_v47, %v1622_v46  ;;  %v416_v46 = vmul.f32 %v2283_v56, %v2308_v0  ;;  %v417_v47 = vmul.f32 %v2292_v59, %v2295_v60 }
  0x89   :  { %v2323_v6 = vpop.permute.xlu1 %396  ;;  %v2325_v7 = vpop.permute.xlu0 %44  ;;  %1864 = vmatprep.mubr.msk.f32.mxu0 %vm107_vm0, %v882_v3  ;;  %1984 = vmatpush3.bf16.msra.mxu0 %v1981_v48  ;;  %v2442_v48 = vld [vmem:[%s2667_s0 + $0x28] sm:$0xff]  ;;  %v1632_v3 = vld [vmem:[%s2666_s1 + $0x100] sm:$0xff] }
  0x8a   :  { %v884_v11 = vmul.f32 %v2320_v5, %v2323_v6  ;;  %v82_v12 = vmul.f32 %v2325_v7, %v34_v2  ;;  %1986 = vmatprep.subr.bf16.mxu0 %v1985_v4  ;;  %v1038_v44 = vmul.f32 %v2384_v28, %v2325_v7  ;;  %v2460_v2 = vld [vmem:[%s2667_s0 + $0x30] sm:$0xff] }
  0x8c   :  { %1781 = vmatprep.mubr.msk.f32.mxu1 %vm107_vm0, %v82_v12  ;;  %1865 = vmatmul.mubr.msk.f32.gmra.mrb[2].mxu0 %vm107_vm0, %v883_v14 }
  0x8d   :  { %v2364_v21 = vpop.permute.xlu1 %401  ;;  %v2366_v22 = vpop.permute.xlu0 %49  ;;  %1867 = vmatprep.mubr.msk.f32.mxu0 %vm107_vm0, %v884_v11  ;;  %1988 = vmatpush3.bf16.msra.mxu0 %v1985_v4  ;;  %v1633_v4 = vld [vmem:[%s2666_s1 + $0x108] sm:$0xff] }
  0x8e   :  { %v885_v23 = vmul.f32 %v2356_v19, %v2364_v21  ;;  %v83_v24 = vmul.f32 %v2361_v20, %v2366_v22  ;;  %1990 = vmatprep.subr.bf16.mxu0 %v2351_v17  ;;  %v1039_v53 = vmul.f32 %v2408_v37, %v2366_v22 }
  0x90   :  { %1782 = vmatmul.mubr.msk.f32.vlgmr.msra.gmra.mrb[0].mxu1 %vm107_vm0, %v83_v24  ;;  %1868 = vmatmul.mubr.msk.f32.gmra.mrb[4].mxu0 %vm107_vm0, %v885_v23  ;;  %v1997_v24 = vpack.c.bf16 %v1633_v4, %v1632_v3  ;;  %v572_v3 = vmul.f32 %v2361_v20, %v2325_v7  ;;  %v1195_v20 = vld [vmem:[%s2667_s0 + $0x49] sm:$0xff] }
  0x91   :  { %v2392_v30 = vpop.permute.xlu1 %406  ;;  %v2394_v31 = vpop.permute.xlu0 %54  ;;  %1952 = vmatpush3.bf16.msra.mxu1 %v2258_v51 }
  0x92   :  { %v886_v32 = vmul.f32 %v2389_v29, %v2392_v30  ;;  %v84_v34 = vmul.f32 %v2384_v28, %v2394_v31  ;;  %1954 = vmatprep.subr.bf16.mxu1 %v1953_v25  ;;  %v1040_v63 = vmul.f32 %v2429_v45, %v2394_v31  ;;  %v574_v7 = vmul.f32 %v2408_v37, %v2394_v31 }
  0x94   :  { %1784 = vmatprep.mubr.msk.f32.mxu1 %vm107_vm0, %v84_v34  ;;  %1870 = vmatprep.mubr.msk.f32.mxu0 %vm107_vm0, %v886_v32  ;;  %v415_v34 = vmul.f32 %v2281_v55, %v2297_v61 }
  0x95   :  { %v2415_v39 = vpop.permute.xlu1 %411  ;;  %v2417_v41 = vpop.permute.xlu0 %59  ;;  %1956 = vmatpush3.bf16.msra.mxu1 %v1953_v25  ;;  %v414_v25 = vmul.f32 %v2285_v57, %v366_v8 }
  0x96   :  { %v887_v42 = vmul.f32 %v2413_v38, %v2415_v39  ;;  %v85_v43 = vmul.f32 %v2408_v37, %v2417_v41  ;;  %1958 = vmatprep.subr.bf16.mxu1 %v2401_v36  ;;  %v1041_v14 = vmul.f32 %v2442_v48, %v2417_v41 }
  0x98   :  { %1785 = vmatmul.mubr.msk.f32.gmra.mrb[2].mxu1 %vm107_vm0, %v85_v43  ;;  %1871 = vmatmul.mubr.msk.f32.gmra.mrb[6].mxu0 %vm107_vm0, %v887_v42  ;;  %v1037_v42 = vld [vmem:[%s2667_s0 + $0x48] sm:$0xff] }
  0x99   :  { %v2444_v51 = vpop.permute.xlu1 %69  ;;  %v2446_v52 = vpop.permute.xlu0 %64  ;;  %1881 = vmatprep.mubr.msk.f32.mxu0 %vm107_vm0, %v1038_v44 }
  0x9a   :  { %v87_v58 = vmul.f32 %v2442_v48, %v2444_v51  ;;  %v86_v62 = vmul.f32 %v2429_v45, %v2446_v52  ;;  %v1042_v23 = vmul.f32 %v2460_v2, %v2446_v52  ;;  %v1043_v32 = vmul.f32 %v2476_v9, %v2444_v51 }
  0x9b   :  { %v576_v31 = vmul.f32 %v2442_v48, %v2446_v52 }
  0x9c   :  { %1787 = vmatprep.mubr.msk.f32.mxu1 %vm107_vm0, %v86_v62  ;;  %1882 = vmatmul.mubr.msk.f32.vlgmr.msra.gmra.mrb[0].mxu0 %vm107_vm0, %v1039_v53  ;;  %v418_v53 = vmul.f32 %v2336_v10, %v2323_v6  ;;  %v1635_v62 = vld [vmem:[%s2666_s1 + $0x118] sm:$0xff] }
  0x9d   :  { %v2478_v11 = vpop.permute.xlu1 %79  ;;  %v2480_v12 = vpop.permute.xlu0 %74  ;;  %1788 = vmatmul.mubr.msk.f32.gmra.mrb[4].mxu1 %vm107_vm0, %v87_v58  ;;  %1884 = vmatprep.mubr.msk.f32.mxu0 %vm107_vm0, %v1040_v63  ;;  %v1634_v58 = vld [vmem:[%s2666_s1 + $0x110] sm:$0xff] }
  0x9e   :  { %v89_v15 = vmul.f32 %v2476_v9, %v2478_v11  ;;  %v88_v16 = vmul.f32 %v2460_v2, %v2480_v12  ;;  %1992 = vmatpush3.bf16.msra.mxu0 %v2351_v17  ;;  %v1574_v17 = vld [vmem:[%s2666_s1 + $0x70] sm:$0xff]  ;;  %v1044_v43 = vmul.f32 %v2497_v26, %v2480_v12  ;;  %v1045_v55 = vmul.f32 %v1037_v42, %v2478_v11 }
  0x9f   :  { %1994 = vmatprep.subr.bf16.mxu0 %v1993_v1  ;;  %v1961_v44 = vpack.c.bf16 %v1575_v27, %v1574_v17  ;;  %v2001_v63 = vpack.c.bf16 %v1635_v62, %v1634_v58  ;;  %v578_v37 = vmul.f32 %v2476_v9, %v2480_v12 }
  0xa0   :  { %1790 = vmatprep.mubr.msk.f32.mxu1 %vm107_vm0, %v88_v16  ;;  %1885 = vmatmul.mubr.msk.f32.gmra.mrb[2].mxu0 %vm107_vm0, %v1041_v14 }
  0xa1   :  { %1791 = vmatmul.mubr.msk.f32.gmra.mrb[6].mxu1 %vm107_vm0, %v89_v15  ;;  %1887 = vmatprep.mubr.msk.f32.mxu0 %vm107_vm0, %v1042_v23 }
  0xa2   :  { %1801 = vmatprep.mubr.msk.f32.mxu1 %vm107_vm0, %v414_v25  ;;  %1996 = vmatpush3.bf16.msra.mxu0 %v1993_v1  ;;  %v420_v1 = vmul.f32 %v2356_v19, %v2392_v30 }
  0xa3   :  { %1998 = vmatprep.subr.bf16.mxu0 %v1997_v24 }
  0xa4   :  { %1888 = vmatmul.mubr.msk.f32.gmra.mrb[4].mxu0 %vm107_vm0, %v1043_v32 }
  0xa5   :  { %1802 = vmatmul.mubr.msk.f32.vlgmr.msra.gmra.mrb[0].mxu1 %vm107_vm0, %v415_v34  ;;  %1890 = vmatprep.mubr.msk.f32.mxu0 %vm107_vm0, %v1044_v43 }
  0xa6   :  { %1960 = vmatpush3.bf16.msra.mxu1 %v2401_v36  ;;  %1804 = vmatprep.mubr.msk.f32.mxu1 %vm107_vm0, %v416_v46  ;;  %v419_v36 = vmul.f32 %v2320_v5, %v2364_v21 }
  0xa7   :  { %1962 = vmatprep.subr.bf16.mxu1 %v1961_v44 }
  0xa8   :  { %1891 = vmatmul.mubr.msk.f32.gmra.mrb[6].mxu0 %vm107_vm0, %v1045_v55 }
  0xa9   :  { %1805 = vmatmul.mubr.msk.f32.gmra.mrb[2].mxu1 %vm107_vm0, %v417_v47  ;;  %1901 = vmatprep.mubr.msk.f32.mxu0 %vm107_vm0, %v2193_v33  ;;  %v421_v33 = vmul.f32 %v2389_v29, %v2415_v39 }
  0xaa   :  { %1807 = vmatprep.mubr.msk.f32.mxu1 %vm107_vm0, %v418_v53  ;;  %1964 = vmatpush3.bf16.msra.mxu1 %v1961_v44 }
  0xab   :  { %2005 = vmatprep.subr.bf16.mxu1 %v2135_v13 }
  0xac   :  { %1902 = vmatmul.mubr.msk.f32.vlgmr.msra.gmra.mrb[0].mxu0 %vm107_vm0, %v2198_v35  ;;  %v1194_v35 = vld [vmem:[%s2667_s0 + $0x41] sm:$0xff] }
  0xad   :  { %1808 = vmatmul.mubr.msk.f32.gmra.mrb[4].mxu1 %vm107_vm0, %v419_v36  ;;  %2000 = vmatpush3.bf16.msra.mxu0 %v1997_v24 }
  0xae   :  { %1810 = vmatprep.mubr.msk.f32.mxu1 %vm107_vm0, %v420_v1  ;;  %1904 = vmatprep.mubr.msk.f32.mxu0 %vm107_vm0, %v2220_v40  ;;  %v573_v40 = vmul.f32 %v2384_v28, %v2366_v22  ;;  %v1346_v22 = vmul.f32 %v2285_v57, %v2308_v0  ;;  %v575_v28 = vmul.f32 %v2429_v45, %v2417_v41 }
  0xaf   :  { %2002 = vmatprep.subr.bf16.mxu0 %v2001_v63  ;;  %v1348_v57 = vmul.f32 %v2336_v10, %v2283_v56  ;;  %v577_v0 = vmul.f32 %v2460_v2, %v2444_v51  ;;  %v579_v56 = vmul.f32 %v2497_v26, %v2478_v11 }
  0xb0   :  { %1905 = vmatmul.mubr.msk.f32.gmra.mrb[2].mxu0 %vm107_vm0, %v2249_v49 }
  0xb1   :  { %1811 = vmatmul.mubr.msk.f32.gmra.mrb[6].mxu1 %vm107_vm0, %v421_v33  ;;  %1907 = vmatprep.mubr.msk.f32.mxu0 %vm107_vm0, %v2256_v50 }
  0xb2   :  { %1821 = vmatprep.mubr.msk.f32.mxu1 %vm107_vm0, %v572_v3  ;;  %2004 = vmatpush3.bf16.msra.mxu0 %v2001_v63 }
  0xb4   :  { %1908 = vmatmul.mubr.msk.f32.gmra.mrb[4].mxu0 %vm107_vm0, %v2273_v54 }
  0xb5   :  { %1822 = vmatmul.mubr.msk.f32.vlgmr.msra.gmra.mrb[0].mxu1 %vm107_vm0, %v573_v40  ;;  %1910 = vmatprep.mubr.msk.f32.mxu0 %vm107_vm0, %v1194_v35 }
  0xb6   :  { %2007 = vmatpush3.bf16.msra.mxu1 %v2135_v13  ;;  %1824 = vmatprep.mubr.msk.f32.mxu1 %vm107_vm0, %v574_v7  ;;  %v1347_v13 = vmul.f32 %v2292_v59, %v2297_v61  ;;  %v1349_v59 = vmul.f32 %v2320_v5, %v2295_v60  ;;  %v1351_v61 = vmul.f32 %v2389_v29, %v2364_v21  ;;  %v1345_v5 = vld [vmem:[%s2667_s0 + $0x4a] sm:$0xff] }
  0xb7   :  { %2006 = vmatprep.subr.bf16.mxu1 %v2146_v18  ;;  %v1352_v60 = vmul.f32 %v2413_v38, %v2392_v30 }
  0xb8   :  { %1911 = vmatmul.mubr.msk.f32.gmra.mrb[6].mxu0 %vm107_vm0, %v1195_v20 }
  0xb9   :  { %1825 = vmatmul.mubr.msk.f32.gmra.mrb[2].mxu1 %vm107_vm0, %v575_v28  ;;  %1921 = vmatprep.mubr.msk.f32.mxu0 %vm107_vm0, %v1346_v22 }
  0xba   :  { %1827 = vmatprep.mubr.msk.f32.mxu1 %vm107_vm0, %v576_v31  ;;  %2008 = vmatpush3.bf16.msra.mxu1 %v2146_v18  ;;  %v1350_v18 = vmul.f32 %v2356_v19, %v2323_v6  ;;  %v1353_v6 = vmul.f32 %v1345_v5, %v2415_v39 }
  0xbc   :  { %1922 = vmatmul.mubr.msk.f32.vlgmr.msra.gmra.mrb[0].mxu0 %vm107_vm0, %v1347_v13 }
  0xbd   :  { %1828 = vmatmul.mubr.msk.f32.gmra.mrb[4].mxu1 %vm107_vm0, %v577_v0  ;;  %1924 = vmatprep.mubr.msk.f32.mxu0 %vm107_vm0, %v1348_v57 }
  0xbe   :  { %1830 = vmatprep.mubr.msk.f32.mxu1 %vm107_vm0, %v578_v37 }
  0xc0   :  { %1925 = vmatmul.mubr.msk.f32.gmra.mrb[2].mxu0 %vm107_vm0, %v1349_v59 }
  0xc1   :  { %1831 = vmatmul.mubr.msk.f32.gmra.mrb[6].mxu1 %vm107_vm0, %v579_v56  ;;  %1927 = vmatprep.mubr.msk.f32.mxu0 %vm107_vm0, %v1350_v18 }
  0xc2   :  { %1847 = vmatprep.mubr.msk.f32.mxu1 %vm107_vm0, %v2249_v49 }
  0xc4   :  { %1928 = vmatmul.mubr.msk.f32.gmra.mrb[4].mxu0 %vm107_vm0, %v1351_v61 }
  0xc5   :  { %1848 = vmatmul.mubr.msk.f32.vlgmr.msra.gmra.mrb[4].mxu1 %vm107_vm0, %v2256_v50  ;;  %1930 = vmatprep.mubr.msk.f32.mxu0 %vm107_vm0, %v1352_v60  ;;  %v1644_v50 = vld [vmem:[%s2668_s2] ss:$0 sm:$0xff] }
  0xc6   :  { %1850 = vmatprep.mubr.msk.f32.mxu1 %vm107_vm0, %v2273_v54 }
  0xc8   :  { %1931 = vmatmul.mubr.msk.f32.gmra.mrb[6].mxu0 %vm107_vm0, %v1353_v6 }
  0xc9   :  { %1851 = vmatmul.mubr.msk.f32.gmra.mrb[6].mxu1 %vm107_vm0, %v1194_v35 }
 0x188   :  { %v1823_v49 = vpop.f32.mrb[0].mxu1 }
 0x189   :  { %v675_v10 = vpop.f32.mrb[1].mxu1 }
 0x18c   :  { %v1826_v19 = vpop.f32.mrb[2].mxu1 }
 0x18d   :  { %v685_v21 = vpop.f32.mrb[3].mxu1 }
 0x18f   :  { %v1923_v29 = vpop.f32.mrb[0].mxu0 }
 0x190   :  { %v2009_v30 = vadd.f32 %v1923_v29, %v1823_v49  ;;  %v1449_v38 = vpop.f32.mrb[1].mxu0 }
 0x191   :  { %v2010_v41 = vadd.f32 %v1449_v38, %v675_v10 }
 0x192   :  { %v1504_v39 = vadd.f32 %v2009_v30, %v1644_v50 }
 0x193   :  { %v1503_v45 = vadd.f32 %v2010_v41, %v1644_v50  ;;  %v1926_v54 = vpop.f32.mrb[2].mxu0 }
 0x194   :  { %v1512_v48 = vmax.f32 %v1504_v39, 0.0  ;;  %v2011_v51 = vadd.f32 %v1926_v54, %v1826_v19  ;;  %v1459_v52 = vpop.f32.mrb[3].mxu0 }
 0x195   :  { %v1511_v2 = vmax.f32 %v1503_v45, 0.0  ;;  %v2012_v4 = vadd.f32 %v1459_v52, %v685_v21 }
 0x196   :  { %1521 = vst.msk [vmem:[%s2669_s4 + $0x8] sm:$0xff] %vm1519_vm1, %v1512_v48  ;;  %v1506_v8 = vadd.f32 %v2011_v51, %v1644_v50 }
 0x197   :  { %1520 = vst.msk [vmem:[%s2669_s4] sm:$0xff] %vm1519_vm1, %v1511_v2  ;;  %v1505_v9 = vadd.f32 %v2012_v4, %v1644_v50  ;;  %v1929_v11 = vpop.f32.mrb[4].mxu0 }
 0x198   :  { %v1514_v12 = vmax.f32 %v1506_v8, 0.0  ;;  %v1849_v14 = vpop.f32.mrb[4].mxu1  ;;  %v1469_v15 = vpop.f32.mrb[5].mxu0 }
 0x199   :  { %v1513_v16 = vmax.f32 %v1505_v9, 0.0  ;;  %v2013_v23 = vadd.f32 %v1929_v11, %v1849_v14  ;;  %v845_v24 = vpop.f32.mrb[5].mxu1 }
 0x19a   :  { %1523 = vst.msk [vmem:[%s2669_s4 + $0x18] sm:$0xff] %vm1519_vm1, %v1514_v12  ;;  %v2014_v25 = vadd.f32 %v1469_v15, %v845_v24 }
 0x19b   :  { %1522 = vst.msk [vmem:[%s2669_s4 + $0x10] sm:$0xff] %vm1519_vm1, %v1513_v16  ;;  %v1508_v26 = vadd.f32 %v2013_v23, %v1644_v50  ;;  %v1932_v17 = vpop.f32.mrb[6].mxu0 }
 0x19c   :  { %v1507_v27 = vadd.f32 %v2014_v25, %v1644_v50  ;;  %v1852_v32 = vpop.f32.mrb[6].mxu1  ;;  %v1479_v34 = vpop.f32.mrb[7].mxu0 }
 0x19d   :  { %v1516_v42 = vmax.f32 %v1508_v26, 0.0  ;;  %v2015_v43 = vadd.f32 %v1932_v17, %v1852_v32  ;;  %v855_v44 = vpop.f32.mrb[7].mxu1 }
 0x19e   :  { %v1515_v46 = vmax.f32 %v1507_v27, 0.0  ;;  %v2016_v55 = vadd.f32 %v1479_v34, %v855_v44 }
 0x19f   :  { %1525 = vst.msk [vmem:[%s2669_s4 + $0x28] sm:$0xff] %vm1519_vm1, %v1516_v42  ;;  %v1510_v47 = vadd.f32 %v2015_v43, %v1644_v50 }
 0x1a0   :  { %1524 = vst.msk [vmem:[%s2669_s4 + $0x20] sm:$0xff] %vm1519_vm1, %v1515_v46  ;;  %v1509_v53 = vadd.f32 %v2016_v55, %v1644_v50 }
 0x1a1   :  { %v1518_v58 = vmax.f32 %v1510_v47, 0.0 }
 0x1a2   :  { %v1517_v62 = vmax.f32 %v1509_v53, 0.0 }
 0x1a3   :  { %1527 = vst.msk [vmem:[%s2669_s4 + $0x38] sm:$0xff] %vm1519_vm1, %v1518_v58 }
 0x1a4   :  { %1526 = vst.msk [vmem:[%s2669_s4 + $0x30] sm:$0xff] %vm1519_vm1, %v1517_v62 }

// kernel: _lambda_.13
= control target key start
LH: loop header
LB: loop body
LE: loop exit
PB: predicated region body
PF: predicated region fallthrough
CT: control target
= control target key end

     0   :  { %v5723_v0 = vmov 0   ;;  %vm351_vm0 = vcmask 130048   ;;  %vm4140_vm1 = vcmask 64512   ;;  %vm4276_vm2 = vcmask 7168   ;;  %s7668_s5 = inlined_call_operand.vmem [shape: f32[2,256,1], index: 5, kind: input, shape index: {}]   ;;  %s7669_s1 = inlined_call_operand.vmem [shape: f32[9,16,8], index: 1, kind: input, shape index: {}]   ;;  %s7670_s0 = inlined_call_operand.vmem [shape: f32[1,290,16], index: 0, kind: input, shape index: {}]   ;;  %s7671_s4 = inlined_call_operand.<no memory space> [shape: f32[1,1], index: 4, kind: input, shape index: {}]   ;;  %s7672_s2 = inlined_call_operand.vmem [shape: f32[1,8], index: 2, kind: input, shape index: {}]   ;;  %s7673_s3 = inlined_call_operand.vmem [shape: f32[1,8], index: 3, kind: input, shape index: {}]   ;;  %s7674_s6 = inlined_call_operand.vmem [shape: f32[1,256,1], index: 6, kind: output, shape index: {}]  }
   0x1   :  { %5722 = vset.pattern.permute.xlu1 %v5723_v0  ;;  %5721 = vset.pattern.permute.xlu0 %v5723_v0  ;;  %v4315_v1 = vld [vmem:[%s7668_s5 + $0x110] sm:$0xff]  ;;  %v4313_v2 = vld [vmem:[%s7668_s5 + $0x100] sm:$0xff]  ;;  %v4316_v3 = vld [vmem:[%s7668_s5 + $0x118] sm:$0xff] }
   0x2   :  { %1038 = vperm.xlu1 %5722, %v4315_v1   ;;  %1028 = vperm.xlu0 %5721, %v4313_v2   ;;  %v4314_v4 = vld [vmem:[%s7668_s5 + $0x108] sm:$0xff]  ;;  %v4317_v6 = vld [vmem:[%s7668_s5 + $0x120] sm:$0xff]  ;;  %v4320_v7 = vld [vmem:[%s7668_s5 + $0x138] sm:$0xff] }
   0x3   :  { %v4318_v5 = vld [vmem:[%s7668_s5 + $0x128] sm:$0xff]  ;;  %v4319_v8 = vld [vmem:[%s7668_s5 + $0x130] sm:$0xff]  ;;  %v4321_v10 = vld [vmem:[%s7668_s5 + $0x140] sm:$0xff] }
   0x4   :  { %v4322_v9 = vld [vmem:[%s7668_s5 + $0x148] sm:$0xff]  ;;  %v4345_v11 = vld [vmem:[%s7669_s1 + $0x10] sm:$0xff]  ;;  %v4346_v12 = vld [vmem:[%s7669_s1 + $0x18] sm:$0xff] }
   0x5   :  { %v4479_v13 = vld [vmem:[%s7669_s1 + $0x40] sm:$0xff]  ;;  %v4480_v14 = vld [vmem:[%s7669_s1 + $0x48] sm:$0xff]  ;;  %v4324_v15 = vld [vmem:[%s7668_s5 + $0x158] sm:$0xff]  ;;  %v5426_v17 = vpack.c.bf16 %v4346_v12, %v4345_v11 }
   0x6   :  { %1043 = vperm.xlu1 %5722, %v4316_v3   ;;  %1033 = vperm.xlu0 %5721, %v4314_v4   ;;  %v4323_v16 = vld [vmem:[%s7668_s5 + $0x150] sm:$0xff]  ;;  %v5807_v18 = vpack.c.bf16 %v4480_v14, %v4479_v13  ;;  %v316_v19 = vld [vmem:[%s7670_s0 + $0x1] sm:$0xff]  ;;  %v1995_v24 = vld [vmem:[%s7670_s0 + $0x19] sm:$0xff] }
   0x7   :  { %4962 = vmatprep.mubr.msk.f32.mxu1 %vm351_vm0, %v316_v19  ;;  %5427 = vmatprep.subr.bf16.mxu1 %v5426_v17  ;;  %v1994_v20 = vld [vmem:[%s7670_s0 + $0x11] sm:$0xff]  ;;  %v4326_v21 = vld [vmem:[%s7668_s5 + $0x168] sm:$0xff]  ;;  %v4325_v22 = vld [vmem:[%s7668_s5 + $0x160] sm:$0xff] }
   0x8   :  { %5443 = vmatprep.subr.bf16.mxu0 %v5807_v18  ;;  %5429 = vmatpush3.bf16.msra.mxu1 %v5426_v17  ;;  %v317_v23 = vld [vmem:[%s7670_s0 + $0x9] sm:$0xff]  ;;  %v1996_v25 = vld [vmem:[%s7670_s0 + $0x21] sm:$0xff]  ;;  %v4328_v26 = vld [vmem:[%s7668_s5 + $0x178] sm:$0xff] }
   0x9   :  { %5445 = vmatpush3.bf16.msra.mxu0 %v5807_v18  ;;  %5170 = vmatprep.mubr.msk.f32.mxu0 %vm351_vm0, %v1994_v20  ;;  %v4327_v27 = vld [vmem:[%s7668_s5 + $0x170] sm:$0xff]  ;;  %v4329_v31 = vld [vmem:[%s7668_s5 + $0x180] sm:$0xff]  ;;  %v4514_v33 = vld [vmem:[%s7669_s1 + $0x58] sm:$0xff] }
   0xa   :  { %1053 = vperm.xlu1 %5722, %v4318_v5   ;;  %1048 = vperm.xlu0 %5721, %v4317_v6   ;;  %v1997_v28 = vld [vmem:[%s7670_s0 + $0x29] sm:$0xff]  ;;  %v1998_v29 = vld [vmem:[%s7670_s0 + $0x31] sm:$0xff]  ;;  %v25_v32 = vld [vmem:[%s7668_s5] sm:$0xff] }
   0xb   :  { %4963 = vmatmul.mubr.msk.f32.vlgmr.msra.gmra.mrb[0].mxu1 %vm351_vm0, %v317_v23  ;;  %v4513_v30 = vld [vmem:[%s7669_s1 + $0x50] sm:$0xff]  ;;  %v1999_v34 = vld [vmem:[%s7670_s0 + $0x39] sm:$0xff]  ;;  %v2000_v35 = vld [vmem:[%s7670_s0 + $0x41] sm:$0xff] }
   0xc   :  { %5171 = vmatmul.mubr.msk.f32.vlgmr.msra.gmra.mrb[0].mxu0 %vm351_vm0, %v1995_v24  ;;  %4965 = vmatprep.mubr.msk.f32.mxu1 %vm351_vm0, %v1994_v20  ;;  %v5446_v36 = vpack.c.bf16 %v4514_v33, %v4513_v30  ;;  %v314_v37 = vld [vmem:[%s7669_s1] sm:$0xff]  ;;  %v315_v38 = vld [vmem:[%s7669_s1 + $0x8] sm:$0xff]  ;;  %v2002_v43 = vld [vmem:[%s7670_s0 + $0x51] sm:$0xff] }
   0xd   :  { %5173 = vmatprep.mubr.msk.f32.mxu0 %vm351_vm0, %v1996_v25  ;;  %v5430_v39 = vpack.c.bf16 %v315_v38, %v314_v37  ;;  %v4330_v40 = vld [vmem:[%s7668_s5 + $0x188] sm:$0xff]  ;;  %v4331_v44 = vld [vmem:[%s7668_s5 + $0x190] sm:$0xff]  ;;  %v2003_v46 = vld [vmem:[%s7670_s0 + $0x59] sm:$0xff] }
   0xe   :  { %1063 = vperm.xlu1 %5722, %v4320_v7   ;;  %1058 = vperm.xlu0 %5721, %v4319_v8   ;;  %v26_v41 = vld [vmem:[%s7668_s5 + $0x8] sm:$0xff]  ;;  %v27_v45 = vld [vmem:[%s7668_s5 + $0x10] sm:$0xff]  ;;  %v4332_v48 = vld [vmem:[%s7668_s5 + $0x198] sm:$0xff] }
   0xf   :  { %4966 = vmatmul.mubr.msk.f32.gmra.mrb[2].mxu1 %vm351_vm0, %v1995_v24  ;;  %v2001_v42 = vld [vmem:[%s7670_s0 + $0x49] sm:$0xff]  ;;  %5447 = vmatprep.subr.bf16.mxu0 %v5446_v36  ;;  %v2004_v47 = vld [vmem:[%s7670_s0 + $0x61] sm:$0xff]  ;;  %v28_v49 = vld [vmem:[%s7668_s5 + $0x18] sm:$0xff] }
  0x10   :  { %5174 = vmatmul.mubr.msk.f32.gmra.mrb[2].mxu0 %vm351_vm0, %v1997_v28  ;;  %4968 = vmatprep.mubr.msk.f32.mxu1 %vm351_vm0, %v1996_v25  ;;  %v4547_v50 = vld [vmem:[%s7669_s1 + $0x60] sm:$0xff]  ;;  %v2005_v51 = vld [vmem:[%s7670_s0 + $0x69] sm:$0xff]  ;;  %v2006_v53 = vld [vmem:[%s7670_s0 + $0x71] sm:$0xff] }
  0x11   :  { %5176 = vmatprep.mubr.msk.f32.mxu0 %vm351_vm0, %v1998_v29  ;;  %5431 = vmatprep.subr.bf16.mxu1 %v5430_v39  ;;  %v4548_v52 = vld [vmem:[%s7669_s1 + $0x68] sm:$0xff]  ;;  %v4333_v55 = vld [vmem:[%s7668_s5 + $0x1a0] sm:$0xff]  ;;  %v4335_v62 = vld [vmem:[%s7668_s5 + $0x1b0] sm:$0xff] }
  0x12   :  { %1073 = vperm.xlu1 %5722, %v4322_v9   ;;  %1068 = vperm.xlu0 %5721, %v4321_v10   ;;  %v5932_v54 = vpack.c.bf16 %v4548_v52, %v4547_v50  ;;  %v29_v56 = vld [vmem:[%s7668_s5 + $0x20] sm:$0xff]  ;;  %v4334_v59 = vld [vmem:[%s7668_s5 + $0x1a8] sm:$0xff]  ;;  %v31_v63 = vld [vmem:[%s7668_s5 + $0x30] sm:$0xff] }
  0x13   :  { %4969 = vmatmul.mubr.msk.f32.gmra.mrb[4].mxu1 %vm351_vm0, %v1997_v28  ;;  %5449 = vmatpush3.bf16.msra.mxu0 %v5446_v36  ;;  %v2007_v57 = vld [vmem:[%s7670_s0 + $0x79] sm:$0xff]  ;;  %v2008_v58 = vld [vmem:[%s7670_s0 + $0x81] sm:$0xff]  ;;  %v2009_v61 = vld [vmem:[%s7670_s0 + $0x89] sm:$0xff] }
  0x14   :  { %5177 = vmatmul.mubr.msk.f32.gmra.mrb[4].mxu0 %vm351_vm0, %v1999_v34  ;;  %4971 = vmatprep.mubr.msk.f32.mxu1 %vm351_vm0, %v1998_v29  ;;  %v30_v60 = vld [vmem:[%s7668_s5 + $0x28] sm:$0xff]  ;;  %v334_v0 = vld [vmem:[%s7670_s0 + $0x91] sm:$0xff]  ;;  %v335_v3 = vld [vmem:[%s7670_s0 + $0x99] sm:$0xff] }
  0x15   :  { %5179 = vmatprep.mubr.msk.f32.mxu0 %vm351_vm0, %v2000_v35  ;;  %5433 = vmatpush3.bf16.msra.mxu1 %v5430_v39  ;;  %v4336_v1 = vld [vmem:[%s7668_s5 + $0x1b8] sm:$0xff]  ;;  %v336_v4 = vld [vmem:[%s7670_s0 + $0xa1] sm:$0xff]  ;;  %v337_v7 = vld [vmem:[%s7670_s0 + $0xa9] sm:$0xff] }
  0x16   :  { %1083 = vperm.xlu1 %5722, %v4324_v15   ;;  %1078 = vperm.xlu0 %5721, %v4323_v16   ;;  %v32_v2 = vld [vmem:[%s7668_s5 + $0x38] sm:$0xff]  ;;  %v4337_v5 = vld [vmem:[%s7668_s5 + $0x1c0] sm:$0xff]  ;;  %v4338_v9 = vld [vmem:[%s7668_s5 + $0x1c8] sm:$0xff] }
  0x17   :  { %4972 = vmatmul.mubr.msk.f32.gmra.mrb[6].mxu1 %vm351_vm0, %v1999_v34  ;;  %5451 = vmatprep.subr.bf16.mxu0 %v5932_v54  ;;  %v33_v6 = vld [vmem:[%s7668_s5 + $0x40] sm:$0xff]  ;;  %v338_v8 = vld [vmem:[%s7670_s0 + $0xb1] sm:$0xff]  ;;  %v34_v10 = vld [vmem:[%s7668_s5 + $0x48] sm:$0xff] }
  0x18   :  { %5180 = vmatmul.mubr.msk.f32.gmra.mrb[6].mxu0 %vm351_vm0, %v2001_v42  ;;  %4974 = vmatprep.mubr.msk.f32.mxu1 %vm351_vm0, %v2000_v35  ;;  %v339_v11 = vld [vmem:[%s7670_s0 + $0xb9] sm:$0xff]  ;;  %v340_v12 = vld [vmem:[%s7670_s0 + $0xc1] sm:$0xff]  ;;  %v4339_v13 = vld [vmem:[%s7668_s5 + $0x1d0] sm:$0xff] }
  0x19   :  { %5182 = vmatprep.mubr.msk.f32.mxu0 %vm351_vm0, %v2002_v43  ;;  %v35_v14 = vld [vmem:[%s7668_s5 + $0x50] sm:$0xff]  ;;  %v4411_v15 = vld [vmem:[%s7669_s1 + $0x20] sm:$0xff]  ;;  %v4412_v16 = vld [vmem:[%s7669_s1 + $0x28] sm:$0xff] }
  0x1a   :  { %1093 = vperm.xlu1 %5722, %v4326_v21   ;;  %1088 = vperm.xlu0 %5721, %v4325_v22   ;;  %v341_v17 = vld [vmem:[%s7670_s0 + $0xc9] sm:$0xff]  ;;  %v6035_v19 = vpack.c.bf16 %v4412_v16, %v4411_v15  ;;  %v342_v20 = vld [vmem:[%s7670_s0 + $0xd1] sm:$0xff]  ;;  %v343_v23 = vld [vmem:[%s7670_s0 + $0xd9] sm:$0xff] }
  0x1b   :  { %4975 = vmatmul.mubr.msk.f32.gmra.mrb[8].mxu1 %vm351_vm0, %v2001_v42  ;;  %v4340_v21 = vld [vmem:[%s7668_s5 + $0x1d8] sm:$0xff]  ;;  %v344_v24 = vld [vmem:[%s7670_s0 + $0xe1] sm:$0xff]  ;;  %v39_v33 = vld [vmem:[%s7668_s5 + $0x70] sm:$0xff] }
  0x1c   :  { %5183 = vmatmul.mubr.msk.f32.gmra.mrb[8].mxu0 %vm351_vm0, %v2003_v46  ;;  %4977 = vmatprep.mubr.msk.f32.mxu1 %vm351_vm0, %v2002_v43  ;;  %v36_v22 = vld [vmem:[%s7668_s5 + $0x58] sm:$0xff]  ;;  %v4341_v25 = vld [vmem:[%s7668_s5 + $0x1e0] sm:$0xff]  ;;  %v4342_v29 = vld [vmem:[%s7668_s5 + $0x1e8] sm:$0xff] }
  0x1d   :  { %5185 = vmatprep.mubr.msk.f32.mxu0 %vm351_vm0, %v2004_v47  ;;  %5435 = vmatprep.subr.bf16.mxu1 %v6035_v19  ;;  %v346_v28 = vld [vmem:[%s7670_s0 + $0xf1] sm:$0xff]  ;;  %v38_v30 = vld [vmem:[%s7668_s5 + $0x68] sm:$0xff]  ;;  %v41_v37 = vld [vmem:[%s7668_s5 + $0x80] sm:$0xff] }
  0x1e   :  { %1103 = vperm.xlu1 %5722, %v4328_v26   ;;  %1098 = vperm.xlu0 %5721, %v4327_v27   ;;  %v37_v26 = vld [vmem:[%s7668_s5 + $0x60] sm:$0xff]  ;;  %v345_v27 = vld [vmem:[%s7670_s0 + $0xe9] sm:$0xff]  ;;  %v4344_v34 = vld [vmem:[%s7668_s5 + $0x1f8] sm:$0xff] }
  0x1f   :  { %4978 = vmatmul.mubr.msk.f32.gmra.mrb[10].mxu1 %vm351_vm0, %v2003_v46  ;;  %v40_v35 = vld [vmem:[%s7668_s5 + $0x78] sm:$0xff]  ;;  %v42_v36 = vld [vmem:[%s7668_s5 + $0x88] sm:$0xff]  ;;  %v43_v39 = vld [vmem:[%s7668_s5 + $0x90] sm:$0xff] }
  0x20   :  { %5186 = vmatmul.mubr.msk.f32.gmra.mrb[10].mxu0 %vm351_vm0, %v2005_v51  ;;  %4980 = vmatprep.mubr.msk.f32.mxu1 %vm351_vm0, %v2004_v47  ;;  %v44_v38 = vld [vmem:[%s7668_s5 + $0x98] sm:$0xff]  ;;  %v47_v43 = vld [vmem:[%s7668_s5 + $0xb0] sm:$0xff] }
  0x21   :  { %5188 = vmatprep.mubr.msk.f32.mxu0 %vm351_vm0, %v2006_v53  ;;  %v48_v42 = vld [vmem:[%s7668_s5 + $0xb8] sm:$0xff]  ;;  %v51_v47 = vld [vmem:[%s7668_s5 + $0xd0] sm:$0xff] }
  0x22   :  { %1108 = vperm.xlu1 %5722, %v4329_v31   ;;  %124 = vperm.xlu0 %5721, %v25_v32   ;;  %v347_v31 = vld [vmem:[%s7670_s0 + $0xf9] sm:$0xff]  ;;  %v4343_v32 = vld [vmem:[%s7668_s5 + $0x1f0] sm:$0xff] }
  0x23   :  { %4981 = vmatmul.mubr.msk.f32.gmra.mrb[12].mxu1 %vm351_vm0, %v2005_v51  ;;  %v52_v46 = vld [vmem:[%s7668_s5 + $0xd8] sm:$0xff]  ;;  %v55_v51 = vld [vmem:[%s7668_s5 + $0xf0] sm:$0xff] }
  0x24   :  { %5189 = vmatmul.mubr.msk.f32.gmra.mrb[12].mxu0 %vm351_vm0, %v2007_v57  ;;  %4983 = vmatprep.mubr.msk.f32.mxu1 %vm351_vm0, %v2006_v53  ;;  %v56_v50 = vld [vmem:[%s7668_s5 + $0xf8] sm:$0xff] }
  0x25   :  { %5191 = vmatprep.mubr.msk.f32.mxu0 %vm351_vm0, %v2008_v58  ;;  %v996_v52 = vld [vmem:[%s7670_s0 + $0x12] sm:$0xff] }
  0x26   :  { %1113 = vperm.xlu1 %5722, %v4330_v40   ;;  %129 = vperm.xlu0 %5721, %v26_v41   ;;  %v46_v40 = vld [vmem:[%s7668_s5 + $0xa8] sm:$0xff]  ;;  %v45_v41 = vld [vmem:[%s7668_s5 + $0xa0] sm:$0xff]  ;;  %v3612_v53 = vld [vmem:[%s7670_s0 + $0x32] sm:$0xff] }
  0x27   :  { %4984 = vmatmul.mubr.msk.f32.gmra.mrb[14].mxu1 %vm351_vm0, %v2007_v57 }
  0x28   :  { %5192 = vmatmul.mubr.msk.f32.gmra.mrb[14].mxu0 %vm351_vm0, %v2009_v61  ;;  %4986 = vmatprep.mubr.msk.f32.mxu1 %vm351_vm0, %v2008_v58  ;;  %v2384_v58 = vld [vmem:[%s7670_s0 + $0x22] sm:$0xff] }
  0x2a   :  { %1118 = vperm.xlu1 %5722, %v4331_v44   ;;  %134 = vperm.xlu0 %5721, %v27_v45   ;;  %v50_v44 = vld [vmem:[%s7668_s5 + $0xc8] sm:$0xff]  ;;  %v49_v45 = vld [vmem:[%s7668_s5 + $0xc0] sm:$0xff] }
  0x2b   :  { %4987 = vmatmul.mubr.msk.f32.gmra.mrb[16].mxu1 %vm351_vm0, %v2009_v61 }
  0x2c   :  { %4989 = vmatprep.mubr.msk.f32.mxu1 %vm351_vm0, %v334_v0  ;;  %v2385_v0 = vld [vmem:[%s7670_s0 + $0x2a] sm:$0xff] }
  0x2e   :  { %1123 = vperm.xlu1 %5722, %v4332_v48   ;;  %139 = vperm.xlu0 %5721, %v28_v49   ;;  %v54_v48 = vld [vmem:[%s7668_s5 + $0xe8] sm:$0xff]  ;;  %v53_v49 = vld [vmem:[%s7668_s5 + $0xe0] sm:$0xff] }
  0x2f   :  { %4990 = vmatmul.mubr.msk.f32.gmra.mrb[18].mxu1 %vm351_vm0, %v335_v3  ;;  %v4581_v3 = vld [vmem:[%s7669_s1 + $0x70] sm:$0xff] }
  0x30   :  { %4992 = vmatprep.mubr.msk.f32.mxu1 %vm351_vm0, %v336_v4  ;;  %v4582_v4 = vld [vmem:[%s7669_s1 + $0x78] sm:$0xff] }
  0x32   :  { %1128 = vperm.xlu1 %5722, %v4333_v55   ;;  %144 = vperm.xlu0 %5721, %v29_v56  }
  0x33   :  { %4993 = vmatmul.mubr.msk.f32.gmra.mrb[20].mxu1 %vm351_vm0, %v337_v7 }
  0x34   :  { %4995 = vmatprep.mubr.msk.f32.mxu1 %vm351_vm0, %v338_v8 }
  0x36   :  { %1133 = vperm.xlu1 %5722, %v4334_v59   ;;  %149 = vperm.xlu0 %5721, %v30_v60  }
  0x37   :  { %4996 = vmatmul.mubr.msk.f32.gmra.mrb[22].mxu1 %vm351_vm0, %v339_v11  ;;  %v3614_v11 = vld [vmem:[%s7670_s0 + $0x42] sm:$0xff] }
  0x38   :  { %4998 = vmatprep.mubr.msk.f32.mxu1 %vm351_vm0, %v340_v12  ;;  %v6192_v12 = vpack.c.bf16 %v4582_v4, %v4581_v3  ;;  %v3625_v4 = vld [vmem:[%s7670_s0 + $0x9a] sm:$0xff] }
  0x3a   :  { %1138 = vperm.xlu1 %5722, %v4335_v62   ;;  %154 = vperm.xlu0 %5721, %v31_v63   ;;  %v997_v62 = vld [vmem:[%s7670_s0 + $0x1a] sm:$0xff] }
  0x3b   :  { %4999 = vmatmul.mubr.msk.f32.gmra.mrb[24].mxu1 %vm351_vm0, %v341_v17  ;;  %v3613_v63 = vld [vmem:[%s7670_s0 + $0x3a] sm:$0xff] }
  0x3c   :  { %5001 = vmatprep.mubr.msk.f32.mxu1 %vm351_vm0, %v342_v20 }
  0x3e   :  { %1143 = vperm.xlu1 %5722, %v4336_v1   ;;  %159 = vperm.xlu0 %5721, %v32_v2  }
  0x3f   :  { %5002 = vmatmul.mubr.msk.f32.gmra.mrb[26].mxu1 %vm351_vm0, %v343_v23  ;;  %v3617_v23 = vld [vmem:[%s7670_s0 + $0x5a] sm:$0xff] }
  0x40   :  { %5004 = vmatprep.mubr.msk.f32.mxu1 %vm351_vm0, %v344_v24  ;;  %v3616_v24 = vld [vmem:[%s7670_s0 + $0x52] sm:$0xff] }
  0x42   :  { %1148 = vperm.xlu1 %5722, %v4337_v5   ;;  %164 = vperm.xlu0 %5721, %v33_v6  }
  0x43   :  { %5005 = vmatmul.mubr.msk.f32.gmra.mrb[28].mxu1 %vm351_vm0, %v345_v27 }
  0x44   :  { %5007 = vmatprep.mubr.msk.f32.mxu1 %vm351_vm0, %v346_v28 }
  0x46   :  { %1153 = vperm.xlu1 %5722, %v4338_v9   ;;  %169 = vperm.xlu0 %5721, %v34_v10   ;;  %v3615_v9 = vld [vmem:[%s7670_s0 + $0x4a] sm:$0xff] }
  0x47   :  { %5008 = vmatmul.mubr.msk.f32.gmra.mrb[30].mxu1 %vm351_vm0, %v347_v31 }
  0x4a   :  { %1158 = vperm.xlu1 %5722, %v4339_v13   ;;  %174 = vperm.xlu0 %5721, %v35_v14  }
  0x4e   :  { %1163 = vperm.xlu1 %5722, %v4340_v21   ;;  %179 = vperm.xlu0 %5721, %v36_v22  }
  0x52   :  { %1168 = vperm.xlu1 %5722, %v4341_v25   ;;  %184 = vperm.xlu0 %5721, %v37_v26  }
  0x56   :  { %1173 = vperm.xlu1 %5722, %v4342_v29   ;;  %189 = vperm.xlu0 %5721, %v38_v30  }
  0x5a   :  { %1178 = vperm.xlu1 %5722, %v4343_v32   ;;  %194 = vperm.xlu0 %5721, %v39_v33   ;;  %v3619_v32 = vld [vmem:[%s7670_s0 + $0x6a] sm:$0xff]  ;;  %v3618_v33 = vld [vmem:[%s7670_s0 + $0x62] sm:$0xff] }
  0x5e   :  { %1183 = vperm.xlu1 %5722, %v4344_v34   ;;  %199 = vperm.xlu0 %5721, %v40_v35  }
  0x62   :  { %209 = vperm.xlu1 %5722, %v42_v36   ;;  %204 = vperm.xlu0 %5721, %v41_v37  }
  0x66   :  { %219 = vperm.xlu1 %5722, %v44_v38   ;;  %214 = vperm.xlu0 %5721, %v43_v39  }
  0x6a   :  { %229 = vperm.xlu1 %5722, %v46_v40   ;;  %224 = vperm.xlu0 %5721, %v45_v41  }
  0x6e   :  { %239 = vperm.xlu1 %5722, %v48_v42   ;;  %234 = vperm.xlu0 %5721, %v47_v43   ;;  %v3621_v42 = vld [vmem:[%s7670_s0 + $0x7a] sm:$0xff]  ;;  %v3620_v43 = vld [vmem:[%s7670_s0 + $0x72] sm:$0xff] }
  0x72   :  { %249 = vperm.xlu1 %5722, %v50_v44   ;;  %244 = vperm.xlu0 %5721, %v49_v45  }
  0x76   :  { %259 = vperm.xlu1 %5722, %v52_v46   ;;  %254 = vperm.xlu0 %5721, %v51_v47  }
  0x7a   :  { %269 = vperm.xlu1 %5722, %v54_v48   ;;  %264 = vperm.xlu0 %5721, %v53_v49  }
  0x7e   :  { %279 = vperm.xlu1 %5722, %v56_v50   ;;  %274 = vperm.xlu0 %5721, %v55_v51  }
  0x81   :  { %v1039_v55 = vpop.permute.xlu1 %1038  ;;  %v6147_v56 = vpop.permute.xlu0 %1028 }
  0x82   :  { %v6149_v57 = vmul.f32 %v1039_v55, %v996_v52  ;;  %v6154_v59 = vmul.f32 %v3612_v53, %v1039_v55  ;;  %v2414_v60 = vmul.f32 %v6147_v56, %v996_v52  ;;  %v6158_v61 = vmul.f32 %v2384_v58, %v6147_v56  ;;  %v3623_v52 = vld [vmem:[%s7670_s0 + $0x8a] sm:$0xff] }
  0x83   :  { %v2416_v10 = vmul.f32 %v2384_v58, %v1039_v55 }
  0x84   :  { %7677 = vst [vmem:[#allocation3_spill] sm:$0xff] %v6154_v59  ;;  %7678 = vst [vmem:[#allocation4_spill] sm:$0xff] %v6158_v61  ;;  %5222 = vmatprep.mubr.msk.f32.mxu0 %vm351_vm0, %v2414_v60 }
  0x85   :  { %v1044_v1 = vpop.permute.xlu1 %1043  ;;  %v6169_v2 = vpop.permute.xlu0 %1033 }
  0x86   :  { %v6178_v5 = vmul.f32 %v1044_v1, %v997_v62  ;;  %v6180_v6 = vmul.f32 %v3613_v63, %v1044_v1  ;;  %v2415_v7 = vmul.f32 %v6169_v2, %v997_v62  ;;  %v6184_v8 = vmul.f32 %v2385_v0, %v6169_v2 }
  0x87   :  { %v2417_v20 = vmul.f32 %v2385_v0, %v1044_v1 }
  0x88   :  { %7679 = vst [vmem:[#allocation5_spill] sm:$0xff] %v6180_v6  ;;  %7680 = vst [vmem:[#allocation6_spill] sm:$0xff] %v6184_v8  ;;  %5223 = vmatmul.mubr.msk.f32.vlgmr.msra.gmra.mrb[0].mxu0 %vm351_vm0, %v2415_v7  ;;  %v3624_v7 = vld [vmem:[%s7670_s0 + $0x92] sm:$0xff] }
  0x89   :  { %v1054_v13 = vpop.permute.xlu1 %1053  ;;  %v1049_v14 = vpop.permute.xlu0 %1048  ;;  %5225 = vmatprep.mubr.msk.f32.mxu0 %vm351_vm0, %v2416_v10  ;;  %5453 = vmatpush3.bf16.msra.mxu0 %v5932_v54 }
  0x8a   :  { %v6195_v15 = vmul.f32 %v2385_v0, %v1054_v13  ;;  %v6197_v16 = vmul.f32 %v3615_v9, %v1054_v13  ;;  %v6199_v17 = vmul.f32 %v2384_v58, %v1049_v14  ;;  %v2418_v21 = vmul.f32 %v3612_v53, %v1049_v14  ;;  %5455 = vmatprep.subr.bf16.mxu0 %v6192_v12 }
  0x8b   :  { %v6202_v22 = vmul.f32 %v3614_v11, %v1049_v14  ;;  %v2419_v30 = vmul.f32 %v3613_v63, %v1054_v13 }
  0x8c   :  { %7681 = vst [vmem:[#allocation7_spill] sm:$0xff] %v6197_v16  ;;  %5226 = vmatmul.mubr.msk.f32.gmra.mrb[2].mxu0 %vm351_vm0, %v2417_v20 }
  0x8d   :  { %7682 = vst [vmem:[#allocation8_spill] sm:$0xff] %v6202_v22  ;;  %v1064_v25 = vpop.permute.xlu1 %1063  ;;  %v1059_v26 = vpop.permute.xlu0 %1058  ;;  %5228 = vmatprep.mubr.msk.f32.mxu0 %vm351_vm0, %v2418_v21 }
  0x8e   :  { %v6213_v27 = vmul.f32 %v3613_v63, %v1064_v25  ;;  %v6215_v28 = vmul.f32 %v3617_v23, %v1064_v25  ;;  %v6217_v29 = vmul.f32 %v3612_v53, %v1059_v26  ;;  %v2420_v54 = vmul.f32 %v3614_v11, %v1059_v26  ;;  %v3622_v53 = vld [vmem:[%s7670_s0 + $0x82] sm:$0xff] }
  0x8f   :  { %v6220_v31 = vmul.f32 %v3616_v24, %v1059_v26  ;;  %v2421_v39 = vmul.f32 %v3615_v9, %v1064_v25  ;;  %v90_v25 = vld [vmem:[%s7670_s0] sm:$0xff]  ;;  %v1574_v26 = vld [vmem:[%s7670_s0 + $0x10] sm:$0xff] }
  0x90   :  { %7683 = vst [vmem:[#allocation9_spill] sm:$0xff] %v6215_v28  ;;  %5229 = vmatmul.mubr.msk.f32.gmra.mrb[4].mxu0 %vm351_vm0, %v2419_v30 }
  0x91   :  { %7684 = vst [vmem:[#allocation10_spill] sm:$0xff] %v6220_v31  ;;  %v1074_v34 = vpop.permute.xlu1 %1073  ;;  %v1069_v35 = vpop.permute.xlu0 %1068  ;;  %5231 = vmatprep.mubr.msk.f32.mxu0 %vm351_vm0, %v2420_v54 }
  0x92   :  { %v6229_v36 = vmul.f32 %v3615_v9, %v1074_v34  ;;  %v6231_v37 = vmul.f32 %v3619_v32, %v1074_v34  ;;  %v6233_v38 = vmul.f32 %v3614_v11, %v1069_v35  ;;  %v2422_v40 = vmul.f32 %v3616_v24, %v1069_v35 }
  0x93   :  { %v6236_v41 = vmul.f32 %v3618_v33, %v1069_v35  ;;  %v2423_v49 = vmul.f32 %v3617_v23, %v1074_v34 }
  0x94   :  { %7685 = vst [vmem:[#allocation11_spill] sm:$0xff] %v6231_v37  ;;  %5232 = vmatmul.mubr.msk.f32.gmra.mrb[6].mxu0 %vm351_vm0, %v2421_v39  ;;  %v4445_v39 = vld [vmem:[%s7669_s1 + $0x30] sm:$0xff] }
  0x95   :  { %7686 = vst [vmem:[#allocation12_spill] sm:$0xff] %v6236_v41  ;;  %v1084_v44 = vpop.permute.xlu1 %1083  ;;  %v1079_v45 = vpop.permute.xlu0 %1078  ;;  %5234 = vmatprep.mubr.msk.f32.mxu0 %vm351_vm0, %v2422_v40  ;;  %v4446_v40 = vld [vmem:[%s7669_s1 + $0x38] sm:$0xff] }
  0x96   :  { %v6245_v46 = vmul.f32 %v3617_v23, %v1084_v44  ;;  %v6247_v47 = vmul.f32 %v3621_v42, %v1084_v44  ;;  %v6249_v48 = vmul.f32 %v3616_v24, %v1079_v45  ;;  %v2424_v50 = vmul.f32 %v3618_v33, %v1079_v45  ;;  %v3626_v24 = vld [vmem:[%s7670_s0 + $0xa2] sm:$0xff] }
  0x97   :  { %v6252_v51 = vmul.f32 %v3620_v43, %v1079_v45  ;;  %v2425_v0 = vmul.f32 %v3619_v32, %v1084_v44  ;;  %v3627_v44 = vld [vmem:[%s7670_s0 + $0xaa] sm:$0xff] }
  0x98   :  { %7687 = vst [vmem:[#allocation13_spill] sm:$0xff] %v6247_v47  ;;  %5235 = vmatmul.mubr.msk.f32.gmra.mrb[8].mxu0 %vm351_vm0, %v2423_v49  ;;  %v91_v45 = vld [vmem:[%s7670_s0 + $0x8] sm:$0xff]  ;;  %v1575_v49 = vld [vmem:[%s7670_s0 + $0x18] sm:$0xff] }
  0x99   :  { %7688 = vst [vmem:[#allocation14_spill] sm:$0xff] %v6252_v51  ;;  %v1094_v55 = vpop.permute.xlu1 %1093  ;;  %v1089_v58 = vpop.permute.xlu0 %1088  ;;  %5237 = vmatprep.mubr.msk.f32.mxu0 %vm351_vm0, %v2424_v50 }
  0x9a   :  { %v6261_v60 = vmul.f32 %v3619_v32, %v1094_v55  ;;  %v6263_v62 = vmul.f32 %v3623_v52, %v1094_v55  ;;  %v6265_v63 = vmul.f32 %v3618_v33, %v1089_v58  ;;  %v2426_v1 = vmul.f32 %v3620_v43, %v1089_v58 }
  0x9b   :  { %v6268_v3 = vmul.f32 %v3622_v53, %v1089_v58  ;;  %v2427_v20 = vmul.f32 %v3621_v42, %v1094_v55  ;;  %v6326_v55 = vpack.c.bf16 %v4446_v40, %v4445_v39 }
  0x9c   :  { %7689 = vst [vmem:[#allocation15_spill] sm:$0xff] %v6263_v62  ;;  %5238 = vmatmul.mubr.msk.f32.gmra.mrb[10].mxu0 %vm351_vm0, %v2425_v0 }
  0x9d   :  { %7690 = vst [vmem:[#allocation16_spill] sm:$0xff] %v6268_v3  ;;  %v1104_v9 = vpop.permute.xlu1 %1103  ;;  %v1099_v10 = vpop.permute.xlu0 %1098  ;;  %5240 = vmatprep.mubr.msk.f32.mxu0 %vm351_vm0, %v2426_v1 }
  0x9e   :  { %v6277_v11 = vmul.f32 %v3621_v42, %v1104_v9  ;;  %v6279_v13 = vmul.f32 %v3625_v4, %v1104_v9  ;;  %v6281_v14 = vmul.f32 %v3620_v43, %v1099_v10  ;;  %v2428_v21 = vmul.f32 %v3622_v53, %v1099_v10 }
  0x9f   :  { %v6284_v23 = vmul.f32 %v3624_v7, %v1099_v10  ;;  %v2429_v42 = vmul.f32 %v3623_v52, %v1104_v9 }
  0xa0   :  { %7691 = vst [vmem:[#allocation17_spill] sm:$0xff] %v6279_v13  ;;  %5241 = vmatmul.mubr.msk.f32.gmra.mrb[12].mxu0 %vm351_vm0, %v2427_v20  ;;  %v3628_v20 = vld [vmem:[%s7670_s0 + $0xb2] sm:$0xff] }
  0xa1   :  { %7692 = vst [vmem:[#allocation18_spill] sm:$0xff] %v6284_v23  ;;  %v1109_v30 = vpop.permute.xlu1 %1108  ;;  %v6296_v54 = vpop.permute.xlu0 %124  ;;  %5243 = vmatprep.mubr.msk.f32.mxu0 %vm351_vm0, %v2428_v21 }
  0xa2   :  { %v6298_v32 = vmul.f32 %v3622_v53, %v1109_v30  ;;  %v2430_v33 = vmul.f32 %v3624_v7, %v1109_v30  ;;  %v6300_v34 = vmul.f32 %v3626_v24, %v1109_v30  ;;  %v282_v35 = vmul.f32 %v6296_v54, %v90_v25  ;;  %v6348_v25 = vld [vmem:[%s7670_s0 + $0x20] sm:$0xff] }
  0xa3   :  { %v6311_v43 = vmul.f32 %v1574_v26, %v6296_v54 }
  0xa4   :  { %7693 = vst [vmem:[#allocation19_spill] sm:$0xff] %v6300_v34  ;;  %5014 = vmatprep.mubr.msk.f32.mxu1 %vm351_vm0, %v282_v35  ;;  %5244 = vmatmul.mubr.msk.f32.gmra.mrb[14].mxu0 %vm351_vm0, %v2429_v42 }
  0xa5   :  { %7694 = vst [vmem:[#allocation20_spill] sm:$0xff] %v6311_v43  ;;  %v1114_v50 = vpop.permute.xlu1 %1113  ;;  %v6324_v53 = vpop.permute.xlu0 %129  ;;  %5246 = vmatprep.mubr.msk.f32.mxu0 %vm351_vm0, %v2430_v33 }
  0xa6   :  { %v6328_v58 = vmul.f32 %v3623_v52, %v1114_v50  ;;  %v2431_v0 = vmul.f32 %v3625_v4, %v1114_v50  ;;  %v6330_v1 = vmul.f32 %v3627_v44, %v1114_v50  ;;  %v283_v9 = vmul.f32 %v6324_v53, %v91_v45 }
  0xa7   :  { %v6335_v10 = vmul.f32 %v1575_v49, %v6324_v53 }
  0xa8   :  { %7695 = vst [vmem:[#allocation21_spill] sm:$0xff] %v6330_v1  ;;  %5015 = vmatmul.mubr.msk.f32.vlgmr.msra.gmra.mrb[0].mxu1 %vm351_vm0, %v283_v9  ;;  %5247 = vmatmul.mubr.msk.f32.gmra.mrb[16].mxu0 %vm351_vm0, %v2431_v0 }
  0xa9   :  { %7696 = vst [vmem:[#allocation22_spill] sm:$0xff] %v6335_v10  ;;  %v1119_v52 = vpop.permute.xlu1 %1118  ;;  %v6342_v21 = vpop.permute.xlu0 %134  ;;  %5437 = vmatpush3.bf16.msra.mxu1 %v6035_v19  ;;  %v3629_v19 = vld [vmem:[%s7670_s0 + $0xba] sm:$0xff] }
  0xaa   :  { %v6350_v30 = vmul.f32 %v3624_v7, %v1119_v52  ;;  %v2432_v33 = vmul.f32 %v3626_v24, %v1119_v52  ;;  %v6352_v35 = vmul.f32 %v3628_v20, %v1119_v52  ;;  %v284_v39 = vmul.f32 %v1574_v26, %v6342_v21  ;;  %5439 = vmatprep.subr.bf16.mxu1 %v6326_v55  ;;  %v6370_v26 = vld [vmem:[%s7670_s0 + $0x28] sm:$0xff] }
  0xab   :  { %v6358_v40 = vmul.f32 %v6348_v25, %v6342_v21 }
  0xac   :  { %7697 = vst [vmem:[#allocation23_spill] sm:$0xff] %v6352_v35  ;;  %5017 = vmatprep.mubr.msk.f32.mxu1 %vm351_vm0, %v284_v39  ;;  %5249 = vmatprep.mubr.msk.f32.mxu0 %vm351_vm0, %v2432_v33  ;;  %v3630_v33 = vld [vmem:[%s7670_s0 + $0xc2] sm:$0xff] }
  0xad   :  { %7698 = vst [vmem:[#allocation24_spill] sm:$0xff] %v6358_v40  ;;  %v1124_v7 = vpop.permute.xlu1 %1123  ;;  %v6365_v42 = vpop.permute.xlu0 %139 }
  0xae   :  { %v6372_v45 = vmul.f32 %v3625_v4, %v1124_v7  ;;  %v2433_v50 = vmul.f32 %v3627_v44, %v1124_v7  ;;  %v6374_v0 = vmul.f32 %v3629_v19, %v1124_v7  ;;  %v285_v9 = vmul.f32 %v1575_v49, %v6365_v42  ;;  %v6391_v7 = vld [vmem:[%s7670_s0 + $0x30] sm:$0xff] }
  0xaf   :  { %v6379_v52 = vmul.f32 %v6370_v26, %v6365_v42 }
  0xb0   :  { %7699 = vst [vmem:[#allocation25_spill] sm:$0xff] %v6374_v0  ;;  %5018 = vmatmul.mubr.msk.f32.gmra.mrb[2].mxu1 %vm351_vm0, %v285_v9  ;;  %5250 = vmatmul.mubr.msk.f32.gmra.mrb[18].mxu0 %vm351_vm0, %v2433_v50  ;;  %v3631_v50 = vld [vmem:[%s7670_s0 + $0xca] sm:$0xff] }
  0xb1   :  { %7700 = vst [vmem:[#allocation26_spill] sm:$0xff] %v6379_v52  ;;  %v1129_v39 = vpop.permute.xlu1 %1128  ;;  %v6386_v4 = vpop.permute.xlu0 %144 }
  0xb2   :  { %v6393_v49 = vmul.f32 %v3626_v24, %v1129_v39  ;;  %v2434_v0 = vmul.f32 %v3628_v20, %v1129_v39  ;;  %v6395_v35 = vmul.f32 %v3630_v33, %v1129_v39  ;;  %v286_v1 = vmul.f32 %v6348_v25, %v6386_v4  ;;  %v6413_v39 = vld [vmem:[%s7670_s0 + $0x38] sm:$0xff] }
  0xb3   :  { %v6401_v9 = vmul.f32 %v6391_v7, %v6386_v4 }
  0xb4   :  { %7701 = vst [vmem:[#allocation27_spill] sm:$0xff] %v6393_v49  ;;  %7702 = vst [vmem:[#allocation28_spill] sm:$0xff] %v6395_v35  ;;  %5020 = vmatprep.mubr.msk.f32.mxu1 %vm351_vm0, %v286_v1  ;;  %5252 = vmatprep.mubr.msk.f32.mxu0 %vm351_vm0, %v2434_v0  ;;  %v3632_v0 = vld [vmem:[%s7670_s0 + $0xd2] sm:$0xff] }
  0xb5   :  { %7703 = vst [vmem:[#allocation29_spill] sm:$0xff] %v6401_v9  ;;  %v1134_v24 = vpop.permute.xlu1 %1133  ;;  %v6408_v34 = vpop.permute.xlu0 %149 }
  0xb6   :  { %v6415_v35 = vmul.f32 %v3627_v44, %v1134_v24  ;;  %v2435_v13 = vmul.f32 %v3629_v19, %v1134_v24  ;;  %v6417_v23 = vmul.f32 %v3631_v50, %v1134_v24  ;;  %v287_v62 = vmul.f32 %v6370_v26, %v6408_v34  ;;  %v6435_v24 = vld [vmem:[%s7670_s0 + $0x40] sm:$0xff] }
  0xb7   :  { %v6423_v1 = vmul.f32 %v6413_v39, %v6408_v34 }
  0xb8   :  { %7704 = vst [vmem:[#allocation30_spill] sm:$0xff] %v6415_v35  ;;  %7705 = vst [vmem:[#allocation31_spill] sm:$0xff] %v6417_v23  ;;  %5021 = vmatmul.mubr.msk.f32.gmra.mrb[4].mxu1 %vm351_vm0, %v287_v62  ;;  %5253 = vmatmul.mubr.msk.f32.gmra.mrb[20].mxu0 %vm351_vm0, %v2435_v13  ;;  %v3633_v13 = vld [vmem:[%s7670_s0 + $0xda] sm:$0xff] }
  0xb9   :  { %7706 = vst [vmem:[#allocation32_spill] sm:$0xff] %v6423_v1  ;;  %v1139_v44 = vpop.permute.xlu1 %1138  ;;  %v6430_v3 = vpop.permute.xlu0 %154 }
  0xba   :  { %v6437_v23 = vmul.f32 %v3628_v20, %v1139_v44  ;;  %v2436_v47 = vmul.f32 %v3630_v33, %v1139_v44  ;;  %v6439_v51 = vmul.f32 %v3632_v0, %v1139_v44  ;;  %v288_v37 = vmul.f32 %v6391_v7, %v6430_v3  ;;  %v6457_v44 = vld [vmem:[%s7670_s0 + $0x48] sm:$0xff] }
  0xbb   :  { %v6445_v62 = vmul.f32 %v6435_v24, %v6430_v3 }
  0xbc   :  { %7707 = vst [vmem:[#allocation33_spill] sm:$0xff] %v6437_v23  ;;  %7708 = vst [vmem:[#allocation34_spill] sm:$0xff] %v6439_v51  ;;  %5023 = vmatprep.mubr.msk.f32.mxu1 %vm351_vm0, %v288_v37  ;;  %5255 = vmatprep.mubr.msk.f32.mxu0 %vm351_vm0, %v2436_v47  ;;  %v3634_v47 = vld [vmem:[%s7670_s0 + $0xe2] sm:$0xff] }
  0xbd   :  { %7709 = vst [vmem:[#allocation35_spill] sm:$0xff] %v6445_v62  ;;  %v1144_v20 = vpop.permute.xlu1 %1143  ;;  %v6452_v41 = vpop.permute.xlu0 %159 }
  0xbe   :  { %v6459_v51 = vmul.f32 %v3629_v19, %v1144_v20  ;;  %v2437_v28 = vmul.f32 %v3631_v50, %v1144_v20  ;;  %v6461_v31 = vmul.f32 %v3633_v13, %v1144_v20  ;;  %v289_v16 = vmul.f32 %v6413_v39, %v6452_v41  ;;  %v6479_v20 = vld [vmem:[%s7670_s0 + $0x50] sm:$0xff] }
  0xbf   :  { %v6467_v37 = vmul.f32 %v6457_v44, %v6452_v41 }
  0xc0   :  { %7710 = vst [vmem:[#allocation36_spill] sm:$0xff] %v6459_v51  ;;  %7711 = vst [vmem:[#allocation37_spill] sm:$0xff] %v6461_v31  ;;  %5024 = vmatmul.mubr.msk.f32.gmra.mrb[6].mxu1 %vm351_vm0, %v289_v16  ;;  %5256 = vmatmul.mubr.msk.f32.gmra.mrb[22].mxu0 %vm351_vm0, %v2437_v28  ;;  %v3635_v28 = vld [vmem:[%s7670_s0 + $0xea] sm:$0xff] }
  0xc1   :  { %7712 = vst [vmem:[#allocation38_spill] sm:$0xff] %v6467_v37  ;;  %v1149_v19 = vpop.permute.xlu1 %1148  ;;  %v6474_v22 = vpop.permute.xlu0 %164 }
  0xc2   :  { %v6481_v31 = vmul.f32 %v3630_v33, %v1149_v19  ;;  %v2438_v6 = vmul.f32 %v3632_v0, %v1149_v19  ;;  %v6483_v59 = vmul.f32 %v3634_v47, %v1149_v19  ;;  %v290_v8 = vmul.f32 %v6435_v24, %v6474_v22  ;;  %v6501_v19 = vld [vmem:[%s7670_s0 + $0x58] sm:$0xff] }
  0xc3   :  { %v6489_v16 = vmul.f32 %v6479_v20, %v6474_v22 }
  0xc4   :  { %7713 = vst [vmem:[#allocation39_spill] sm:$0xff] %v6481_v31  ;;  %7714 = vst [vmem:[#allocation40_spill] sm:$0xff] %v6483_v59  ;;  %5026 = vmatprep.mubr.msk.f32.mxu1 %vm351_vm0, %v290_v8  ;;  %5258 = vmatprep.mubr.msk.f32.mxu0 %vm351_vm0, %v2438_v6  ;;  %v3636_v6 = vld [vmem:[%s7670_s0 + $0xf2] sm:$0xff] }
  0xc5   :  { %7715 = vst [vmem:[#allocation41_spill] sm:$0xff] %v6489_v16  ;;  %v1154_v33 = vpop.permute.xlu1 %1153  ;;  %v6496_v61 = vpop.permute.xlu0 %169 }
  0xc6   :  { %v6503_v59 = vmul.f32 %v3631_v50, %v1154_v33  ;;  %v2439_v37 = vmul.f32 %v3633_v13, %v1154_v33  ;;  %v6505_v16 = vmul.f32 %v3635_v28, %v1154_v33  ;;  %v291_v62 = vmul.f32 %v6457_v44, %v6496_v61  ;;  %v6523_v33 = vld [vmem:[%s7670_s0 + $0x60] sm:$0xff] }
  0xc7   :  { %v6511_v8 = vmul.f32 %v6501_v19, %v6496_v61 }
  0xc8   :  { %7716 = vst [vmem:[#allocation42_spill] sm:$0xff] %v6503_v59  ;;  %7717 = vst [vmem:[#allocation43_spill] sm:$0xff] %v6505_v16  ;;  %5027 = vmatmul.mubr.msk.f32.gmra.mrb[8].mxu1 %vm351_vm0, %v291_v62  ;;  %5259 = vmatmul.mubr.msk.f32.gmra.mrb[24].mxu0 %vm351_vm0, %v2439_v37  ;;  %v3637_v37 = vld [vmem:[%s7670_s0 + $0xfa] sm:$0xff] }
  0xc9   :  { %7718 = vst [vmem:[#allocation44_spill] sm:$0xff] %v6511_v8  ;;  %v1159_v50 = vpop.permute.xlu1 %1158  ;;  %v6518_v1 = vpop.permute.xlu0 %174 }
  0xca   :  { %v6525_v16 = vmul.f32 %v3632_v0, %v1159_v50  ;;  %v2440_v9 = vmul.f32 %v3634_v47, %v1159_v50  ;;  %v6527_v8 = vmul.f32 %v3636_v6, %v1159_v50  ;;  %v292_v52 = vmul.f32 %v6479_v20, %v6518_v1  ;;  %v6545_v50 = vld [vmem:[%s7670_s0 + $0x68] sm:$0xff] }
  0xcb   :  { %v6533_v62 = vmul.f32 %v6523_v33, %v6518_v1 }
  0xcc   :  { %7719 = vst [vmem:[#allocation45_spill] sm:$0xff] %v6525_v16  ;;  %7720 = vst [vmem:[#allocation46_spill] sm:$0xff] %v6527_v8  ;;  %5029 = vmatprep.mubr.msk.f32.mxu1 %vm351_vm0, %v292_v52  ;;  %5261 = vmatprep.mubr.msk.f32.mxu0 %vm351_vm0, %v2440_v9  ;;  %v3638_v9 = vld [vmem:[%s7670_s0 + $0x102] sm:$0xff] }
  0xcd   :  { %7721 = vst [vmem:[#allocation47_spill] sm:$0xff] %v6533_v62  ;;  %v1164_v0 = vpop.permute.xlu1 %1163  ;;  %v6540_v40 = vpop.permute.xlu0 %179 }
  0xce   :  { %v6547_v8 = vmul.f32 %v3633_v13, %v1164_v0  ;;  %v2441_v10 = vmul.f32 %v3635_v28, %v1164_v0  ;;  %v6549_v62 = vmul.f32 %v3637_v37, %v1164_v0  ;;  %v293_v43 = vmul.f32 %v6501_v19, %v6540_v40  ;;  %v6567_v0 = vld [vmem:[%s7670_s0 + $0x70] sm:$0xff] }
  0xcf   :  { %v6555_v52 = vmul.f32 %v6545_v50, %v6540_v40 }
  0xd0   :  { %7722 = vst [vmem:[#allocation48_spill] sm:$0xff] %v6547_v8  ;;  %7723 = vst [vmem:[#allocation49_spill] sm:$0xff] %v6549_v62  ;;  %5030 = vmatmul.mubr.msk.f32.gmra.mrb[10].mxu1 %vm351_vm0, %v293_v43  ;;  %5262 = vmatmul.mubr.msk.f32.gmra.mrb[26].mxu0 %vm351_vm0, %v2441_v10  ;;  %v3639_v10 = vld [vmem:[%s7670_s0 + $0x10a] sm:$0xff] }
  0xd1   :  { %7724 = vst [vmem:[#allocation50_spill] sm:$0xff] %v6555_v52  ;;  %v1169_v13 = vpop.permute.xlu1 %1168  ;;  %v6562_v8 = vpop.permute.xlu0 %184 }
  0xd2   :  { %v6569_v62 = vmul.f32 %v3634_v47, %v1169_v13  ;;  %v2442_v16 = vmul.f32 %v3636_v6, %v1169_v13  ;;  %v6571_v52 = vmul.f32 %v3638_v9, %v1169_v13  ;;  %v294_v59 = vmul.f32 %v6523_v33, %v6562_v8  ;;  %v6589_v13 = vld [vmem:[%s7670_s0 + $0x78] sm:$0xff] }
  0xd3   :  { %v6577_v43 = vmul.f32 %v6567_v0, %v6562_v8 }
  0xd4   :  { %7725 = vst [vmem:[#allocation51_spill] sm:$0xff] %v6569_v62  ;;  %7726 = vst [vmem:[#allocation52_spill] sm:$0xff] %v6571_v52  ;;  %5032 = vmatprep.mubr.msk.f32.mxu1 %vm351_vm0, %v294_v59  ;;  %5264 = vmatprep.mubr.msk.f32.mxu0 %vm351_vm0, %v2442_v16 }
  0xd5   :  { %7727 = vst [vmem:[#allocation53_spill] sm:$0xff] %v6577_v43  ;;  %v1174_v47 = vpop.permute.xlu1 %1173  ;;  %v6584_v62 = vpop.permute.xlu0 %189 }
  0xd6   :  { %v6591_v52 = vmul.f32 %v3635_v28, %v1174_v47  ;;  %v2443_v31 = vmul.f32 %v3637_v37, %v1174_v47  ;;  %v6593_v43 = vmul.f32 %v3639_v10, %v1174_v47  ;;  %v295_v51 = vmul.f32 %v6545_v50, %v6584_v62  ;;  %v6610_v28 = vld [vmem:[%s7670_s0 + $0x80] sm:$0xff] }
  0xd7   :  { %v6599_v59 = vmul.f32 %v6589_v13, %v6584_v62 }
  0xd8   :  { %7728 = vst [vmem:[#allocation54_spill] sm:$0xff] %v6591_v52  ;;  %7729 = vst [vmem:[#allocation55_spill] sm:$0xff] %v6593_v43  ;;  %5033 = vmatmul.mubr.msk.f32.gmra.mrb[12].mxu1 %vm351_vm0, %v295_v51  ;;  %5265 = vmatmul.mubr.msk.f32.gmra.mrb[28].mxu0 %vm351_vm0, %v2443_v31 }
  0xd9   :  { %7730 = vst [vmem:[#allocation56_spill] sm:$0xff] %v6599_v59  ;;  %v6603_v16 = vpop.permute.xlu1 %1178  ;;  %v6605_v23 = vpop.permute.xlu0 %194 }
  0xda   :  { %7731 = vst [vmem:[#allocation57_spill] sm:$0xff] %v6603_v16  ;;  %v6613_v47 = vmul.f32 %v3636_v6, %v6603_v16  ;;  %v2444_v43 = vmul.f32 %v3638_v9, %v6603_v16  ;;  %v296_v59 = vmul.f32 %v6567_v0, %v6605_v23  ;;  %v6620_v31 = vmul.f32 %v6610_v28, %v6605_v23  ;;  %v6631_v6 = vld [vmem:[%s7670_s0 + $0x88] sm:$0xff] }
  0xdc   :  { %7732 = vst [vmem:[#allocation58_spill] sm:$0xff] %v6613_v47  ;;  %7733 = vst [vmem:[#allocation59_spill] sm:$0xff] %v6620_v31  ;;  %5035 = vmatprep.mubr.msk.f32.mxu1 %vm351_vm0, %v296_v59  ;;  %5267 = vmatprep.mubr.msk.f32.mxu0 %vm351_vm0, %v2444_v43  ;;  %v2834_v43 = vmul.f32 %v6348_v25, %v6296_v54  ;;  %v6656_v54 = vld [vmem:[%s7670_s0 + $0x98] sm:$0xff] }
  0xdd   :  { %v6624_v51 = vpop.permute.xlu1 %1183  ;;  %v6626_v52 = vpop.permute.xlu0 %199 }
  0xde   :  { %7734 = vst [vmem:[#allocation60_spill] sm:$0xff] %v6624_v51  ;;  %v6634_v9 = vmul.f32 %v3637_v37, %v6624_v51  ;;  %v2445_v16 = vmul.f32 %v3639_v10, %v6624_v51  ;;  %v297_v31 = vmul.f32 %v6589_v13, %v6626_v52  ;;  %v6643_v59 = vmul.f32 %v6631_v6, %v6626_v52  ;;  %v4615_v37 = vld [vmem:[%s7669_s1 + $0x80] sm:$0xff]  ;;  %v4616_v10 = vld [vmem:[%s7669_s1 + $0x88] sm:$0xff] }
  0xe0   :  { %7735 = vst [vmem:[#allocation61_spill] sm:$0xff] %v6634_v9  ;;  %7736 = vst [vmem:[#allocation62_spill] sm:$0xff] %v6643_v59  ;;  %5036 = vmatmul.mubr.msk.f32.gmra.mrb[14].mxu1 %vm351_vm0, %v297_v31  ;;  %5268 = vmatmul.mubr.msk.f32.gmra.mrb[30].mxu0 %vm351_vm0, %v2445_v16  ;;  %v2835_v16 = vmul.f32 %v6370_v26, %v6324_v53  ;;  %v6668_v31 = vld [vmem:[%s7670_s0 + $0x90] sm:$0xff]  ;;  %v6682_v53 = vpack.c.bf16 %v4616_v10, %v4615_v37 }
  0xe1   :  { %v6658_v25 = vpop.permute.xlu1 %209  ;;  %v6660_v51 = vpop.permute.xlu0 %204  ;;  %5274 = vmatprep.mubr.msk.f32.mxu0 %vm351_vm0, %v2834_v43  ;;  %v2836_v26 = vmul.f32 %v6391_v7, %v6342_v21  ;;  %v2837_v21 = vmul.f32 %v6413_v39, %v6365_v42  ;;  %v6704_v7 = vld [vmem:[%s7670_s0 + $0xa0] sm:$0xff]  ;;  %v2838_v42 = vmul.f32 %v6435_v24, %v6386_v4  ;;  %v2839_v4 = vmul.f32 %v6457_v44, %v6408_v34  ;;  %v6740_v24 = vld [vmem:[%s7670_s0 + $0xb0] sm:$0xff]  ;;  %v6761_v44 = vld [vmem:[%s7670_s0 + $0xc8] sm:$0xff] }
  0xe2   :  { %v299_v59 = vmul.f32 %v6631_v6, %v6658_v25  ;;  %v6674_v9 = vmul.f32 %v6656_v54, %v6658_v25  ;;  %v298_v47 = vmul.f32 %v6610_v28, %v6660_v51  ;;  %v6680_v43 = vmul.f32 %v6668_v31, %v6660_v51 }
  0xe4   :  { %7737 = vst [vmem:[#allocation63_spill] sm:$0xff] %v6674_v9  ;;  %5038 = vmatprep.mubr.msk.f32.mxu1 %vm351_vm0, %v298_v47  ;;  %5275 = vmatmul.mubr.msk.f32.vlgmr.msra.gmra.mrb[0].mxu0 %vm351_vm0, %v2835_v16  ;;  %v6691_v9 = vld [vmem:[%s7670_s0 + $0xa8] sm:$0xff] }
  0xe5   :  { %5457 = vmatpush3.bf16.msra.mxu0 %v6192_v12  ;;  %v6694_v35 = vpop.permute.xlu1 %219  ;;  %v6696_v49 = vpop.permute.xlu0 %214  ;;  %5039 = vmatmul.mubr.msk.f32.gmra.mrb[16].mxu1 %vm351_vm0, %v299_v59  ;;  %v6727_v59 = vld [vmem:[%s7670_s0 + $0xb8] sm:$0xff] }
  0xe6   :  { %v301_v47 = vmul.f32 %v6656_v54, %v6694_v35  ;;  %v6710_v12 = vmul.f32 %v6691_v9, %v6694_v35  ;;  %v300_v37 = vmul.f32 %v6668_v31, %v6696_v49  ;;  %5277 = vmatprep.mubr.msk.f32.mxu0 %vm351_vm0, %v2836_v26  ;;  %v6719_v39 = vmul.f32 %v6704_v7, %v6696_v49 }
  0xe7   :  { %5459 = vmatprep.subr.bf16.mxu0 %v6682_v53 }
  0xe8   :  { %7738 = vst [vmem:[#allocation64_spill] sm:$0xff] %v6710_v12  ;;  %5041 = vmatprep.mubr.msk.f32.mxu1 %vm351_vm0, %v300_v37  ;;  %5278 = vmatmul.mubr.msk.f32.gmra.mrb[2].mxu0 %vm351_vm0, %v2837_v21  ;;  %v2840_v37 = vmul.f32 %v6479_v20, %v6430_v3  ;;  %v2841_v3 = vmul.f32 %v6501_v19, %v6452_v41  ;;  %v6774_v20 = vld [vmem:[%s7670_s0 + $0xc0] sm:$0xff]  ;;  %v6795_v19 = vld [vmem:[%s7670_s0 + $0xd8] sm:$0xff] }
  0xe9   :  { %v6729_v10 = vpop.permute.xlu1 %229  ;;  %v6731_v16 = vpop.permute.xlu0 %224  ;;  %5042 = vmatmul.mubr.msk.f32.gmra.mrb[18].mxu1 %vm351_vm0, %v301_v47  ;;  %5280 = vmatprep.mubr.msk.f32.mxu0 %vm351_vm0, %v2838_v42 }
  0xea   :  { %v303_v26 = vmul.f32 %v6691_v9, %v6729_v10  ;;  %v6746_v21 = vmul.f32 %v6727_v59, %v6729_v10  ;;  %v302_v47 = vmul.f32 %v6704_v7, %v6731_v16  ;;  %v6754_v34 = vmul.f32 %v6740_v24, %v6731_v16 }
  0xec   :  { %7739 = vst [vmem:[#allocation65_spill] sm:$0xff] %v6746_v21  ;;  %7740 = vst [vmem:[#allocation66_spill] sm:$0xff] %v6754_v34  ;;  %5044 = vmatprep.mubr.msk.f32.mxu1 %vm351_vm0, %v302_v47  ;;  %5281 = vmatmul.mubr.msk.f32.gmra.mrb[4].mxu0 %vm351_vm0, %v2839_v4 }
  0xed   :  { %v6763_v42 = vpop.permute.xlu1 %239  ;;  %v6765_v21 = vpop.permute.xlu0 %234  ;;  %5045 = vmatmul.mubr.msk.f32.gmra.mrb[20].mxu1 %vm351_vm0, %v303_v26  ;;  %5283 = vmatprep.mubr.msk.f32.mxu0 %vm351_vm0, %v2840_v37  ;;  %v2842_v37 = vmul.f32 %v6523_v33, %v6474_v22  ;;  %v2843_v22 = vmul.f32 %v6545_v50, %v6496_v61  ;;  %v6808_v33 = vld [vmem:[%s7670_s0 + $0xd0] sm:$0xff]  ;;  %v6829_v50 = vld [vmem:[%s7670_s0 + $0xe8] sm:$0xff] }
  0xee   :  { %v305_v4 = vmul.f32 %v6727_v59, %v6763_v42  ;;  %v6780_v47 = vmul.f32 %v6761_v44, %v6763_v42  ;;  %v304_v26 = vmul.f32 %v6740_v24, %v6765_v21  ;;  %v6788_v41 = vmul.f32 %v6774_v20, %v6765_v21 }
  0xf0   :  { %7741 = vst [vmem:[#allocation67_spill] sm:$0xff] %v6780_v47  ;;  %7742 = vst [vmem:[#allocation68_spill] sm:$0xff] %v6788_v41  ;;  %5047 = vmatprep.mubr.msk.f32.mxu1 %vm351_vm0, %v304_v26  ;;  %5284 = vmatmul.mubr.msk.f32.gmra.mrb[6].mxu0 %vm351_vm0, %v2841_v3 }
  0xf1   :  { %v6797_v47 = vpop.permute.xlu1 %249  ;;  %v6799_v34 = vpop.permute.xlu0 %244  ;;  %5048 = vmatmul.mubr.msk.f32.gmra.mrb[22].mxu1 %vm351_vm0, %v305_v4  ;;  %5286 = vmatprep.mubr.msk.f32.mxu0 %vm351_vm0, %v2842_v37  ;;  %v2844_v37 = vmul.f32 %v6567_v0, %v6518_v1  ;;  %v2845_v1 = vmul.f32 %v6589_v13, %v6540_v40  ;;  %v2826_v0 = vld [vmem:[%s7670_s0 + $0xe0] sm:$0xff]  ;;  %v6860_v40 = vld [vmem:[%s7670_s0 + $0xf8] sm:$0xff] }
  0xf2   :  { %v307_v3 = vmul.f32 %v6761_v44, %v6797_v47  ;;  %v6814_v26 = vmul.f32 %v6795_v19, %v6797_v47  ;;  %v306_v4 = vmul.f32 %v6774_v20, %v6799_v34  ;;  %v6822_v61 = vmul.f32 %v6808_v33, %v6799_v34 }
  0xf4   :  { %7743 = vst [vmem:[#allocation69_spill] sm:$0xff] %v6814_v26  ;;  %7744 = vst [vmem:[#allocation70_spill] sm:$0xff] %v6822_v61  ;;  %5050 = vmatprep.mubr.msk.f32.mxu1 %vm351_vm0, %v306_v4  ;;  %5287 = vmatmul.mubr.msk.f32.gmra.mrb[8].mxu0 %vm351_vm0, %v2843_v22 }
  0xf5   :  { %v6831_v26 = vpop.permute.xlu1 %259  ;;  %v6833_v41 = vpop.permute.xlu0 %254  ;;  %5051 = vmatmul.mubr.msk.f32.gmra.mrb[24].mxu1 %vm351_vm0, %v307_v3  ;;  %5289 = vmatprep.mubr.msk.f32.mxu0 %vm351_vm0, %v2844_v37  ;;  %v2846_v3 = vmul.f32 %v6610_v28, %v6562_v8  ;;  %v2847_v8 = vmul.f32 %v6631_v6, %v6584_v62  ;;  %v2828_v28 = vld [vmem:[%s7670_s0 + $0xf0] sm:$0xff]  ;;  %v994_v62 = vld [vmem:[%s7670_s0 + $0x2] sm:$0xff] }
  0xf6   :  { %v309_v22 = vmul.f32 %v6795_v19, %v6831_v26  ;;  %v6846_v4 = vmul.f32 %v6829_v50, %v6831_v26  ;;  %v308_v61 = vmul.f32 %v6808_v33, %v6833_v41  ;;  %v6853_v37 = vmul.f32 %v2826_v0, %v6833_v41 }
  0xf8   :  { %7745 = vst [vmem:[#allocation71_spill] sm:$0xff] %v6846_v4  ;;  %7746 = vst [vmem:[#allocation72_spill] sm:$0xff] %v6853_v37  ;;  %5053 = vmatprep.mubr.msk.f32.mxu1 %vm351_vm0, %v308_v61  ;;  %5290 = vmatmul.mubr.msk.f32.gmra.mrb[10].mxu0 %vm351_vm0, %v2845_v1 }
  0xf9   :  { %v6862_v13 = vpop.permute.xlu1 %269  ;;  %v6864_v4 = vpop.permute.xlu0 %264  ;;  %5054 = vmatmul.mubr.msk.f32.gmra.mrb[26].mxu1 %vm351_vm0, %v309_v22  ;;  %5292 = vmatprep.mubr.msk.f32.mxu0 %vm351_vm0, %v2846_v3  ;;  %v2848_v22 = vmul.f32 %v6668_v31, %v6605_v23  ;;  %v2849_v23 = vmul.f32 %v6656_v54, %v6626_v52  ;;  %v2851_v52 = vmul.f32 %v6691_v9, %v6658_v25  ;;  %v2833_v9 = vld [vmem:[%s7670_s0 + $0x118] sm:$0xff] }
  0xfa   :  { %v311_v61 = vmul.f32 %v6829_v50, %v6862_v13  ;;  %v6877_v1 = vmul.f32 %v6860_v40, %v6862_v13  ;;  %v310_v37 = vmul.f32 %v2826_v0, %v6864_v4  ;;  %v6883_v3 = vmul.f32 %v2828_v28, %v6864_v4 }
  0xfb   :  { %v2853_v54 = vmul.f32 %v6727_v59, %v6694_v35  ;;  %v2855_v35 = vmul.f32 %v6761_v44, %v6729_v10  ;;  %v7751_v59 = vld [vmem:[#allocation33_spill] sm:$0xff]  ;;  %v3230_v10 = vld [vmem:[%s7670_s0 + $0x61] sm:$0xff]  ;;  %v7754_v44 = vld [vmem:[#allocation42_spill] sm:$0xff] }
  0xfc   :  { %7747 = vst [vmem:[#allocation73_spill] sm:$0xff] %v6877_v1  ;;  %7748 = vst [vmem:[#allocation74_spill] sm:$0xff] %v6883_v3  ;;  %5056 = vmatprep.mubr.msk.f32.mxu1 %vm351_vm0, %v310_v37  ;;  %5293 = vmatmul.mubr.msk.f32.gmra.mrb[12].mxu0 %vm351_vm0, %v2847_v8  ;;  %v2850_v8 = vmul.f32 %v6704_v7, %v6660_v51  ;;  %v1186_v1 = vmul.f32 %v6147_v56, %v994_v62  ;;  %v995_v3 = vld [vmem:[%s7670_s0 + $0xa] sm:$0xff]  ;;  %v7750_v7 = vld [vmem:[#allocation30_spill] sm:$0xff] }
  0xfd   :  { %v6890_v6 = vpop.permute.xlu1 %279  ;;  %v6892_v12 = vpop.permute.xlu0 %274  ;;  %5057 = vmatmul.mubr.msk.f32.gmra.mrb[28].mxu1 %vm351_vm0, %v311_v61  ;;  %5295 = vmatprep.mubr.msk.f32.mxu0 %vm351_vm0, %v2848_v22  ;;  %v1187_v51 = vmul.f32 %v6169_v2, %v995_v3  ;;  %v2852_v56 = vmul.f32 %v6740_v24, %v6696_v49  ;;  %v2854_v2 = vmul.f32 %v6774_v20, %v6731_v16  ;;  %v7752_v16 = vld [vmem:[#allocation36_spill] sm:$0xff]  ;;  %v7755_v20 = vld [vmem:[#allocation45_spill] sm:$0xff]  ;;  %v7762_v22 = vld [vmem:[#allocation22_spill] sm:$0xff] }
  0xfe   :  { %v313_v31 = vmul.f32 %v6860_v40, %v6890_v6  ;;  %v312_v37 = vmul.f32 %v2828_v28, %v6892_v12  ;;  %v3231_v24 = vld [vmem:[%s7670_s0 + $0x69] sm:$0xff]  ;;  %v7132_v3 = vld [vmem:[%s7670_s0 + $0xb9] sm:$0xff] }
  0xff   :  { %v7761_v61 = vld [vmem:[#allocation20_spill] sm:$0xff] }
 0x100   :  { %5059 = vmatprep.mubr.msk.f32.mxu1 %vm351_vm0, %v312_v37  ;;  %5296 = vmatmul.mubr.msk.f32.gmra.mrb[14].mxu0 %vm351_vm0, %v2849_v23  ;;  %v7763_v62 = vld [vmem:[#allocation24_spill] sm:$0xff]  ;;  %v7140_v23 = vld [vmem:[%s7670_s0 + $0xc1] sm:$0xff] }
 0x101   :  { %5060 = vmatmul.mubr.msk.f32.gmra.mrb[30].mxu1 %vm351_vm0, %v313_v31  ;;  %5298 = vmatprep.mubr.msk.f32.mxu0 %vm351_vm0, %v2850_v8  ;;  %v7764_v31 = vld [vmem:[#allocation26_spill] sm:$0xff]  ;;  %v7151_v37 = vld [vmem:[%s7670_s0 + $0xc9] sm:$0xff]  ;;  %v7158_v8 = vld [vmem:[%s7670_s0 + $0xd1] sm:$0xff] }
 0x102   :  { %5066 = vmatprep.mubr.msk.f32.mxu1 %vm351_vm0, %v1186_v1  ;;  %v7121_v1 = vld [vmem:[%s7670_s0 + $0xb1] sm:$0xff] }
 0x104   :  { %5299 = vmatmul.mubr.msk.f32.gmra.mrb[16].mxu0 %vm351_vm0, %v2851_v52  ;;  %v7766_v52 = vld [vmem:[#allocation32_spill] sm:$0xff] }
 0x105   :  { %5067 = vmatmul.mubr.msk.f32.vlgmr.msra.gmra.mrb[0].mxu1 %vm351_vm0, %v1187_v51  ;;  %5301 = vmatprep.mubr.msk.f32.mxu0 %vm351_vm0, %v2852_v56  ;;  %v7169_v51 = vld [vmem:[%s7670_s0 + $0xd9] sm:$0xff]  ;;  %v7767_v56 = vld [vmem:[#allocation35_spill] sm:$0xff] }
 0x106   :  { %5069 = vmatprep.mubr.msk.f32.mxu1 %vm351_vm0, %v6149_v57  ;;  %5441 = vmatpush3.bf16.msra.mxu1 %v6326_v55  ;;  %v2856_v57 = vmul.f32 %v6808_v33, %v6765_v21  ;;  %v2858_v55 = vmul.f32 %v2826_v0, %v6799_v34  ;;  %v7753_v21 = vld [vmem:[#allocation39_spill] sm:$0xff]  ;;  %v3232_v34 = vld [vmem:[%s7670_s0 + $0x71] sm:$0xff]  ;;  %v7096_v0 = vld [vmem:[%s7670_s0 + $0x99] sm:$0xff] }
 0x107   :  { %5462 = vmatprep.subr.bf16.mxu1 %v5807_v18  ;;  %v7757_v33 = vld [vmem:[#allocation51_spill] sm:$0xff] }
 0x108   :  { %5302 = vmatmul.mubr.msk.f32.gmra.mrb[18].mxu0 %vm351_vm0, %v2853_v54  ;;  %v7176_v54 = vld [vmem:[%s7670_s0 + $0xe1] sm:$0xff] }
 0x109   :  { %5070 = vmatmul.mubr.msk.f32.gmra.mrb[2].mxu1 %vm351_vm0, %v6178_v5  ;;  %5304 = vmatprep.mubr.msk.f32.mxu0 %vm351_vm0, %v2854_v2  ;;  %v2857_v5 = vmul.f32 %v6795_v19, %v6763_v42  ;;  %v3233_v42 = vld [vmem:[%s7670_s0 + $0x79] sm:$0xff]  ;;  %v3235_v19 = vld [vmem:[%s7670_s0 + $0x89] sm:$0xff] }
 0x10a   :  { %5072 = vmatprep.mubr.msk.f32.mxu1 %vm351_vm0, %v6199_v17  ;;  %v2860_v17 = vmul.f32 %v2828_v28, %v6833_v41  ;;  %v7756_v41 = vld [vmem:[#allocation48_spill] sm:$0xff]  ;;  %v7768_v2 = vld [vmem:[#allocation38_spill] sm:$0xff] }
 0x10b   :  { %v7114_v28 = vld [vmem:[%s7670_s0 + $0xa9] sm:$0xff] }
 0x10c   :  { %5305 = vmatmul.mubr.msk.f32.gmra.mrb[20].mxu0 %vm351_vm0, %v2855_v35  ;;  %v7187_v35 = vld [vmem:[%s7670_s0 + $0xe9] sm:$0xff] }
 0x10d   :  { %5073 = vmatmul.mubr.msk.f32.gmra.mrb[4].mxu1 %vm351_vm0, %v6195_v15  ;;  %5307 = vmatprep.mubr.msk.f32.mxu0 %vm351_vm0, %v2856_v57  ;;  %v2859_v15 = vmul.f32 %v6829_v50, %v6797_v47  ;;  %v3234_v47 = vld [vmem:[%s7670_s0 + $0x81] sm:$0xff]  ;;  %v7758_v50 = vld [vmem:[#allocation54_spill] sm:$0xff]  ;;  %v7769_v57 = vld [vmem:[#allocation41_spill] sm:$0xff] }
 0x10e   :  { %5075 = vmatprep.mubr.msk.f32.mxu1 %vm351_vm0, %v6217_v29  ;;  %v6959_v29 = vld [vmem:[%s7670_s0 + $0x100] sm:$0xff] }
 0x10f   :  { %v2862_v49 = vmul.f32 %v6959_v29, %v6864_v4  ;;  %v7759_v4 = vld [vmem:[#allocation58_spill] sm:$0xff] }
 0x110   :  { %5308 = vmatmul.mubr.msk.f32.gmra.mrb[22].mxu0 %vm351_vm0, %v2857_v5  ;;  %v7194_v5 = vld [vmem:[%s7670_s0 + $0xf1] sm:$0xff] }
 0x111   :  { %5076 = vmatmul.mubr.msk.f32.gmra.mrb[6].mxu1 %vm351_vm0, %v6213_v27  ;;  %5310 = vmatprep.mubr.msk.f32.mxu0 %vm351_vm0, %v2858_v55  ;;  %v2861_v27 = vmul.f32 %v6860_v40, %v6831_v26  ;;  %v7086_v26 = vld [vmem:[%s7670_s0 + $0x91] sm:$0xff]  ;;  %v7103_v40 = vld [vmem:[%s7670_s0 + $0xa1] sm:$0xff]  ;;  %v7770_v55 = vld [vmem:[#allocation44_spill] sm:$0xff] }
 0x112   :  { %5078 = vmatprep.mubr.msk.f32.mxu1 %vm351_vm0, %v6233_v38  ;;  %v6972_v38 = vld [vmem:[%s7670_s0 + $0x108] sm:$0xff] }
 0x114   :  { %5311 = vmatmul.mubr.msk.f32.gmra.mrb[24].mxu0 %vm351_vm0, %v2859_v15  ;;  %v7205_v15 = vld [vmem:[%s7670_s0 + $0xf9] sm:$0xff] }
 0x115   :  { %5079 = vmatmul.mubr.msk.f32.gmra.mrb[8].mxu1 %vm351_vm0, %v6229_v36  ;;  %5313 = vmatprep.mubr.msk.f32.mxu0 %vm351_vm0, %v2860_v17  ;;  %v2832_v36 = vld [vmem:[%s7670_s0 + $0x110] sm:$0xff]  ;;  %v7771_v17 = vld [vmem:[#allocation47_spill] sm:$0xff] }
 0x116   :  { %5081 = vmatprep.mubr.msk.f32.mxu1 %vm351_vm0, %v6249_v48  ;;  %v2863_v48 = vmul.f32 %v6972_v38, %v6862_v13  ;;  %v2864_v25 = vmul.f32 %v2832_v36, %v6892_v12  ;;  %v7760_v13 = vld [vmem:[#allocation61_spill] sm:$0xff]  ;;  %v7223_v36 = vld [vmem:[%s7670_s0 + $0x109] sm:$0xff] }
 0x118   :  { %5314 = vmatmul.mubr.msk.f32.gmra.mrb[26].mxu0 %vm351_vm0, %v2861_v27  ;;  %v7212_v27 = vld [vmem:[%s7670_s0 + $0x101] sm:$0xff] }
 0x119   :  { %5082 = vmatmul.mubr.msk.f32.gmra.mrb[10].mxu1 %vm351_vm0, %v6245_v46  ;;  %5316 = vmatprep.mubr.msk.f32.mxu0 %vm351_vm0, %v2862_v49  ;;  %v2865_v46 = vmul.f32 %v2833_v9, %v6890_v6  ;;  %v7772_v49 = vld [vmem:[#allocation50_spill] sm:$0xff]  ;;  %v3252_v9 = vld [vmem:[%s7670_s0 + $0x111] sm:$0xff] }
 0x11a   :  { %5084 = vmatprep.mubr.msk.f32.mxu1 %vm351_vm0, %v6265_v63  ;;  %v3222_v63 = vld [vmem:[%s7670_s0 + $0x21] sm:$0xff] }
 0x11c   :  { %5317 = vmatmul.mubr.msk.f32.gmra.mrb[28].mxu0 %vm351_vm0, %v2863_v48  ;;  %v7773_v48 = vld [vmem:[#allocation53_spill] sm:$0xff] }
 0x11d   :  { %5085 = vmatmul.mubr.msk.f32.gmra.mrb[12].mxu1 %vm351_vm0, %v6261_v60  ;;  %5319 = vmatprep.mubr.msk.f32.mxu0 %vm351_vm0, %v2864_v25  ;;  %v3223_v60 = vld [vmem:[%s7670_s0 + $0x29] sm:$0xff] }
 0x11e   :  { %5087 = vmatprep.mubr.msk.f32.mxu1 %vm351_vm0, %v6281_v14  ;;  %v3224_v14 = vld [vmem:[%s7670_s0 + $0x31] sm:$0xff]  ;;  %v7774_v25 = vld [vmem:[#allocation56_spill] sm:$0xff] }
 0x120   :  { %5320 = vmatmul.mubr.msk.f32.gmra.mrb[30].mxu0 %vm351_vm0, %v2865_v46  ;;  %v3253_v46 = vld [vmem:[%s7670_s0 + $0x119] sm:$0xff] }
 0x121   :  { %5088 = vmatmul.mubr.msk.f32.gmra.mrb[14].mxu1 %vm351_vm0, %v6277_v11  ;;  %5326 = vmatprep.mubr.msk.f32.mxu0 %vm351_vm0, %v3222_v63  ;;  %v3225_v11 = vld [vmem:[%s7670_s0 + $0x39] sm:$0xff]  ;;  %v7775_v63 = vld [vmem:[#allocation59_spill] sm:$0xff] }
 0x122   :  { %5090 = vmatprep.mubr.msk.f32.mxu1 %vm351_vm0, %v6298_v32  ;;  %v3226_v32 = vld [vmem:[%s7670_s0 + $0x41] sm:$0xff] }
 0x124   :  { %5327 = vmatmul.mubr.msk.f32.vlgmr.msra.gmra.mrb[0].mxu0 %vm351_vm0, %v3223_v60  ;;  %v7776_v60 = vld [vmem:[#allocation62_spill] sm:$0xff] }
 0x125   :  { %5461 = vmatpush3.bf16.msra.mxu0 %v6682_v53  ;;  %5091 = vmatmul.mubr.msk.f32.gmra.mrb[16].mxu1 %vm351_vm0, %v6328_v58  ;;  %v3227_v58 = vld [vmem:[%s7670_s0 + $0x49] sm:$0xff]  ;;  %v7749_v53 = vld [vmem:[#allocation27_spill] sm:$0xff] }
 0x126   :  { %5093 = vmatprep.mubr.msk.f32.mxu1 %vm351_vm0, %v6350_v30  ;;  %5329 = vmatprep.mubr.msk.f32.mxu0 %vm351_vm0, %v3224_v14  ;;  %v3228_v30 = vld [vmem:[%s7670_s0 + $0x51] sm:$0xff]  ;;  %v7777_v14 = vld [vmem:[#allocation4_spill] sm:$0xff] }
 0x128   :  { %5330 = vmatmul.mubr.msk.f32.gmra.mrb[2].mxu0 %vm351_vm0, %v3225_v11  ;;  %v7778_v11 = vld [vmem:[#allocation6_spill] sm:$0xff] }
 0x129   :  { %5094 = vmatmul.mubr.msk.f32.gmra.mrb[18].mxu1 %vm351_vm0, %v6372_v45  ;;  %5332 = vmatprep.mubr.msk.f32.mxu0 %vm351_vm0, %v3226_v32  ;;  %v3229_v45 = vld [vmem:[%s7670_s0 + $0x59] sm:$0xff]  ;;  %v7779_v32 = vld [vmem:[#allocation63_spill] sm:$0xff] }
 0x12a   :  { %5096 = vmatprep.mubr.msk.f32.mxu1 %vm351_vm0, %v7749_v53  ;;  %v7781_v53 = vld [vmem:[#allocation5_spill] sm:$0xff] }
 0x12c   :  { %5333 = vmatmul.mubr.msk.f32.gmra.mrb[4].mxu0 %vm351_vm0, %v3227_v58  ;;  %v7780_v58 = vld [vmem:[#allocation3_spill] sm:$0xff] }
 0x12d   :  { %5097 = vmatmul.mubr.msk.f32.gmra.mrb[20].mxu1 %vm351_vm0, %v7750_v7  ;;  %5335 = vmatprep.mubr.msk.f32.mxu0 %vm351_vm0, %v3228_v30  ;;  %v7782_v30 = vld [vmem:[#allocation64_spill] sm:$0xff] }
 0x12e   :  { %5099 = vmatprep.mubr.msk.f32.mxu1 %vm351_vm0, %v7751_v59  ;;  %v7783_v7 = vld [vmem:[#allocation8_spill] sm:$0xff]  ;;  %v7786_v59 = vld [vmem:[#allocation65_spill] sm:$0xff] }
 0x130   :  { %5336 = vmatmul.mubr.msk.f32.gmra.mrb[6].mxu0 %vm351_vm0, %v3229_v45  ;;  %v7785_v45 = vld [vmem:[#allocation7_spill] sm:$0xff] }
 0x131   :  { %5100 = vmatmul.mubr.msk.f32.gmra.mrb[22].mxu1 %vm351_vm0, %v7752_v16  ;;  %5338 = vmatprep.mubr.msk.f32.mxu0 %vm351_vm0, %v3230_v10  ;;  %v7787_v10 = vld [vmem:[#allocation10_spill] sm:$0xff]  ;;  %v7789_v16 = vld [vmem:[#allocation9_spill] sm:$0xff] }
 0x132   :  { %5102 = vmatprep.mubr.msk.f32.mxu1 %vm351_vm0, %v7753_v21  ;;  %v7791_v21 = vld [vmem:[#allocation12_spill] sm:$0xff] }
 0x134   :  { %5339 = vmatmul.mubr.msk.f32.gmra.mrb[8].mxu0 %vm351_vm0, %v3231_v24  ;;  %v7790_v24 = vld [vmem:[#allocation67_spill] sm:$0xff] }
 0x135   :  { %5103 = vmatmul.mubr.msk.f32.gmra.mrb[24].mxu1 %vm351_vm0, %v7754_v44  ;;  %5341 = vmatprep.mubr.msk.f32.mxu0 %vm351_vm0, %v3232_v34  ;;  %v7792_v34 = vld [vmem:[#allocation70_spill] sm:$0xff]  ;;  %v7793_v44 = vld [vmem:[#allocation11_spill] sm:$0xff] }
 0x136   :  { %5105 = vmatprep.mubr.msk.f32.mxu1 %vm351_vm0, %v7755_v20  ;;  %v7795_v20 = vld [vmem:[#allocation14_spill] sm:$0xff] }
 0x138   :  { %5342 = vmatmul.mubr.msk.f32.gmra.mrb[10].mxu0 %vm351_vm0, %v3233_v42  ;;  %v7794_v42 = vld [vmem:[#allocation69_spill] sm:$0xff] }
 0x139   :  { %5106 = vmatmul.mubr.msk.f32.gmra.mrb[26].mxu1 %vm351_vm0, %v7756_v41  ;;  %5344 = vmatprep.mubr.msk.f32.mxu0 %vm351_vm0, %v3234_v47  ;;  %v7796_v47 = vld [vmem:[#allocation72_spill] sm:$0xff]  ;;  %v7797_v41 = vld [vmem:[#allocation13_spill] sm:$0xff] }
 0x13a   :  { %5108 = vmatprep.mubr.msk.f32.mxu1 %vm351_vm0, %v7757_v33  ;;  %v7799_v33 = vld [vmem:[#allocation16_spill] sm:$0xff] }
 0x13c   :  { %5345 = vmatmul.mubr.msk.f32.gmra.mrb[12].mxu0 %vm351_vm0, %v3235_v19  ;;  %v7798_v19 = vld [vmem:[#allocation71_spill] sm:$0xff] }
 0x13d   :  { %5109 = vmatmul.mubr.msk.f32.gmra.mrb[28].mxu1 %vm351_vm0, %v7758_v50  ;;  %5347 = vmatprep.mubr.msk.f32.mxu0 %vm351_vm0, %v7086_v26  ;;  %v7800_v50 = vld [vmem:[#allocation74_spill] sm:$0xff] }
 0x13e   :  { %5111 = vmatprep.mubr.msk.f32.mxu1 %vm351_vm0, %v7759_v4  ;;  %v1636_v4 = vmul.f32 %v6959_v29, %v6892_v12  ;;  %v7805_v12 = vld [vmem:[#allocation19_spill] sm:$0xff]  ;;  %v7806_v29 = vld [vmem:[#allocation21_spill] sm:$0xff] }
 0x140   :  { %5348 = vmatmul.mubr.msk.f32.gmra.mrb[14].mxu0 %vm351_vm0, %v7096_v0 }
 0x141   :  { %5112 = vmatmul.mubr.msk.f32.gmra.mrb[30].mxu1 %vm351_vm0, %v7760_v13  ;;  %5350 = vmatprep.mubr.msk.f32.mxu0 %vm351_vm0, %v7103_v40  ;;  %v7801_v13 = vld [vmem:[#allocation15_spill] sm:$0xff] }
 0x142   :  { %5118 = vmatprep.mubr.msk.f32.mxu1 %vm351_vm0, %v7761_v61  ;;  %v7802_v61 = vld [vmem:[#allocation73_spill] sm:$0xff] }
 0x144   :  { %5351 = vmatmul.mubr.msk.f32.gmra.mrb[16].mxu0 %vm351_vm0, %v7114_v28 }
 0x145   :  { %5119 = vmatmul.mubr.msk.f32.vlgmr.msra.gmra.mrb[0].mxu1 %vm351_vm0, %v7762_v22  ;;  %5353 = vmatprep.mubr.msk.f32.mxu0 %vm351_vm0, %v7121_v1  ;;  %v7803_v22 = vld [vmem:[#allocation18_spill] sm:$0xff] }
 0x146   :  { %5121 = vmatprep.mubr.msk.f32.mxu1 %vm351_vm0, %v7763_v62  ;;  %5463 = vmatpush3.bf16.msra.mxu1 %v5807_v18  ;;  %v7765_v18 = vld [vmem:[#allocation29_spill] sm:$0xff]  ;;  %v1637_v62 = vmul.f32 %v6972_v38, %v6890_v6  ;;  %v7809_v38 = vld [vmem:[#allocation28_spill] sm:$0xff] }
 0x147   :  { %v7808_v6 = vld [vmem:[#allocation25_spill] sm:$0xff] }
 0x148   :  { %5354 = vmatmul.mubr.msk.f32.gmra.mrb[18].mxu0 %vm351_vm0, %v7132_v3 }
 0x149   :  { %5122 = vmatmul.mubr.msk.f32.gmra.mrb[2].mxu1 %vm351_vm0, %v7764_v31  ;;  %5356 = vmatprep.mubr.msk.f32.mxu0 %vm351_vm0, %v7140_v23  ;;  %v7804_v31 = vld [vmem:[#allocation17_spill] sm:$0xff] }
 0x14a   :  { %5124 = vmatprep.mubr.msk.f32.mxu1 %vm351_vm0, %v7765_v18  ;;  %v7807_v18 = vld [vmem:[#allocation23_spill] sm:$0xff] }
 0x14c   :  { %5357 = vmatmul.mubr.msk.f32.gmra.mrb[20].mxu0 %vm351_vm0, %v7151_v37 }
 0x14d   :  { %5125 = vmatmul.mubr.msk.f32.gmra.mrb[4].mxu1 %vm351_vm0, %v7766_v52  ;;  %5359 = vmatprep.mubr.msk.f32.mxu0 %vm351_vm0, %v7158_v8  ;;  %v7818_v52 = vld [vmem:[#allocation57_spill] sm:$0xff] }
 0x14e   :  { %5127 = vmatprep.mubr.msk.f32.mxu1 %vm351_vm0, %v7767_v56  ;;  %v3641_v56 = vld [vmem:[%s7670_s0 + $0x11a] sm:$0xff] }
 0x150   :  { %5360 = vmatmul.mubr.msk.f32.gmra.mrb[22].mxu0 %vm351_vm0, %v7169_v51 }
 0x151   :  { %5128 = vmatmul.mubr.msk.f32.gmra.mrb[6].mxu1 %vm351_vm0, %v7768_v2  ;;  %5362 = vmatprep.mubr.msk.f32.mxu0 %vm351_vm0, %v7176_v54  ;;  %v7820_v2 = vld [vmem:[#allocation60_spill] sm:$0xff] }
 0x152   :  { %5130 = vmatprep.mubr.msk.f32.mxu1 %vm351_vm0, %v7769_v57  ;;  %v11_v57 = vstv %s7671_s4 }
 0x153   :  { %12 = vst [vmem:[#allocation2] sm:$0x1] %v11_v57 }
 0x154   :  { %5363 = vmatmul.mubr.msk.f32.gmra.mrb[24].mxu0 %vm351_vm0, %v7187_v35 }
 0x155   :  { %5131 = vmatmul.mubr.msk.f32.gmra.mrb[8].mxu1 %vm351_vm0, %v7770_v55  ;;  %5365 = vmatprep.mubr.msk.f32.mxu0 %vm351_vm0, %v7194_v5 }
 0x156   :  { %5133 = vmatprep.mubr.msk.f32.mxu1 %vm351_vm0, %v7771_v17 }
 0x158   :  { %5366 = vmatmul.mubr.msk.f32.gmra.mrb[26].mxu0 %vm351_vm0, %v7205_v15 }
 0x159   :  { %5134 = vmatmul.mubr.msk.f32.gmra.mrb[10].mxu1 %vm351_vm0, %v7772_v49  ;;  %5368 = vmatprep.mubr.msk.f32.mxu0 %vm351_vm0, %v7212_v27 }
 0x15a   :  { %5136 = vmatprep.mubr.msk.f32.mxu1 %vm351_vm0, %v7773_v48 }
 0x15c   :  { %5369 = vmatmul.mubr.msk.f32.gmra.mrb[28].mxu0 %vm351_vm0, %v7223_v36 }
 0x15d   :  { %5137 = vmatmul.mubr.msk.f32.gmra.mrb[12].mxu1 %vm351_vm0, %v7774_v25  ;;  %5371 = vmatprep.mubr.msk.f32.mxu0 %vm351_vm0, %v3252_v9 }
 0x15e   :  { %5139 = vmatprep.mubr.msk.f32.mxu1 %vm351_vm0, %v7775_v63 }
 0x160   :  { %5372 = vmatmul.mubr.msk.f32.gmra.mrb[30].mxu0 %vm351_vm0, %v3253_v46 }
 0x161   :  { %5140 = vmatmul.mubr.msk.f32.gmra.mrb[14].mxu1 %vm351_vm0, %v7776_v60  ;;  %5378 = vmatprep.mubr.msk.f32.mxu0 %vm351_vm0, %v7777_v14 }
 0x162   :  { %5142 = vmatprep.mubr.msk.f32.mxu1 %vm351_vm0, %v6680_v43  ;;  %v7784_v43 = vld [vmem:[#allocation66_spill] sm:$0xff] }
 0x164   :  { %5379 = vmatmul.mubr.msk.f32.vlgmr.msra.gmra.mrb[0].mxu0 %vm351_vm0, %v7778_v11 }
 0x165   :  { %5143 = vmatmul.mubr.msk.f32.gmra.mrb[16].mxu1 %vm351_vm0, %v7779_v32  ;;  %5381 = vmatprep.mubr.msk.f32.mxu0 %vm351_vm0, %v7780_v58 }
 0x166   :  { %5145 = vmatprep.mubr.msk.f32.mxu1 %vm351_vm0, %v6719_v39  ;;  %v7788_v39 = vld [vmem:[#allocation68_spill] sm:$0xff] }
 0x168   :  { %5382 = vmatmul.mubr.msk.f32.gmra.mrb[2].mxu0 %vm351_vm0, %v7781_v53  ;;  %v7397_v53 = vld [vmem:[%s7672_s2] ss:$0 sm:$0xff] }
 0x169   :  { %5146 = vmatmul.mubr.msk.f32.gmra.mrb[18].mxu1 %vm351_vm0, %v7782_v30  ;;  %5384 = vmatprep.mubr.msk.f32.mxu0 %vm351_vm0, %v7783_v7 }
 0x16a   :  { %5148 = vmatprep.mubr.msk.f32.mxu1 %vm351_vm0, %v7784_v43 }
 0x16c   :  { %5385 = vmatmul.mubr.msk.f32.gmra.mrb[4].mxu0 %vm351_vm0, %v7785_v45 }
 0x16d   :  { %5149 = vmatmul.mubr.msk.f32.gmra.mrb[20].mxu1 %vm351_vm0, %v7786_v59  ;;  %5387 = vmatprep.mubr.msk.f32.mxu0 %vm351_vm0, %v7787_v10 }
 0x16e   :  { %5151 = vmatprep.mubr.msk.f32.mxu1 %vm351_vm0, %v7788_v39  ;;  %v7404_v39 = vld [vmem:[%s7673_s3] ss:$0 sm:$0xff] }
 0x170   :  { %5388 = vmatmul.mubr.msk.f32.gmra.mrb[6].mxu0 %vm351_vm0, %v7789_v16 }
 0x171   :  { %5152 = vmatmul.mubr.msk.f32.gmra.mrb[22].mxu1 %vm351_vm0, %v7790_v24  ;;  %5390 = vmatprep.mubr.msk.f32.mxu0 %vm351_vm0, %v7791_v21 }
 0x172   :  { %5154 = vmatprep.mubr.msk.f32.mxu1 %vm351_vm0, %v7792_v34 }
 0x174   :  { %5391 = vmatmul.mubr.msk.f32.gmra.mrb[8].mxu0 %vm351_vm0, %v7793_v44 }
 0x175   :  { %5155 = vmatmul.mubr.msk.f32.gmra.mrb[24].mxu1 %vm351_vm0, %v7794_v42  ;;  %5393 = vmatprep.mubr.msk.f32.mxu0 %vm351_vm0, %v7795_v20 }
 0x176   :  { %5157 = vmatprep.mubr.msk.f32.mxu1 %vm351_vm0, %v7796_v47 }
 0x178   :  { %5394 = vmatmul.mubr.msk.f32.gmra.mrb[10].mxu0 %vm351_vm0, %v7797_v41 }
 0x179   :  { %5158 = vmatmul.mubr.msk.f32.gmra.mrb[26].mxu1 %vm351_vm0, %v7798_v19  ;;  %5396 = vmatprep.mubr.msk.f32.mxu0 %vm351_vm0, %v7799_v33 }
 0x17a   :  { %5160 = vmatprep.mubr.msk.f32.mxu1 %vm351_vm0, %v7800_v50 }
 0x17c   :  { %5397 = vmatmul.mubr.msk.f32.gmra.mrb[12].mxu0 %vm351_vm0, %v7801_v13 }
 0x17d   :  { %5161 = vmatmul.mubr.msk.f32.gmra.mrb[28].mxu1 %vm351_vm0, %v7802_v61  ;;  %5399 = vmatprep.mubr.msk.f32.mxu0 %vm351_vm0, %v7803_v22 }
 0x17e   :  { %5163 = vmatprep.mubr.msk.f32.mxu1 %vm351_vm0, %v1636_v4 }
 0x180   :  { %5400 = vmatmul.mubr.msk.f32.gmra.mrb[14].mxu0 %vm351_vm0, %v7804_v31 }
 0x181   :  { %5164 = vmatmul.mubr.msk.f32.gmra.mrb[30].mxu1 %vm351_vm0, %v1637_v62  ;;  %5402 = vmatprep.mubr.msk.f32.mxu0 %vm351_vm0, %v7805_v12 }
 0x182   :  { %5194 = vmatprep.mubr.msk.f32.mxu1 %vm351_vm0, %v7086_v26  ;;  %v7810_v26 = vld [vmem:[#allocation31_spill] sm:$0xff] }
 0x184   :  { %5403 = vmatmul.mubr.msk.f32.gmra.mrb[16].mxu0 %vm351_vm0, %v7806_v29 }
 0x185   :  { %5195 = vmatmul.mubr.msk.f32.vlgmr.msra.gmra.mrb[16].mxu1 %vm351_vm0, %v7096_v0  ;;  %5405 = vmatprep.mubr.msk.f32.mxu0 %vm351_vm0, %v7807_v18  ;;  %v7811_v0 = vld [vmem:[#allocation34_spill] sm:$0xff] }
 0x186   :  { %5197 = vmatprep.mubr.msk.f32.mxu1 %vm351_vm0, %v7103_v40  ;;  %v7812_v40 = vld [vmem:[#allocation37_spill] sm:$0xff] }
 0x188   :  { %5406 = vmatmul.mubr.msk.f32.gmra.mrb[18].mxu0 %vm351_vm0, %v7808_v6 }
 0x189   :  { %5198 = vmatmul.mubr.msk.f32.gmra.mrb[18].mxu1 %vm351_vm0, %v7114_v28  ;;  %5408 = vmatprep.mubr.msk.f32.mxu0 %vm351_vm0, %v7809_v38  ;;  %v7813_v28 = vld [vmem:[#allocation40_spill] sm:$0xff] }
 0x18a   :  { %5200 = vmatprep.mubr.msk.f32.mxu1 %vm351_vm0, %v7121_v1  ;;  %v7814_v1 = vld [vmem:[#allocation43_spill] sm:$0xff] }
 0x18c   :  { %5409 = vmatmul.mubr.msk.f32.gmra.mrb[20].mxu0 %vm351_vm0, %v7810_v26 }
 0x18d   :  { %5201 = vmatmul.mubr.msk.f32.gmra.mrb[20].mxu1 %vm351_vm0, %v7132_v3  ;;  %5411 = vmatprep.mubr.msk.f32.mxu0 %vm351_vm0, %v7811_v0  ;;  %v7815_v3 = vld [vmem:[#allocation46_spill] sm:$0xff] }
 0x18e   :  { %5203 = vmatprep.mubr.msk.f32.mxu1 %vm351_vm0, %v7140_v23  ;;  %v3640_v23 = vld [vmem:[%s7670_s0 + $0x112] sm:$0xff] }
 0x190   :  { %5412 = vmatmul.mubr.msk.f32.gmra.mrb[22].mxu0 %vm351_vm0, %v7812_v40 }
 0x191   :  { %5204 = vmatmul.mubr.msk.f32.gmra.mrb[22].mxu1 %vm351_vm0, %v7151_v37  ;;  %5414 = vmatprep.mubr.msk.f32.mxu0 %vm351_vm0, %v7813_v28  ;;  %v7816_v37 = vld [vmem:[#allocation49_spill] sm:$0xff] }
 0x192   :  { %5206 = vmatprep.mubr.msk.f32.mxu1 %vm351_vm0, %v7158_v8  ;;  %v7817_v8 = vld [vmem:[#allocation52_spill] sm:$0xff] }
 0x194   :  { %5415 = vmatmul.mubr.msk.f32.gmra.mrb[24].mxu0 %vm351_vm0, %v7814_v1 }
 0x195   :  { %5207 = vmatmul.mubr.msk.f32.gmra.mrb[24].mxu1 %vm351_vm0, %v7169_v51  ;;  %5417 = vmatprep.mubr.msk.f32.mxu0 %vm351_vm0, %v7815_v3  ;;  %v3672_v51 = vmul.f32 %v3640_v23, %v7818_v52 }
 0x196   :  { %5209 = vmatprep.mubr.msk.f32.mxu1 %vm351_vm0, %v7176_v54  ;;  %v7819_v54 = vld [vmem:[#allocation55_spill] sm:$0xff] }
 0x198   :  { %5418 = vmatmul.mubr.msk.f32.gmra.mrb[26].mxu0 %vm351_vm0, %v7816_v37 }
 0x199   :  { %5210 = vmatmul.mubr.msk.f32.gmra.mrb[26].mxu1 %vm351_vm0, %v7187_v35  ;;  %5420 = vmatprep.mubr.msk.f32.mxu0 %vm351_vm0, %v7817_v8  ;;  %v3673_v35 = vmul.f32 %v3641_v56, %v7820_v2 }
 0x19a   :  { %5212 = vmatprep.mubr.msk.f32.mxu1 %vm351_vm0, %v7194_v5 }
 0x19c   :  { %5421 = vmatmul.mubr.msk.f32.gmra.mrb[28].mxu0 %vm351_vm0, %v7819_v54 }
 0x19d   :  { %5213 = vmatmul.mubr.msk.f32.gmra.mrb[28].mxu1 %vm351_vm0, %v7205_v15  ;;  %5423 = vmatprep.mubr.msk.f32.mxu0 %vm351_vm0, %v3672_v51 }
 0x19e   :  { %5215 = vmatprep.mubr.msk.f32.mxu1 %vm351_vm0, %v7212_v27 }
 0x1a0   :  { %5424 = vmatmul.mubr.msk.f32.gmra.mrb[30].mxu0 %vm351_vm0, %v3673_v35 }
 0x1a1   :  { %5216 = vmatmul.mubr.msk.f32.gmra.mrb[30].mxu1 %vm351_vm0, %v7223_v36 }
 0x218   :  { %v5120_v5 = vpop.f32.mrb[0].mxu1 }
 0x219   :  { %v1803_v55 = vpop.f32.mrb[1].mxu1 }
 0x21c   :  { %v5123_v15 = vpop.f32.mrb[2].mxu1 }
 0x21d   :  { %v1813_v17 = vpop.f32.mrb[3].mxu1 }
 0x220   :  { %v5126_v49 = vpop.f32.mrb[4].mxu1 }
 0x221   :  { %v1823_v48 = vpop.f32.mrb[5].mxu1 }
 0x224   :  { %v5129_v9 = vpop.f32.mrb[6].mxu1 }
 0x225   :  { %v1833_v25 = vpop.f32.mrb[7].mxu1 }
 0x228   :  { %v5132_v46 = vpop.f32.mrb[8].mxu1 }
 0x229   :  { %v1843_v27 = vpop.f32.mrb[9].mxu1 }
 0x22c   :  { %v7382_v63 = vpop.f32.mrb[10].mxu1 }
 0x22d   :  { %v7384_v60 = vpop.f32.mrb[11].mxu1 }
 0x230   :  { %v7386_v36 = vpop.f32.mrb[12].mxu1 }
 0x231   :  { %v7388_v14 = vpop.f32.mrb[13].mxu1 }
 0x234   :  { %v7390_v11 = vpop.f32.mrb[14].mxu1 }
 0x235   :  { %v7392_v32 = vpop.f32.mrb[15].mxu1 }
 0x237   :  { %v5380_v58 = vpop.f32.mrb[0].mxu0 }
 0x238   :  { %v5464_v30 = vadd.f32 %v5380_v58, %v5120_v5  ;;  %v3839_v7 = vpop.f32.mrb[1].mxu0 }
 0x239   :  { %v5465_v43 = vadd.f32 %v3839_v7, %v1803_v55 }
 0x23a   :  { %v4038_v45 = vadd.f32 %v5464_v30, %v7397_v53 }
 0x23b   :  { %v4037_v59 = vadd.f32 %v5465_v43, %v7397_v53  ;;  %v5383_v10 = vpop.f32.mrb[2].mxu0 }
 0x23c   :  { %v4070_v16 = vmax.f32 %v4038_v45, 0.0  ;;  %v5466_v24 = vadd.f32 %v5383_v10, %v5123_v15  ;;  %v3849_v21 = vpop.f32.mrb[3].mxu0 }
 0x23d   :  { %v4069_v34 = vmax.f32 %v4037_v59, 0.0  ;;  %v5467_v44 = vadd.f32 %v3849_v21, %v1813_v17 }
 0x23e   :  { %v4040_v42 = vadd.f32 %v5466_v24, %v7397_v53  ;;  %v4109_v20 = vmul.f32 %v7404_v39, %v4070_v16 }
 0x23f   :  { %v4039_v47 = vadd.f32 %v5467_v44, %v7397_v53  ;;  %v5386_v41 = vpop.f32.mrb[4].mxu0  ;;  %v4108_v19 = vmul.f32 %v7404_v39, %v4069_v34 }
 0x240   :  { %v4072_v33 = vmax.f32 %v4040_v42, 0.0  ;;  %v5468_v50 = vadd.f32 %v5386_v41, %v5126_v49  ;;  %v3859_v4 = vpop.f32.mrb[5].mxu0  ;;  %v4144_v13 = vsel %vm4140_vm1, %v4109_v20, 0.0 }
 0x241   :  { %v4071_v61 = vmax.f32 %v4039_v47, 0.0  ;;  %v5469_v22 = vadd.f32 %v3859_v4, %v1823_v48  ;;  %4145 = vadd.xlane.f32.xlu1 %v4144_v13  ;;  %v4141_v62 = vsel %vm4140_vm1, %v4108_v19, 0.0 }
 0x242   :  { %v4042_v31 = vadd.f32 %v5468_v50, %v7397_v53  ;;  %4142 = vadd.xlane.f32.xlu0 %v4141_v62  ;;  %v4111_v12 = vmul.f32 %v7404_v39, %v4072_v33 }
 0x243   :  { %v4041_v29 = vadd.f32 %v5469_v22, %v7397_v53  ;;  %v5389_v18 = vpop.f32.mrb[6].mxu0  ;;  %v4110_v1 = vmul.f32 %v7404_v39, %v4071_v61 }
 0x244   :  { %v4074_v6 = vmax.f32 %v4042_v31, 0.0  ;;  %v5470_v38 = vadd.f32 %v5389_v18, %v5129_v9  ;;  %v3869_v26 = vpop.f32.mrb[7].mxu0  ;;  %v4150_v0 = vsel %vm4140_vm1, %v4111_v12, 0.0 }
 0x245   :  { %v4073_v40 = vmax.f32 %v4041_v29, 0.0  ;;  %v5471_v28 = vadd.f32 %v3869_v26, %v1833_v25  ;;  %v4147_v57 = vsel %vm4140_vm1, %v4110_v1, 0.0 }
 0x246   :  { %v4044_v3 = vadd.f32 %v5470_v38, %v7397_v53  ;;  %4151 = vadd.xlane.f32.xlu0 %v4150_v0  ;;  %v4113_v54 = vmul.f32 %v7404_v39, %v4074_v6 }
 0x247   :  { %v4043_v23 = vadd.f32 %v5471_v28, %v7397_v53  ;;  %v5392_v37 = vpop.f32.mrb[8].mxu0  ;;  %v4112_v8 = vmul.f32 %v7404_v39, %v4073_v40 }
 0x248   :  { %v4076_v52 = vmax.f32 %v4044_v3, 0.0  ;;  %v5472_v51 = vadd.f32 %v5392_v37, %v5132_v46  ;;  %v3879_v56 = vpop.f32.mrb[9].mxu0  ;;  %v4156_v25 = vsel %vm4140_vm1, %v4113_v54, 0.0 }
 0x249   :  { %v4075_v2 = vmax.f32 %v4043_v23, 0.0  ;;  %v5473_v35 = vadd.f32 %v3879_v56, %v1843_v27  ;;  %v4153_v5 = vsel %vm4140_vm1, %v4112_v8, 0.0 }
 0x24a   :  { %v4046_v55 = vadd.f32 %v5472_v51, %v7397_v53  ;;  %4148 = vadd.xlane.f32.xlu0 %v4147_v57  ;;  %4154 = vadd.xlane.f32.xlu1 %v4153_v5  ;;  %v4115_v46 = vmul.f32 %v7404_v39, %v4076_v52 }
 0x24b   :  { %v4045_v15 = vadd.f32 %v5473_v35, %v7397_v53  ;;  %v5395_v17 = vpop.f32.mrb[10].mxu0  ;;  %v4114_v49 = vmul.f32 %v7404_v39, %v4075_v2 }
 0x24c   :  { %v5474_v48 = vadd.f32 %v5395_v17, %v7382_v63  ;;  %v3889_v9 = vpop.f32.mrb[11].mxu0  ;;  %v4078_v27 = vmax.f32 %v4046_v55, 0.0  ;;  %v4162_v21 = vsel %vm4140_vm1, %v4115_v46, 0.0 }
 0x24d   :  { %v4077_v58 = vmax.f32 %v4045_v15, 0.0  ;;  %v5475_v30 = vadd.f32 %v3889_v9, %v7384_v60  ;;  %v4159_v7 = vsel %vm4140_vm1, %v4114_v49, 0.0 }
 0x24e   :  { %v4048_v43 = vadd.f32 %v5474_v48, %v7397_v53  ;;  %4157 = vadd.xlane.f32.xlu0 %v4156_v25  ;;  %4160 = vadd.xlane.f32.xlu1 %v4159_v7  ;;  %v4117_v42 = vmul.f32 %v7404_v39, %v4078_v27 }
 0x24f   :  { %v4047_v45 = vadd.f32 %v5475_v30, %v7397_v53  ;;  %v5398_v59 = vpop.f32.mrb[12].mxu0  ;;  %v4116_v63 = vmul.f32 %v7404_v39, %v4077_v58 }
 0x250   :  { %v4080_v10 = vmax.f32 %v4048_v43, 0.0  ;;  %v5476_v16 = vadd.f32 %v5398_v59, %v7386_v36  ;;  %v3899_v24 = vpop.f32.mrb[13].mxu0  ;;  %v4168_v61 = vsel %vm4140_vm1, %v4117_v42, 0.0 }
 0x251   :  { %v4079_v34 = vmax.f32 %v4047_v45, 0.0  ;;  %v5477_v60 = vadd.f32 %v3899_v24, %v7388_v14  ;;  %v4165_v44 = vsel %vm4140_vm1, %v4116_v63, 0.0 }
 0x252   :  { %v4050_v20 = vadd.f32 %v5476_v16, %v7397_v53  ;;  %4163 = vadd.xlane.f32.xlu0 %v4162_v21  ;;  %4166 = vadd.xlane.f32.xlu1 %v4165_v44  ;;  %v4119_v4 = vmul.f32 %v7404_v39, %v4080_v10 }
 0x253   :  { %v4049_v47 = vadd.f32 %v5477_v60, %v7397_v53  ;;  %v5401_v41 = vpop.f32.mrb[14].mxu0  ;;  %v4118_v19 = vmul.f32 %v7404_v39, %v4079_v34 }
 0x254   :  { %v4082_v36 = vmax.f32 %v4050_v20, 0.0  ;;  %v5478_v33 = vadd.f32 %v5401_v41, %v7390_v11  ;;  %v3909_v50 = vpop.f32.mrb[15].mxu0  ;;  %v4174_v6 = vsel %vm4140_vm1, %v4119_v4, 0.0 }
 0x255   :  { %v4081_v14 = vmax.f32 %v4049_v47, 0.0  ;;  %v5479_v13 = vadd.f32 %v3909_v50, %v7392_v32  ;;  %v4171_v22 = vsel %vm4140_vm1, %v4118_v19, 0.0 }
 0x256   :  { %v4052_v62 = vadd.f32 %v5478_v33, %v7397_v53  ;;  %4169 = vadd.xlane.f32.xlu0 %v4168_v61  ;;  %4172 = vadd.xlane.f32.xlu1 %v4171_v22  ;;  %v4121_v38 = vmul.f32 %v7404_v39, %v4082_v36 }
 0x257   :  { %v4051_v31 = vadd.f32 %v5479_v13, %v7397_v53  ;;  %v5404_v12 = vpop.f32.mrb[16].mxu0  ;;  %v4120_v29 = vmul.f32 %v7404_v39, %v4081_v14 }
 0x258   :  { %v5196_v11 = vpop.f32.mrb[16].mxu1  ;;  %v3919_v18 = vpop.f32.mrb[17].mxu0  ;;  %v4084_v32 = vmax.f32 %v4052_v62, 0.0  ;;  %v4180_v56 = vsel %vm4140_vm1, %v4121_v38, 0.0 }
 0x259   :  { %v4083_v26 = vmax.f32 %v4051_v31, 0.0  ;;  %v5480_v0 = vadd.f32 %v5404_v12, %v5196_v11  ;;  %v2271_v40 = vpop.f32.mrb[17].mxu1  ;;  %v4177_v28 = vsel %vm4140_vm1, %v4120_v29, 0.0 }
 0x25a   :  { %v5481_v1 = vadd.f32 %v3919_v18, %v2271_v40  ;;  %4175 = vadd.xlane.f32.xlu0 %v4174_v6  ;;  %4178 = vadd.xlane.f32.xlu1 %v4177_v28  ;;  %v4123_v5 = vmul.f32 %v7404_v39, %v4084_v32 }
 0x25b   :  { %v4054_v3 = vadd.f32 %v5480_v0, %v7397_v53  ;;  %v5407_v23 = vpop.f32.mrb[18].mxu0  ;;  %v4122_v37 = vmul.f32 %v7404_v39, %v4083_v26 }
 0x25c   :  { %v4053_v8 = vadd.f32 %v5481_v1, %v7397_v53  ;;  %v5199_v52 = vpop.f32.mrb[18].mxu1  ;;  %v3929_v51 = vpop.f32.mrb[19].mxu0  ;;  %v4186_v7 = vsel %vm4140_vm1, %v4123_v5, 0.0 }
 0x25d   :  { %v4086_v54 = vmax.f32 %v4054_v3, 0.0  ;;  %v5482_v2 = vadd.f32 %v5407_v23, %v5199_v52  ;;  %v2281_v35 = vpop.f32.mrb[19].mxu1  ;;  %v4183_v57 = vsel %vm4140_vm1, %v4122_v37, 0.0 }
 0x25e   :  { %v4085_v55 = vmax.f32 %v4053_v8, 0.0  ;;  %v5483_v15 = vadd.f32 %v3929_v51, %v2281_v35  ;;  %4181 = vadd.xlane.f32.xlu0 %v4180_v56  ;;  %4184 = vadd.xlane.f32.xlu1 %v4183_v57 }
 0x25f   :  { %v4056_v17 = vadd.f32 %v5482_v2, %v7397_v53  ;;  %v5410_v49 = vpop.f32.mrb[20].mxu0  ;;  %v4125_v43 = vmul.f32 %v7404_v39, %v4086_v54 }
 0x260   :  { %v4055_v48 = vadd.f32 %v5483_v15, %v7397_v53  ;;  %v5202_v9 = vpop.f32.mrb[20].mxu1  ;;  %v3939_v25 = vpop.f32.mrb[21].mxu0  ;;  %v4124_v46 = vmul.f32 %v7404_v39, %v4085_v55 }
 0x261   :  { %v4088_v27 = vmax.f32 %v4056_v17, 0.0  ;;  %v5484_v58 = vadd.f32 %v5410_v49, %v5202_v9  ;;  %v2291_v30 = vpop.f32.mrb[21].mxu1  ;;  %v4192_v47 = vsel %vm4140_vm1, %v4125_v43, 0.0 }
 0x262   :  { %v4087_v45 = vmax.f32 %v4055_v48, 0.0  ;;  %v5485_v59 = vadd.f32 %v3939_v25, %v2291_v30  ;;  %4187 = vadd.xlane.f32.xlu0 %v4186_v7  ;;  %v4189_v63 = vsel %vm4140_vm1, %v4124_v46, 0.0 }
 0x263   :  { %v4058_v10 = vadd.f32 %v5484_v58, %v7397_v53  ;;  %v5413_v16 = vpop.f32.mrb[22].mxu0  ;;  %4190 = vadd.xlane.f32.xlu1 %v4189_v63  ;;  %v4127_v41 = vmul.f32 %v7404_v39, %v4088_v27 }
 0x264   :  { %v4057_v24 = vadd.f32 %v5485_v59, %v7397_v53  ;;  %v5205_v21 = vpop.f32.mrb[22].mxu1  ;;  %v3949_v34 = vpop.f32.mrb[23].mxu0  ;;  %v4126_v60 = vmul.f32 %v7404_v39, %v4087_v45 }
 0x265   :  { %v4090_v44 = vmax.f32 %v4058_v10, 0.0  ;;  %v5486_v42 = vadd.f32 %v5413_v16, %v5205_v21  ;;  %v2301_v20 = vpop.f32.mrb[23].mxu1  ;;  %v4198_v29 = vsel %vm4140_vm1, %v4127_v41, 0.0 }
 0x266   :  { %v4089_v19 = vmax.f32 %v4057_v24, 0.0  ;;  %v5487_v36 = vadd.f32 %v3949_v34, %v2301_v20  ;;  %4193 = vadd.xlane.f32.xlu0 %v4192_v47  ;;  %v4195_v33 = vsel %vm4140_vm1, %v4126_v60, 0.0 }
 0x267   :  { %v4060_v50 = vadd.f32 %v5486_v42, %v7397_v53  ;;  %v5416_v4 = vpop.f32.mrb[24].mxu0  ;;  %4196 = vadd.xlane.f32.xlu1 %v4195_v33  ;;  %v4129_v11 = vmul.f32 %v7404_v39, %v4090_v44 }
 0x268   :  { %v4059_v14 = vadd.f32 %v5487_v36, %v7397_v53  ;;  %v5208_v13 = vpop.f32.mrb[24].mxu1  ;;  %v3959_v61 = vpop.f32.mrb[25].mxu0  ;;  %v4128_v22 = vmul.f32 %v7404_v39, %v4089_v19 }
 0x269   :  { %v4092_v62 = vmax.f32 %v4060_v50, 0.0  ;;  %v5488_v31 = vadd.f32 %v5416_v4, %v5208_v13  ;;  %v2311_v12 = vpop.f32.mrb[25].mxu1  ;;  %v4204_v8 = vsel %vm4140_vm1, %v4129_v11, 0.0 }
 0x26a   :  { %v4091_v18 = vmax.f32 %v4059_v14, 0.0  ;;  %v5489_v6 = vadd.f32 %v3959_v61, %v2311_v12  ;;  %4199 = vadd.xlane.f32.xlu0 %v4198_v29  ;;  %v4201_v38 = vsel %vm4140_vm1, %v4128_v22, 0.0 }
 0x26b   :  { %v4062_v32 = vadd.f32 %v5488_v31, %v7397_v53  ;;  %v5419_v26 = vpop.f32.mrb[26].mxu0  ;;  %4202 = vadd.xlane.f32.xlu1 %v4201_v38  ;;  %v4131_v52 = vmul.f32 %v7404_v39, %v4092_v62  ;;  %v7506_v62 = vld [vmem:[#allocation2] ss:$0 sm:$0xff] }
 0x26c   :  { %v4061_v0 = vadd.f32 %v5489_v6, %v7397_v53  ;;  %v5211_v40 = vpop.f32.mrb[26].mxu1  ;;  %v3969_v28 = vpop.f32.mrb[27].mxu0  ;;  %v4130_v1 = vmul.f32 %v7404_v39, %v4091_v18 }
 0x26d   :  { %v4094_v3 = vmax.f32 %v4062_v32, 0.0  ;;  %v5490_v23 = vadd.f32 %v5419_v26, %v5211_v40  ;;  %v2321_v37 = vpop.f32.mrb[27].mxu1  ;;  %v4210_v9 = vsel %vm4140_vm1, %v4131_v52, 0.0 }
 0x26e   :  { %v4093_v51 = vmax.f32 %v4061_v0, 0.0  ;;  %v5491_v56 = vadd.f32 %v3969_v28, %v2321_v37  ;;  %4205 = vadd.xlane.f32.xlu0 %v4204_v8  ;;  %v4207_v54 = vsel %vm4140_vm1, %v4130_v1, 0.0 }
 0x26f   :  { %v4064_v2 = vadd.f32 %v5490_v23, %v7397_v53  ;;  %v5422_v35 = vpop.f32.mrb[28].mxu0  ;;  %4208 = vadd.xlane.f32.xlu1 %v4207_v54  ;;  %v4133_v25 = vmul.f32 %v7404_v39, %v4094_v3 }
 0x270   :  { %v4063_v57 = vadd.f32 %v5491_v56, %v7397_v53  ;;  %v5214_v5 = vpop.f32.mrb[28].mxu1  ;;  %v3979_v55 = vpop.f32.mrb[29].mxu0  ;;  %v4132_v15 = vmul.f32 %v7404_v39, %v4093_v51 }
 0x271   :  { %v4096_v17 = vmax.f32 %v4064_v2, 0.0  ;;  %v5492_v49 = vadd.f32 %v5422_v35, %v5214_v5  ;;  %v2331_v48 = vpop.f32.mrb[29].mxu1  ;;  %v4216_v21 = vsel %vm4140_vm1, %v4133_v25, 0.0 }
 0x272   :  { %v4095_v46 = vmax.f32 %v4063_v57, 0.0  ;;  %v5493_v27 = vadd.f32 %v3979_v55, %v2331_v48  ;;  %4211 = vadd.xlane.f32.xlu0 %v4210_v9  ;;  %v4213_v58 = vsel %vm4140_vm1, %v4132_v15, 0.0 }
 0x273   :  { %v4066_v30 = vadd.f32 %v5492_v49, %v7397_v53  ;;  %v5425_v7 = vpop.f32.mrb[30].mxu0  ;;  %4214 = vadd.xlane.f32.xlu1 %v4213_v58  ;;  %v4135_v34 = vmul.f32 %v7404_v39, %v4096_v17 }
 0x274   :  { %v4065_v43 = vadd.f32 %v5493_v27, %v7397_v53  ;;  %v5217_v45 = vpop.f32.mrb[30].mxu1  ;;  %v3989_v59 = vpop.f32.mrb[31].mxu0  ;;  %v4134_v63 = vmul.f32 %v7404_v39, %v4095_v46 }
 0x275   :  { %v4098_v10 = vmax.f32 %v4066_v30, 0.0  ;;  %v5494_v16 = vadd.f32 %v5425_v7, %v5217_v45  ;;  %v2341_v24 = vpop.f32.mrb[31].mxu1  ;;  %v4222_v36 = vsel %vm4140_vm1, %v4135_v34, 0.0 }
 0x276   :  { %v4097_v60 = vmax.f32 %v4065_v43, 0.0  ;;  %v5495_v44 = vadd.f32 %v3989_v59, %v2341_v24  ;;  %4217 = vadd.xlane.f32.xlu0 %v4216_v21  ;;  %v4219_v42 = vsel %vm4140_vm1, %v4134_v63, 0.0 }
 0x277   :  { %v4068_v20 = vadd.f32 %v5494_v16, %v7397_v53  ;;  %4220 = vadd.xlane.f32.xlu1 %v4219_v42  ;;  %v4137_v33 = vmul.f32 %v7404_v39, %v4098_v10 }
 0x278   :  { %v4067_v47 = vadd.f32 %v5495_v44, %v7397_v53  ;;  %v4136_v41 = vmul.f32 %v7404_v39, %v4097_v60 }
 0x279   :  { %v4100_v19 = vmax.f32 %v4068_v20, 0.0  ;;  %v4228_v61 = vsel %vm4140_vm1, %v4137_v33, 0.0 }
 0x27a   :  { %v4099_v50 = vmax.f32 %v4067_v47, 0.0  ;;  %4223 = vadd.xlane.f32.xlu0 %v4222_v36  ;;  %v4225_v4 = vsel %vm4140_vm1, %v4136_v41, 0.0 }
 0x27b   :  { %4226 = vadd.xlane.f32.xlu1 %v4225_v4  ;;  %v4139_v14 = vmul.f32 %v7404_v39, %v4100_v19 }
 0x27c   :  { %v4138_v13 = vmul.f32 %v7404_v39, %v4099_v50 }
 0x27d   :  { %v4234_v53 = vsel %vm4140_vm1, %v4139_v14, 0.0 }
 0x27e   :  { %4229 = vadd.xlane.f32.xlu0 %v4228_v61  ;;  %v4231_v22 = vsel %vm4140_vm1, %v4138_v13, 0.0 }
 0x27f   :  { %4232 = vadd.xlane.f32.xlu1 %v4231_v22 }
 0x282   :  { %4235 = vadd.xlane.f32.xlu0 %v4234_v53 }
 0x2ce   :  { %v4146_v31 = vpop.xlane.xlu1 %4145 }
 0x2cf   :  { %v4245_v12 = vadd.f32 %v7506_v62, %v4146_v31  ;;  %v4143_v29 = vpop.xlane.xlu0 %4142 }
 0x2d0   :  { %v4244_v11 = vadd.f32 %v7506_v62, %v4143_v29 }
 0x2d1   :  { %4278 = vst.msk [vmem:[%s7674_s6 + $0x8] sm:$0xff] %vm4276_vm2, %v4245_v12 }
 0x2d2   :  { %4277 = vst.msk [vmem:[%s7674_s6] sm:$0xff] %vm4276_vm2, %v4244_v11 }
 0x2d3   :  { %v4152_v39 = vpop.xlane.xlu0 %4151 }
 0x2d4   :  { %v4247_v18 = vadd.f32 %v7506_v62, %v4152_v39 }
 0x2d6   :  { %4280 = vst.msk [vmem:[%s7674_s6 + $0x18] sm:$0xff] %vm4276_vm2, %v4247_v18 }
 0x2d7   :  { %v4149_v6 = vpop.xlane.xlu0 %4148  ;;  %v4155_v38 = vpop.xlane.xlu1 %4154 }
 0x2d8   :  { %v4246_v32 = vadd.f32 %v7506_v62, %v4149_v6  ;;  %v4248_v26 = vadd.f32 %v7506_v62, %v4155_v38 }
 0x2da   :  { %4279 = vst.msk [vmem:[%s7674_s6 + $0x10] sm:$0xff] %vm4276_vm2, %v4246_v32  ;;  %4281 = vst.msk [vmem:[%s7674_s6 + $0x20] sm:$0xff] %vm4276_vm2, %v4248_v26 }
 0x2db   :  { %v4158_v0 = vpop.xlane.xlu0 %4157  ;;  %v4161_v40 = vpop.xlane.xlu1 %4160 }
 0x2dc   :  { %v4249_v28 = vadd.f32 %v7506_v62, %v4158_v0  ;;  %v4250_v1 = vadd.f32 %v7506_v62, %v4161_v40 }
 0x2de   :  { %4282 = vst.msk [vmem:[%s7674_s6 + $0x28] sm:$0xff] %vm4276_vm2, %v4249_v28  ;;  %4283 = vst.msk [vmem:[%s7674_s6 + $0x30] sm:$0xff] %vm4276_vm2, %v4250_v1 }
 0x2df   :  { %v4164_v3 = vpop.xlane.xlu0 %4163  ;;  %v4167_v23 = vpop.xlane.xlu1 %4166 }
 0x2e0   :  { %v4251_v37 = vadd.f32 %v7506_v62, %v4164_v3  ;;  %v4252_v8 = vadd.f32 %v7506_v62, %v4167_v23 }
 0x2e2   :  { %4284 = vst.msk [vmem:[%s7674_s6 + $0x38] sm:$0xff] %vm4276_vm2, %v4251_v37  ;;  %4285 = vst.msk [vmem:[%s7674_s6 + $0x40] sm:$0xff] %vm4276_vm2, %v4252_v8 }
 0x2e3   :  { %v4170_v52 = vpop.xlane.xlu0 %4169  ;;  %v4173_v51 = vpop.xlane.xlu1 %4172 }
 0x2e4   :  { %v4253_v56 = vadd.f32 %v7506_v62, %v4170_v52  ;;  %v4254_v54 = vadd.f32 %v7506_v62, %v4173_v51 }
 0x2e6   :  { %4286 = vst.msk [vmem:[%s7674_s6 + $0x48] sm:$0xff] %vm4276_vm2, %v4253_v56  ;;  %4287 = vst.msk [vmem:[%s7674_s6 + $0x50] sm:$0xff] %vm4276_vm2, %v4254_v54 }
 0x2e7   :  { %v4176_v2 = vpop.xlane.xlu0 %4175  ;;  %v4179_v35 = vpop.xlane.xlu1 %4178 }
 0x2e8   :  { %v4255_v57 = vadd.f32 %v7506_v62, %v4176_v2  ;;  %v4256_v5 = vadd.f32 %v7506_v62, %v4179_v35 }
 0x2ea   :  { %4288 = vst.msk [vmem:[%s7674_s6 + $0x58] sm:$0xff] %vm4276_vm2, %v4255_v57  ;;  %4289 = vst.msk [vmem:[%s7674_s6 + $0x60] sm:$0xff] %vm4276_vm2, %v4256_v5 }
 0x2eb   :  { %v4182_v55 = vpop.xlane.xlu0 %4181  ;;  %v4185_v15 = vpop.xlane.xlu1 %4184 }
 0x2ec   :  { %v4257_v17 = vadd.f32 %v7506_v62, %v4182_v55  ;;  %v4258_v49 = vadd.f32 %v7506_v62, %v4185_v15 }
 0x2ee   :  { %4290 = vst.msk [vmem:[%s7674_s6 + $0x68] sm:$0xff] %vm4276_vm2, %v4257_v17  ;;  %4291 = vst.msk [vmem:[%s7674_s6 + $0x70] sm:$0xff] %vm4276_vm2, %v4258_v49 }
 0x2ef   :  { %v4188_v48 = vpop.xlane.xlu0 %4187 }
 0x2f0   :  { %v4259_v9 = vadd.f32 %v7506_v62, %v4188_v48  ;;  %v4191_v25 = vpop.xlane.xlu1 %4190 }
 0x2f1   :  { %v4260_v46 = vadd.f32 %v7506_v62, %v4191_v25 }
 0x2f2   :  { %4292 = vst.msk [vmem:[%s7674_s6 + $0x78] sm:$0xff] %vm4276_vm2, %v4259_v9 }
 0x2f3   :  { %4293 = vst.msk [vmem:[%s7674_s6 + $0x80] sm:$0xff] %vm4276_vm2, %v4260_v46  ;;  %v4194_v27 = vpop.xlane.xlu0 %4193 }
 0x2f4   :  { %v4261_v58 = vadd.f32 %v7506_v62, %v4194_v27  ;;  %v4197_v30 = vpop.xlane.xlu1 %4196 }
 0x2f5   :  { %v4262_v7 = vadd.f32 %v7506_v62, %v4197_v30 }
 0x2f6   :  { %4294 = vst.msk [vmem:[%s7674_s6 + $0x88] sm:$0xff] %vm4276_vm2, %v4261_v58 }
 0x2f7   :  { %4295 = vst.msk [vmem:[%s7674_s6 + $0x90] sm:$0xff] %vm4276_vm2, %v4262_v7  ;;  %v4200_v43 = vpop.xlane.xlu0 %4199 }
 0x2f8   :  { %v4263_v45 = vadd.f32 %v7506_v62, %v4200_v43  ;;  %v4203_v59 = vpop.xlane.xlu1 %4202 }
 0x2f9   :  { %v4264_v63 = vadd.f32 %v7506_v62, %v4203_v59 }
 0x2fa   :  { %4296 = vst.msk [vmem:[%s7674_s6 + $0x98] sm:$0xff] %vm4276_vm2, %v4263_v45 }
 0x2fb   :  { %4297 = vst.msk [vmem:[%s7674_s6 + $0xa0] sm:$0xff] %vm4276_vm2, %v4264_v63  ;;  %v4206_v10 = vpop.xlane.xlu0 %4205 }
 0x2fc   :  { %v4265_v16 = vadd.f32 %v7506_v62, %v4206_v10  ;;  %v4209_v24 = vpop.xlane.xlu1 %4208 }
 0x2fd   :  { %v4266_v21 = vadd.f32 %v7506_v62, %v4209_v24 }
 0x2fe   :  { %4298 = vst.msk [vmem:[%s7674_s6 + $0xa8] sm:$0xff] %vm4276_vm2, %v4265_v16 }
 0x2ff   :  { %4299 = vst.msk [vmem:[%s7674_s6 + $0xb0] sm:$0xff] %vm4276_vm2, %v4266_v21  ;;  %v4212_v34 = vpop.xlane.xlu0 %4211 }
 0x300   :  { %v4267_v60 = vadd.f32 %v7506_v62, %v4212_v34  ;;  %v4215_v44 = vpop.xlane.xlu1 %4214 }
 0x301   :  { %v4268_v42 = vadd.f32 %v7506_v62, %v4215_v44 }
 0x302   :  { %4300 = vst.msk [vmem:[%s7674_s6 + $0xb8] sm:$0xff] %vm4276_vm2, %v4267_v60 }
 0x303   :  { %4301 = vst.msk [vmem:[%s7674_s6 + $0xc0] sm:$0xff] %vm4276_vm2, %v4268_v42  ;;  %v4218_v20 = vpop.xlane.xlu0 %4217 }
 0x304   :  { %v4269_v47 = vadd.f32 %v7506_v62, %v4218_v20  ;;  %v4221_v41 = vpop.xlane.xlu1 %4220 }
 0x305   :  { %v4270_v19 = vadd.f32 %v7506_v62, %v4221_v41 }
 0x306   :  { %4302 = vst.msk [vmem:[%s7674_s6 + $0xc8] sm:$0xff] %vm4276_vm2, %v4269_v47 }
 0x307   :  { %4303 = vst.msk [vmem:[%s7674_s6 + $0xd0] sm:$0xff] %vm4276_vm2, %v4270_v19  ;;  %v4224_v36 = vpop.xlane.xlu0 %4223 }
 0x308   :  { %v4271_v33 = vadd.f32 %v7506_v62, %v4224_v36  ;;  %v4227_v50 = vpop.xlane.xlu1 %4226 }
 0x309   :  { %v4272_v4 = vadd.f32 %v7506_v62, %v4227_v50 }
 0x30a   :  { %4304 = vst.msk [vmem:[%s7674_s6 + $0xd8] sm:$0xff] %vm4276_vm2, %v4271_v33 }
 0x30b   :  { %4305 = vst.msk [vmem:[%s7674_s6 + $0xe0] sm:$0xff] %vm4276_vm2, %v4272_v4  ;;  %v4230_v14 = vpop.xlane.xlu0 %4229 }
 0x30c   :  { %v4273_v13 = vadd.f32 %v7506_v62, %v4230_v14  ;;  %v4233_v61 = vpop.xlane.xlu1 %4232 }
 0x30d   :  { %v4274_v53 = vadd.f32 %v7506_v62, %v4233_v61 }
 0x30e   :  { %4306 = vst.msk [vmem:[%s7674_s6 + $0xe8] sm:$0xff] %vm4276_vm2, %v4273_v13 }
 0x30f   :  { %4307 = vst.msk [vmem:[%s7674_s6 + $0xf0] sm:$0xff] %vm4276_vm2, %v4274_v53  ;;  %v4236_v22 = vpop.xlane.xlu0 %4235 }
 0x310   :  { %v4275_v31 = vadd.f32 %v7506_v62, %v4236_v22 }
 0x312   :  { %4308 = vst.msk [vmem:[%s7674_s6 + $0xf8] sm:$0xff] %vm4276_vm2, %v4275_v31 }

</bundles_post_ra>
